<compile_context>
chip_gen: v5e
topology: v5e:2x2
jax: 0.10.0
libtpu: 0.0.40
codegen_flags: <defaults>
</compile_context>

<pallas_src>
import jax
import jax.numpy as jnp
from jax import lax
from jax.experimental import pallas as pl
from jax.experimental.pallas import tpu as pltpu

NGF = 8
LATENT_SIZE = 16
EMBED_SIZE = 16
KSIZE = 4
EPS = 1e-5

# (stride, padding) per layer.  Layer-5 output channels are padded 3 -> 4 so
# every layer's flattened activation has exactly W*C = 256 lane columns.
_LAYER_CFG = [(1, 0), (2, 1), (2, 1), (2, 1), (2, 1)]


# ----------------------------------------------------------------------------
# Glue: build the structured per-layer matmul operands (tiny, XLA-side).
# ----------------------------------------------------------------------------
def _placement_matrix(n_in, n_out, stride, pad, k):
    """P[j, i, o] = 1  iff  o == stride*i - pad + j   (shape (k, n_in, n_out))."""
    j = jnp.arange(k)[:, None, None]
    i = jnp.arange(n_in)[None, :, None]
    o = jnp.arange(n_out)[None, None, :]
    return (o == stride * i - pad + j).astype(jnp.float32)


def _tconv_operands(weight, h_in, stride, pad, batch, cout_pad=None):
    """ConvTranspose2d(weight: (Cin,Cout,k,k), bias=False) -> (T, S, Hout, Cp).

    T: (k, Win*Cin, Wout*Cp)  width-direction block-Toeplitz matrices.
    S: (k, B*Hout,  B*Hin)    height-direction 0/1 row-placement matrices.
    """
    cin, cout, k, _ = weight.shape
    h_out = (h_in - 1) * stride - 2 * pad + k
    cp = cout if cout_pad is None else cout_pad
    w = weight if cp == cout else jnp.pad(
        weight, ((0, 0), (0, cp - cout), (0, 0), (0, 0)))

    p = _placement_matrix(h_in, h_out, stride, pad, k)      # (k, n_in, n_out)
    # T[ky, w*Cin+ci, x*Cp+co] = sum_kx P[kx, w, x] * W[ci, co, ky, kx]
    t = jnp.einsum("awx,ioya->ywixo", p, w).reshape(k, h_in * cin, h_out * cp)
    # S[ky, b*Hout+y, b2*Hin+h] = (b == b2) * P[ky, h, y]
    s = jnp.einsum("bc,ahy->abych", jnp.eye(batch, dtype=jnp.float32), p)
    s = s.reshape(k, batch * h_out, batch * h_in)
    return t, s, h_out, cp


def _bn_operands(gamma, beta, w_out):
    """Channel-collapse / channel-broadcast matrices for the (x, co) column layout."""
    cout = gamma.shape[0]
    eye = jnp.eye(cout, dtype=jnp.float32)
    coll = jnp.tile(eye, (w_out, 1))      # (Wout*Cout, Cout): column -> channel sum
    bcast = jnp.tile(eye, (1, w_out))     # (Cout, Wout*Cout): channel -> columns
    return (coll, bcast,
            gamma.reshape(1, cout).astype(jnp.float32),
            beta.reshape(1, cout).astype(jnp.float32))


# ----------------------------------------------------------------------------
# The single fused Pallas kernel: 5 ConvTranspose layers + BN/ReLU + Tanh.
# ----------------------------------------------------------------------------
def _generator_kernel(z_ref,
                      t1, s1, c1, r1, g1, b1,
                      t2, s2, c2, r2, g2, b2,
                      t3, s3, c3, r3, g3, b3,
                      t4, s4, c4, r4, g4, b4,
                      t5, s5,
                      out_ref):
    f32 = jnp.float32

    def tconv(x, t_ref, s_ref):
        """ConvTranspose2d on the flat layout:  sum_ky  S_ky @ (X @ T_ky)."""
        acc = jnp.zeros((s_ref.shape[1], t_ref.shape[2]), f32)
        for ky in range(t_ref.shape[0]):                       # k = 4, unrolled
            y = jnp.dot(x, t_ref[ky], preferred_element_type=f32)
            acc = acc + jnp.dot(s_ref[ky], y, preferred_element_type=f32)
        return acc

    def bn_relu(y, coll_ref, bcast_ref, gamma_ref, beta_ref):
        """Train-mode BatchNorm2d + ReLU; stats & broadcast done with MXU matmuls."""
        m, n = y.shape
        cout = coll_ref.shape[1]
        inv_count = 1.0 / float(m * (n // cout))               # 1/(B*Hout*Wout)
        ones_row = jnp.ones((1, m), f32)
        col_sum = jnp.dot(ones_row, y, preferred_element_type=f32)        # (1, n)
        col_sq = jnp.dot(ones_row, y * y, preferred_element_type=f32)     # (1, n)
        ch_mean = jnp.dot(col_sum, coll_ref[...], preferred_element_type=f32) * inv_count
        ch_msq = jnp.dot(col_sq, coll_ref[...], preferred_element_type=f32) * inv_count
        ch_var = ch_msq - ch_mean * ch_mean                    # biased variance
        scale = gamma_ref[...] * lax.rsqrt(ch_var + EPS)
        shift = beta_ref[...] - ch_mean * scale
        scale_cols = jnp.dot(scale, bcast_ref[...], preferred_element_type=f32)
        shift_cols = jnp.dot(shift, bcast_ref[...], preferred_element_type=f32)
        return jnp.maximum(y * scale_cols + shift_cols, 0.0)   # one pass over y

    x = z_ref[...]                                             # (B, latent+embed)
    x = bn_relu(tconv(x, t1, s1), c1, r1, g1, b1)              # (B*4,  256)
    x = bn_relu(tconv(x, t2, s2), c2, r2, g2, b2)              # (B*8,  256)
    x = bn_relu(tconv(x, t3, s3), c3, r3, g3, b3)              # (B*16, 256)
    x = bn_relu(tconv(x, t4, s4), c4, r4, g4, b4)              # (B*32, 256)
    out_ref[...] = jnp.tanh(tconv(x, t5, s5))                  # (B*64, 256)


# ----------------------------------------------------------------------------
# Generator forward (CONDITIONAL = True)
# ----------------------------------------------------------------------------
def generator_forward(z, emb, params):
    batch = z.shape[0]
    zemb = jnp.concatenate([z, emb], axis=-1).astype(jnp.float32)   # (B, lat+emb)

    weights = [params["w1"], params["w2"], params["w3"], params["w4"], params["w5"]]
    operands = [zemb]
    h_in = 1
    for i, (w, (stride, pad)) in enumerate(zip(weights, _LAYER_CFG)):
        cout_pad = 4 if i == 4 else None
        t, s, h_out, cp = _tconv_operands(w, h_in, stride, pad, batch, cout_pad)
        operands += [t, s]
        if i < 4:
            operands += list(_bn_operands(params[f"g{i+1}"], params[f"b{i+1}"], h_out))
        h_in = h_out

    h5 = h_in                                   # 64
    cout5 = weights[4].shape[1]                 # 3
    cp5 = 4
    flat = pl.pallas_call(
        _generator_kernel,
        out_shape=jax.ShapeDtypeStruct((batch * h5, h5 * cp5), jnp.float32),
        compiler_params=pltpu.CompilerParams(vmem_limit_bytes=32 * 1024 * 1024),
    )(*operands)

    img = flat.reshape(batch, h5, h5, cp5)[..., :cout5]         # NHWC, drop pad chan
    return jnp.transpose(img, (0, 3, 1, 2))                     # NCHW


# ----------------------------------------------------------------------------
# Pure-JAX reference (lax.conv) for correctness validation.
# ----------------------------------------------------------------------------
def _ref_conv_transpose(x_nhwc, w, stride, pad):
    k = w.shape[2]
    w_hwio = jnp.transpose(w[:, :, ::-1, ::-1], (2, 3, 0, 1))   # (k,k,Cin,Cout)
    return lax.conv_general_dilated(
        x_nhwc, w_hwio, window_strides=(1, 1),
        padding=[(k - 1 - pad, k - 1 - pad)] * 2,
        lhs_dilation=(stride, stride),
        dimension_numbers=("NHWC", "HWIO", "NHWC"),
        precision=lax.Precision.HIGHEST)


def reference_forward(z, emb, params):
    x = jnp.concatenate([z, emb], axis=-1)[:, None, None, :]    # NHWC (B,1,1,C)
    for i, (stride, pad) in enumerate(_LAYER_CFG[:4]):
        x = _ref_conv_transpose(x, params[f"w{i+1}"], stride, pad)
        mean = jnp.mean(x, axis=(0, 1, 2))
        var = jnp.mean(jnp.square(x - mean), axis=(0, 1, 2))
        x = (x - mean) * lax.rsqrt(var + EPS) * params[f"g{i+1}"] + params[f"b{i+1}"]
        x = jnp.maximum(x, 0.0)
    x = jnp.tanh(_ref_conv_transpose(x, params["w5"], *_LAYER_CFG[4]))
    return jnp.transpose(x, (0, 3, 1, 2))


if __name__ == "__main__":
    B = 2
    CIN = LATENT_SIZE + EMBED_SIZE

    key = jax.random.PRNGKey(0)
    k1, k2, k3, k4, k5, kz, ke = jax.random.split(key, 7)

    def winit(k, shape):
        return (0.02 * jax.random.normal(k, shape)).astype(jnp.float32)

    params = {
        # ConvTranspose2d weights: (Cin, Cout, kH, kW), bias=False
        "w1": winit(k1, (CIN, NGF * 8, KSIZE, KSIZE)),
        "w2": winit(k2, (NGF * 8, NGF * 4, KSIZE, KSIZE)),
        "w3": winit(k3, (NGF * 4, NGF * 2, KSIZE, KSIZE)),
        "w4": winit(k4, (NGF * 2, NGF, KSIZE, KSIZE)),
        "w5": winit(k5, (NGF, 3, KSIZE, KSIZE)),
        # BatchNorm2d affine params (PyTorch default init: gamma=1, beta=0)
        "g1": jnp.ones((NGF * 8,), jnp.float32), "b1": jnp.zeros((NGF * 8,), jnp.float32),
        "g2": jnp.ones((NGF * 4,), jnp.float32), "b2": jnp.zeros((NGF * 4,), jnp.float32),
        "g3": jnp.ones((NGF * 2,), jnp.float32), "b3": jnp.zeros((NGF * 2,), jnp.float32),
        "g4": jnp.ones((NGF,), jnp.float32), "b4": jnp.zeros((NGF,), jnp.float32),
    }

    z = jax.random.normal(kz, (B, LATENT_SIZE), jnp.float32)
    emb = jax.random.normal(ke, (B, EMBED_SIZE), jnp.float32)

    out = jax.block_until_ready(jax.jit(generator_forward)(z, emb, params))

    assert out.shape == (B, 3, 64, 64), out.shape
    assert out.dtype == jnp.float32
    assert bool(jnp.all(jnp.isfinite(out)))
    assert bool(jnp.all(jnp.abs(out) <= 1.0))                   # tanh range

    ref = jax.block_until_ready(jax.jit(reference_forward)(z, emb, params))
    max_err = float(jnp.max(jnp.abs(out - ref)))
    assert max_err < 2e-2, max_err

    print("KERNEL_OK")
</pallas_src>

<mosaic_0001>
module attributes {stable_mosaic.version = 11 : i64} {
  func.func @_generator_kernel(%arg0: memref<2x32xf32, #tpu.memory_space<vmem>>, %arg1: memref<4x32x256xf32, #tpu.memory_space<vmem>>, %arg2: memref<4x8x2xf32, #tpu.memory_space<vmem>>, %arg3: memref<256x64xf32, #tpu.memory_space<vmem>>, %arg4: memref<64x256xf32, #tpu.memory_space<vmem>>, %arg5: memref<1x64xf32, #tpu.memory_space<vmem>>, %arg6: memref<1x64xf32, #tpu.memory_space<vmem>>, %arg7: memref<4x256x256xf32, #tpu.memory_space<vmem>>, %arg8: memref<4x16x8xf32, #tpu.memory_space<vmem>>, %arg9: memref<256x32xf32, #tpu.memory_space<vmem>>, %arg10: memref<32x256xf32, #tpu.memory_space<vmem>>, %arg11: memref<1x32xf32, #tpu.memory_space<vmem>>, %arg12: memref<1x32xf32, #tpu.memory_space<vmem>>, %arg13: memref<4x256x256xf32, #tpu.memory_space<vmem>>, %arg14: memref<4x32x16xf32, #tpu.memory_space<vmem>>, %arg15: memref<256x16xf32, #tpu.memory_space<vmem>>, %arg16: memref<16x256xf32, #tpu.memory_space<vmem>>, %arg17: memref<1x16xf32, #tpu.memory_space<vmem>>, %arg18: memref<1x16xf32, #tpu.memory_space<vmem>>, %arg19: memref<4x256x256xf32, #tpu.memory_space<vmem>>, %arg20: memref<4x64x32xf32, #tpu.memory_space<vmem>>, %arg21: memref<256x8xf32, #tpu.memory_space<vmem>>, %arg22: memref<8x256xf32, #tpu.memory_space<vmem>>, %arg23: memref<1x8xf32, #tpu.memory_space<vmem>>, %arg24: memref<1x8xf32, #tpu.memory_space<vmem>>, %arg25: memref<4x256x256xf32, #tpu.memory_space<vmem>>, %arg26: memref<4x128x64xf32, #tpu.memory_space<vmem>>, %arg27: memref<128x256xf32, #tpu.memory_space<vmem>>) attributes {dimension_semantics = [], scalar_prefetch = 0 : i64, scratch_operands = 0 : i64, tpu.core_type = #tpu.core_type<tc>} {
    %c0 = arith.constant 0 : index
    %c0_0 = arith.constant 0 : index
    %0 = vector.load %arg0[%c0, %c0_0] : memref<2x32xf32, #tpu.memory_space<vmem>>, vector<2x32xf32>
    %cst = arith.constant 0.000000e+00 : f32
    %1 = vector.broadcast %cst : f32 to vector<8x256xf32>
    %c0_1 = arith.constant 0 : index
    %c0_2 = arith.constant 0 : index
    %c0_3 = arith.constant 0 : index
    %2 = vector.load %arg1[%c0_1, %c0_2, %c0_3] : memref<4x32x256xf32, #tpu.memory_space<vmem>>, vector<1x32x256xf32>
    %3 = vector.shape_cast %2 : vector<1x32x256xf32> to vector<32x256xf32>
    %cst_4 = arith.constant dense<0.000000e+00> : vector<2x256xf32>
    %4 = tpu.matmul %0, %3, %cst_4 {dimension_numbers = #tpu.dot_dimension_numbers<[1], [0], [0], [1], [0, 0, 1, 1], [], []>} : vector<2x32xf32>, vector<32x256xf32>, vector<2x256xf32> -> vector<2x256xf32>
    %c0_5 = arith.constant 0 : index
    %c0_6 = arith.constant 0 : index
    %c0_7 = arith.constant 0 : index
    %5 = vector.load %arg2[%c0_5, %c0_6, %c0_7] : memref<4x8x2xf32, #tpu.memory_space<vmem>>, vector<1x8x2xf32>
    %6 = vector.shape_cast %5 : vector<1x8x2xf32> to vector<8x2xf32>
    %cst_8 = arith.constant dense<0.000000e+00> : vector<8x256xf32>
    %7 = tpu.matmul %6, %4, %cst_8 {dimension_numbers = #tpu.dot_dimension_numbers<[1], [0], [0], [1], [0, 0, 1, 1], [], []>} : vector<8x2xf32>, vector<2x256xf32>, vector<8x256xf32> -> vector<8x256xf32>
    %8 = arith.addf %1, %7 : vector<8x256xf32>
    %c1 = arith.constant 1 : index
    %c0_9 = arith.constant 0 : index
    %c0_10 = arith.constant 0 : index
    %9 = vector.load %arg1[%c1, %c0_9, %c0_10] : memref<4x32x256xf32, #tpu.memory_space<vmem>>, vector<1x32x256xf32>
    %10 = vector.shape_cast %9 : vector<1x32x256xf32> to vector<32x256xf32>
    %cst_11 = arith.constant dense<0.000000e+00> : vector<2x256xf32>
    %11 = tpu.matmul %0, %10, %cst_11 {dimension_numbers = #tpu.dot_dimension_numbers<[1], [0], [0], [1], [0, 0, 1, 1], [], []>} : vector<2x32xf32>, vector<32x256xf32>, vector<2x256xf32> -> vector<2x256xf32>
    %c1_12 = arith.constant 1 : index
    %c0_13 = arith.constant 0 : index
    %c0_14 = arith.constant 0 : index
    %12 = vector.load %arg2[%c1_12, %c0_13, %c0_14] : memref<4x8x2xf32, #tpu.memory_space<vmem>>, vector<1x8x2xf32>
    %13 = vector.shape_cast %12 : vector<1x8x2xf32> to vector<8x2xf32>
    %cst_15 = arith.constant dense<0.000000e+00> : vector<8x256xf32>
    %14 = tpu.matmul %13, %11, %cst_15 {dimension_numbers = #tpu.dot_dimension_numbers<[1], [0], [0], [1], [0, 0, 1, 1], [], []>} : vector<8x2xf32>, vector<2x256xf32>, vector<8x256xf32> -> vector<8x256xf32>
    %15 = arith.addf %8, %14 : vector<8x256xf32>
    %c2 = arith.constant 2 : index
    %c0_16 = arith.constant 0 : index
    %c0_17 = arith.constant 0 : index
    %16 = vector.load %arg1[%c2, %c0_16, %c0_17] : memref<4x32x256xf32, #tpu.memory_space<vmem>>, vector<1x32x256xf32>
    %17 = vector.shape_cast %16 : vector<1x32x256xf32> to vector<32x256xf32>
    %cst_18 = arith.constant dense<0.000000e+00> : vector<2x256xf32>
    %18 = tpu.matmul %0, %17, %cst_18 {dimension_numbers = #tpu.dot_dimension_numbers<[1], [0], [0], [1], [0, 0, 1, 1], [], []>} : vector<2x32xf32>, vector<32x256xf32>, vector<2x256xf32> -> vector<2x256xf32>
    %c2_19 = arith.constant 2 : index
    %c0_20 = arith.constant 0 : index
    %c0_21 = arith.constant 0 : index
    %19 = vector.load %arg2[%c2_19, %c0_20, %c0_21] : memref<4x8x2xf32, #tpu.memory_space<vmem>>, vector<1x8x2xf32>
    %20 = vector.shape_cast %19 : vector<1x8x2xf32> to vector<8x2xf32>
    %cst_22 = arith.constant dense<0.000000e+00> : vector<8x256xf32>
    %21 = tpu.matmul %20, %18, %cst_22 {dimension_numbers = #tpu.dot_dimension_numbers<[1], [0], [0], [1], [0, 0, 1, 1], [], []>} : vector<8x2xf32>, vector<2x256xf32>, vector<8x256xf32> -> vector<8x256xf32>
    %22 = arith.addf %15, %21 : vector<8x256xf32>
    %c3 = arith.constant 3 : index
    %c0_23 = arith.constant 0 : index
    %c0_24 = arith.constant 0 : index
    %23 = vector.load %arg1[%c3, %c0_23, %c0_24] : memref<4x32x256xf32, #tpu.memory_space<vmem>>, vector<1x32x256xf32>
    %24 = vector.shape_cast %23 : vector<1x32x256xf32> to vector<32x256xf32>
    %cst_25 = arith.constant dense<0.000000e+00> : vector<2x256xf32>
    %25 = tpu.matmul %0, %24, %cst_25 {dimension_numbers = #tpu.dot_dimension_numbers<[1], [0], [0], [1], [0, 0, 1, 1], [], []>} : vector<2x32xf32>, vector<32x256xf32>, vector<2x256xf32> -> vector<2x256xf32>
    %c3_26 = arith.constant 3 : index
    %c0_27 = arith.constant 0 : index
    %c0_28 = arith.constant 0 : index
    %26 = vector.load %arg2[%c3_26, %c0_27, %c0_28] : memref<4x8x2xf32, #tpu.memory_space<vmem>>, vector<1x8x2xf32>
    %27 = vector.shape_cast %26 : vector<1x8x2xf32> to vector<8x2xf32>
    %cst_29 = arith.constant dense<0.000000e+00> : vector<8x256xf32>
    %28 = tpu.matmul %27, %25, %cst_29 {dimension_numbers = #tpu.dot_dimension_numbers<[1], [0], [0], [1], [0, 0, 1, 1], [], []>} : vector<8x2xf32>, vector<2x256xf32>, vector<8x256xf32> -> vector<8x256xf32>
    %29 = arith.addf %22, %28 : vector<8x256xf32>
    %cst_30 = arith.constant 1.000000e+00 : f32
    %30 = vector.broadcast %cst_30 : f32 to vector<1x8xf32>
    %cst_31 = arith.constant dense<0.000000e+00> : vector<1x256xf32>
    %31 = tpu.matmul %30, %29, %cst_31 {dimension_numbers = #tpu.dot_dimension_numbers<[1], [0], [0], [1], [0, 0, 1, 1], [], []>} : vector<1x8xf32>, vector<8x256xf32>, vector<1x256xf32> -> vector<1x256xf32>
    %32 = arith.mulf %29, %29 : vector<8x256xf32>
    %cst_32 = arith.constant dense<0.000000e+00> : vector<1x256xf32>
    %33 = tpu.matmul %30, %32, %cst_32 {dimension_numbers = #tpu.dot_dimension_numbers<[1], [0], [0], [1], [0, 0, 1, 1], [], []>} : vector<1x8xf32>, vector<8x256xf32>, vector<1x256xf32> -> vector<1x256xf32>
    %c0_33 = arith.constant 0 : index
    %c0_34 = arith.constant 0 : index
    %34 = vector.load %arg3[%c0_33, %c0_34] : memref<256x64xf32, #tpu.memory_space<vmem>>, vector<256x64xf32>
    %cst_35 = arith.constant dense<0.000000e+00> : vector<1x64xf32>
    %35 = tpu.matmul %31, %34, %cst_35 {dimension_numbers = #tpu.dot_dimension_numbers<[1], [0], [0], [1], [0, 0, 1, 1], [], []>} : vector<1x256xf32>, vector<256x64xf32>, vector<1x64xf32> -> vector<1x64xf32>
    %cst_36 = arith.constant 3.125000e-02 : f32
    %36 = vector.broadcast %cst_36 : f32 to vector<1x64xf32>
    %37 = arith.mulf %35, %36 : vector<1x64xf32>
    %c0_37 = arith.constant 0 : index
    %c0_38 = arith.constant 0 : index
    %38 = vector.load %arg3[%c0_37, %c0_38] : memref<256x64xf32, #tpu.memory_space<vmem>>, vector<256x64xf32>
    %cst_39 = arith.constant dense<0.000000e+00> : vector<1x64xf32>
    %39 = tpu.matmul %33, %38, %cst_39 {dimension_numbers = #tpu.dot_dimension_numbers<[1], [0], [0], [1], [0, 0, 1, 1], [], []>} : vector<1x256xf32>, vector<256x64xf32>, vector<1x64xf32> -> vector<1x64xf32>
    %cst_40 = arith.constant 3.125000e-02 : f32
    %40 = vector.broadcast %cst_40 : f32 to vector<1x64xf32>
    %41 = arith.mulf %39, %40 : vector<1x64xf32>
    %42 = arith.mulf %37, %37 : vector<1x64xf32>
    %43 = arith.subf %41, %42 : vector<1x64xf32>
    %c0_41 = arith.constant 0 : index
    %c0_42 = arith.constant 0 : index
    %44 = vector.load %arg5[%c0_41, %c0_42] : memref<1x64xf32, #tpu.memory_space<vmem>>, vector<1x64xf32>
    %cst_43 = arith.constant 9.99999974E-6 : f32
    %45 = vector.broadcast %cst_43 : f32 to vector<1x64xf32>
    %46 = arith.addf %43, %45 : vector<1x64xf32>
    %47 = math.rsqrt %46 : vector<1x64xf32>
    %48 = arith.mulf %44, %47 : vector<1x64xf32>
    %c0_44 = arith.constant 0 : index
    %c0_45 = arith.constant 0 : index
    %49 = vector.load %arg6[%c0_44, %c0_45] : memref<1x64xf32, #tpu.memory_space<vmem>>, vector<1x64xf32>
    %50 = arith.mulf %37, %48 : vector<1x64xf32>
    %51 = arith.subf %49, %50 : vector<1x64xf32>
    %c0_46 = arith.constant 0 : index
    %c0_47 = arith.constant 0 : index
    %52 = vector.load %arg4[%c0_46, %c0_47] : memref<64x256xf32, #tpu.memory_space<vmem>>, vector<64x256xf32>
    %cst_48 = arith.constant dense<0.000000e+00> : vector<1x256xf32>
    %53 = tpu.matmul %48, %52, %cst_48 {dimension_numbers = #tpu.dot_dimension_numbers<[1], [0], [0], [1], [0, 0, 1, 1], [], []>} : vector<1x64xf32>, vector<64x256xf32>, vector<1x256xf32> -> vector<1x256xf32>
    %c0_49 = arith.constant 0 : index
    %c0_50 = arith.constant 0 : index
    %54 = vector.load %arg4[%c0_49, %c0_50] : memref<64x256xf32, #tpu.memory_space<vmem>>, vector<64x256xf32>
    %cst_51 = arith.constant dense<0.000000e+00> : vector<1x256xf32>
    %55 = tpu.matmul %51, %54, %cst_51 {dimension_numbers = #tpu.dot_dimension_numbers<[1], [0], [0], [1], [0, 0, 1, 1], [], []>} : vector<1x64xf32>, vector<64x256xf32>, vector<1x256xf32> -> vector<1x256xf32>
    %56 = vector.broadcast %53 : vector<1x256xf32> to vector<8x256xf32>
    %57 = arith.mulf %29, %56 : vector<8x256xf32>
    %58 = vector.broadcast %55 : vector<1x256xf32> to vector<8x256xf32>
    %59 = arith.addf %57, %58 : vector<8x256xf32>
    %cst_52 = arith.constant 0.000000e+00 : f32
    %60 = vector.broadcast %cst_52 : f32 to vector<8x256xf32>
    %61 = arith.maximumf %59, %60 : vector<8x256xf32>
    %cst_53 = arith.constant 0.000000e+00 : f32
    %62 = vector.broadcast %cst_53 : f32 to vector<16x256xf32>
    %c0_54 = arith.constant 0 : index
    %c0_55 = arith.constant 0 : index
    %c0_56 = arith.constant 0 : index
    %63 = vector.load %arg7[%c0_54, %c0_55, %c0_56] : memref<4x256x256xf32, #tpu.memory_space<vmem>>, vector<1x256x256xf32>
    %64 = vector.shape_cast %63 : vector<1x256x256xf32> to vector<256x256xf32>
    %cst_57 = arith.constant dense<0.000000e+00> : vector<8x256xf32>
    %65 = tpu.matmul %61, %64, %cst_57 {dimension_numbers = #tpu.dot_dimension_numbers<[1], [0], [0], [1], [0, 0, 1, 1], [], []>} : vector<8x256xf32>, vector<256x256xf32>, vector<8x256xf32> -> vector<8x256xf32>
    %c0_58 = arith.constant 0 : index
    %c0_59 = arith.constant 0 : index
    %c0_60 = arith.constant 0 : index
    %66 = vector.load %arg8[%c0_58, %c0_59, %c0_60] : memref<4x16x8xf32, #tpu.memory_space<vmem>>, vector<1x16x8xf32>
    %67 = vector.shape_cast %66 : vector<1x16x8xf32> to vector<16x8xf32>
    %cst_61 = arith.constant dense<0.000000e+00> : vector<16x256xf32>
    %68 = tpu.matmul %67, %65, %cst_61 {dimension_numbers = #tpu.dot_dimension_numbers<[1], [0], [0], [1], [0, 0, 1, 1], [], []>} : vector<16x8xf32>, vector<8x256xf32>, vector<16x256xf32> -> vector<16x256xf32>
    %69 = arith.addf %62, %68 : vector<16x256xf32>
    %c1_62 = arith.constant 1 : index
    %c0_63 = arith.constant 0 : index
    %c0_64 = arith.constant 0 : index
    %70 = vector.load %arg7[%c1_62, %c0_63, %c0_64] : memref<4x256x256xf32, #tpu.memory_space<vmem>>, vector<1x256x256xf32>
    %71 = vector.shape_cast %70 : vector<1x256x256xf32> to vector<256x256xf32>
    %cst_65 = arith.constant dense<0.000000e+00> : vector<8x256xf32>
    %72 = tpu.matmul %61, %71, %cst_65 {dimension_numbers = #tpu.dot_dimension_numbers<[1], [0], [0], [1], [0, 0, 1, 1], [], []>} : vector<8x256xf32>, vector<256x256xf32>, vector<8x256xf32> -> vector<8x256xf32>
    %c1_66 = arith.constant 1 : index
    %c0_67 = arith.constant 0 : index
    %c0_68 = arith.constant 0 : index
    %73 = vector.load %arg8[%c1_66, %c0_67, %c0_68] : memref<4x16x8xf32, #tpu.memory_space<vmem>>, vector<1x16x8xf32>
    %74 = vector.shape_cast %73 : vector<1x16x8xf32> to vector<16x8xf32>
    %cst_69 = arith.constant dense<0.000000e+00> : vector<16x256xf32>
    %75 = tpu.matmul %74, %72, %cst_69 {dimension_numbers = #tpu.dot_dimension_numbers<[1], [0], [0], [1], [0, 0, 1, 1], [], []>} : vector<16x8xf32>, vector<8x256xf32>, vector<16x256xf32> -> vector<16x256xf32>
    %76 = arith.addf %69, %75 : vector<16x256xf32>
    %c2_70 = arith.constant 2 : index
    %c0_71 = arith.constant 0 : index
    %c0_72 = arith.constant 0 : index
    %77 = vector.load %arg7[%c2_70, %c0_71, %c0_72] : memref<4x256x256xf32, #tpu.memory_space<vmem>>, vector<1x256x256xf32>
    %78 = vector.shape_cast %77 : vector<1x256x256xf32> to vector<256x256xf32>
    %cst_73 = arith.constant dense<0.000000e+00> : vector<8x256xf32>
    %79 = tpu.matmul %61, %78, %cst_73 {dimension_numbers = #tpu.dot_dimension_numbers<[1], [0], [0], [1], [0, 0, 1, 1], [], []>} : vector<8x256xf32>, vector<256x256xf32>, vector<8x256xf32> -> vector<8x256xf32>
    %c2_74 = arith.constant 2 : index
    %c0_75 = arith.constant 0 : index
    %c0_76 = arith.constant 0 : index
    %80 = vector.load %arg8[%c2_74, %c0_75, %c0_76] : memref<4x16x8xf32, #tpu.memory_space<vmem>>, vector<1x16x8xf32>
    %81 = vector.shape_cast %80 : vector<1x16x8xf32> to vector<16x8xf32>
    %cst_77 = arith.constant dense<0.000000e+00> : vector<16x256xf32>
    %82 = tpu.matmul %81, %79, %cst_77 {dimension_numbers = #tpu.dot_dimension_numbers<[1], [0], [0], [1], [0, 0, 1, 1], [], []>} : vector<16x8xf32>, vector<8x256xf32>, vector<16x256xf32> -> vector<16x256xf32>
    %83 = arith.addf %76, %82 : vector<16x256xf32>
    %c3_78 = arith.constant 3 : index
    %c0_79 = arith.constant 0 : index
    %c0_80 = arith.constant 0 : index
    %84 = vector.load %arg7[%c3_78, %c0_79, %c0_80] : memref<4x256x256xf32, #tpu.memory_space<vmem>>, vector<1x256x256xf32>
    %85 = vector.shape_cast %84 : vector<1x256x256xf32> to vector<256x256xf32>
    %cst_81 = arith.constant dense<0.000000e+00> : vector<8x256xf32>
    %86 = tpu.matmul %61, %85, %cst_81 {dimension_numbers = #tpu.dot_dimension_numbers<[1], [0], [0], [1], [0, 0, 1, 1], [], []>} : vector<8x256xf32>, vector<256x256xf32>, vector<8x256xf32> -> vector<8x256xf32>
    %c3_82 = arith.constant 3 : index
    %c0_83 = arith.constant 0 : index
    %c0_84 = arith.constant 0 : index
    %87 = vector.load %arg8[%c3_82, %c0_83, %c0_84] : memref<4x16x8xf32, #tpu.memory_space<vmem>>, vector<1x16x8xf32>
    %88 = vector.shape_cast %87 : vector<1x16x8xf32> to vector<16x8xf32>
    %cst_85 = arith.constant dense<0.000000e+00> : vector<16x256xf32>
    %89 = tpu.matmul %88, %86, %cst_85 {dimension_numbers = #tpu.dot_dimension_numbers<[1], [0], [0], [1], [0, 0, 1, 1], [], []>} : vector<16x8xf32>, vector<8x256xf32>, vector<16x256xf32> -> vector<16x256xf32>
    %90 = arith.addf %83, %89 : vector<16x256xf32>
    %cst_86 = arith.constant 1.000000e+00 : f32
    %91 = vector.broadcast %cst_86 : f32 to vector<1x16xf32>
    %cst_87 = arith.constant dense<0.000000e+00> : vector<1x256xf32>
    %92 = tpu.matmul %91, %90, %cst_87 {dimension_numbers = #tpu.dot_dimension_numbers<[1], [0], [0], [1], [0, 0, 1, 1], [], []>} : vector<1x16xf32>, vector<16x256xf32>, vector<1x256xf32> -> vector<1x256xf32>
    %93 = arith.mulf %90, %90 : vector<16x256xf32>
    %cst_88 = arith.constant dense<0.000000e+00> : vector<1x256xf32>
    %94 = tpu.matmul %91, %93, %cst_88 {dimension_numbers = #tpu.dot_dimension_numbers<[1], [0], [0], [1], [0, 0, 1, 1], [], []>} : vector<1x16xf32>, vector<16x256xf32>, vector<1x256xf32> -> vector<1x256xf32>
    %c0_89 = arith.constant 0 : index
    %c0_90 = arith.constant 0 : index
    %95 = vector.load %arg9[%c0_89, %c0_90] : memref<256x32xf32, #tpu.memory_space<vmem>>, vector<256x32xf32>
    %cst_91 = arith.constant dense<0.000000e+00> : vector<1x32xf32>
    %96 = tpu.matmul %92, %95, %cst_91 {dimension_numbers = #tpu.dot_dimension_numbers<[1], [0], [0], [1], [0, 0, 1, 1], [], []>} : vector<1x256xf32>, vector<256x32xf32>, vector<1x32xf32> -> vector<1x32xf32>
    %cst_92 = arith.constant 7.812500e-03 : f32
    %97 = vector.broadcast %cst_92 : f32 to vector<1x32xf32>
    %98 = arith.mulf %96, %97 : vector<1x32xf32>
    %c0_93 = arith.constant 0 : index
    %c0_94 = arith.constant 0 : index
    %99 = vector.load %arg9[%c0_93, %c0_94] : memref<256x32xf32, #tpu.memory_space<vmem>>, vector<256x32xf32>
    %cst_95 = arith.constant dense<0.000000e+00> : vector<1x32xf32>
    %100 = tpu.matmul %94, %99, %cst_95 {dimension_numbers = #tpu.dot_dimension_numbers<[1], [0], [0], [1], [0, 0, 1, 1], [], []>} : vector<1x256xf32>, vector<256x32xf32>, vector<1x32xf32> -> vector<1x32xf32>
    %cst_96 = arith.constant 7.812500e-03 : f32
    %101 = vector.broadcast %cst_96 : f32 to vector<1x32xf32>
    %102 = arith.mulf %100, %101 : vector<1x32xf32>
    %103 = arith.mulf %98, %98 : vector<1x32xf32>
    %104 = arith.subf %102, %103 : vector<1x32xf32>
    %c0_97 = arith.constant 0 : index
    %c0_98 = arith.constant 0 : index
    %105 = vector.load %arg11[%c0_97, %c0_98] : memref<1x32xf32, #tpu.memory_space<vmem>>, vector<1x32xf32>
    %cst_99 = arith.constant 9.99999974E-6 : f32
    %106 = vector.broadcast %cst_99 : f32 to vector<1x32xf32>
    %107 = arith.addf %104, %106 : vector<1x32xf32>
    %108 = math.rsqrt %107 : vector<1x32xf32>
    %109 = arith.mulf %105, %108 : vector<1x32xf32>
    %c0_100 = arith.constant 0 : index
    %c0_101 = arith.constant 0 : index
    %110 = vector.load %arg12[%c0_100, %c0_101] : memref<1x32xf32, #tpu.memory_space<vmem>>, vector<1x32xf32>
    %111 = arith.mulf %98, %109 : vector<1x32xf32>
    %112 = arith.subf %110, %111 : vector<1x32xf32>
    %c0_102 = arith.constant 0 : index
    %c0_103 = arith.constant 0 : index
    %113 = vector.load %arg10[%c0_102, %c0_103] : memref<32x256xf32, #tpu.memory_space<vmem>>, vector<32x256xf32>
    %cst_104 = arith.constant dense<0.000000e+00> : vector<1x256xf32>
    %114 = tpu.matmul %109, %113, %cst_104 {dimension_numbers = #tpu.dot_dimension_numbers<[1], [0], [0], [1], [0, 0, 1, 1], [], []>} : vector<1x32xf32>, vector<32x256xf32>, vector<1x256xf32> -> vector<1x256xf32>
    %c0_105 = arith.constant 0 : index
    %c0_106 = arith.constant 0 : index
    %115 = vector.load %arg10[%c0_105, %c0_106] : memref<32x256xf32, #tpu.memory_space<vmem>>, vector<32x256xf32>
    %cst_107 = arith.constant dense<0.000000e+00> : vector<1x256xf32>
    %116 = tpu.matmul %112, %115, %cst_107 {dimension_numbers = #tpu.dot_dimension_numbers<[1], [0], [0], [1], [0, 0, 1, 1], [], []>} : vector<1x32xf32>, vector<32x256xf32>, vector<1x256xf32> -> vector<1x256xf32>
    %117 = vector.broadcast %114 : vector<1x256xf32> to vector<16x256xf32>
    %118 = arith.mulf %90, %117 : vector<16x256xf32>
    %119 = vector.broadcast %116 : vector<1x256xf32> to vector<16x256xf32>
    %120 = arith.addf %118, %119 : vector<16x256xf32>
    %cst_108 = arith.constant 0.000000e+00 : f32
    %121 = vector.broadcast %cst_108 : f32 to vector<16x256xf32>
    %122 = arith.maximumf %120, %121 : vector<16x256xf32>
    %cst_109 = arith.constant 0.000000e+00 : f32
    %123 = vector.broadcast %cst_109 : f32 to vector<32x256xf32>
    %c0_110 = arith.constant 0 : index
    %c0_111 = arith.constant 0 : index
    %c0_112 = arith.constant 0 : index
    %124 = vector.load %arg13[%c0_110, %c0_111, %c0_112] : memref<4x256x256xf32, #tpu.memory_space<vmem>>, vector<1x256x256xf32>
    %125 = vector.shape_cast %124 : vector<1x256x256xf32> to vector<256x256xf32>
    %cst_113 = arith.constant dense<0.000000e+00> : vector<16x256xf32>
    %126 = tpu.matmul %122, %125, %cst_113 {dimension_numbers = #tpu.dot_dimension_numbers<[1], [0], [0], [1], [0, 0, 1, 1], [], []>} : vector<16x256xf32>, vector<256x256xf32>, vector<16x256xf32> -> vector<16x256xf32>
    %c0_114 = arith.constant 0 : index
    %c0_115 = arith.constant 0 : index
    %c0_116 = arith.constant 0 : index
    %127 = vector.load %arg14[%c0_114, %c0_115, %c0_116] : memref<4x32x16xf32, #tpu.memory_space<vmem>>, vector<1x32x16xf32>
    %128 = vector.shape_cast %127 : vector<1x32x16xf32> to vector<32x16xf32>
    %cst_117 = arith.constant dense<0.000000e+00> : vector<32x256xf32>
    %129 = tpu.matmul %128, %126, %cst_117 {dimension_numbers = #tpu.dot_dimension_numbers<[1], [0], [0], [1], [0, 0, 1, 1], [], []>} : vector<32x16xf32>, vector<16x256xf32>, vector<32x256xf32> -> vector<32x256xf32>
    %130 = arith.addf %123, %129 : vector<32x256xf32>
    %c1_118 = arith.constant 1 : index
    %c0_119 = arith.constant 0 : index
    %c0_120 = arith.constant 0 : index
    %131 = vector.load %arg13[%c1_118, %c0_119, %c0_120] : memref<4x256x256xf32, #tpu.memory_space<vmem>>, vector<1x256x256xf32>
    %132 = vector.shape_cast %131 : vector<1x256x256xf32> to vector<256x256xf32>
    %cst_121 = arith.constant dense<0.000000e+00> : vector<16x256xf32>
    %133 = tpu.matmul %122, %132, %cst_121 {dimension_numbers = #tpu.dot_dimension_numbers<[1], [0], [0], [1], [0, 0, 1, 1], [], []>} : vector<16x256xf32>, vector<256x256xf32>, vector<16x256xf32> -> vector<16x256xf32>
    %c1_122 = arith.constant 1 : index
    %c0_123 = arith.constant 0 : index
    %c0_124 = arith.constant 0 : index
    %134 = vector.load %arg14[%c1_122, %c0_123, %c0_124] : memref<4x32x16xf32, #tpu.memory_space<vmem>>, vector<1x32x16xf32>
    %135 = vector.shape_cast %134 : vector<1x32x16xf32> to vector<32x16xf32>
    %cst_125 = arith.constant dense<0.000000e+00> : vector<32x256xf32>
    %136 = tpu.matmul %135, %133, %cst_125 {dimension_numbers = #tpu.dot_dimension_numbers<[1], [0], [0], [1], [0, 0, 1, 1], [], []>} : vector<32x16xf32>, vector<16x256xf32>, vector<32x256xf32> -> vector<32x256xf32>
    %137 = arith.addf %130, %136 : vector<32x256xf32>
    %c2_126 = arith.constant 2 : index
    %c0_127 = arith.constant 0 : index
    %c0_128 = arith.constant 0 : index
    %138 = vector.load %arg13[%c2_126, %c0_127, %c0_128] : memref<4x256x256xf32, #tpu.memory_space<vmem>>, vector<1x256x256xf32>
    %139 = vector.shape_cast %138 : vector<1x256x256xf32> to vector<256x256xf32>
    %cst_129 = arith.constant dense<0.000000e+00> : vector<16x256xf32>
    %140 = tpu.matmul %122, %139, %cst_129 {dimension_numbers = #tpu.dot_dimension_numbers<[1], [0], [0], [1], [0, 0, 1, 1], [], []>} : vector<16x256xf32>, vector<256x256xf32>, vector<16x256xf32> -> vector<16x256xf32>
    %c2_130 = arith.constant 2 : index
    %c0_131 = arith.constant 0 : index
    %c0_132 = arith.constant 0 : index
    %141 = vector.load %arg14[%c2_130, %c0_131, %c0_132] : memref<4x32x16xf32, #tpu.memory_space<vmem>>, vector<1x32x16xf32>
    %142 = vector.shape_cast %141 : vector<1x32x16xf32> to vector<32x16xf32>
    %cst_133 = arith.constant dense<0.000000e+00> : vector<32x256xf32>
    %143 = tpu.matmul %142, %140, %cst_133 {dimension_numbers = #tpu.dot_dimension_numbers<[1], [0], [0], [1], [0, 0, 1, 1], [], []>} : vector<32x16xf32>, vector<16x256xf32>, vector<32x256xf32> -> vector<32x256xf32>
    %144 = arith.addf %137, %143 : vector<32x256xf32>
    %c3_134 = arith.constant 3 : index
    %c0_135 = arith.constant 0 : index
    %c0_136 = arith.constant 0 : index
    %145 = vector.load %arg13[%c3_134, %c0_135, %c0_136] : memref<4x256x256xf32, #tpu.memory_space<vmem>>, vector<1x256x256xf32>
    %146 = vector.shape_cast %145 : vector<1x256x256xf32> to vector<256x256xf32>
    %cst_137 = arith.constant dense<0.000000e+00> : vector<16x256xf32>
    %147 = tpu.matmul %122, %146, %cst_137 {dimension_numbers = #tpu.dot_dimension_numbers<[1], [0], [0], [1], [0, 0, 1, 1], [], []>} : vector<16x256xf32>, vector<256x256xf32>, vector<16x256xf32> -> vector<16x256xf32>
    %c3_138 = arith.constant 3 : index
    %c0_139 = arith.constant 0 : index
    %c0_140 = arith.constant 0 : index
    %148 = vector.load %arg14[%c3_138, %c0_139, %c0_140] : memref<4x32x16xf32, #tpu.memory_space<vmem>>, vector<1x32x16xf32>
    %149 = vector.shape_cast %148 : vector<1x32x16xf32> to vector<32x16xf32>
    %cst_141 = arith.constant dense<0.000000e+00> : vector<32x256xf32>
    %150 = tpu.matmul %149, %147, %cst_141 {dimension_numbers = #tpu.dot_dimension_numbers<[1], [0], [0], [1], [0, 0, 1, 1], [], []>} : vector<32x16xf32>, vector<16x256xf32>, vector<32x256xf32> -> vector<32x256xf32>
    %151 = arith.addf %144, %150 : vector<32x256xf32>
    %cst_142 = arith.constant 1.000000e+00 : f32
    %152 = vector.broadcast %cst_142 : f32 to vector<1x32xf32>
    %cst_143 = arith.constant dense<0.000000e+00> : vector<1x256xf32>
    %153 = tpu.matmul %152, %151, %cst_143 {dimension_numbers = #tpu.dot_dimension_numbers<[1], [0], [0], [1], [0, 0, 1, 1], [], []>} : vector<1x32xf32>, vector<32x256xf32>, vector<1x256xf32> -> vector<1x256xf32>
    %154 = arith.mulf %151, %151 : vector<32x256xf32>
    %cst_144 = arith.constant dense<0.000000e+00> : vector<1x256xf32>
    %155 = tpu.matmul %152, %154, %cst_144 {dimension_numbers = #tpu.dot_dimension_numbers<[1], [0], [0], [1], [0, 0, 1, 1], [], []>} : vector<1x32xf32>, vector<32x256xf32>, vector<1x256xf32> -> vector<1x256xf32>
    %c0_145 = arith.constant 0 : index
    %c0_146 = arith.constant 0 : index
    %156 = vector.load %arg15[%c0_145, %c0_146] : memref<256x16xf32, #tpu.memory_space<vmem>>, vector<256x16xf32>
    %cst_147 = arith.constant dense<0.000000e+00> : vector<1x16xf32>
    %157 = tpu.matmul %153, %156, %cst_147 {dimension_numbers = #tpu.dot_dimension_numbers<[1], [0], [0], [1], [0, 0, 1, 1], [], []>} : vector<1x256xf32>, vector<256x16xf32>, vector<1x16xf32> -> vector<1x16xf32>
    %cst_148 = arith.constant 0.001953125 : f32
    %158 = vector.broadcast %cst_148 : f32 to vector<1x16xf32>
    %159 = arith.mulf %157, %158 : vector<1x16xf32>
    %c0_149 = arith.constant 0 : index
    %c0_150 = arith.constant 0 : index
    %160 = vector.load %arg15[%c0_149, %c0_150] : memref<256x16xf32, #tpu.memory_space<vmem>>, vector<256x16xf32>
    %cst_151 = arith.constant dense<0.000000e+00> : vector<1x16xf32>
    %161 = tpu.matmul %155, %160, %cst_151 {dimension_numbers = #tpu.dot_dimension_numbers<[1], [0], [0], [1], [0, 0, 1, 1], [], []>} : vector<1x256xf32>, vector<256x16xf32>, vector<1x16xf32> -> vector<1x16xf32>
    %cst_152 = arith.constant 0.001953125 : f32
    %162 = vector.broadcast %cst_152 : f32 to vector<1x16xf32>
    %163 = arith.mulf %161, %162 : vector<1x16xf32>
    %164 = arith.mulf %159, %159 : vector<1x16xf32>
    %165 = arith.subf %163, %164 : vector<1x16xf32>
    %c0_153 = arith.constant 0 : index
    %c0_154 = arith.constant 0 : index
    %166 = vector.load %arg17[%c0_153, %c0_154] : memref<1x16xf32, #tpu.memory_space<vmem>>, vector<1x16xf32>
    %cst_155 = arith.constant 9.99999974E-6 : f32
    %167 = vector.broadcast %cst_155 : f32 to vector<1x16xf32>
    %168 = arith.addf %165, %167 : vector<1x16xf32>
    %169 = math.rsqrt %168 : vector<1x16xf32>
    %170 = arith.mulf %166, %169 : vector<1x16xf32>
    %c0_156 = arith.constant 0 : index
    %c0_157 = arith.constant 0 : index
    %171 = vector.load %arg18[%c0_156, %c0_157] : memref<1x16xf32, #tpu.memory_space<vmem>>, vector<1x16xf32>
    %172 = arith.mulf %159, %170 : vector<1x16xf32>
    %173 = arith.subf %171, %172 : vector<1x16xf32>
    %c0_158 = arith.constant 0 : index
    %c0_159 = arith.constant 0 : index
    %174 = vector.load %arg16[%c0_158, %c0_159] : memref<16x256xf32, #tpu.memory_space<vmem>>, vector<16x256xf32>
    %cst_160 = arith.constant dense<0.000000e+00> : vector<1x256xf32>
    %175 = tpu.matmul %170, %174, %cst_160 {dimension_numbers = #tpu.dot_dimension_numbers<[1], [0], [0], [1], [0, 0, 1, 1], [], []>} : vector<1x16xf32>, vector<16x256xf32>, vector<1x256xf32> -> vector<1x256xf32>
    %c0_161 = arith.constant 0 : index
    %c0_162 = arith.constant 0 : index
    %176 = vector.load %arg16[%c0_161, %c0_162] : memref<16x256xf32, #tpu.memory_space<vmem>>, vector<16x256xf32>
    %cst_163 = arith.constant dense<0.000000e+00> : vector<1x256xf32>
    %177 = tpu.matmul %173, %176, %cst_163 {dimension_numbers = #tpu.dot_dimension_numbers<[1], [0], [0], [1], [0, 0, 1, 1], [], []>} : vector<1x16xf32>, vector<16x256xf32>, vector<1x256xf32> -> vector<1x256xf32>
    %178 = vector.broadcast %175 : vector<1x256xf32> to vector<32x256xf32>
    %179 = arith.mulf %151, %178 : vector<32x256xf32>
    %180 = vector.broadcast %177 : vector<1x256xf32> to vector<32x256xf32>
    %181 = arith.addf %179, %180 : vector<32x256xf32>
    %cst_164 = arith.constant 0.000000e+00 : f32
    %182 = vector.broadcast %cst_164 : f32 to vector<32x256xf32>
    %183 = arith.maximumf %181, %182 : vector<32x256xf32>
    %cst_165 = arith.constant 0.000000e+00 : f32
    %184 = vector.broadcast %cst_165 : f32 to vector<64x256xf32>
    %c0_166 = arith.constant 0 : index
    %c0_167 = arith.constant 0 : index
    %c0_168 = arith.constant 0 : index
    %185 = vector.load %arg19[%c0_166, %c0_167, %c0_168] : memref<4x256x256xf32, #tpu.memory_space<vmem>>, vector<1x256x256xf32>
    %186 = vector.shape_cast %185 : vector<1x256x256xf32> to vector<256x256xf32>
    %cst_169 = arith.constant dense<0.000000e+00> : vector<32x256xf32>
    %187 = tpu.matmul %183, %186, %cst_169 {dimension_numbers = #tpu.dot_dimension_numbers<[1], [0], [0], [1], [0, 0, 1, 1], [], []>} : vector<32x256xf32>, vector<256x256xf32>, vector<32x256xf32> -> vector<32x256xf32>
    %c0_170 = arith.constant 0 : index
    %c0_171 = arith.constant 0 : index
    %c0_172 = arith.constant 0 : index
    %188 = vector.load %arg20[%c0_170, %c0_171, %c0_172] : memref<4x64x32xf32, #tpu.memory_space<vmem>>, vector<1x64x32xf32>
    %189 = vector.shape_cast %188 : vector<1x64x32xf32> to vector<64x32xf32>
    %cst_173 = arith.constant dense<0.000000e+00> : vector<64x256xf32>
    %190 = tpu.matmul %189, %187, %cst_173 {dimension_numbers = #tpu.dot_dimension_numbers<[1], [0], [0], [1], [0, 0, 1, 1], [], []>} : vector<64x32xf32>, vector<32x256xf32>, vector<64x256xf32> -> vector<64x256xf32>
    %191 = arith.addf %184, %190 : vector<64x256xf32>
    %c1_174 = arith.constant 1 : index
    %c0_175 = arith.constant 0 : index
    %c0_176 = arith.constant 0 : index
    %192 = vector.load %arg19[%c1_174, %c0_175, %c0_176] : memref<4x256x256xf32, #tpu.memory_space<vmem>>, vector<1x256x256xf32>
    %193 = vector.shape_cast %192 : vector<1x256x256xf32> to vector<256x256xf32>
    %cst_177 = arith.constant dense<0.000000e+00> : vector<32x256xf32>
    %194 = tpu.matmul %183, %193, %cst_177 {dimension_numbers = #tpu.dot_dimension_numbers<[1], [0], [0], [1], [0, 0, 1, 1], [], []>} : vector<32x256xf32>, vector<256x256xf32>, vector<32x256xf32> -> vector<32x256xf32>
    %c1_178 = arith.constant 1 : index
    %c0_179 = arith.constant 0 : index
    %c0_180 = arith.constant 0 : index
    %195 = vector.load %arg20[%c1_178, %c0_179, %c0_180] : memref<4x64x32xf32, #tpu.memory_space<vmem>>, vector<1x64x32xf32>
    %196 = vector.shape_cast %195 : vector<1x64x32xf32> to vector<64x32xf32>
    %cst_181 = arith.constant dense<0.000000e+00> : vector<64x256xf32>
    %197 = tpu.matmul %196, %194, %cst_181 {dimension_numbers = #tpu.dot_dimension_numbers<[1], [0], [0], [1], [0, 0, 1, 1], [], []>} : vector<64x32xf32>, vector<32x256xf32>, vector<64x256xf32> -> vector<64x256xf32>
    %198 = arith.addf %191, %197 : vector<64x256xf32>
    %c2_182 = arith.constant 2 : index
    %c0_183 = arith.constant 0 : index
    %c0_184 = arith.constant 0 : index
    %199 = vector.load %arg19[%c2_182, %c0_183, %c0_184] : memref<4x256x256xf32, #tpu.memory_space<vmem>>, vector<1x256x256xf32>
    %200 = vector.shape_cast %199 : vector<1x256x256xf32> to vector<256x256xf32>
    %cst_185 = arith.constant dense<0.000000e+00> : vector<32x256xf32>
    %201 = tpu.matmul %183, %200, %cst_185 {dimension_numbers = #tpu.dot_dimension_numbers<[1], [0], [0], [1], [0, 0, 1, 1], [], []>} : vector<32x256xf32>, vector<256x256xf32>, vector<32x256xf32> -> vector<32x256xf32>
    %c2_186 = arith.constant 2 : index
    %c0_187 = arith.constant 0 : index
    %c0_188 = arith.constant 0 : index
    %202 = vector.load %arg20[%c2_186, %c0_187, %c0_188] : memref<4x64x32xf32, #tpu.memory_space<vmem>>, vector<1x64x32xf32>
    %203 = vector.shape_cast %202 : vector<1x64x32xf32> to vector<64x32xf32>
    %cst_189 = arith.constant dense<0.000000e+00> : vector<64x256xf32>
    %204 = tpu.matmul %203, %201, %cst_189 {dimension_numbers = #tpu.dot_dimension_numbers<[1], [0], [0], [1], [0, 0, 1, 1], [], []>} : vector<64x32xf32>, vector<32x256xf32>, vector<64x256xf32> -> vector<64x256xf32>
    %205 = arith.addf %198, %204 : vector<64x256xf32>
    %c3_190 = arith.constant 3 : index
    %c0_191 = arith.constant 0 : index
    %c0_192 = arith.constant 0 : index
    %206 = vector.load %arg19[%c3_190, %c0_191, %c0_192] : memref<4x256x256xf32, #tpu.memory_space<vmem>>, vector<1x256x256xf32>
    %207 = vector.shape_cast %206 : vector<1x256x256xf32> to vector<256x256xf32>
    %cst_193 = arith.constant dense<0.000000e+00> : vector<32x256xf32>
    %208 = tpu.matmul %183, %207, %cst_193 {dimension_numbers = #tpu.dot_dimension_numbers<[1], [0], [0], [1], [0, 0, 1, 1], [], []>} : vector<32x256xf32>, vector<256x256xf32>, vector<32x256xf32> -> vector<32x256xf32>
    %c3_194 = arith.constant 3 : index
    %c0_195 = arith.constant 0 : index
    %c0_196 = arith.constant 0 : index
    %209 = vector.load %arg20[%c3_194, %c0_195, %c0_196] : memref<4x64x32xf32, #tpu.memory_space<vmem>>, vector<1x64x32xf32>
    %210 = vector.shape_cast %209 : vector<1x64x32xf32> to vector<64x32xf32>
    %cst_197 = arith.constant dense<0.000000e+00> : vector<64x256xf32>
    %211 = tpu.matmul %210, %208, %cst_197 {dimension_numbers = #tpu.dot_dimension_numbers<[1], [0], [0], [1], [0, 0, 1, 1], [], []>} : vector<64x32xf32>, vector<32x256xf32>, vector<64x256xf32> -> vector<64x256xf32>
    %212 = arith.addf %205, %211 : vector<64x256xf32>
    %cst_198 = arith.constant 1.000000e+00 : f32
    %213 = vector.broadcast %cst_198 : f32 to vector<1x64xf32>
    %cst_199 = arith.constant dense<0.000000e+00> : vector<1x256xf32>
    %214 = tpu.matmul %213, %212, %cst_199 {dimension_numbers = #tpu.dot_dimension_numbers<[1], [0], [0], [1], [0, 0, 1, 1], [], []>} : vector<1x64xf32>, vector<64x256xf32>, vector<1x256xf32> -> vector<1x256xf32>
    %215 = arith.mulf %212, %212 : vector<64x256xf32>
    %cst_200 = arith.constant dense<0.000000e+00> : vector<1x256xf32>
    %216 = tpu.matmul %213, %215, %cst_200 {dimension_numbers = #tpu.dot_dimension_numbers<[1], [0], [0], [1], [0, 0, 1, 1], [], []>} : vector<1x64xf32>, vector<64x256xf32>, vector<1x256xf32> -> vector<1x256xf32>
    %c0_201 = arith.constant 0 : index
    %c0_202 = arith.constant 0 : index
    %217 = vector.load %arg21[%c0_201, %c0_202] : memref<256x8xf32, #tpu.memory_space<vmem>>, vector<256x8xf32>
    %cst_203 = arith.constant dense<0.000000e+00> : vector<1x8xf32>
    %218 = tpu.matmul %214, %217, %cst_203 {dimension_numbers = #tpu.dot_dimension_numbers<[1], [0], [0], [1], [0, 0, 1, 1], [], []>} : vector<1x256xf32>, vector<256x8xf32>, vector<1x8xf32> -> vector<1x8xf32>
    %cst_204 = arith.constant 4.8828125E-4 : f32
    %219 = vector.broadcast %cst_204 : f32 to vector<1x8xf32>
    %220 = arith.mulf %218, %219 : vector<1x8xf32>
    %c0_205 = arith.constant 0 : index
    %c0_206 = arith.constant 0 : index
    %221 = vector.load %arg21[%c0_205, %c0_206] : memref<256x8xf32, #tpu.memory_space<vmem>>, vector<256x8xf32>
    %cst_207 = arith.constant dense<0.000000e+00> : vector<1x8xf32>
    %222 = tpu.matmul %216, %221, %cst_207 {dimension_numbers = #tpu.dot_dimension_numbers<[1], [0], [0], [1], [0, 0, 1, 1], [], []>} : vector<1x256xf32>, vector<256x8xf32>, vector<1x8xf32> -> vector<1x8xf32>
    %cst_208 = arith.constant 4.8828125E-4 : f32
    %223 = vector.broadcast %cst_208 : f32 to vector<1x8xf32>
    %224 = arith.mulf %222, %223 : vector<1x8xf32>
    %225 = arith.mulf %220, %220 : vector<1x8xf32>
    %226 = arith.subf %224, %225 : vector<1x8xf32>
    %c0_209 = arith.constant 0 : index
    %c0_210 = arith.constant 0 : index
    %227 = vector.load %arg23[%c0_209, %c0_210] : memref<1x8xf32, #tpu.memory_space<vmem>>, vector<1x8xf32>
    %cst_211 = arith.constant 9.99999974E-6 : f32
    %228 = vector.broadcast %cst_211 : f32 to vector<1x8xf32>
    %229 = arith.addf %226, %228 : vector<1x8xf32>
    %230 = math.rsqrt %229 : vector<1x8xf32>
    %231 = arith.mulf %227, %230 : vector<1x8xf32>
    %c0_212 = arith.constant 0 : index
    %c0_213 = arith.constant 0 : index
    %232 = vector.load %arg24[%c0_212, %c0_213] : memref<1x8xf32, #tpu.memory_space<vmem>>, vector<1x8xf32>
    %233 = arith.mulf %220, %231 : vector<1x8xf32>
    %234 = arith.subf %232, %233 : vector<1x8xf32>
    %c0_214 = arith.constant 0 : index
    %c0_215 = arith.constant 0 : index
    %235 = vector.load %arg22[%c0_214, %c0_215] : memref<8x256xf32, #tpu.memory_space<vmem>>, vector<8x256xf32>
    %cst_216 = arith.constant dense<0.000000e+00> : vector<1x256xf32>
    %236 = tpu.matmul %231, %235, %cst_216 {dimension_numbers = #tpu.dot_dimension_numbers<[1], [0], [0], [1], [0, 0, 1, 1], [], []>} : vector<1x8xf32>, vector<8x256xf32>, vector<1x256xf32> -> vector<1x256xf32>
    %c0_217 = arith.constant 0 : index
    %c0_218 = arith.constant 0 : index
    %237 = vector.load %arg22[%c0_217, %c0_218] : memref<8x256xf32, #tpu.memory_space<vmem>>, vector<8x256xf32>
    %cst_219 = arith.constant dense<0.000000e+00> : vector<1x256xf32>
    %238 = tpu.matmul %234, %237, %cst_219 {dimension_numbers = #tpu.dot_dimension_numbers<[1], [0], [0], [1], [0, 0, 1, 1], [], []>} : vector<1x8xf32>, vector<8x256xf32>, vector<1x256xf32> -> vector<1x256xf32>
    %239 = vector.broadcast %236 : vector<1x256xf32> to vector<64x256xf32>
    %240 = arith.mulf %212, %239 : vector<64x256xf32>
    %241 = vector.broadcast %238 : vector<1x256xf32> to vector<64x256xf32>
    %242 = arith.addf %240, %241 : vector<64x256xf32>
    %cst_220 = arith.constant 0.000000e+00 : f32
    %243 = vector.broadcast %cst_220 : f32 to vector<64x256xf32>
    %244 = arith.maximumf %242, %243 : vector<64x256xf32>
    %cst_221 = arith.constant 0.000000e+00 : f32
    %245 = vector.broadcast %cst_221 : f32 to vector<128x256xf32>
    %c0_222 = arith.constant 0 : index
    %c0_223 = arith.constant 0 : index
    %c0_224 = arith.constant 0 : index
    %246 = vector.load %arg25[%c0_222, %c0_223, %c0_224] : memref<4x256x256xf32, #tpu.memory_space<vmem>>, vector<1x256x256xf32>
    %247 = vector.shape_cast %246 : vector<1x256x256xf32> to vector<256x256xf32>
    %cst_225 = arith.constant dense<0.000000e+00> : vector<64x256xf32>
    %248 = tpu.matmul %244, %247, %cst_225 {dimension_numbers = #tpu.dot_dimension_numbers<[1], [0], [0], [1], [0, 0, 1, 1], [], []>} : vector<64x256xf32>, vector<256x256xf32>, vector<64x256xf32> -> vector<64x256xf32>
    %c0_226 = arith.constant 0 : index
    %c0_227 = arith.constant 0 : index
    %c0_228 = arith.constant 0 : index
    %249 = vector.load %arg26[%c0_226, %c0_227, %c0_228] : memref<4x128x64xf32, #tpu.memory_space<vmem>>, vector<1x128x64xf32>
    %250 = vector.shape_cast %249 : vector<1x128x64xf32> to vector<128x64xf32>
    %cst_229 = arith.constant dense<0.000000e+00> : vector<128x256xf32>
    %251 = tpu.matmul %250, %248, %cst_229 {dimension_numbers = #tpu.dot_dimension_numbers<[1], [0], [0], [1], [0, 0, 1, 1], [], []>} : vector<128x64xf32>, vector<64x256xf32>, vector<128x256xf32> -> vector<128x256xf32>
    %252 = arith.addf %245, %251 : vector<128x256xf32>
    %c1_230 = arith.constant 1 : index
    %c0_231 = arith.constant 0 : index
    %c0_232 = arith.constant 0 : index
    %253 = vector.load %arg25[%c1_230, %c0_231, %c0_232] : memref<4x256x256xf32, #tpu.memory_space<vmem>>, vector<1x256x256xf32>
    %254 = vector.shape_cast %253 : vector<1x256x256xf32> to vector<256x256xf32>
    %cst_233 = arith.constant dense<0.000000e+00> : vector<64x256xf32>
    %255 = tpu.matmul %244, %254, %cst_233 {dimension_numbers = #tpu.dot_dimension_numbers<[1], [0], [0], [1], [0, 0, 1, 1], [], []>} : vector<64x256xf32>, vector<256x256xf32>, vector<64x256xf32> -> vector<64x256xf32>
    %c1_234 = arith.constant 1 : index
    %c0_235 = arith.constant 0 : index
    %c0_236 = arith.constant 0 : index
    %256 = vector.load %arg26[%c1_234, %c0_235, %c0_236] : memref<4x128x64xf32, #tpu.memory_space<vmem>>, vector<1x128x64xf32>
    %257 = vector.shape_cast %256 : vector<1x128x64xf32> to vector<128x64xf32>
    %cst_237 = arith.constant dense<0.000000e+00> : vector<128x256xf32>
    %258 = tpu.matmul %257, %255, %cst_237 {dimension_numbers = #tpu.dot_dimension_numbers<[1], [0], [0], [1], [0, 0, 1, 1], [], []>} : vector<128x64xf32>, vector<64x256xf32>, vector<128x256xf32> -> vector<128x256xf32>
    %259 = arith.addf %252, %258 : vector<128x256xf32>
    %c2_238 = arith.constant 2 : index
    %c0_239 = arith.constant 0 : index
    %c0_240 = arith.constant 0 : index
    %260 = vector.load %arg25[%c2_238, %c0_239, %c0_240] : memref<4x256x256xf32, #tpu.memory_space<vmem>>, vector<1x256x256xf32>
    %261 = vector.shape_cast %260 : vector<1x256x256xf32> to vector<256x256xf32>
    %cst_241 = arith.constant dense<0.000000e+00> : vector<64x256xf32>
    %262 = tpu.matmul %244, %261, %cst_241 {dimension_numbers = #tpu.dot_dimension_numbers<[1], [0], [0], [1], [0, 0, 1, 1], [], []>} : vector<64x256xf32>, vector<256x256xf32>, vector<64x256xf32> -> vector<64x256xf32>
    %c2_242 = arith.constant 2 : index
    %c0_243 = arith.constant 0 : index
    %c0_244 = arith.constant 0 : index
    %263 = vector.load %arg26[%c2_242, %c0_243, %c0_244] : memref<4x128x64xf32, #tpu.memory_space<vmem>>, vector<1x128x64xf32>
    %264 = vector.shape_cast %263 : vector<1x128x64xf32> to vector<128x64xf32>
    %cst_245 = arith.constant dense<0.000000e+00> : vector<128x256xf32>
    %265 = tpu.matmul %264, %262, %cst_245 {dimension_numbers = #tpu.dot_dimension_numbers<[1], [0], [0], [1], [0, 0, 1, 1], [], []>} : vector<128x64xf32>, vector<64x256xf32>, vector<128x256xf32> -> vector<128x256xf32>
    %266 = arith.addf %259, %265 : vector<128x256xf32>
    %c3_246 = arith.constant 3 : index
    %c0_247 = arith.constant 0 : index
    %c0_248 = arith.constant 0 : index
    %267 = vector.load %arg25[%c3_246, %c0_247, %c0_248] : memref<4x256x256xf32, #tpu.memory_space<vmem>>, vector<1x256x256xf32>
    %268 = vector.shape_cast %267 : vector<1x256x256xf32> to vector<256x256xf32>
    %cst_249 = arith.constant dense<0.000000e+00> : vector<64x256xf32>
    %269 = tpu.matmul %244, %268, %cst_249 {dimension_numbers = #tpu.dot_dimension_numbers<[1], [0], [0], [1], [0, 0, 1, 1], [], []>} : vector<64x256xf32>, vector<256x256xf32>, vector<64x256xf32> -> vector<64x256xf32>
    %c3_250 = arith.constant 3 : index
    %c0_251 = arith.constant 0 : index
    %c0_252 = arith.constant 0 : index
    %270 = vector.load %arg26[%c3_250, %c0_251, %c0_252] : memref<4x128x64xf32, #tpu.memory_space<vmem>>, vector<1x128x64xf32>
    %271 = vector.shape_cast %270 : vector<1x128x64xf32> to vector<128x64xf32>
    %cst_253 = arith.constant dense<0.000000e+00> : vector<128x256xf32>
    %272 = tpu.matmul %271, %269, %cst_253 {dimension_numbers = #tpu.dot_dimension_numbers<[1], [0], [0], [1], [0, 0, 1, 1], [], []>} : vector<128x64xf32>, vector<64x256xf32>, vector<128x256xf32> -> vector<128x256xf32>
    %273 = arith.addf %266, %272 : vector<128x256xf32>
    %274 = math.tanh %273 : vector<128x256xf32>
    %c0_254 = arith.constant 0 : index
    %c0_255 = arith.constant 0 : index
    %275 = vector.load %arg27[%c0_254, %c0_255] : memref<128x256xf32, #tpu.memory_space<vmem>>, vector<128x256xf32>
    tpu.vector_store %arg27[%c0_254, %c0_255], %274 {strides = array<i32>} : memref<128x256xf32, #tpu.memory_space<vmem>>, vector<128x256xf32>,
    return
  }
}

</mosaic_0001>

<bundles_post_ra>
// kernel: tile.49
= control target key start
LH: loop header
LB: loop body
LE: loop exit
PB: predicated region body
PF: predicated region fallthrough
CT: control target
= control target key end

     0   :  { %vm644_vm0 = vcmask 1047556   ;;  %s389_s9 = smov 3  ;;  %s383_s12 = smov 3  ;;  %vm260_vm1 = vcmask 523264   ;;  %vm648_vm2 = vcmask 1048064   ;;  %s1512_s0 = inlined_call_operand.vmem [shape: f32[64,4,64], index: 0, kind: input, shape index: {}]   ;;  %s1513_s1 = inlined_call_operand.vmem [shape: f32[64,256], index: 1, kind: output, shape index: {}]  }
   0x1   :  { %v871_v0 = vld [vmem:[%s1512_s0 + $0x1c] sm:$0xf]  ;;  %v872_v1 = vld [vmem:[%s1512_s0 + $0x18] sm:$0xf]  ;;  %v873_v2 = vld [vmem:[%s1512_s0 + $0x14] sm:$0xf] }
   0x2   :  { %231 = vst [vmem:[#allocation0 + $0x38] sm:$0xf] %v871_v0  ;;  %v874_v3 = vld [vmem:[%s1512_s0 + $0x10] sm:$0xf]  ;;  %v875_v4 = vld [vmem:[%s1512_s0 + $0xc] sm:$0xf] }
   0x3   :  { %235 = vst [vmem:[#allocation0 + $0x30] sm:$0xf] %v872_v1  ;;  %v876_v5 = vld [vmem:[%s1512_s0 + $0x8] sm:$0xf]  ;;  %v877_v6 = vld [vmem:[%s1512_s0 + $0x4] sm:$0xf] }
   0x4   :  { %239 = vst [vmem:[#allocation0 + $0x28] sm:$0xf] %v873_v2  ;;  %v256_v7 = vld [vmem:[%s1512_s0] sm:$0xf]  ;;  %v855_v8 = vld [vmem:[%s1512_s0 + $0x5c] sm:$0xf] }
   0x5   :  { %243 = vst [vmem:[#allocation0 + $0x20] sm:$0xf] %v874_v3  ;;  %v856_v9 = vld [vmem:[%s1512_s0 + $0x58] sm:$0xf]  ;;  %v857_v10 = vld [vmem:[%s1512_s0 + $0x54] sm:$0xf] }
   0x6   :  { %247 = vst [vmem:[#allocation0 + $0x18] sm:$0xf] %v875_v4  ;;  %v858_v11 = vld [vmem:[%s1512_s0 + $0x50] sm:$0xf]  ;;  %v859_v12 = vld [vmem:[%s1512_s0 + $0x4c] sm:$0xf] }
   0x7   :  { %251 = vst [vmem:[#allocation0 + $0x10] sm:$0xf] %v876_v5  ;;  %v860_v13 = vld [vmem:[%s1512_s0 + $0x48] sm:$0xf]  ;;  %v861_v14 = vld [vmem:[%s1512_s0 + $0x44] sm:$0xf] }
   0x8   :  { %255 = vst [vmem:[#allocation0 + $0x8] sm:$0xf] %v877_v6  ;;  %v862_v15 = vld [vmem:[%s1512_s0 + $0x40] sm:$0xf]  ;;  %v839_v17 = vld [vmem:[%s1512_s0 + $0x9c] sm:$0xf] }
   0x9   :  { %257 = vst [vmem:[#allocation0] sm:$0xf] %v256_v7  ;;  %s377_s13 = smov 3  ;;  %s957_s14 = smov 64   ;;  %v840_v24 = vld [vmem:[%s1512_s0 + $0x98] sm:$0xf] }
   0xa   :  { %167 = vst [vmem:[#allocation0 + $0xb8] sm:$0xf] %v855_v8  ;;  %s371_s15 = smov 3  ;;  %s365_s16 = smov 3  ;;  %v841_v26 = vld [vmem:[%s1512_s0 + $0x94] sm:$0xf] }
   0xb   :  { %171 = vst [vmem:[#allocation0 + $0xb0] sm:$0xf] %v856_v9  ;;  %s359_s19 = smov 3  ;;  %s353_s22 = smov 3  ;;  %v842_v28 = vld [vmem:[%s1512_s0 + $0x90] sm:$0xf] }
   0xc   :  { %175 = vst [vmem:[#allocation0 + $0xa8] sm:$0xf] %v857_v10  ;;  %v643_v16 = vld [vmem:[#allocation0 + $0x1] ss:$8 sm:$0xf0]   ;;  %s479_s21 = smov 3 }
   0xd   :  { %179 = vst [vmem:[#allocation0 + $0xa0] sm:$0xf] %v858_v11  ;;  %v843_v30 = vld [vmem:[%s1512_s0 + $0x8c] sm:$0xf]  ;;  %v844_v34 = vld [vmem:[%s1512_s0 + $0x88] sm:$0xf] }
   0xe   :  { %183 = vst [vmem:[#allocation0 + $0x98] sm:$0xf] %v859_v12  ;;  %v845_v35 = vld [vmem:[%s1512_s0 + $0x84] sm:$0xf]  ;;  %v846_v36 = vld [vmem:[%s1512_s0 + $0x80] sm:$0xf] }
   0xf   :  { %187 = vst [vmem:[#allocation0 + $0x90] sm:$0xf] %v860_v13  ;;  %v847_v37 = vld [vmem:[%s1512_s0 + $0x7c] sm:$0xf]  ;;  %v838_v38 = vld [vmem:[%s1512_s0 + $0xa0] sm:$0xf] }
  0x10   :  { %v641_v18 = vld [vmem:[#allocation0 + $0x1] ss:$8 sm:$0xf]   ;;  %191 = vst [vmem:[#allocation0 + $0x88] sm:$0xf] %v861_v14  ;;  %s473_s24 = smov 3 }
  0x11   :  { %v645_v19 = vsel %vm644_vm0, %v643_v16, %v641_v18  ;;  %195 = vst [vmem:[#allocation0 + $0x80] sm:$0xf] %v862_v15  ;;  %s467_s25 = smov 3  ;;  %s461_s26 = smov 3  ;;  %v823_v47 = vld [vmem:[%s1512_s0 + $0xdc] sm:$0xf] }
  0x12   :  { %646 = vrot.lane.b32.xlu0 %v645_v19, %s957_s14  ;;  %v390_v20 = vld [vmem:[#allocation0 + $0xb0] ss:$2 sm:%s389_s9]   ;;  %103 = vst [vmem:[#allocation0 + $0x138] sm:$0xf] %v839_v17  ;;  %s485_s27 = smov 3  ;;  %s455_s28 = smov 3 }
  0x13   :  { %v384_v21 = vld [vmem:[#allocation0 + $0xa8] ss:$2 sm:%s383_s12]   ;;  %899 = vst.msk [vmem:[%s1513_s1 + $0x26] ss:$8 sm:$0x3] %vm260_vm1, %v390_v20   ;;  %s449_s2 = smov 3 }
  0x14   :  { %v378_v22 = vld [vmem:[#allocation0 + $0xa0] ss:$2 sm:%s377_s13]   ;;  %898 = vst.msk [vmem:[%s1513_s1 + $0x25] ss:$8 sm:$0x3] %vm260_vm1, %v384_v21   ;;  %s443_s5 = smov 3 }
  0x15   :  { %v372_v23 = vld [vmem:[#allocation0 + $0x98] ss:$2 sm:%s371_s15]   ;;  %897 = vst.msk [vmem:[%s1513_s1 + $0x24] ss:$8 sm:$0x3] %vm260_vm1, %v378_v22   ;;  %s491_s15 = smov 3 }
  0x16   :  { %v366_v25 = vld [vmem:[#allocation0 + $0x90] ss:$2 sm:%s365_s16]   ;;  %896 = vst.msk [vmem:[%s1513_s1 + $0x23] ss:$8 sm:$0x3] %vm260_vm1, %v372_v23   ;;  %s581_s9 = smov 3 }
  0x17   :  { %v360_v27 = vld [vmem:[#allocation0 + $0x88] ss:$2 sm:%s359_s19]   ;;  %895 = vst.msk [vmem:[%s1513_s1 + $0x22] ss:$8 sm:$0x3] %vm260_vm1, %v366_v25   ;;  %s575_s12 = smov 3 }
  0x18   :  { %v354_v29 = vld [vmem:[#allocation0 + $0x80] ss:$2 sm:%s353_s22]   ;;  %894 = vst.msk [vmem:[%s1513_s1 + $0x21] ss:$8 sm:$0x3] %vm260_vm1, %v360_v27   ;;  %s569_s13 = smov 3 }
  0x19   :  { %893 = vst.msk [vmem:[%s1513_s1 + $0x20] ss:$8 sm:$0x3] %vm260_vm1, %v354_v29   ;;  %v651_v31 = vld [vmem:[#allocation0 + $0x81] ss:$8 sm:$0xf]  }
  0x1a   :  { %v653_v32 = vld [vmem:[#allocation0 + $0x81] ss:$8 sm:$0xf0]   ;;  %107 = vst [vmem:[#allocation0 + $0x130] sm:$0xf] %v840_v24  ;;  %s557_s16 = smov 3 }
  0x1b   :  { %v655_v33 = vsel %vm644_vm0, %v653_v32, %v651_v31  ;;  %111 = vst [vmem:[#allocation0 + $0x128] sm:$0xf] %v841_v26  ;;  %v824_v49 = vld [vmem:[%s1512_s0 + $0xd8] sm:$0xf]  ;;  %v825_v51 = vld [vmem:[%s1512_s0 + $0xd4] sm:$0xf] }
  0x1c   :  { %656 = vrot.lane.b32.xlu0 %v655_v33, %s957_s14  ;;  %115 = vst [vmem:[#allocation0 + $0x120] sm:$0xf] %v842_v28  ;;  %v826_v57 = vld [vmem:[%s1512_s0 + $0xd0] sm:$0xf]  ;;  %v827_v58 = vld [vmem:[%s1512_s0 + $0xcc] sm:$0xf] }
  0x1d   :  { %119 = vst [vmem:[#allocation0 + $0x118] sm:$0xf] %v843_v30  ;;  %v828_v59 = vld [vmem:[%s1512_s0 + $0xc8] sm:$0xf]  ;;  %v829_v60 = vld [vmem:[%s1512_s0 + $0xc4] sm:$0xf] }
  0x1e   :  { %123 = vst [vmem:[#allocation0 + $0x110] sm:$0xf] %v844_v34  ;;  %v830_v61 = vld [vmem:[%s1512_s0 + $0xc0] sm:$0xf]  ;;  %s551_s19 = smov 3  ;;  %s545_s22 = smov 3 }
  0x1f   :  { %127 = vst [vmem:[#allocation0 + $0x108] sm:$0xf] %v845_v35  ;;  %v822_v62 = vld [vmem:[%s1512_s0 + $0xe0] sm:$0xf]  ;;  %s587_s29 = smov 3  ;;  %s347_s3 = smov 3 }
  0x20   :  { %131 = vst [vmem:[#allocation0 + $0x100] sm:$0xf] %v846_v36  ;;  %v684_v63 = vld [vmem:[#allocation0 + $0x3] ss:$8 sm:$0xf]   ;;  %s341_s4 = smov 3 }
  0x21   :  { %135 = vst [vmem:[#allocation0 + $0xf8] sm:$0xf] %v847_v37  ;;  %v486_v43 = vld [vmem:[#allocation0 + $0x130] ss:$2 sm:%s485_s27]   ;;  %v851_v16 = vld [vmem:[%s1512_s0 + $0x6c] sm:$0xf] }
  0x22   :  { %v480_v39 = vld [vmem:[#allocation0 + $0x128] ss:$2 sm:%s479_s21]   ;;  %99 = vst [vmem:[#allocation0 + $0x140] sm:$0xf] %v838_v38  ;;  %v848_v8 = vld [vmem:[%s1512_s0 + $0x78] sm:$0xf] }
  0x23   :  { %v474_v40 = vld [vmem:[#allocation0 + $0x120] ss:$2 sm:%s473_s24]   ;;  %914 = vst.msk [vmem:[%s1513_s1 + $0x45] ss:$8 sm:$0x3] %vm260_vm1, %v480_v39   ;;  %s263_s21 = smov 3 }
  0x24   :  { %v468_v41 = vld [vmem:[#allocation0 + $0x118] ss:$2 sm:%s467_s25]   ;;  %913 = vst.msk [vmem:[%s1513_s1 + $0x44] ss:$8 sm:$0x3] %vm260_vm1, %v474_v40   ;;  %s275_s25 = smov 3 }
  0x25   :  { %v462_v42 = vld [vmem:[#allocation0 + $0x110] ss:$2 sm:%s461_s26]   ;;  %912 = vst.msk [vmem:[%s1513_s1 + $0x43] ss:$8 sm:$0x3] %vm260_vm1, %v468_v41   ;;  %s281_s26 = smov 3 }
  0x26   :  { %v456_v44 = vld [vmem:[#allocation0 + $0x108] ss:$2 sm:%s455_s28]   ;;  %911 = vst.msk [vmem:[%s1513_s1 + $0x42] ss:$8 sm:$0x3] %vm260_vm1, %v462_v42   ;;  %s287_s27 = smov 3 }
  0x27   :  { %v450_v45 = vld [vmem:[#allocation0 + $0x100] ss:$2 sm:%s449_s2]   ;;  %910 = vst.msk [vmem:[%s1513_s1 + $0x41] ss:$8 sm:$0x3] %vm260_vm1, %v456_v44   ;;  %s293_s28 = smov 3 }
  0x28   :  { %v444_v46 = vld [vmem:[#allocation0 + $0xf8] ss:$2 sm:%s443_s5]   ;;  %909 = vst.msk [vmem:[%s1513_s1 + $0x40] ss:$8 sm:$0x3] %vm260_vm1, %v450_v45   ;;  %s335_s7 = smov 3 }
  0x29   :  { %908 = vst.msk [vmem:[%s1513_s1 + $0x37] ss:$8 sm:$0x3] %vm260_vm1, %v444_v46   ;;  %v662_v48 = vld [vmem:[#allocation0 + $0x101] ss:$8 sm:$0xf]  }
  0x2a   :  { %v664_v50 = vld [vmem:[#allocation0 + $0x101] ss:$8 sm:$0xf0]   ;;  %915 = vst.msk [vmem:[%s1513_s1 + $0x46] ss:$8 sm:$0x3] %vm260_vm1, %v486_v43  }
  0x2b   :  { %v666_v52 = vsel %vm644_vm0, %v664_v50, %v662_v48  ;;  %v492_v53 = vld [vmem:[#allocation0 + $0x138] ss:$2 sm:%s491_s15]   ;;  %v706_v54 = vld [vmem:[#allocation0 + $0x103] ss:$8 sm:$0xf]   ;;  %s563_s15 = smov 3 }
  0x2c   :  { %667 = vrot.lane.b32.xlu1 %v666_v52, %s957_s14  ;;  %916 = vst.msk [vmem:[%s1513_s1 + $0x47] ss:$8 sm:$0x3] %vm260_vm1, %v492_v53   ;;  %v708_v55 = vld [vmem:[#allocation0 + $0x103] ss:$8 sm:$0xf0]  }
  0x2d   :  { %v710_v56 = vsel %vm644_vm0, %v708_v55, %v706_v54  ;;  %39 = vst [vmem:[#allocation0 + $0x1b8] sm:$0xf] %v823_v47  ;;  %v686_v0 = vld [vmem:[#allocation0 + $0x3] ss:$8 sm:$0xf0]   ;;  %s329_s8 = smov 3 }
  0x2e   :  { %711 = vrot.lane.b32.xlu0 %v710_v56, %s957_s14  ;;  %43 = vst [vmem:[#allocation0 + $0x1b0] sm:$0xf] %v824_v49  ;;  %v688_v2 = vsel %vm644_vm0, %v686_v0, %v684_v63  ;;  %v849_v10 = vld [vmem:[%s1512_s0 + $0x74] sm:$0xf]  ;;  %v850_v12 = vld [vmem:[%s1512_s0 + $0x70] sm:$0xf] }
  0x2f   :  { %47 = vst [vmem:[#allocation0 + $0x1a8] sm:$0xf] %v825_v51  ;;  %689 = vrot.lane.b32.xlu2 %v688_v2, %s957_s14  ;;  %v852_v17 = vld [vmem:[%s1512_s0 + $0x68] sm:$0xf]  ;;  %v853_v18 = vld [vmem:[%s1512_s0 + $0x64] sm:$0xf] }
  0x30   :  { %51 = vst [vmem:[#allocation0 + $0x1a0] sm:$0xf] %v826_v57  ;;  %v854_v21 = vld [vmem:[%s1512_s0 + $0x60] sm:$0xf]  ;;  %v264_v24 = vld [vmem:[#allocation0 + $0x8] ss:$2 sm:%s263_s21]  }
  0x31   :  { %55 = vst [vmem:[#allocation0 + $0x198] sm:$0xf] %v827_v58  ;;  %v276_v26 = vld [vmem:[#allocation0 + $0x18] ss:$2 sm:%s275_s25]   ;;  %v288_v28 = vld [vmem:[#allocation0 + $0x28] ss:$2 sm:%s287_s27]  }
  0x32   :  { %59 = vst [vmem:[#allocation0 + $0x190] sm:$0xf] %v828_v59  ;;  %v282_v27 = vld [vmem:[#allocation0 + $0x20] ss:$2 sm:%s281_s26]   ;;  %v294_v30 = vld [vmem:[#allocation0 + $0x30] ss:$2 sm:%s293_s28]  }
  0x33   :  { %63 = vst [vmem:[#allocation0 + $0x188] sm:$0xf] %v829_v60  ;;  %v870_v29 = vld [vmem:[%s1512_s0 + $0x20] sm:$0xf]  ;;  %v863_v31 = vld [vmem:[%s1512_s0 + $0x3c] sm:$0xf] }
  0x34   :  { %67 = vst [vmem:[#allocation0 + $0x180] sm:$0xf] %v830_v61  ;;  %v864_v33 = vld [vmem:[%s1512_s0 + $0x38] sm:$0xf]  ;;  %v865_v34 = vld [vmem:[%s1512_s0 + $0x34] sm:$0xf] }
  0x35   :  { %35 = vst [vmem:[#allocation0 + $0x1c0] sm:$0xf] %v822_v62  ;;  %v582_v1 = vld [vmem:[#allocation0 + $0x1b0] ss:$2 sm:%s581_s9]   ;;  %v867_v40 = vld [vmem:[%s1512_s0 + $0x2c] sm:$0xf] }
  0x36   :  { %v576_v3 = vld [vmem:[#allocation0 + $0x1a8] ss:$2 sm:%s575_s12]   ;;  %931 = vst.msk [vmem:[%s1513_s1 + $0x66] ss:$8 sm:$0x3] %vm260_vm1, %v582_v1   ;;  %s299_s27 = smov 3 }
  0x37   :  { %v570_v4 = vld [vmem:[#allocation0 + $0x1a0] ss:$2 sm:%s569_s13]   ;;  %930 = vst.msk [vmem:[%s1513_s1 + $0x65] ss:$8 sm:$0x3] %vm260_vm1, %v576_v3   ;;  %s323_s9 = smov 3 }
  0x38   :  { %v564_v5 = vld [vmem:[#allocation0 + $0x198] ss:$2 sm:%s563_s15]   ;;  %929 = vst.msk [vmem:[%s1513_s1 + $0x64] ss:$8 sm:$0x3] %vm260_vm1, %v570_v4   ;;  %s317_s12 = smov 3 }
  0x39   :  { %v558_v6 = vld [vmem:[#allocation0 + $0x190] ss:$2 sm:%s557_s16]   ;;  %928 = vst.msk [vmem:[%s1513_s1 + $0x63] ss:$8 sm:$0x3] %vm260_vm1, %v564_v5   ;;  %s258_s16 = smov 3 }
  0x3a   :  { %v552_v7 = vld [vmem:[#allocation0 + $0x188] ss:$2 sm:%s551_s19]   ;;  %927 = vst.msk [vmem:[%s1513_s1 + $0x62] ss:$8 sm:$0x3] %vm260_vm1, %v558_v6   ;;  %s305_s18 = smov 3 }
  0x3b   :  { %v546_v9 = vld [vmem:[#allocation0 + $0x180] ss:$2 sm:%s545_s22]   ;;  %926 = vst.msk [vmem:[%s1513_s1 + $0x61] ss:$8 sm:$0x3] %vm260_vm1, %v552_v7   ;;  %s269_s22 = smov 3 }
  0x3c   :  { %925 = vst.msk [vmem:[%s1513_s1 + $0x60] ss:$8 sm:$0x3] %vm260_vm1, %v546_v9   ;;  %v673_v11 = vld [vmem:[#allocation0 + $0x181] ss:$8 sm:$0xf]  }
  0x3d   :  { %v675_v13 = vld [vmem:[#allocation0 + $0x181] ss:$8 sm:$0xf0]   ;;  %v588_v14 = vld [vmem:[#allocation0 + $0x1b8] ss:$2 sm:%s587_s29]   ;;  %s311_s21 = smov 3 }
  0x3e   :  { %v677_v15 = vsel %vm644_vm0, %v675_v13, %v673_v11  ;;  %932 = vst.msk [vmem:[%s1513_s1 + $0x67] ss:$8 sm:$0x3] %vm260_vm1, %v588_v14   ;;  %v717_v19 = vld [vmem:[#allocation0 + $0x183] ss:$8 sm:$0xf]  }
  0x3f   :  { %678 = vrot.lane.b32.xlu1 %v677_v15, %s957_s14  ;;  %139 = vst [vmem:[#allocation0 + $0xf0] sm:$0xf] %v848_v8  ;;  %v719_v20 = vld [vmem:[#allocation0 + $0x183] ss:$8 sm:$0xf0]   ;;  %s395_s28 = smov 3 }
  0x40   :  { %143 = vst [vmem:[#allocation0 + $0xe8] sm:$0xf] %v849_v10  ;;  %v259_v22 = vld [vmem:[#allocation0] ss:$2 sm:%s258_s16]   ;;  %v721_v23 = vsel %vm644_vm0, %v719_v20, %v717_v19  ;;  %v270_v25 = vld [vmem:[#allocation0 + $0x10] ss:$2 sm:%s269_s22]  }
  0x41   :  { %147 = vst [vmem:[#allocation0 + $0xe0] sm:$0xf] %v850_v12  ;;  %v866_v36 = vld [vmem:[%s1512_s0 + $0x30] sm:$0xf]  ;;  %v868_v42 = vld [vmem:[%s1512_s0 + $0x28] sm:$0xf] }
  0x42   :  { %151 = vst [vmem:[#allocation0 + $0xd8] sm:$0xf] %v851_v16  ;;  %v695_v38 = vld [vmem:[#allocation0 + $0x83] ss:$8 sm:$0xf]   ;;  %s401_s15 = smov 3 }
  0x43   :  { %155 = vst [vmem:[#allocation0 + $0xd0] sm:$0xf] %v852_v17  ;;  %v697_v39 = vld [vmem:[#allocation0 + $0x83] ss:$8 sm:$0xf0]   ;;  %s407_s16 = smov 3 }
  0x44   :  { %159 = vst [vmem:[#allocation0 + $0xc8] sm:$0xf] %v853_v18  ;;  %v699_v41 = vsel %vm644_vm0, %v697_v39, %v695_v38  ;;  %v869_v43 = vld [vmem:[%s1512_s0 + $0x24] sm:$0xf]  ;;  %v831_v48 = vld [vmem:[%s1512_s0 + $0xbc] sm:$0xf] }
  0x45   :  { %163 = vst [vmem:[#allocation0 + $0xc0] sm:$0xf] %v854_v21  ;;  %700 = vrot.lane.b32.xlu2 %v699_v41, %s957_s14  ;;  %v832_v52 = vld [vmem:[%s1512_s0 + $0xb8] sm:$0xf]  ;;  %v833_v54 = vld [vmem:[%s1512_s0 + $0xb4] sm:$0xf] }
  0x46   :  { %261 = vst.msk [vmem:[%s1513_s1] ss:$8 sm:$0x3] %vm260_vm1, %v259_v22   ;;  %v834_v57 = vld [vmem:[%s1512_s0 + $0xb0] sm:$0xf]  ;;  %s413_s19 = smov 3 }
  0x47   :  { %722 = vrot.lane.b32.xlu1 %v721_v23, %s957_s14  ;;  %878 = vst.msk [vmem:[%s1513_s1 + $0x1] ss:$8 sm:$0x3] %vm260_vm1, %v264_v24   ;;  %v835_v60 = vld [vmem:[%s1512_s0 + $0xac] sm:$0xf]  ;;  %s419_s20 = smov 3 }
  0x48   :  { %879 = vst.msk [vmem:[%s1513_s1 + $0x2] ss:$8 sm:$0x3] %vm260_vm1, %v270_v25   ;;  %v741_v32 = vld [vmem:[#allocation0 + $0xc1] ss:$8 sm:$0xf0]  }
  0x49   :  { %880 = vst.msk [vmem:[%s1513_s1 + $0x3] ss:$8 sm:$0x3] %vm260_vm1, %v276_v26   ;;  %v836_v61 = vld [vmem:[%s1512_s0 + $0xa8] sm:$0xf]  ;;  %s431_s22 = smov 3 }
  0x4a   :  { %881 = vst.msk [vmem:[%s1513_s1 + $0x4] ss:$8 sm:$0x3] %vm260_vm1, %v282_v27   ;;  %v837_v62 = vld [vmem:[%s1512_s0 + $0xa4] sm:$0xf]  ;;  %s437_s25 = smov 3 }
  0x4b   :  { %882 = vst.msk [vmem:[%s1513_s1 + $0x5] ss:$8 sm:$0x3] %vm260_vm1, %v288_v28   ;;  %v408_v4 = vld [vmem:[#allocation0 + $0xc8] ss:$2 sm:%s407_s16]   ;;  %s599_s29 = smov 3 }
  0x4c   :  { %v739_v35 = vld [vmem:[#allocation0 + $0xc1] ss:$8 sm:$0xf]   ;;  %227 = vst [vmem:[#allocation0 + $0x40] sm:$0xf] %v870_v29  ;;  %s605_s30 = smov 3 }
  0x4d   :  { %v743_v37 = vsel %vm644_vm0, %v741_v32, %v739_v35  ;;  %883 = vst.msk [vmem:[%s1513_s1 + $0x6] ss:$8 sm:$0x3] %vm260_vm1, %v294_v30   ;;  %v396_v63 = vld [vmem:[#allocation0 + $0xb8] ss:$2 sm:%s395_s28]   ;;  %s629_s28 = smov 3 }
  0x4e   :  { %744 = vrot.lane.b32.xlu0 %v743_v37, %s957_s14  ;;  %199 = vst [vmem:[#allocation0 + $0x78] sm:$0xf] %v863_v31  ;;  %v402_v2 = vld [vmem:[#allocation0 + $0xc0] ss:$2 sm:%s401_s15]   ;;  %v414_v5 = vld [vmem:[#allocation0 + $0xd0] ss:$2 sm:%s413_s19]  }
  0x4f   :  { %203 = vst [vmem:[#allocation0 + $0x70] sm:$0xf] %v864_v33  ;;  %v420_v6 = vld [vmem:[#allocation0 + $0xd8] ss:$2 sm:%s419_s20]   ;;  %v432_v8 = vld [vmem:[#allocation0 + $0xe8] ss:$2 sm:%s431_s22]  }
  0x50   :  { %207 = vst [vmem:[#allocation0 + $0x68] sm:$0xf] %v865_v34  ;;  %v438_v9 = vld [vmem:[#allocation0 + $0xf0] ss:$2 sm:%s437_s25]   ;;  %v819_v19 = vld [vmem:[%s1512_s0 + $0xec] sm:$0xf] }
  0x51   :  { %211 = vst [vmem:[#allocation0 + $0x60] sm:$0xf] %v866_v36  ;;  %v815_v10 = vld [vmem:[%s1512_s0 + $0xfc] sm:$0xf]  ;;  %v816_v12 = vld [vmem:[%s1512_s0 + $0xf8] sm:$0xf] }
  0x52   :  { %215 = vst [vmem:[#allocation0 + $0x58] sm:$0xf] %v867_v40  ;;  %v817_v15 = vld [vmem:[%s1512_s0 + $0xf4] sm:$0xf]  ;;  %v818_v18 = vld [vmem:[%s1512_s0 + $0xf0] sm:$0xf] }
  0x53   :  { %v300_v44 = vld [vmem:[#allocation0 + $0x38] ss:$2 sm:%s299_s27]   ;;  %219 = vst [vmem:[#allocation0 + $0x50] sm:$0xf] %v868_v42  ;;  %s497_s22 = smov 3  ;;  %s593_s27 = smov 3 }
  0x54   :  { %884 = vst.msk [vmem:[%s1513_s1 + $0x7] ss:$8 sm:$0x3] %vm260_vm1, %v300_v44   ;;  %v783_v16 = vld [vmem:[#allocation0 + $0xc3] ss:$8 sm:$0xf]  }
  0x55   :  { %223 = vst [vmem:[#allocation0 + $0x48] sm:$0xf] %v869_v43  ;;  %v348_v45 = vld [vmem:[#allocation0 + $0x78] ss:$2 sm:%s347_s3]   ;;  %v820_v20 = vld [vmem:[%s1512_s0 + $0xe8] sm:$0xf] }
  0x56   :  { %v342_v46 = vld [vmem:[#allocation0 + $0x70] ss:$2 sm:%s341_s4]   ;;  %892 = vst.msk [vmem:[%s1513_s1 + $0x17] ss:$8 sm:$0x3] %vm260_vm1, %v348_v45   ;;  %s617_s2 = smov 3 }
  0x57   :  { %v336_v47 = vld [vmem:[#allocation0 + $0x68] ss:$2 sm:%s335_s7]   ;;  %891 = vst.msk [vmem:[%s1513_s1 + $0x16] ss:$8 sm:$0x3] %vm260_vm1, %v342_v46   ;;  %s611_s5 = smov 3 }
  0x58   :  { %v330_v49 = vld [vmem:[#allocation0 + $0x60] ss:$2 sm:%s329_s8]   ;;  %890 = vst.msk [vmem:[%s1513_s1 + $0x15] ss:$8 sm:$0x3] %vm260_vm1, %v336_v47   ;;  %s623_s8 = smov 3 }
  0x59   :  { %v324_v50 = vld [vmem:[#allocation0 + $0x58] ss:$2 sm:%s323_s9]   ;;  %889 = vst.msk [vmem:[%s1513_s1 + $0x14] ss:$8 sm:$0x3] %vm260_vm1, %v330_v49   ;;  %s503_s11 = smov 3 }
  0x5a   :  { %v318_v51 = vld [vmem:[#allocation0 + $0x50] ss:$2 sm:%s317_s12]   ;;  %888 = vst.msk [vmem:[%s1513_s1 + $0x13] ss:$8 sm:$0x3] %vm260_vm1, %v324_v50   ;;  %s509_s12 = smov 3 }
  0x5b   :  { %887 = vst.msk [vmem:[%s1513_s1 + $0x12] ss:$8 sm:$0x3] %vm260_vm1, %v318_v51   ;;  %v774_v53 = vld [vmem:[#allocation0 + $0x43] ss:$8 sm:$0xf0]  }
  0x5c   :  { %v306_v55 = vld [vmem:[#allocation0 + $0x40] ss:$2 sm:%s305_s18]   ;;  %71 = vst [vmem:[#allocation0 + $0x178] sm:$0xf] %v831_v48  ;;  %s515_s16 = smov 3  ;;  %s521_s19 = smov 3 }
  0x5d   :  { %v312_v56 = vld [vmem:[#allocation0 + $0x48] ss:$2 sm:%s311_s21]   ;;  %885 = vst.msk [vmem:[%s1513_s1 + $0x10] ss:$8 sm:$0x3] %vm260_vm1, %v306_v55   ;;  %s425_s21 = smov 3 }
  0x5e   :  { %v772_v58 = vld [vmem:[#allocation0 + $0x43] ss:$8 sm:$0xf]   ;;  %886 = vst.msk [vmem:[%s1513_s1 + $0x11] ss:$8 sm:$0x3] %vm260_vm1, %v312_v56  }
  0x5f   :  { %v776_v59 = vsel %vm644_vm0, %v774_v53, %v772_v58  ;;  %75 = vst [vmem:[#allocation0 + $0x170] sm:$0xf] %v832_v52  ;;  %v728_v0 = vld [vmem:[#allocation0 + $0x41] ss:$8 sm:$0xf]   ;;  %s527_s20 = smov 3 }
  0x60   :  { %777 = vrot.lane.b32.xlu0 %v776_v59, %s957_s14  ;;  %79 = vst [vmem:[#allocation0 + $0x168] sm:$0xf] %v833_v54  ;;  %v730_v1 = vld [vmem:[#allocation0 + $0x41] ss:$8 sm:$0xf0]   ;;  %s533_s23 = smov 3 }
  0x61   :  { %83 = vst [vmem:[#allocation0 + $0x160] sm:$0xf] %v834_v57  ;;  %v732_v3 = vsel %vm644_vm0, %v730_v1, %v728_v0  ;;  %v426_v7 = vld [vmem:[#allocation0 + $0xe0] ss:$2 sm:%s425_s21]  }
  0x62   :  { %87 = vst [vmem:[#allocation0 + $0x158] sm:$0xf] %v835_v60  ;;  %733 = vrot.lane.b32.xlu2 %v732_v3, %s957_s14  ;;  %v785_v17 = vld [vmem:[#allocation0 + $0xc3] ss:$8 sm:$0xf0]  }
  0x63   :  { %91 = vst [vmem:[#allocation0 + $0x150] sm:$0xf] %v836_v61  ;;  %v821_v21 = vld [vmem:[%s1512_s0 + $0xe4] sm:$0xf]  ;;  %s635_s0 = smov 3  ;;  %v787_v23 = vsel %vm644_vm0, %v785_v17, %v783_v16 }
  0x64   :  { %95 = vst [vmem:[#allocation0 + $0x148] sm:$0xf] %v837_v62 }
  0x65   :  { %900 = vst.msk [vmem:[%s1513_s1 + $0x27] ss:$8 sm:$0x3] %vm260_vm1, %v396_v63  }
  0x66   :  { %901 = vst.msk [vmem:[%s1513_s1 + $0x30] ss:$8 sm:$0x3] %vm260_vm1, %v402_v2   ;;  %v534_v43 = vld [vmem:[#allocation0 + $0x170] ss:$2 sm:%s533_s23]  }
  0x67   :  { %902 = vst.msk [vmem:[%s1513_s1 + $0x31] ss:$8 sm:$0x3] %vm260_vm1, %v408_v4   ;;  %v528_v41 = vld [vmem:[#allocation0 + $0x168] ss:$2 sm:%s527_s20]  }
  0x68   :  { %903 = vst.msk [vmem:[%s1513_s1 + $0x32] ss:$8 sm:$0x3] %vm260_vm1, %v414_v5   ;;  %v752_v11 = vld [vmem:[#allocation0 + $0x141] ss:$8 sm:$0xf0]  }
  0x69   :  { %904 = vst.msk [vmem:[%s1513_s1 + $0x33] ss:$8 sm:$0x3] %vm260_vm1, %v420_v6   ;;  %v516_v40 = vld [vmem:[#allocation0 + $0x158] ss:$2 sm:%s515_s16]  }
  0x6a   :  { %905 = vst.msk [vmem:[%s1513_s1 + $0x34] ss:$8 sm:$0x3] %vm260_vm1, %v426_v7   ;;  %v510_v36 = vld [vmem:[#allocation0 + $0x150] ss:$2 sm:%s509_s12]  }
  0x6b   :  { %v750_v13 = vld [vmem:[#allocation0 + $0x141] ss:$8 sm:$0xf]   ;;  %906 = vst.msk [vmem:[%s1513_s1 + $0x35] ss:$8 sm:$0x3] %vm260_vm1, %v432_v8  }
  0x6c   :  { %v754_v14 = vsel %vm644_vm0, %v752_v11, %v750_v13  ;;  %907 = vst.msk [vmem:[%s1513_s1 + $0x36] ss:$8 sm:$0x3] %vm260_vm1, %v438_v9   ;;  %v498_v22 = vld [vmem:[#allocation0 + $0x140] ss:$2 sm:%s497_s22]  }
  0x6d   :  { %755 = vrot.lane.b32.xlu1 %v754_v14, %s957_s14  ;;  %7 = vst [vmem:[#allocation0 + $0x1f8] sm:$0xf] %v815_v10  ;;  %v504_v33 = vld [vmem:[#allocation0 + $0x148] ss:$2 sm:%s503_s11]  }
  0x6e   :  { %11 = vst [vmem:[#allocation0 + $0x1f0] sm:$0xf] %v816_v12  ;;  %v522_v42 = vld [vmem:[#allocation0 + $0x160] ss:$2 sm:%s521_s19]  }
  0x6f   :  { %15 = vst [vmem:[#allocation0 + $0x1e8] sm:$0xf] %v817_v15  ;;  %v794_v44 = vld [vmem:[#allocation0 + $0x143] ss:$8 sm:$0xf]  }
  0x70   :  { %19 = vst [vmem:[#allocation0 + $0x1e0] sm:$0xf] %v818_v18  ;;  %v796_v45 = vld [vmem:[#allocation0 + $0x143] ss:$8 sm:$0xf0]  }
  0x71   :  { %23 = vst [vmem:[#allocation0 + $0x1d8] sm:$0xf] %v819_v19  ;;  %v798_v47 = vsel %vm644_vm0, %v796_v45, %v794_v44 }
  0x72   :  { %27 = vst [vmem:[#allocation0 + $0x1d0] sm:$0xf] %v820_v20 }
  0x73   :  { %31 = vst [vmem:[#allocation0 + $0x1c8] sm:$0xf] %v821_v21 }
  0x74   :  { %v636_v24 = vld [vmem:[#allocation0 + $0x1f8] ss:$2 sm:%s635_s0]   ;;  %917 = vst.msk [vmem:[%s1513_s1 + $0x50] ss:$8 sm:$0x3] %vm260_vm1, %v498_v22  }
  0x75   :  { %788 = vrot.lane.b32.xlu1 %v787_v23, %s957_s14  ;;  %v630_v25 = vld [vmem:[#allocation0 + $0x1f0] ss:$2 sm:%s629_s28]   ;;  %940 = vst.msk [vmem:[%s1513_s1 + $0x77] ss:$8 sm:$0x3] %vm260_vm1, %v636_v24  }
  0x76   :  { %939 = vst.msk [vmem:[%s1513_s1 + $0x76] ss:$8 sm:$0x3] %vm260_vm1, %v630_v25   ;;  %v624_v30 = vld [vmem:[#allocation0 + $0x1e8] ss:$2 sm:%s623_s8]  }
  0x77   :  { %v807_v26 = vld [vmem:[#allocation0 + $0x1c3] ss:$8 sm:$0xf0]   ;;  %v618_v27 = vld [vmem:[#allocation0 + $0x1e0] ss:$2 sm:%s617_s2]   ;;  %s539_s2 = smov 3 }
  0x78   :  { %v612_v28 = vld [vmem:[#allocation0 + $0x1d8] ss:$2 sm:%s611_s5]   ;;  %937 = vst.msk [vmem:[%s1513_s1 + $0x74] ss:$8 sm:$0x3] %vm260_vm1, %v618_v27  }
  0x79   :  { %v606_v29 = vld [vmem:[#allocation0 + $0x1d0] ss:$2 sm:%s605_s30]   ;;  %936 = vst.msk [vmem:[%s1513_s1 + $0x73] ss:$8 sm:$0x3] %vm260_vm1, %v612_v28  }
  0x7a   :  { %v805_v31 = vld [vmem:[#allocation0 + $0x1c3] ss:$8 sm:$0xf]   ;;  %v594_v32 = vld [vmem:[#allocation0 + $0x1c0] ss:$2 sm:%s593_s27]  }
  0x7b   :  { %v809_v34 = vsel %vm644_vm0, %v807_v26, %v805_v31  ;;  %933 = vst.msk [vmem:[%s1513_s1 + $0x70] ss:$8 sm:$0x3] %vm260_vm1, %v594_v32   ;;  %v600_v35 = vld [vmem:[#allocation0 + $0x1c8] ss:$2 sm:%s599_s29]  }
  0x7c   :  { %810 = vrot.lane.b32.xlu0 %v809_v34, %s957_s14  ;;  %934 = vst.msk [vmem:[%s1513_s1 + $0x71] ss:$8 sm:$0x3] %vm260_vm1, %v600_v35   ;;  %v761_v37 = vld [vmem:[#allocation0 + $0x1c1] ss:$8 sm:$0xf]  }
  0x7d   :  { %935 = vst.msk [vmem:[%s1513_s1 + $0x72] ss:$8 sm:$0x3] %vm260_vm1, %v606_v29   ;;  %v763_v38 = vld [vmem:[#allocation0 + $0x1c1] ss:$8 sm:$0xf0]  }
  0x7e   :  { %938 = vst.msk [vmem:[%s1513_s1 + $0x75] ss:$8 sm:$0x3] %vm260_vm1, %v624_v30   ;;  %v765_v39 = vsel %vm644_vm0, %v763_v38, %v761_v37  ;;  %v540_v46 = vld [vmem:[#allocation0 + $0x178] ss:$2 sm:%s539_s2]  }
  0x7f   :  { %766 = vrot.lane.b32.xlu2 %v765_v39, %s957_s14  ;;  %918 = vst.msk [vmem:[%s1513_s1 + $0x51] ss:$8 sm:$0x3] %vm260_vm1, %v504_v33  }
  0x80   :  { %919 = vst.msk [vmem:[%s1513_s1 + $0x52] ss:$8 sm:$0x3] %vm260_vm1, %v510_v36  }
  0x81   :  { %920 = vst.msk [vmem:[%s1513_s1 + $0x53] ss:$8 sm:$0x3] %vm260_vm1, %v516_v40  }
  0x82   :  { %921 = vst.msk [vmem:[%s1513_s1 + $0x54] ss:$8 sm:$0x3] %vm260_vm1, %v522_v42  }
  0x83   :  { %922 = vst.msk [vmem:[%s1513_s1 + $0x55] ss:$8 sm:$0x3] %vm260_vm1, %v528_v41  }
  0x84   :  { %923 = vst.msk [vmem:[%s1513_s1 + $0x56] ss:$8 sm:$0x3] %vm260_vm1, %v534_v43   ;;  %v647_v48 = vpop.permute.xlu0 %646  }
  0x85   :  { %924 = vst.msk [vmem:[%s1513_s1 + $0x57] ss:$8 sm:$0x3] %vm260_vm1, %v540_v46  }
  0x86   :  { %649 = vst.msk [vmem:[%s1513_s1] sm:$0xff] %vm648_vm2, %v647_v48  }
  0x87   :  { %799 = vrot.lane.b32.xlu2 %v798_v47, %s957_s14 }
  0x89   :  { %v690_v50 = vpop.permute.xlu2 %689  }
  0x8a   :  { %944 = vst.msk [vmem:[%s1513_s1 + $0x8] sm:$0xff] %vm648_vm2, %v690_v50  }
  0x8e   :  { %v657_v49 = vpop.permute.xlu0 %656  }
  0x8f   :  { %941 = vst.msk [vmem:[%s1513_s1 + $0x20] sm:$0xff] %vm648_vm2, %v657_v49  }
  0x9e   :  { %v668_v51 = vpop.permute.xlu1 %667  }
  0x9f   :  { %942 = vst.msk [vmem:[%s1513_s1 + $0x40] sm:$0xff] %vm648_vm2, %v668_v51   ;;  %v701_v53 = vpop.permute.xlu2 %700  }
  0xa0   :  { %v712_v52 = vpop.permute.xlu0 %711   ;;  %945 = vst.msk [vmem:[%s1513_s1 + $0x28] sm:$0xff] %vm648_vm2, %v701_v53  }
  0xa1   :  { %946 = vst.msk [vmem:[%s1513_s1 + $0x48] sm:$0xff] %vm648_vm2, %v712_v52  }
  0xb1   :  { %v679_v54 = vpop.permute.xlu1 %678  }
  0xb2   :  { %943 = vst.msk [vmem:[%s1513_s1 + $0x60] sm:$0xff] %vm648_vm2, %v679_v54  }
  0xb9   :  { %v723_v55 = vpop.permute.xlu1 %722  }
  0xba   :  { %947 = vst.msk [vmem:[%s1513_s1 + $0x68] sm:$0xff] %vm648_vm2, %v723_v55  }
  0xbc   :  { %v734_v56 = vpop.permute.xlu2 %733  }
  0xbd   :  { %948 = vst.msk [vmem:[%s1513_s1 + $0x10] sm:$0xff] %vm648_vm2, %v734_v56  }
  0xc0   :  { %v745_v57 = vpop.permute.xlu0 %744  }
  0xc1   :  { %949 = vst.msk [vmem:[%s1513_s1 + $0x30] sm:$0xff] %vm648_vm2, %v745_v57  }
  0xd2   :  { %v778_v58 = vpop.permute.xlu0 %777  }
  0xd3   :  { %952 = vst.msk [vmem:[%s1513_s1 + $0x18] sm:$0xff] %vm648_vm2, %v778_v58  }
  0xd9   :  { %v767_v59 = vpop.permute.xlu2 %766  }
  0xda   :  { %951 = vst.msk [vmem:[%s1513_s1 + $0x70] sm:$0xff] %vm648_vm2, %v767_v59  }
  0xdf   :  { %v756_v60 = vpop.permute.xlu1 %755  }
  0xe0   :  { %950 = vst.msk [vmem:[%s1513_s1 + $0x50] sm:$0xff] %vm648_vm2, %v756_v60  }
  0xe1   :  { %v800_v61 = vpop.permute.xlu2 %799  }
  0xe2   :  { %954 = vst.msk [vmem:[%s1513_s1 + $0x58] sm:$0xff] %vm648_vm2, %v800_v61  }
  0xe7   :  { %v789_v62 = vpop.permute.xlu1 %788  }
  0xe8   :  { %953 = vst.msk [vmem:[%s1513_s1 + $0x38] sm:$0xff] %vm648_vm2, %v789_v62  }
  0xee   :  { %v811_v63 = vpop.permute.xlu0 %810  }
  0xef   :  { %955 = vst.msk [vmem:[%s1513_s1 + $0x78] sm:$0xff] %vm648_vm2, %v811_v63  }

// kernel: tile.59
= control target key start
LH: loop header
LB: loop body
LE: loop exit
PB: predicated region body
PF: predicated region fallthrough
CT: control target
= control target key end

     0   :  { %vm92_vm0 = vcmask 1047556   ;;  %s459_s14 = smov 96   ;;  %s460_s22 = smov 64   ;;  %vm3_vm1 = vcmask 261120   ;;  %vm96_vm2 = vcmask 1048320   ;;  %vm183_vm3 = vcmask 785920   ;;  %s896_s0 = inlined_call_operand.vmem [shape: f32[32,8,32], index: 0, kind: input, shape index: {}]   ;;  %s897_s1 = inlined_call_operand.vmem [shape: f32[32,256], index: 1, kind: output, shape index: {}]  }
   0x1   :  { %v392_v0 = vld [vmem:[%s896_s0 + $0x7] ss:$8 sm:$0xf]   ;;  %v387_v3 = vld [vmem:[%s896_s0 + $0x3] ss:$8 sm:$0xf]  }
   0x2   :  { %v393_v1 = vld [vmem:[%s896_s0 + $0x7] ss:$8 sm:$0xf0]   ;;  %v388_v4 = vld [vmem:[%s896_s0 + $0x3] ss:$8 sm:$0xf0]  }
   0x3   :  { %v114_v2 = vsel %vm92_vm0, %v393_v1, %v392_v0  ;;  %v93_v5 = vsel %vm92_vm0, %v388_v4, %v387_v3  ;;  %v395_v6 = vld [vmem:[%s896_s0 + $0x87] ss:$8 sm:$0xf]   ;;  %v389_v8 = vld [vmem:[%s896_s0 + $0x83] ss:$8 sm:$0xf]  }
   0x4   :  { %115 = vrot.lane.b32.xlu1 %v114_v2, %s459_s14  ;;  %94 = vrot.lane.b32.xlu0 %v93_v5, %s459_s14  ;;  %v396_v7 = vld [vmem:[%s896_s0 + $0x87] ss:$8 sm:$0xf0]   ;;  %v390_v9 = vld [vmem:[%s896_s0 + $0x83] ss:$8 sm:$0xf0]  }
   0x5   :  { %v398_v10 = vld [vmem:[%s896_s0 + $0x43] ss:$8 sm:$0xf]   ;;  %v125_v12 = vsel %vm92_vm0, %v396_v7, %v395_v6  ;;  %v103_v14 = vsel %vm92_vm0, %v390_v9, %v389_v8  ;;  %v407_v17 = vld [vmem:[%s896_s0 + $0xc7] ss:$8 sm:$0xf]  }
   0x6   :  { %v399_v11 = vld [vmem:[%s896_s0 + $0x43] ss:$8 sm:$0xf0]   ;;  %v408_v18 = vld [vmem:[%s896_s0 + $0xc7] ss:$8 sm:$0xf0]  }
   0x7   :  { %v136_v13 = vsel %vm92_vm0, %v399_v11, %v398_v10  ;;  %v401_v15 = vld [vmem:[%s896_s0 + $0xc3] ss:$8 sm:$0xf]   ;;  %v404_v19 = vld [vmem:[%s896_s0 + $0x47] ss:$8 sm:$0xf]   ;;  %v169_v22 = vsel %vm92_vm0, %v408_v18, %v407_v17 }
   0x8   :  { %137 = vrot.lane.b32.xlu2 %v136_v13, %s459_s14  ;;  %v402_v16 = vld [vmem:[%s896_s0 + $0xc3] ss:$8 sm:$0xf0]   ;;  %v405_v20 = vld [vmem:[%s896_s0 + $0x47] ss:$8 sm:$0xf0]  }
   0x9   :  { %v147_v21 = vsel %vm92_vm0, %v402_v16, %v401_v15  ;;  %v158_v23 = vsel %vm92_vm0, %v405_v20, %v404_v19  ;;  %v410_v24 = vld [vmem:[%s896_s0 + $0x2] ss:$8 sm:$0xf]   ;;  %v415_v26 = vld [vmem:[%s896_s0 + $0x6] ss:$8 sm:$0xf]  }
   0xa   :  { %v411_v25 = vld [vmem:[%s896_s0 + $0x2] ss:$8 sm:$0xf0]   ;;  %v416_v27 = vld [vmem:[%s896_s0 + $0x6] ss:$8 sm:$0xf0]  }
   0xb   :  { %v412_v28 = vld [vmem:[%s896_s0 + $0x82] ss:$8 sm:$0xf]   ;;  %v180_v30 = vsel %vm92_vm0, %v411_v25, %v410_v24  ;;  %v201_v31 = vsel %vm92_vm0, %v416_v27, %v415_v26  ;;  %v418_v33 = vld [vmem:[%s896_s0 + $0x86] ss:$8 sm:$0xf]  }
   0xc   :  { %126 = vrot.lane.b32.xlu1 %v125_v12, %s459_s14  ;;  %104 = vrot.lane.b32.xlu0 %v103_v14, %s459_s14  ;;  %v413_v29 = vld [vmem:[%s896_s0 + $0x82] ss:$8 sm:$0xf0]   ;;  %v419_v34 = vld [vmem:[%s896_s0 + $0x86] ss:$8 sm:$0xf0]  }
   0xd   :  { %v190_v32 = vsel %vm92_vm0, %v413_v29, %v412_v28  ;;  %v424_v35 = vld [vmem:[%s896_s0 + $0xc2] ss:$8 sm:$0xf]   ;;  %v212_v39 = vsel %vm92_vm0, %v419_v34, %v418_v33  ;;  %v427_v42 = vld [vmem:[%s896_s0 + $0x46] ss:$8 sm:$0xf]  }
   0xe   :  { %v425_v36 = vld [vmem:[%s896_s0 + $0xc2] ss:$8 sm:$0xf0]   ;;  %v428_v43 = vld [vmem:[%s896_s0 + $0x46] ss:$8 sm:$0xf0]  }
   0xf   :  { %v421_v37 = vld [vmem:[%s896_s0 + $0x42] ss:$8 sm:$0xf]   ;;  %v234_v40 = vsel %vm92_vm0, %v425_v36, %v424_v35  ;;  %v433_v44 = vld [vmem:[%s896_s0 + $0x1] ss:$8 sm:$0xf]   ;;  %v245_v48 = vsel %vm92_vm0, %v428_v43, %v427_v42 }
  0x10   :  { %148 = vrot.lane.b32.xlu2 %v147_v21, %s459_s14  ;;  %v422_v38 = vld [vmem:[%s896_s0 + $0x42] ss:$8 sm:$0xf0]   ;;  %v434_v45 = vld [vmem:[%s896_s0 + $0x1] ss:$8 sm:$0xf0]  }
  0x11   :  { %v223_v41 = vsel %vm92_vm0, %v422_v38, %v421_v37  ;;  %v430_v46 = vld [vmem:[%s896_s0 + $0xc6] ss:$8 sm:$0xf]   ;;  %v267_v49 = vsel %vm92_vm0, %v434_v45, %v433_v44  ;;  %s461_s18 = smov 32   ;;  %v2_v8 = vld [vmem:[%s896_s0] ss:$4 sm:$0xff]  }
  0x12   :  { %v431_v47 = vld [vmem:[%s896_s0 + $0xc6] ss:$8 sm:$0xf0]   ;;  %v435_v51 = vld [vmem:[%s896_s0 + $0x81] ss:$8 sm:$0xf]  }
  0x13   :  { %v256_v50 = vsel %vm92_vm0, %v431_v47, %v430_v46  ;;  %v436_v52 = vld [vmem:[%s896_s0 + $0x81] ss:$8 sm:$0xf0]   ;;  %v441_v53 = vld [vmem:[%s896_s0 + $0x85] ss:$8 sm:$0xf]  }
  0x14   :  { %170 = vrot.lane.b32.xlu1 %v169_v22, %s459_s14  ;;  %159 = vrot.lane.b32.xlu0 %v158_v23, %s459_s14  ;;  %v442_v54 = vld [vmem:[%s896_s0 + $0x85] ss:$8 sm:$0xf0]   ;;  %v277_v57 = vsel %vm92_vm0, %v436_v52, %v435_v51  ;;  %v444_v60 = vld [vmem:[%s896_s0 + $0x41] ss:$8 sm:$0xf]  }
  0x15   :  { %v438_v55 = vld [vmem:[%s896_s0 + $0x5] ss:$8 sm:$0xf]   ;;  %v299_v58 = vsel %vm92_vm0, %v442_v54, %v441_v53  ;;  %v445_v61 = vld [vmem:[%s896_s0 + $0x41] ss:$8 sm:$0xf0]  }
  0x16   :  { %v439_v56 = vld [vmem:[%s896_s0 + $0x5] ss:$8 sm:$0xf0]   ;;  %v447_v0 = vld [vmem:[%s896_s0 + $0xc1] ss:$8 sm:$0xf]   ;;  %v310_v2 = vsel %vm92_vm0, %v445_v61, %v444_v60 }
  0x17   :  { %v288_v59 = vsel %vm92_vm0, %v439_v56, %v438_v55  ;;  %v450_v62 = vld [vmem:[%s896_s0 + $0x45] ss:$8 sm:$0xf]   ;;  %v448_v1 = vld [vmem:[%s896_s0 + $0xc1] ss:$8 sm:$0xf0]  }
  0x18   :  { %181 = vrot.lane.b32.xlu2 %v180_v30, %s460_s22  ;;  %v451_v63 = vld [vmem:[%s896_s0 + $0x45] ss:$8 sm:$0xf0]   ;;  %v321_v4 = vsel %vm92_vm0, %v448_v1, %v447_v0  ;;  %4 = vst.msk [vmem:[%s897_s1] ss:$8 sm:$0x3] %vm3_vm1, %v2_v8  }
  0x19   :  { %v332_v3 = vsel %vm92_vm0, %v451_v63, %v450_v62  ;;  %v453_v5 = vld [vmem:[%s896_s0 + $0xc5] ss:$8 sm:$0xf]   ;;  %349 = vst.msk [vmem:[%s897_s1 - $0xf] ss:$8 sm:$0xc] %vm3_vm1, %v2_v8  }
  0x1a   :  { %v454_v6 = vld [vmem:[%s896_s0 + $0xc5] ss:$8 sm:$0xf0]   ;;  %v352_v9 = vld [vmem:[%s896_s0 + $0x20] ss:$4 sm:$0xff]   ;;  %vm270_vm4 = vcmask 523520  }
  0x1b   :  { %v343_v7 = vsel %vm92_vm0, %v454_v6, %v453_v5  ;;  %350 = vst.msk [vmem:[%s897_s1 - $0x1e] ss:$8 sm:$0x30] %vm3_vm1, %v2_v8   ;;  %v367_v10 = vld [vmem:[%s896_s0 + $0x80] ss:$4 sm:$0xff]  }
  0x1c   :  { %202 = vrot.lane.b32.xlu1 %v201_v31, %s460_s22  ;;  %191 = vrot.lane.b32.xlu0 %v190_v32, %s460_s22  ;;  %351 = vst.msk [vmem:[%s897_s1 - $0x2d] ss:$8 sm:$0xc0] %vm3_vm1, %v2_v8   ;;  %v372_v11 = vld [vmem:[%s896_s0 + $0xa0] ss:$4 sm:$0xff]  }
  0x1d   :  { %353 = vst.msk [vmem:[%s897_s1 + $0x4] ss:$8 sm:$0x3] %vm3_vm1, %v352_v9   ;;  %v357_v13 = vld [vmem:[%s896_s0 + $0x40] ss:$4 sm:$0xff]  }
  0x1e   :  { %354 = vst.msk [vmem:[%s897_s1 - $0xb] ss:$8 sm:$0xc] %vm3_vm1, %v352_v9   ;;  %v362_v14 = vld [vmem:[%s896_s0 + $0x60] ss:$4 sm:$0xff]  }
  0x1f   :  { %355 = vst.msk [vmem:[%s897_s1 - $0x1a] ss:$8 sm:$0x30] %vm3_vm1, %v352_v9   ;;  %v377_v16 = vld [vmem:[%s896_s0 + $0xc0] ss:$4 sm:$0xff]  }
  0x20   :  { %213 = vrot.lane.b32.xlu2 %v212_v39, %s460_s22  ;;  %356 = vst.msk [vmem:[%s897_s1 - $0x29] ss:$8 sm:$0xc0] %vm3_vm1, %v352_v9   ;;  %v382_v17 = vld [vmem:[%s896_s0 + $0xe0] ss:$4 sm:$0xff]  }
  0x21   :  { %368 = vst.msk [vmem:[%s897_s1 + $0x20] ss:$8 sm:$0x3] %vm3_vm1, %v367_v10  }
  0x22   :  { %369 = vst.msk [vmem:[%s897_s1 + $0x11] ss:$8 sm:$0xc] %vm3_vm1, %v367_v10  }
  0x23   :  { %370 = vst.msk [vmem:[%s897_s1 + $0x2] ss:$8 sm:$0x30] %vm3_vm1, %v367_v10  }
  0x24   :  { %235 = vrot.lane.b32.xlu1 %v234_v40, %s460_s22  ;;  %224 = vrot.lane.b32.xlu0 %v223_v41, %s460_s22  ;;  %371 = vst.msk [vmem:[%s897_s1 - $0xd] ss:$8 sm:$0xc0] %vm3_vm1, %v367_v10  }
  0x25   :  { %373 = vst.msk [vmem:[%s897_s1 + $0x24] ss:$8 sm:$0x3] %vm3_vm1, %v372_v11  }
  0x26   :  { %374 = vst.msk [vmem:[%s897_s1 + $0x15] ss:$8 sm:$0xc] %vm3_vm1, %v372_v11  }
  0x27   :  { %375 = vst.msk [vmem:[%s897_s1 + $0x6] ss:$8 sm:$0x30] %vm3_vm1, %v372_v11  }
  0x28   :  { %246 = vrot.lane.b32.xlu2 %v245_v48, %s460_s22  ;;  %376 = vst.msk [vmem:[%s897_s1 - $0x9] ss:$8 sm:$0xc0] %vm3_vm1, %v372_v11  }
  0x29   :  { %358 = vst.msk [vmem:[%s897_s1 + $0x10] ss:$8 sm:$0x3] %vm3_vm1, %v357_v13  }
  0x2a   :  { %359 = vst.msk [vmem:[%s897_s1 + $0x1] ss:$8 sm:$0xc] %vm3_vm1, %v357_v13  }
  0x2b   :  { %360 = vst.msk [vmem:[%s897_s1 - $0xe] ss:$8 sm:$0x30] %vm3_vm1, %v357_v13  }
  0x2c   :  { %268 = vrot.lane.b32.xlu1 %v267_v49, %s461_s18  ;;  %257 = vrot.lane.b32.xlu0 %v256_v50, %s460_s22  ;;  %361 = vst.msk [vmem:[%s897_s1 - $0x1d] ss:$8 sm:$0xc0] %vm3_vm1, %v357_v13  }
  0x2d   :  { %363 = vst.msk [vmem:[%s897_s1 + $0x14] ss:$8 sm:$0x3] %vm3_vm1, %v362_v14  }
  0x2e   :  { %364 = vst.msk [vmem:[%s897_s1 + $0x5] ss:$8 sm:$0xc] %vm3_vm1, %v362_v14  }
  0x2f   :  { %365 = vst.msk [vmem:[%s897_s1 - $0xa] ss:$8 sm:$0x30] %vm3_vm1, %v362_v14  }
  0x30   :  { %278 = vrot.lane.b32.xlu2 %v277_v57, %s461_s18  ;;  %366 = vst.msk [vmem:[%s897_s1 - $0x19] ss:$8 sm:$0xc0] %vm3_vm1, %v362_v14  }
  0x31   :  { %378 = vst.msk [vmem:[%s897_s1 + $0x30] ss:$8 sm:$0x3] %vm3_vm1, %v377_v16  }
  0x32   :  { %379 = vst.msk [vmem:[%s897_s1 + $0x21] ss:$8 sm:$0xc] %vm3_vm1, %v377_v16  }
  0x33   :  { %380 = vst.msk [vmem:[%s897_s1 + $0x12] ss:$8 sm:$0x30] %vm3_vm1, %v377_v16  }
  0x34   :  { %300 = vrot.lane.b32.xlu1 %v299_v58, %s461_s18  ;;  %289 = vrot.lane.b32.xlu0 %v288_v59, %s461_s18  ;;  %381 = vst.msk [vmem:[%s897_s1 + $0x3] ss:$8 sm:$0xc0] %vm3_vm1, %v377_v16  }
  0x35   :  { %383 = vst.msk [vmem:[%s897_s1 + $0x34] ss:$8 sm:$0x3] %vm3_vm1, %v382_v17  }
  0x36   :  { %384 = vst.msk [vmem:[%s897_s1 + $0x25] ss:$8 sm:$0xc] %vm3_vm1, %v382_v17  }
  0x37   :  { %385 = vst.msk [vmem:[%s897_s1 + $0x16] ss:$8 sm:$0x30] %vm3_vm1, %v382_v17  }
  0x38   :  { %311 = vrot.lane.b32.xlu2 %v310_v2, %s461_s18  ;;  %386 = vst.msk [vmem:[%s897_s1 + $0x7] ss:$8 sm:$0xc0] %vm3_vm1, %v382_v17  }
  0x3c   :  { %333 = vrot.lane.b32.xlu1 %v332_v3, %s461_s18  ;;  %322 = vrot.lane.b32.xlu0 %v321_v4, %s461_s18 }
  0x40   :  { %344 = vrot.lane.b32.xlu2 %v343_v7, %s461_s18 }
  0x62   :  { %v138_v12 = vpop.permute.xlu2 %137  }
  0x63   :  { %400 = vst.msk [vmem:[%s897_s1 + $0x10] sm:$0xff] %vm96_vm2, %v138_v12  }
  0x6a   :  { %v149_v15 = vpop.permute.xlu2 %148  }
  0x6b   :  { %403 = vst.msk [vmem:[%s897_s1 + $0x30] sm:$0xff] %vm96_vm2, %v149_v15  }
  0x72   :  { %v182_v18 = vpop.permute.xlu2 %181  }
  0x76   :  { %v116_v19 = vpop.permute.xlu1 %115   ;;  %v95_v20 = vpop.permute.xlu0 %94  }
  0x77   :  { %394 = vst.msk [vmem:[%s897_s1 + $0x8] sm:$0xff] %vm96_vm2, %v116_v19  }
  0x78   :  { %97 = vst.msk [vmem:[%s897_s1] sm:$0xff] %vm96_vm2, %v95_v20  }
  0x79   :  { %184 = vst.msk [vmem:[%s897_s1] sm:$0xff] %vm183_vm3, %v182_v18  }
  0x7a   :  { %v214_v21 = vpop.permute.xlu2 %213  }
  0x7e   :  { %v127_v22 = vpop.permute.xlu1 %126   ;;  %v105_v23 = vpop.permute.xlu0 %104  }
  0x7f   :  { %397 = vst.msk [vmem:[%s897_s1 + $0x28] sm:$0xff] %vm96_vm2, %v127_v22  }
  0x80   :  { %420 = vst.msk [vmem:[%s897_s1 + $0x28] sm:$0xff] %vm183_vm3, %v214_v21  }
  0x81   :  { %391 = vst.msk [vmem:[%s897_s1 + $0x20] sm:$0xff] %vm96_vm2, %v105_v23  }
  0x82   :  { %v247_v24 = vpop.permute.xlu2 %246  }
  0x86   :  { %v171_v25 = vpop.permute.xlu1 %170   ;;  %v160_v26 = vpop.permute.xlu0 %159  }
  0x87   :  { %409 = vst.msk [vmem:[%s897_s1 + $0x38] sm:$0xff] %vm96_vm2, %v171_v25  }
  0x88   :  { %406 = vst.msk [vmem:[%s897_s1 + $0x18] sm:$0xff] %vm96_vm2, %v160_v26  }
  0x89   :  { %429 = vst.msk [vmem:[%s897_s1 + $0x18] sm:$0xff] %vm183_vm3, %v247_v24  }
  0x8a   :  { %v279_v27 = vpop.permute.xlu2 %278  }
  0x8e   :  { %v203_v28 = vpop.permute.xlu1 %202   ;;  %v192_v29 = vpop.permute.xlu0 %191  }
  0x8f   :  { %417 = vst.msk [vmem:[%s897_s1 + $0x8] sm:$0xff] %vm183_vm3, %v203_v28  }
  0x90   :  { %414 = vst.msk [vmem:[%s897_s1 + $0x20] sm:$0xff] %vm183_vm3, %v192_v29  }
  0x91   :  { %437 = vst.msk [vmem:[%s897_s1 + $0x20] sm:$0xff] %vm270_vm4, %v279_v27  }
  0x92   :  { %v312_v30 = vpop.permute.xlu2 %311  }
  0x96   :  { %v236_v31 = vpop.permute.xlu1 %235   ;;  %v225_v32 = vpop.permute.xlu0 %224  }
  0x97   :  { %426 = vst.msk [vmem:[%s897_s1 + $0x30] sm:$0xff] %vm183_vm3, %v236_v31  }
  0x98   :  { %423 = vst.msk [vmem:[%s897_s1 + $0x10] sm:$0xff] %vm183_vm3, %v225_v32  }
  0x99   :  { %446 = vst.msk [vmem:[%s897_s1 + $0x10] sm:$0xff] %vm270_vm4, %v312_v30  }
  0x9a   :  { %v345_v33 = vpop.permute.xlu2 %344  }
  0x9e   :  { %v269_v34 = vpop.permute.xlu1 %268   ;;  %v258_v35 = vpop.permute.xlu0 %257  }
  0x9f   :  { %271 = vst.msk [vmem:[%s897_s1] sm:$0xff] %vm270_vm4, %v269_v34  }
  0xa0   :  { %432 = vst.msk [vmem:[%s897_s1 + $0x38] sm:$0xff] %vm183_vm3, %v258_v35  }
  0xa1   :  { %455 = vst.msk [vmem:[%s897_s1 + $0x38] sm:$0xff] %vm270_vm4, %v345_v33  }
  0xa6   :  { %v301_v36 = vpop.permute.xlu1 %300   ;;  %v290_v37 = vpop.permute.xlu0 %289  }
  0xa7   :  { %443 = vst.msk [vmem:[%s897_s1 + $0x28] sm:$0xff] %vm270_vm4, %v301_v36  }
  0xa8   :  { %440 = vst.msk [vmem:[%s897_s1 + $0x8] sm:$0xff] %vm270_vm4, %v290_v37  }
  0xae   :  { %v334_v38 = vpop.permute.xlu1 %333   ;;  %v323_v39 = vpop.permute.xlu0 %322  }
  0xaf   :  { %452 = vst.msk [vmem:[%s897_s1 + $0x18] sm:$0xff] %vm270_vm4, %v334_v38  }
  0xb0   :  { %449 = vst.msk [vmem:[%s897_s1 + $0x30] sm:$0xff] %vm270_vm4, %v323_v39  }

// kernel: tile.69
= control target key start
LH: loop header
LB: loop body
LE: loop exit
PB: predicated region body
PF: predicated region fallthrough
CT: control target
= control target key end

     0   :  { %s60_s6 = smov 3  ;;  %s63_s7 = smov 12  ;;  %vm65_vm0 = vcmask 1043458   ;;  %vm70_vm1 = vcmask 1045508   ;;  %vm75_vm2 = vcmask 1047558   ;;  %vm4_vm3 = vcmask 1047556   ;;  %s1502_s0 = inlined_call_operand.vmem [shape: f32[16,16,16], index: 0, kind: input, shape index: {}]   ;;  %s1503_s1 = inlined_call_operand.vmem [shape: f32[16,256], index: 1, kind: output, shape index: {}]  }
   0x1   :  { %v717_v0 = vld [vmem:[%s1502_s0 + $0x7] ss:$16 sm:%s60_s6]   ;;  %s68_s12 = smov 48  ;;  %s73_s13 = smov 192  ;;  %vm6_vm4 = vcmask 130048   ;;  %vm79_vm5 = vcmask 1048448  }
   0x2   :  { %v718_v1 = vld [vmem:[%s1502_s0 + $0x7] ss:$16 sm:%s63_s7]   ;;  %s105_s18 = smov 3  ;;  %s108_s21 = smov 12  ;;  %vm170_vm6 = vcmask 917248   ;;  %vm261_vm7 = vcmask 786048  }
   0x3   :  { %v66_v2 = vsel %vm65_vm0, %v718_v1, %v717_v0  ;;  %v719_v3 = vld [vmem:[%s1502_s0 + $0x7] ss:$16 sm:%s68_s12]   ;;  %s113_s22 = smov 48  ;;  %s118_s27 = smov 192  ;;  %vm352_vm8 = vcmask 654848   ;;  %vm443_vm9 = vcmask 523648  }
   0x4   :  { %v720_v4 = vld [vmem:[%s1502_s0 + $0x7] ss:$16 sm:%s73_s13]   ;;  %v71_v5 = vsel %vm70_vm1, %v719_v3, %v66_v2  ;;  %s82_s28 = smov 3  ;;  %s857_s29 = smov 112   ;;  %vm534_vm10 = vcmask 392448   ;;  %vm625_vm11 = vcmask 261248  }
   0x5   :  { %v726_v6 = vld [vmem:[%s1502_s0 + $0x87] ss:$16 sm:%s105_s18]   ;;  %v76_v7 = vsel %vm75_vm2, %v720_v4, %v71_v5  ;;  %s85_s3 = smov 12  ;;  %s90_s4 = smov 48  ;;  %v721_v13 = vld [vmem:[%s1502_s0 + $0xf] ss:$16 sm:%s82_s28]  }
   0x6   :  { %v727_v8 = vld [vmem:[%s1502_s0 + $0x87] ss:$16 sm:%s108_s21]   ;;  %77 = vrot.lane.b32.xlu0 %v76_v7, %s857_s29  ;;  %s95_s9 = smov 192  ;;  %s128_s10 = smov 3 }
   0x7   :  { %v728_v9 = vld [vmem:[%s1502_s0 + $0x87] ss:$16 sm:%s113_s22]   ;;  %v111_v10 = vsel %vm65_vm0, %v727_v8, %v726_v6  ;;  %v722_v14 = vld [vmem:[%s1502_s0 + $0xf] ss:$16 sm:%s85_s3]   ;;  %s131_s15 = smov 12  ;;  %s136_s16 = smov 48 }
   0x8   :  { %v729_v11 = vld [vmem:[%s1502_s0 + $0x87] ss:$16 sm:%s118_s27]   ;;  %v116_v12 = vsel %vm70_vm1, %v728_v9, %v111_v10  ;;  %v88_v16 = vsel %vm65_vm0, %v722_v14, %v721_v13  ;;  %v723_v17 = vld [vmem:[%s1502_s0 + $0xf] ss:$16 sm:%s90_s4]   ;;  %s141_s19 = smov 192  ;;  %s196_s24 = smov 3 }
   0x9   :  { %v121_v15 = vsel %vm75_vm2, %v729_v11, %v116_v12  ;;  %v724_v18 = vld [vmem:[%s1502_s0 + $0xf] ss:$16 sm:%s95_s9]   ;;  %v93_v19 = vsel %vm70_vm1, %v723_v17, %v88_v16  ;;  %s199_s25 = smov 12  ;;  %v745_v26 = vld [vmem:[%s1502_s0 + $0x86] ss:$16 sm:%s196_s24]   ;;  %s204_s2 = smov 48 }
   0xa   :  { %122 = vrot.lane.b32.xlu1 %v121_v15, %s857_s29  ;;  %v731_v20 = vld [vmem:[%s1502_s0 + $0x8f] ss:$16 sm:%s128_s10]   ;;  %v98_v23 = vsel %vm75_vm2, %v724_v18, %v93_v19  ;;  %s219_s5 = smov 3  ;;  %s222_s6 = smov 12 }
   0xb   :  { %v732_v21 = vld [vmem:[%s1502_s0 + $0x8f] ss:$16 sm:%s131_s15]   ;;  %v746_v28 = vld [vmem:[%s1502_s0 + $0x86] ss:$16 sm:%s199_s25]   ;;  %s209_s9 = smov 192  ;;  %s227_s12 = smov 48 }
   0xc   :  { %v733_v22 = vld [vmem:[%s1502_s0 + $0x8f] ss:$16 sm:%s136_s16]   ;;  %v134_v24 = vsel %vm65_vm0, %v732_v21, %v731_v20  ;;  %v202_v29 = vsel %vm65_vm0, %v746_v28, %v745_v26  ;;  %v747_v30 = vld [vmem:[%s1502_s0 + $0x86] ss:$16 sm:%s204_s2]   ;;  %s232_s15 = smov 192  ;;  %s264_s16 = smov 3 }
   0xd   :  { %v734_v25 = vld [vmem:[%s1502_s0 + $0x8f] ss:$16 sm:%s141_s19]   ;;  %v139_v27 = vsel %vm70_vm1, %v733_v22, %v134_v24  ;;  %v750_v31 = vld [vmem:[%s1502_s0 + $0x8e] ss:$16 sm:%s219_s5]   ;;  %s267_s17 = smov 12  ;;  %v207_v34 = vsel %vm70_vm1, %v747_v30, %v202_v29  ;;  %s272_s22 = smov 48 }
   0xe   :  { %99 = vrot.lane.b32.xlu0 %v98_v23, %s857_s29  ;;  %v144_v32 = vsel %vm75_vm2, %v734_v25, %v139_v27  ;;  %v751_v33 = vld [vmem:[%s1502_s0 + $0x8e] ss:$16 sm:%s222_s6]   ;;  %s151_s23 = smov 3  ;;  %s154_s27 = smov 12 }
   0xf   :  { %v748_v35 = vld [vmem:[%s1502_s0 + $0x86] ss:$16 sm:%s209_s9]   ;;  %v225_v36 = vsel %vm65_vm0, %v751_v33, %v750_v31  ;;  %v752_v37 = vld [vmem:[%s1502_s0 + $0x8e] ss:$16 sm:%s227_s12]   ;;  %s159_s28 = smov 48  ;;  %s164_s5 = smov 192 }
  0x10   :  { %v753_v38 = vld [vmem:[%s1502_s0 + $0x8e] ss:$16 sm:%s232_s15]   ;;  %v759_v39 = vld [vmem:[%s1502_s0 + $0xd] ss:$16 sm:%s264_s16]   ;;  %s287_s6 = smov 3  ;;  %v212_v42 = vsel %vm75_vm2, %v748_v35, %v207_v34  ;;  %v230_v43 = vsel %vm70_vm1, %v752_v37, %v225_v36  ;;  %s290_s11 = smov 12 }
  0x11   :  { %v760_v40 = vld [vmem:[%s1502_s0 + $0xd] ss:$16 sm:%s267_s17]   ;;  %v736_v41 = vld [vmem:[%s1502_s0 + $0x6] ss:$16 sm:%s151_s23]   ;;  %s277_s14 = smov 192  ;;  %s295_s21 = smov 48  ;;  %v235_v53 = vsel %vm75_vm2, %v753_v38, %v230_v43 }
  0x12   :  { %145 = vrot.lane.b32.xlu1 %v144_v32, %s857_s29  ;;  %v737_v44 = vld [vmem:[%s1502_s0 + $0x6] ss:$16 sm:%s154_s27]   ;;  %v270_v49 = vsel %vm65_vm0, %v760_v40, %v759_v39  ;;  %s858_s23 = smov 96   ;;  %s300_s29 = smov 192 }
  0x13   :  { %v738_v45 = vld [vmem:[%s1502_s0 + $0x6] ss:$16 sm:%s159_s28]   ;;  %v761_v46 = vld [vmem:[%s1502_s0 + $0xd] ss:$16 sm:%s272_s22]   ;;  %v157_v47 = vsel %vm65_vm0, %v737_v44, %v736_v41  ;;  %s333_s22 = smov 3  ;;  %s336_s24 = smov 12 }
  0x14   :  { %v739_v48 = vld [vmem:[%s1502_s0 + $0x6] ss:$16 sm:%s164_s5]   ;;  %v162_v50 = vsel %vm70_vm1, %v738_v45, %v157_v47  ;;  %v764_v51 = vld [vmem:[%s1502_s0 + $0x85] ss:$16 sm:%s287_s6]   ;;  %s173_s27 = smov 3  ;;  %s176_s28 = smov 12  ;;  %v275_v56 = vsel %vm70_vm1, %v761_v46, %v270_v49 }
  0x15   :  { %v765_v52 = vld [vmem:[%s1502_s0 + $0x85] ss:$16 sm:%s290_s11]   ;;  %v167_v54 = vsel %vm75_vm2, %v739_v48, %v162_v50  ;;  %v762_v55 = vld [vmem:[%s1502_s0 + $0xd] ss:$16 sm:%s277_s14]   ;;  %s181_s5 = smov 48  ;;  %s186_s6 = smov 192 }
  0x16   :  { %213 = vrot.lane.b32.xlu0 %v212_v42, %s858_s23  ;;  %168 = vrot.lane.b32.xlu2 %v167_v54, %s858_s23  ;;  %v293_v57 = vsel %vm65_vm0, %v765_v52, %v764_v51  ;;  %v766_v58 = vld [vmem:[%s1502_s0 + $0x85] ss:$16 sm:%s295_s21]   ;;  %s341_s11 = smov 48  ;;  %s355_s16 = smov 3  ;;  %v280_v0 = vsel %vm75_vm2, %v762_v55, %v275_v56 }
  0x17   :  { %v774_v59 = vld [vmem:[%s1502_s0 + $0x4] ss:$16 sm:%s333_s22]   ;;  %v767_v60 = vld [vmem:[%s1502_s0 + $0x85] ss:$16 sm:%s300_s29]   ;;  %s358_s17 = smov 12  ;;  %v298_v1 = vsel %vm70_vm1, %v766_v58, %v293_v57  ;;  %s346_s18 = smov 192 }
  0x18   :  { %v775_v61 = vld [vmem:[%s1502_s0 + $0x4] ss:$16 sm:%s336_s24]   ;;  %v740_v62 = vld [vmem:[%s1502_s0 + $0xe] ss:$16 sm:%s173_s27]   ;;  %s363_s25 = smov 48  ;;  %s401_s2 = smov 3  ;;  %v303_v11 = vsel %vm75_vm2, %v767_v60, %v298_v1 }
  0x19   :  { %v741_v63 = vld [vmem:[%s1502_s0 + $0xe] ss:$16 sm:%s176_s28]   ;;  %v776_v5 = vld [vmem:[%s1502_s0 + $0x4] ss:$16 sm:%s341_s11]   ;;  %v339_v7 = vsel %vm65_vm0, %v775_v61, %v774_v59  ;;  %s404_s3 = smov 12  ;;  %s859_s4 = smov 80  }
  0x1a   :  { %236 = vrot.lane.b32.xlu1 %v235_v53, %s858_s23  ;;  %v179_v2 = vsel %vm65_vm0, %v741_v63, %v740_v62  ;;  %v742_v3 = vld [vmem:[%s1502_s0 + $0xe] ss:$16 sm:%s181_s5]   ;;  %s242_s7 = smov 3  ;;  %s245_s9 = smov 12  ;;  %v344_v14 = vsel %vm70_vm1, %v776_v5, %v339_v7 }
  0x1b   :  { %v743_v4 = vld [vmem:[%s1502_s0 + $0xe] ss:$16 sm:%s186_s6]   ;;  %v184_v6 = vsel %vm70_vm1, %v742_v3, %v179_v2  ;;  %v778_v9 = vld [vmem:[%s1502_s0 + $0xc] ss:$16 sm:%s355_s16]   ;;  %s250_s10 = smov 48  ;;  %s368_s11 = smov 192 }
  0x1c   :  { %v189_v8 = vsel %vm75_vm2, %v743_v4, %v184_v6  ;;  %v779_v10 = vld [vmem:[%s1502_s0 + $0xc] ss:$16 sm:%s358_s17]   ;;  %v777_v12 = vld [vmem:[%s1502_s0 + $0x4] ss:$16 sm:%s346_s18]   ;;  %s255_s16 = smov 192  ;;  %s409_s17 = smov 48 }
  0x1d   :  { %v780_v13 = vld [vmem:[%s1502_s0 + $0xc] ss:$16 sm:%s363_s25]   ;;  %v361_v15 = vsel %vm65_vm0, %v779_v10, %v778_v9  ;;  %v755_v18 = vld [vmem:[%s1502_s0 + $0x5] ss:$16 sm:%s242_s7]   ;;  %s424_s24 = smov 3  ;;  %s427_s25 = smov 12  ;;  %v349_v21 = vsel %vm75_vm2, %v777_v12, %v344_v14 }
  0x1e   :  { %281 = vrot.lane.b32.xlu0 %v280_v0, %s859_s4  ;;  %190 = vrot.lane.b32.xlu2 %v189_v8, %s858_s23  ;;  %v788_v16 = vld [vmem:[%s1502_s0 + $0x8c] ss:$16 sm:%s401_s2]   ;;  %v366_v22 = vsel %vm70_vm1, %v780_v13, %v361_v15  ;;  %s414_s28 = smov 192  ;;  %s432_s6 = smov 48 }
  0x1f   :  { %v789_v17 = vld [vmem:[%s1502_s0 + $0x8c] ss:$16 sm:%s404_s3]   ;;  %v756_v19 = vld [vmem:[%s1502_s0 + $0x5] ss:$16 sm:%s245_s9]   ;;  %s469_s7 = smov 3  ;;  %s310_s12 = smov 3 }
  0x20   :  { %v757_v20 = vld [vmem:[%s1502_s0 + $0x5] ss:$16 sm:%s250_s10]   ;;  %v781_v23 = vld [vmem:[%s1502_s0 + $0xc] ss:$16 sm:%s368_s11]   ;;  %v248_v24 = vsel %vm65_vm0, %v756_v19, %v755_v18  ;;  %v407_v28 = vsel %vm65_vm0, %v789_v17, %v788_v16  ;;  %s472_s11 = smov 12  ;;  %s860_s13 = smov 64  }
  0x21   :  { %v758_v25 = vld [vmem:[%s1502_s0 + $0x5] ss:$16 sm:%s255_s16]   ;;  %v790_v26 = vld [vmem:[%s1502_s0 + $0x8c] ss:$16 sm:%s409_s17]   ;;  %v253_v27 = vsel %vm70_vm1, %v757_v20, %v248_v24  ;;  %v371_v32 = vsel %vm75_vm2, %v781_v23, %v366_v22  ;;  %s313_s16 = smov 12  ;;  %s318_s19 = smov 48 }
  0x22   :  { %304 = vrot.lane.b32.xlu1 %v303_v11, %s859_s4  ;;  %v258_v29 = vsel %vm75_vm2, %v758_v25, %v253_v27  ;;  %v793_v30 = vld [vmem:[%s1502_s0 + $0x3] ss:$16 sm:%s424_s24]   ;;  %s323_s20 = smov 192  ;;  %v412_v35 = vsel %vm70_vm1, %v790_v26, %v407_v28  ;;  %s437_s21 = smov 192 }
  0x23   :  { %v794_v31 = vld [vmem:[%s1502_s0 + $0x3] ss:$16 sm:%s427_s25]   ;;  %v791_v33 = vld [vmem:[%s1502_s0 + $0x8c] ss:$16 sm:%s414_s28]   ;;  %s477_s28 = smov 48  ;;  %s492_s23 = smov 3 }
  0x24   :  { %v795_v34 = vld [vmem:[%s1502_s0 + $0x3] ss:$16 sm:%s432_s6]   ;;  %v430_v36 = vsel %vm65_vm0, %v794_v31, %v793_v30  ;;  %v769_v39 = vld [vmem:[%s1502_s0 + $0x8d] ss:$16 sm:%s310_s12]   ;;  %s495_s8 = smov 12  ;;  %v417_v44 = vsel %vm75_vm2, %v791_v33, %v412_v35  ;;  %s500_s15 = smov 48 }
  0x25   :  { %v802_v37 = vld [vmem:[%s1502_s0 + $0x83] ss:$16 sm:%s469_s7]   ;;  %v770_v40 = vld [vmem:[%s1502_s0 + $0x8d] ss:$16 sm:%s313_s16]   ;;  %v435_v45 = vsel %vm70_vm1, %v795_v34, %v430_v36  ;;  %s537_s16 = smov 3  ;;  %s381_s22 = smov 12 }
  0x26   :  { %350 = vrot.lane.b32.xlu0 %v349_v21, %s860_s13  ;;  %259 = vrot.lane.b32.xlu2 %v258_v29, %s859_s4  ;;  %v803_v38 = vld [vmem:[%s1502_s0 + $0x83] ss:$16 sm:%s472_s11]   ;;  %v316_v41 = vsel %vm65_vm0, %v770_v40, %v769_v39  ;;  %s482_s11 = smov 192  ;;  %s386_s25 = smov 48 }
  0x27   :  { %v771_v42 = vld [vmem:[%s1502_s0 + $0x8d] ss:$16 sm:%s318_s19]   ;;  %v796_v46 = vld [vmem:[%s1502_s0 + $0x3] ss:$16 sm:%s437_s21]   ;;  %v475_v50 = vsel %vm65_vm0, %v803_v38, %v802_v37  ;;  %s378_s21 = smov 3  ;;  %s540_s27 = smov 12 }
  0x28   :  { %v772_v43 = vld [vmem:[%s1502_s0 + $0x8d] ss:$16 sm:%s323_s20]   ;;  %v321_v47 = vsel %vm70_vm1, %v771_v42, %v316_v41  ;;  %v804_v48 = vld [vmem:[%s1502_s0 + $0x83] ss:$16 sm:%s477_s28]   ;;  %v440_v53 = vsel %vm75_vm2, %v796_v46, %v435_v45  ;;  %s391_s28 = smov 192  ;;  %s505_s30 = smov 192 }
  0x29   :  { %v326_v49 = vsel %vm75_vm2, %v772_v43, %v321_v47  ;;  %v807_v51 = vld [vmem:[%s1502_s0 + $0x8b] ss:$16 sm:%s492_s23]   ;;  %v805_v54 = vld [vmem:[%s1502_s0 + $0x83] ss:$16 sm:%s482_s11]   ;;  %v480_v56 = vsel %vm70_vm1, %v804_v48, %v475_v50  ;;  %s545_s9 = smov 48  ;;  %s560_s17 = smov 3 }
  0x2a   :  { %372 = vrot.lane.b32.xlu1 %v371_v32, %s860_s13  ;;  %v808_v52 = vld [vmem:[%s1502_s0 + $0x8b] ss:$16 sm:%s495_s8]   ;;  %s861_s8 = smov 48   ;;  %s563_s18 = smov 12  ;;  %v485_v2 = vsel %vm75_vm2, %v805_v54, %v480_v56 }
  0x2b   :  { %v809_v55 = vld [vmem:[%s1502_s0 + $0x8b] ss:$16 sm:%s500_s15]   ;;  %v498_v57 = vsel %vm65_vm0, %v808_v52, %v807_v51  ;;  %v816_v58 = vld [vmem:[%s1502_s0 + $0xa] ss:$16 sm:%s537_s16]   ;;  %s454_s2 = smov 48  ;;  %s459_s23 = smov 192 }
  0x2c   :  { %v783_v59 = vld [vmem:[%s1502_s0 + $0x84] ss:$16 sm:%s378_s21]   ;;  %v817_v63 = vld [vmem:[%s1502_s0 + $0xa] ss:$16 sm:%s540_s27]   ;;  %v503_v3 = vsel %vm70_vm1, %v809_v55, %v498_v57  ;;  %s550_s21 = smov 192  ;;  %s573_s12 = smov 192 }
  0x2d   :  { %v784_v60 = vld [vmem:[%s1502_s0 + $0x84] ss:$16 sm:%s381_s22]   ;;  %v810_v4 = vld [vmem:[%s1502_s0 + $0x8b] ss:$16 sm:%s505_s30]   ;;  %s568_s22 = smov 48  ;;  %v543_v7 = vsel %vm65_vm0, %v817_v63, %v816_v58  ;;  %s449_s30 = smov 12 }
  0x2e   :  { %418 = vrot.lane.b32.xlu0 %v417_v44, %s860_s13  ;;  %327 = vrot.lane.b32.xlu2 %v326_v49, %s859_s4  ;;  %v384_v61 = vsel %vm65_vm0, %v784_v60, %v783_v59  ;;  %v785_v62 = vld [vmem:[%s1502_s0 + $0x84] ss:$16 sm:%s386_s25]   ;;  %s446_s25 = smov 3  ;;  %v508_v10 = vsel %vm75_vm2, %v810_v4, %v503_v3  ;;  %s631_s4 = smov 12 }
  0x2f   :  { %v389_v0 = vsel %vm70_vm1, %v785_v62, %v384_v61  ;;  %v786_v1 = vld [vmem:[%s1502_s0 + $0x84] ss:$16 sm:%s391_s28]   ;;  %v818_v5 = vld [vmem:[%s1502_s0 + $0xa] ss:$16 sm:%s545_s9]   ;;  %s609_s9 = smov 12  ;;  %s619_s28 = smov 192 }
  0x30   :  { %v394_v6 = vsel %vm75_vm2, %v786_v1, %v389_v0  ;;  %v821_v8 = vld [vmem:[%s1502_s0 + $0x82] ss:$16 sm:%s560_s17]   ;;  %v819_v11 = vld [vmem:[%s1502_s0 + $0xa] ss:$16 sm:%s550_s21]   ;;  %v548_v14 = vsel %vm70_vm1, %v818_v5, %v543_v7  ;;  %s518_s5 = smov 12  ;;  %s523_s10 = smov 48 }
  0x31   :  { %v822_v9 = vld [vmem:[%s1502_s0 + $0x82] ss:$16 sm:%s563_s18]   ;;  %v797_v13 = vld [vmem:[%s1502_s0 + $0xb] ss:$16 sm:%s446_s25]   ;;  %s614_s18 = smov 48  ;;  %s628_s25 = smov 3  ;;  %v553_v23 = vsel %vm75_vm2, %v819_v11, %v548_v14 }
  0x32   :  { %441 = vrot.lane.b32.xlu1 %v440_v53, %s861_s8  ;;  %v823_v12 = vld [vmem:[%s1502_s0 + $0x82] ss:$16 sm:%s568_s22]   ;;  %v566_v15 = vsel %vm65_vm0, %v822_v9, %v821_v8  ;;  %s862_s11 = smov 32   ;;  %s641_s15 = smov 192 }
  0x33   :  { %v798_v16 = vld [vmem:[%s1502_s0 + $0xb] ss:$16 sm:%s449_s30]   ;;  %v832_v21 = vld [vmem:[%s1502_s0 + $0x1] ss:$16 sm:%s609_s9]   ;;  %v571_v24 = vsel %vm70_vm1, %v823_v12, %v566_v15  ;;  %s515_s30 = smov 3  ;;  %s636_s9 = smov 48 }
  0x34   :  { %v799_v17 = vld [vmem:[%s1502_s0 + $0xb] ss:$16 sm:%s454_s2]   ;;  %v452_v18 = vsel %vm65_vm0, %v798_v16, %v797_v13  ;;  %v824_v25 = vld [vmem:[%s1502_s0 + $0x82] ss:$16 sm:%s573_s12]   ;;  %s677_s19 = smov 12  ;;  %s586_s26 = smov 12 }
  0x35   :  { %v800_v19 = vld [vmem:[%s1502_s0 + $0xb] ss:$16 sm:%s459_s23]   ;;  %v457_v22 = vsel %vm70_vm1, %v799_v17, %v452_v18  ;;  %v833_v26 = vld [vmem:[%s1502_s0 + $0x1] ss:$16 sm:%s614_s18]   ;;  %v576_v31 = vsel %vm75_vm2, %v824_v25, %v571_v24  ;;  %s528_s18 = smov 192  ;;  %s682_s23 = smov 48 }
  0x36   :  { %486 = vrot.lane.b32.xlu0 %v485_v2, %s861_s8  ;;  %395 = vrot.lane.b32.xlu2 %v394_v6, %s860_s13  ;;  %s606_s13 = smov 3  ;;  %v462_v27 = vsel %vm75_vm2, %v800_v19, %v457_v22  ;;  %v835_v29 = vld [vmem:[%s1502_s0 + $0x9] ss:$16 sm:%s628_s25]   ;;  %s591_s14 = smov 48 }
  0x37   :  { %v831_v20 = vld [vmem:[%s1502_s0 + $0x1] ss:$16 sm:%s606_s13]   ;;  %v836_v30 = vld [vmem:[%s1502_s0 + $0x9] ss:$16 sm:%s631_s4]   ;;  %s583_s4 = smov 3  ;;  %s687_s17 = smov 192 }
  0x38   :  { %v612_v28 = vsel %vm65_vm0, %v832_v21, %v831_v20  ;;  %v834_v32 = vld [vmem:[%s1502_s0 + $0x1] ss:$16 sm:%s619_s28]   ;;  %v812_v33 = vld [vmem:[%s1502_s0 + $0x2] ss:$16 sm:%s515_s30]   ;;  %v634_v36 = vsel %vm65_vm0, %v836_v30, %v835_v29  ;;  %s596_s20 = smov 192  ;;  %s651_s29 = smov 3 }
  0x39   :  { %v813_v34 = vld [vmem:[%s1502_s0 + $0x2] ss:$16 sm:%s518_s5]   ;;  %v617_v35 = vsel %vm70_vm1, %v833_v26, %v612_v28  ;;  %v837_v37 = vld [vmem:[%s1502_s0 + $0x9] ss:$16 sm:%s636_s9]   ;;  %s654_s24 = smov 12  ;;  %s659_s2 = smov 48 }
  0x3a   :  { %509 = vrot.lane.b32.xlu1 %v508_v10, %s861_s8  ;;  %v521_v38 = vsel %vm65_vm0, %v813_v34, %v812_v33  ;;  %v814_v39 = vld [vmem:[%s1502_s0 + $0x2] ss:$16 sm:%s523_s10]   ;;  %v622_v45 = vsel %vm75_vm2, %v834_v32, %v617_v35  ;;  %v639_v46 = vsel %vm70_vm1, %v837_v37, %v634_v36  ;;  %s664_s6 = smov 192  ;;  %v2_v4 = vld [vmem:[%s1502_s0] ss:$8 sm:$0xf]  }
  0x3b   :  { %v838_v40 = vld [vmem:[%s1502_s0 + $0x9] ss:$16 sm:%s641_s15]   ;;  %v526_v41 = vsel %vm70_vm1, %v814_v39, %v521_v38  ;;  %v815_v42 = vld [vmem:[%s1502_s0 + $0x2] ss:$16 sm:%s528_s18]   ;;  %s863_s18 = smov 16  }
  0x3c   :  { %v846_v44 = vld [vmem:[%s1502_s0 + $0x89] ss:$16 sm:%s677_s19]   ;;  %v826_v47 = vld [vmem:[%s1502_s0 + $0x8a] ss:$16 sm:%s583_s4]   ;;  %v531_v49 = vsel %vm75_vm2, %v815_v42, %v526_v41  ;;  %v644_v52 = vsel %vm75_vm2, %v838_v40, %v639_v46 }
  0x3d   :  { %v827_v48 = vld [vmem:[%s1502_s0 + $0x8a] ss:$16 sm:%s586_s26]   ;;  %v847_v51 = vld [vmem:[%s1502_s0 + $0x89] ss:$16 sm:%s682_s23]  }
  0x3e   :  { %554 = vrot.lane.b32.xlu0 %v553_v23, %s862_s11  ;;  %463 = vrot.lane.b32.xlu2 %v462_v27, %s861_s8  ;;  %s674_s8 = smov 3  ;;  %v589_v53 = vsel %vm65_vm0, %v827_v48, %v826_v47  ;;  %v828_v54 = vld [vmem:[%s1502_s0 + $0x8a] ss:$16 sm:%s591_s14]  }
  0x3f   :  { %v845_v43 = vld [vmem:[%s1502_s0 + $0x89] ss:$16 sm:%s674_s8]   ;;  %v594_v57 = vsel %vm70_vm1, %v828_v54, %v589_v53  ;;  %v829_v58 = vld [vmem:[%s1502_s0 + $0x8a] ss:$16 sm:%s596_s20]  }
  0x40   :  { %v680_v50 = vsel %vm65_vm0, %v846_v44, %v845_v43  ;;  %v848_v56 = vld [vmem:[%s1502_s0 + $0x89] ss:$16 sm:%s687_s17]   ;;  %v840_v60 = vld [vmem:[%s1502_s0 + $0x81] ss:$16 sm:%s651_s29]   ;;  %v599_v62 = vsel %vm75_vm2, %v829_v58, %v594_v57 }
  0x41   :  { %v685_v55 = vsel %vm70_vm1, %v847_v51, %v680_v50  ;;  %v841_v61 = vld [vmem:[%s1502_s0 + $0x81] ss:$16 sm:%s654_s24]   ;;  %v3_v5 = vld [vmem:[%s1502_s0] ss:$8 sm:$0xf0]  }
  0x42   :  { %577 = vrot.lane.b32.xlu1 %v576_v31, %s862_s11  ;;  %v690_v59 = vsel %vm75_vm2, %v848_v56, %v685_v55  ;;  %v657_v63 = vsel %vm65_vm0, %v841_v61, %v840_v60  ;;  %v842_v0 = vld [vmem:[%s1502_s0 + $0x81] ss:$16 sm:%s659_s2]   ;;  %v5_v6 = vsel %vm4_vm3, %v3_v5, %v2_v4  ;;  %v699_v7 = vld [vmem:[%s1502_s0 + $0x40] ss:$8 sm:$0xf]  }
  0x43   :  { %v662_v1 = vsel %vm70_vm1, %v842_v0, %v657_v63  ;;  %v843_v2 = vld [vmem:[%s1502_s0 + $0x81] ss:$16 sm:%s664_s6]   ;;  %7 = vst.msk [vmem:[%s1503_s1] ss:$8 sm:$0x3] %vm6_vm4, %v5_v6  }
  0x44   :  { %v667_v3 = vsel %vm75_vm2, %v843_v2, %v662_v1  ;;  %v700_v8 = vld [vmem:[%s1502_s0 + $0x40] ss:$8 sm:$0xf0]   ;;  %696 = vst.msk [vmem:[%s1503_s1 - $0xf] ss:$8 sm:$0xc] %vm6_vm4, %v5_v6  }
  0x45   :  { %v19_v9 = vsel %vm4_vm3, %v700_v8, %v699_v7  ;;  %697 = vst.msk [vmem:[%s1503_s1 - $0x1e] ss:$8 sm:$0x30] %vm6_vm4, %v5_v6   ;;  %v705_v10 = vld [vmem:[%s1502_s0 + $0x80] ss:$8 sm:$0xf]  }
  0x46   :  { %623 = vrot.lane.b32.xlu0 %v622_v45, %s863_s18  ;;  %532 = vrot.lane.b32.xlu2 %v531_v49, %s862_s11  ;;  %698 = vst.msk [vmem:[%s1503_s1 - $0x2d] ss:$8 sm:$0xc0] %vm6_vm4, %v5_v6   ;;  %v706_v11 = vld [vmem:[%s1502_s0 + $0x80] ss:$8 sm:$0xf0]  }
  0x47   :  { %701 = vst.msk [vmem:[%s1503_s1 + $0x4] ss:$8 sm:$0x3] %vm6_vm4, %v19_v9   ;;  %v34_v12 = vsel %vm4_vm3, %v706_v11, %v705_v10  ;;  %v711_v13 = vld [vmem:[%s1502_s0 + $0xc0] ss:$8 sm:$0xf]  }
  0x48   :  { %702 = vst.msk [vmem:[%s1503_s1 - $0xb] ss:$8 sm:$0xc] %vm6_vm4, %v19_v9   ;;  %v712_v14 = vld [vmem:[%s1502_s0 + $0xc0] ss:$8 sm:$0xf0]  }
  0x49   :  { %703 = vst.msk [vmem:[%s1503_s1 - $0x1a] ss:$8 sm:$0x30] %vm6_vm4, %v19_v9   ;;  %v49_v15 = vsel %vm4_vm3, %v712_v14, %v711_v13 }
  0x4a   :  { %645 = vrot.lane.b32.xlu1 %v644_v52, %s863_s18  ;;  %704 = vst.msk [vmem:[%s1503_s1 - $0x29] ss:$8 sm:$0xc0] %vm6_vm4, %v19_v9  }
  0x4b   :  { %707 = vst.msk [vmem:[%s1503_s1 + $0x10] ss:$8 sm:$0x3] %vm6_vm4, %v34_v12  }
  0x4c   :  { %708 = vst.msk [vmem:[%s1503_s1 + $0x1] ss:$8 sm:$0xc] %vm6_vm4, %v34_v12  }
  0x4d   :  { %709 = vst.msk [vmem:[%s1503_s1 - $0xe] ss:$8 sm:$0x30] %vm6_vm4, %v34_v12  }
  0x4e   :  { %691 = vrot.lane.b32.xlu0 %v690_v59, %s863_s18  ;;  %600 = vrot.lane.b32.xlu2 %v599_v62, %s862_s11  ;;  %710 = vst.msk [vmem:[%s1503_s1 - $0x1d] ss:$8 sm:$0xc0] %vm6_vm4, %v34_v12  }
  0x4f   :  { %713 = vst.msk [vmem:[%s1503_s1 + $0x14] ss:$8 sm:$0x3] %vm6_vm4, %v49_v15  }
  0x50   :  { %714 = vst.msk [vmem:[%s1503_s1 + $0x5] ss:$8 sm:$0xc] %vm6_vm4, %v49_v15  }
  0x51   :  { %715 = vst.msk [vmem:[%s1503_s1 - $0xa] ss:$8 sm:$0x30] %vm6_vm4, %v49_v15  }
  0x52   :  { %716 = vst.msk [vmem:[%s1503_s1 - $0x19] ss:$8 sm:$0xc0] %vm6_vm4, %v49_v15  }
  0x56   :  { %668 = vrot.lane.b32.xlu2 %v667_v3, %s863_s18 }
  0x70   :  { %v169_v16 = vpop.permute.xlu2 %168  }
  0x78   :  { %v78_v17 = vpop.permute.xlu0 %77   ;;  %v191_v18 = vpop.permute.xlu2 %190  }
  0x79   :  { %80 = vst.msk [vmem:[%s1503_s1] sm:$0xff] %vm79_vm5, %v78_v17  }
  0x7a   :  { %171 = vst.msk [vmem:[%s1503_s1] sm:$0xff] %vm170_vm6, %v169_v16  }
  0x7c   :  { %v123_v19 = vpop.permute.xlu1 %122  }
  0x7d   :  { %730 = vst.msk [vmem:[%s1503_s1 + $0x10] sm:$0xff] %vm79_vm5, %v123_v19  }
  0x80   :  { %v100_v20 = vpop.permute.xlu0 %99   ;;  %v260_v21 = vpop.permute.xlu2 %259  }
  0x81   :  { %725 = vst.msk [vmem:[%s1503_s1 + $0x8] sm:$0xff] %vm79_vm5, %v100_v20  }
  0x82   :  { %744 = vst.msk [vmem:[%s1503_s1 + $0x8] sm:$0xff] %vm170_vm6, %v191_v18  }
  0x83   :  { %262 = vst.msk [vmem:[%s1503_s1] sm:$0xff] %vm261_vm7, %v260_v21  }
  0x84   :  { %v146_v22 = vpop.permute.xlu1 %145  }
  0x85   :  { %735 = vst.msk [vmem:[%s1503_s1 + $0x18] sm:$0xff] %vm79_vm5, %v146_v22  }
  0x88   :  { %v214_v23 = vpop.permute.xlu0 %213   ;;  %v328_v24 = vpop.permute.xlu2 %327  }
  0x89   :  { %749 = vst.msk [vmem:[%s1503_s1 + $0x10] sm:$0xff] %vm170_vm6, %v214_v23  }
  0x8c   :  { %v237_v25 = vpop.permute.xlu1 %236  }
  0x8d   :  { %754 = vst.msk [vmem:[%s1503_s1 + $0x18] sm:$0xff] %vm170_vm6, %v237_v25  }
  0x8e   :  { %773 = vst.msk [vmem:[%s1503_s1 + $0x18] sm:$0xff] %vm261_vm7, %v328_v24  }
  0x90   :  { %v282_v26 = vpop.permute.xlu0 %281   ;;  %v396_v27 = vpop.permute.xlu2 %395  }
  0x91   :  { %763 = vst.msk [vmem:[%s1503_s1 + $0x8] sm:$0xff] %vm261_vm7, %v282_v26  }
  0x94   :  { %v305_v28 = vpop.permute.xlu1 %304  }
  0x95   :  { %768 = vst.msk [vmem:[%s1503_s1 + $0x10] sm:$0xff] %vm261_vm7, %v305_v28  }
  0x96   :  { %787 = vst.msk [vmem:[%s1503_s1 + $0x10] sm:$0xff] %vm352_vm8, %v396_v27  }
  0x98   :  { %v351_v29 = vpop.permute.xlu0 %350   ;;  %v464_v30 = vpop.permute.xlu2 %463  }
  0x99   :  { %353 = vst.msk [vmem:[%s1503_s1] sm:$0xff] %vm352_vm8, %v351_v29  }
  0x9c   :  { %v373_v31 = vpop.permute.xlu1 %372  }
  0x9d   :  { %782 = vst.msk [vmem:[%s1503_s1 + $0x8] sm:$0xff] %vm352_vm8, %v373_v31  }
  0x9e   :  { %801 = vst.msk [vmem:[%s1503_s1 + $0x8] sm:$0xff] %vm443_vm9, %v464_v30  }
  0xa0   :  { %v419_v32 = vpop.permute.xlu0 %418   ;;  %v533_v33 = vpop.permute.xlu2 %532  }
  0xa1   :  { %792 = vst.msk [vmem:[%s1503_s1 + $0x18] sm:$0xff] %vm352_vm8, %v419_v32  }
  0xa4   :  { %v442_v34 = vpop.permute.xlu1 %441  }
  0xa5   :  { %444 = vst.msk [vmem:[%s1503_s1] sm:$0xff] %vm443_vm9, %v442_v34  }
  0xa6   :  { %535 = vst.msk [vmem:[%s1503_s1] sm:$0xff] %vm534_vm10, %v533_v33  }
  0xa8   :  { %v487_v35 = vpop.permute.xlu0 %486   ;;  %v601_v36 = vpop.permute.xlu2 %600  }
  0xa9   :  { %806 = vst.msk [vmem:[%s1503_s1 + $0x10] sm:$0xff] %vm443_vm9, %v487_v35  }
  0xac   :  { %v510_v37 = vpop.permute.xlu1 %509  }
  0xad   :  { %811 = vst.msk [vmem:[%s1503_s1 + $0x18] sm:$0xff] %vm443_vm9, %v510_v37  }
  0xae   :  { %830 = vst.msk [vmem:[%s1503_s1 + $0x18] sm:$0xff] %vm534_vm10, %v601_v36  }
  0xb0   :  { %v555_v38 = vpop.permute.xlu0 %554   ;;  %v669_v39 = vpop.permute.xlu2 %668  }
  0xb1   :  { %820 = vst.msk [vmem:[%s1503_s1 + $0x8] sm:$0xff] %vm534_vm10, %v555_v38  }
  0xb4   :  { %v578_v40 = vpop.permute.xlu1 %577  }
  0xb5   :  { %825 = vst.msk [vmem:[%s1503_s1 + $0x10] sm:$0xff] %vm534_vm10, %v578_v40  }
  0xb6   :  { %844 = vst.msk [vmem:[%s1503_s1 + $0x10] sm:$0xff] %vm625_vm11, %v669_v39  }
  0xb8   :  { %v624_v41 = vpop.permute.xlu0 %623  }
  0xb9   :  { %626 = vst.msk [vmem:[%s1503_s1] sm:$0xff] %vm625_vm11, %v624_v41  }
  0xbc   :  { %v646_v42 = vpop.permute.xlu1 %645  }
  0xbd   :  { %839 = vst.msk [vmem:[%s1503_s1 + $0x8] sm:$0xff] %vm625_vm11, %v646_v42  }
  0xc0   :  { %v692_v43 = vpop.permute.xlu0 %691  }
  0xc1   :  { %849 = vst.msk [vmem:[%s1503_s1 + $0x18] sm:$0xff] %vm625_vm11, %v692_v43  }

// kernel: tile.79
= control target key start
LH: loop header
LB: loop body
LE: loop exit
PB: predicated region body
PF: predicated region fallthrough
CT: control target
= control target key end

     0   :  { %vm55_vm0 = vcmask 1041409   ;;  %vm59_vm1 = vcmask 1042434   ;;  %vm63_vm2 = vcmask 1043459   ;;  %vm67_vm3 = vcmask 1044484   ;;  %s1367_s19 = smov 120   ;;  %s1368_s9 = smov 112   ;;  %s2494_s0 = inlined_call_operand.vmem [shape: f32[8,32,8], index: 0, kind: input, shape index: {}]   ;;  %s2495_s1 = inlined_call_operand.vmem [shape: f32[8,256], index: 1, kind: output, shape index: {}]  }
   0x1   :  { %v1097_v0 = vld [vmem:[%s2494_s0 + $0xf] sm:$0x1]   ;;  %vm71_vm4 = vcmask 1045509   ;;  %vm75_vm5 = vcmask 1046534   ;;  %vm79_vm6 = vcmask 1047559   ;;  %s1369_s27 = smov 96  }
   0x2   :  { %v1098_v1 = vld [vmem:[%s2494_s0 + $0x2e] sm:$0x2]   ;;  %v1114_v11 = vld [vmem:[%s2494_s0 + $0xe] sm:$0x1]   ;;  %v1105_v24 = vld [vmem:[%s2494_s0 + $0x1f] sm:$0x1]  }
   0x3   :  { %v1099_v2 = vld [vmem:[%s2494_s0 + $0x4d] sm:$0x4]   ;;  %v56_v3 = vsel %vm55_vm0, %v1098_v1, %v1097_v0  ;;  %v1115_v12 = vld [vmem:[%s2494_s0 + $0x2d] sm:$0x2]   ;;  %v1106_v25 = vld [vmem:[%s2494_s0 + $0x3e] sm:$0x2]  }
   0x4   :  { %v1100_v4 = vld [vmem:[%s2494_s0 + $0x6c] sm:$0x8]   ;;  %v60_v7 = vsel %vm59_vm1, %v1099_v2, %v56_v3  ;;  %v125_v14 = vsel %vm55_vm0, %v1115_v12, %v1114_v11  ;;  %v1116_v15 = vld [vmem:[%s2494_s0 + $0x4c] sm:$0x4]   ;;  %v1107_v26 = vld [vmem:[%s2494_s0 + $0x5d] sm:$0x4]   ;;  %v90_v30 = vsel %vm55_vm0, %v1106_v25, %v1105_v24 }
   0x5   :  { %v1101_v5 = vld [vmem:[%s2494_s0 + $0x8b] sm:$0x10]   ;;  %v64_v10 = vsel %vm63_vm2, %v1100_v4, %v60_v7  ;;  %v1117_v16 = vld [vmem:[%s2494_s0 + $0x6b] sm:$0x8]   ;;  %v129_v19 = vsel %vm59_vm1, %v1116_v15, %v125_v14  ;;  %v1108_v31 = vld [vmem:[%s2494_s0 + $0x7c] sm:$0x8]   ;;  %v94_v34 = vsel %vm59_vm1, %v1107_v26, %v90_v30 }
   0x6   :  { %v1102_v6 = vld [vmem:[%s2494_s0 + $0xaa] sm:$0x20]   ;;  %v68_v13 = vsel %vm67_vm3, %v1101_v5, %v64_v10  ;;  %v1118_v17 = vld [vmem:[%s2494_s0 + $0x8a] sm:$0x10]   ;;  %v133_v23 = vsel %vm63_vm2, %v1117_v16, %v129_v19  ;;  %v1109_v32 = vld [vmem:[%s2494_s0 + $0x9b] sm:$0x10]   ;;  %v98_v39 = vsel %vm63_vm2, %v1108_v31, %v94_v34 }
   0x7   :  { %v1103_v8 = vld [vmem:[%s2494_s0 + $0xc9] sm:$0x40]   ;;  %v72_v18 = vsel %vm71_vm4, %v1102_v6, %v68_v13  ;;  %v1119_v20 = vld [vmem:[%s2494_s0 + $0xa9] sm:$0x20]   ;;  %v137_v28 = vsel %vm67_vm3, %v1118_v17, %v133_v23  ;;  %v1110_v35 = vld [vmem:[%s2494_s0 + $0xba] sm:$0x20]   ;;  %v102_v44 = vsel %vm67_vm3, %v1109_v32, %v98_v39 }
   0x8   :  { %v1104_v9 = vld [vmem:[%s2494_s0 + $0xe8] sm:$0x80]   ;;  %v1120_v21 = vld [vmem:[%s2494_s0 + $0xc8] sm:$0x40]   ;;  %v76_v22 = vsel %vm75_vm5, %v1103_v8, %v72_v18  ;;  %v141_v33 = vsel %vm71_vm4, %v1119_v20, %v137_v28  ;;  %v1111_v36 = vld [vmem:[%s2494_s0 + $0xd9] sm:$0x40]   ;;  %v106_v49 = vsel %vm71_vm4, %v1110_v35, %v102_v44 }
   0x9   :  { %v80_v27 = vsel %vm79_vm6, %v1104_v9, %v76_v22  ;;  %v1121_v29 = vld [vmem:[%s2494_s0 + $0xe7] sm:$0x80]   ;;  %v1122_v37 = vld [vmem:[%s2494_s0 + $0x1e] sm:$0x1]   ;;  %v145_v38 = vsel %vm75_vm5, %v1120_v21, %v141_v33  ;;  %v1112_v45 = vld [vmem:[%s2494_s0 + $0xf8] sm:$0x80]   ;;  %v110_v54 = vsel %vm75_vm5, %v1111_v36, %v106_v49 }
   0xa   :  { %81 = vrot.lane.b32.xlu0 %v80_v27, %s1367_s19  ;;  %v1123_v40 = vld [vmem:[%s2494_s0 + $0x3d] sm:$0x2]   ;;  %v149_v43 = vsel %vm79_vm6, %v1121_v29, %v145_v38  ;;  %v1148_v52 = vld [vmem:[%s2494_s0 + $0xc] sm:$0x1]   ;;  %v114_v60 = vsel %vm79_vm6, %v1112_v45, %v110_v54  ;;  %v1156_v3 = vld [vmem:[%s2494_s0 + $0x1c] sm:$0x1]  }
   0xb   :  { %v1124_v41 = vld [vmem:[%s2494_s0 + $0x5c] sm:$0x4]   ;;  %v159_v46 = vsel %vm55_vm0, %v1123_v40, %v1122_v37  ;;  %150 = vrot.lane.b32.xlu1 %v149_v43, %s1368_s9  ;;  %v1149_v53 = vld [vmem:[%s2494_s0 + $0x2b] sm:$0x2]   ;;  %v1157_v4 = vld [vmem:[%s2494_s0 + $0x3b] sm:$0x2]  }
   0xc   :  { %v1125_v42 = vld [vmem:[%s2494_s0 + $0x7b] sm:$0x8]   ;;  %v163_v50 = vsel %vm59_vm1, %v1124_v41, %v159_v46  ;;  %v263_v56 = vsel %vm55_vm0, %v1149_v53, %v1148_v52  ;;  %v1150_v57 = vld [vmem:[%s2494_s0 + $0x4a] sm:$0x4]   ;;  %v1158_v5 = vld [vmem:[%s2494_s0 + $0x5a] sm:$0x4]   ;;  %v297_v9 = vsel %vm55_vm0, %v1157_v4, %v1156_v3 }
   0xd   :  { %v1126_v47 = vld [vmem:[%s2494_s0 + $0x9a] sm:$0x10]   ;;  %v167_v55 = vsel %vm63_vm2, %v1125_v42, %v163_v50  ;;  %v1151_v58 = vld [vmem:[%s2494_s0 + $0x69] sm:$0x8]   ;;  %v267_v63 = vsel %vm59_vm1, %v1150_v57, %v263_v56  ;;  %v1159_v10 = vld [vmem:[%s2494_s0 + $0x79] sm:$0x8]   ;;  %v301_v15 = vsel %vm59_vm1, %v1158_v5, %v297_v9 }
   0xe   :  { %v1127_v48 = vld [vmem:[%s2494_s0 + $0xb9] sm:$0x20]   ;;  %v1152_v59 = vld [vmem:[%s2494_s0 + $0x88] sm:$0x10]   ;;  %v171_v61 = vsel %vm67_vm3, %v1126_v47, %v167_v55  ;;  %v271_v2 = vsel %vm63_vm2, %v1151_v58, %v267_v63  ;;  %v1160_v11 = vld [vmem:[%s2494_s0 + $0x98] sm:$0x10]   ;;  %v305_v17 = vsel %vm63_vm2, %v1159_v10, %v301_v15 }
   0xf   :  { %v1128_v51 = vld [vmem:[%s2494_s0 + $0xd8] sm:$0x40]   ;;  %v1153_v0 = vld [vmem:[%s2494_s0 + $0xa7] sm:$0x20]   ;;  %v175_v1 = vsel %vm71_vm4, %v1127_v48, %v171_v61  ;;  %v275_v7 = vsel %vm67_vm3, %v1152_v59, %v271_v2  ;;  %v1161_v16 = vld [vmem:[%s2494_s0 + $0xb7] sm:$0x20]   ;;  %v309_v22 = vsel %vm67_vm3, %v1160_v11, %v305_v17 }
  0x10   :  { %v1129_v62 = vld [vmem:[%s2494_s0 + $0xf7] sm:$0x80]   ;;  %v179_v6 = vsel %vm75_vm5, %v1128_v51, %v175_v1  ;;  %v1154_v8 = vld [vmem:[%s2494_s0 + $0xc6] sm:$0x40]   ;;  %v279_v13 = vsel %vm71_vm4, %v1153_v0, %v275_v7  ;;  %v1173_v18 = vld [vmem:[%s2494_s0 + $0x1b] sm:$0x1]   ;;  %v313_v27 = vsel %vm71_vm4, %v1161_v16, %v309_v22 }
  0x11   :  { %v183_v12 = vsel %vm79_vm6, %v1129_v62, %v179_v6  ;;  %v1155_v14 = vld [vmem:[%s2494_s0 + $0xe5] sm:$0x80]   ;;  %v1174_v19 = vld [vmem:[%s2494_s0 + $0x3a] sm:$0x2]   ;;  %v283_v21 = vsel %vm75_vm5, %v1154_v8, %v279_v13  ;;  %v1162_v23 = vld [vmem:[%s2494_s0 + $0xd6] sm:$0x40]  }
  0x12   :  { %115 = vrot.lane.b32.xlu0 %v114_v60, %s1367_s19  ;;  %v1175_v20 = vld [vmem:[%s2494_s0 + $0x59] sm:$0x4]   ;;  %v366_v24 = vsel %vm55_vm0, %v1174_v19, %v1173_v18  ;;  %v1163_v28 = vld [vmem:[%s2494_s0 + $0xf5] sm:$0x80]   ;;  %v1131_v31 = vld [vmem:[%s2494_s0 + $0xd] sm:$0x1]   ;;  %v287_v36 = vsel %vm79_vm6, %v1155_v14, %v283_v21  ;;  %v317_v37 = vsel %vm75_vm5, %v1162_v23, %v313_v27 }
  0x13   :  { %v1176_v25 = vld [vmem:[%s2494_s0 + $0x78] sm:$0x8]   ;;  %184 = vrot.lane.b32.xlu1 %v183_v12, %s1368_s9  ;;  %v370_v29 = vsel %vm59_vm1, %v1175_v20, %v366_v24  ;;  %v1132_v33 = vld [vmem:[%s2494_s0 + $0x2c] sm:$0x2]   ;;  %v1182_v45 = vld [vmem:[%s2494_s0 + $0xa] sm:$0x1]   ;;  %v321_v53 = vsel %vm79_vm6, %v1163_v28, %v317_v37 }
  0x14   :  { %v1177_v26 = vld [vmem:[%s2494_s0 + $0x97] sm:$0x10]   ;;  %v374_v32 = vsel %vm63_vm2, %v1176_v25, %v370_v29  ;;  %v1133_v34 = vld [vmem:[%s2494_s0 + $0x4b] sm:$0x4]   ;;  %v194_v40 = vsel %vm55_vm0, %v1132_v33, %v1131_v31  ;;  %v1183_v46 = vld [vmem:[%s2494_s0 + $0x29] sm:$0x2]  }
  0x15   :  { %v1178_v30 = vld [vmem:[%s2494_s0 + $0xb6] sm:$0x20]   ;;  %v1134_v35 = vld [vmem:[%s2494_s0 + $0x6a] sm:$0x8]   ;;  %v378_v38 = vsel %vm67_vm3, %v1177_v26, %v374_v32  ;;  %v198_v43 = vsel %vm59_vm1, %v1133_v34, %v194_v40  ;;  %v401_v49 = vsel %vm55_vm0, %v1183_v46, %v1182_v45  ;;  %v1184_v50 = vld [vmem:[%s2494_s0 + $0x48] sm:$0x4]  }
  0x16   :  { %v1179_v39 = vld [vmem:[%s2494_s0 + $0xd5] sm:$0x40]   ;;  %v1135_v41 = vld [vmem:[%s2494_s0 + $0x89] sm:$0x10]   ;;  %v382_v47 = vsel %vm71_vm4, %v1178_v30, %v378_v38  ;;  %v202_v48 = vsel %vm63_vm2, %v1134_v35, %v198_v43  ;;  %v1185_v51 = vld [vmem:[%s2494_s0 + $0x67] sm:$0x8]   ;;  %v405_v57 = vsel %vm59_vm1, %v1184_v50, %v401_v49 }
  0x17   :  { %v1136_v42 = vld [vmem:[%s2494_s0 + $0xa8] sm:$0x20]   ;;  %v1186_v52 = vld [vmem:[%s2494_s0 + $0x86] sm:$0x10]   ;;  %v1180_v54 = vld [vmem:[%s2494_s0 + $0xf4] sm:$0x80]   ;;  %v206_v55 = vsel %vm67_vm3, %v1135_v41, %v202_v48  ;;  %v409_v60 = vsel %vm63_vm2, %v1185_v51, %v405_v57  ;;  %v386_v0 = vsel %vm75_vm5, %v1179_v39, %v382_v47 }
  0x18   :  { %v1137_v44 = vld [vmem:[%s2494_s0 + $0xc7] sm:$0x40]   ;;  %v1187_v58 = vld [vmem:[%s2494_s0 + $0xa5] sm:$0x20]   ;;  %v210_v59 = vsel %vm71_vm4, %v1136_v42, %v206_v55  ;;  %v1199_v62 = vld [vmem:[%s2494_s0 + $0x9] sm:$0x1]   ;;  %v413_v2 = vsel %vm67_vm3, %v1186_v52, %v409_v60  ;;  %v390_v16 = vsel %vm79_vm6, %v1180_v54, %v386_v0 }
  0x19   :  { %v1138_v56 = vld [vmem:[%s2494_s0 + $0xe6] sm:$0x80]   ;;  %v1188_v61 = vld [vmem:[%s2494_s0 + $0xc4] sm:$0x40]   ;;  %v1200_v63 = vld [vmem:[%s2494_s0 + $0x28] sm:$0x2]   ;;  %v214_v1 = vsel %vm75_vm5, %v1137_v44, %v210_v59  ;;  %v417_v8 = vsel %vm71_vm4, %v1187_v58, %v413_v2 }
  0x1a   :  { %288 = vrot.lane.b32.xlu0 %v287_v36, %s1369_s27  ;;  %v470_v3 = vsel %vm55_vm0, %v1200_v63, %v1199_v62  ;;  %v1201_v4 = vld [vmem:[%s2494_s0 + $0x47] sm:$0x4]   ;;  %v218_v7 = vsel %vm79_vm6, %v1138_v56, %v214_v1  ;;  %v1189_v9 = vld [vmem:[%s2494_s0 + $0xe3] sm:$0x80]   ;;  %s1370_s22 = smov 104   ;;  %v421_v17 = vsel %vm75_vm5, %v1188_v61, %v417_v8  ;;  %s1371_s17 = smov 88  }
  0x1b   :  { %v1202_v5 = vld [vmem:[%s2494_s0 + $0x66] sm:$0x8]   ;;  %322 = vrot.lane.b32.xlu1 %v321_v53, %s1369_s27  ;;  %v474_v10 = vsel %vm59_vm1, %v1201_v4, %v470_v3  ;;  %219 = vrot.lane.b32.xlu2 %v218_v7, %s1370_s22  ;;  %v1139_v13 = vld [vmem:[%s2494_s0 + $0x1d] sm:$0x1]   ;;  %v425_v32 = vsel %vm79_vm6, %v1189_v9, %v421_v17  ;;  %s1372_s8 = smov 80   ;;  %s1373_s19 = smov 72  }
  0x1c   :  { %v1203_v6 = vld [vmem:[%s2494_s0 + $0x85] sm:$0x10]   ;;  %v478_v12 = vsel %vm63_vm2, %v1202_v5, %v474_v10  ;;  %v1140_v14 = vld [vmem:[%s2494_s0 + $0x3c] sm:$0x2]   ;;  %v1207_v26 = vld [vmem:[%s2494_s0 + $0x19] sm:$0x1]  }
  0x1d   :  { %v1204_v11 = vld [vmem:[%s2494_s0 + $0xa4] sm:$0x20]   ;;  %v1141_v15 = vld [vmem:[%s2494_s0 + $0x5b] sm:$0x4]   ;;  %v482_v18 = vsel %vm67_vm3, %v1203_v6, %v478_v12  ;;  %v228_v20 = vsel %vm55_vm0, %v1140_v14, %v1139_v13  ;;  %v1208_v29 = vld [vmem:[%s2494_s0 + $0x38] sm:$0x2]  }
  0x1e   :  { %v1205_v19 = vld [vmem:[%s2494_s0 + $0xc3] sm:$0x40]   ;;  %v1142_v21 = vld [vmem:[%s2494_s0 + $0x7a] sm:$0x8]   ;;  %v232_v23 = vsel %vm59_vm1, %v1141_v15, %v228_v20  ;;  %v486_v27 = vsel %vm71_vm4, %v1204_v11, %v482_v18  ;;  %v1209_v30 = vld [vmem:[%s2494_s0 + $0x57] sm:$0x4]   ;;  %v504_v36 = vsel %vm55_vm0, %v1208_v29, %v1207_v26 }
  0x1f   :  { %v1143_v22 = vld [vmem:[%s2494_s0 + $0x99] sm:$0x10]   ;;  %v236_v28 = vsel %vm63_vm2, %v1142_v21, %v232_v23  ;;  %v1210_v31 = vld [vmem:[%s2494_s0 + $0x76] sm:$0x8]   ;;  %v1206_v33 = vld [vmem:[%s2494_s0 + $0xe2] sm:$0x80]   ;;  %v508_v39 = vsel %vm59_vm1, %v1209_v30, %v504_v36  ;;  %v490_v43 = vsel %vm75_vm5, %v1205_v19, %v486_v27 }
  0x20   :  { %v1144_v24 = vld [vmem:[%s2494_s0 + $0xb8] sm:$0x20]   ;;  %v240_v34 = vsel %vm67_vm3, %v1143_v22, %v236_v28  ;;  %v1211_v37 = vld [vmem:[%s2494_s0 + $0x95] sm:$0x10]   ;;  %v1224_v42 = vld [vmem:[%s2494_s0 + $0x18] sm:$0x1]   ;;  %v512_v45 = vsel %vm63_vm2, %v1210_v31, %v508_v39  ;;  %v494_v59 = vsel %vm79_vm6, %v1206_v33, %v490_v43 }
  0x21   :  { %v1145_v25 = vld [vmem:[%s2494_s0 + $0xd7] sm:$0x40]   ;;  %v244_v38 = vsel %vm71_vm4, %v1144_v24, %v240_v34  ;;  %v1212_v40 = vld [vmem:[%s2494_s0 + $0xb4] sm:$0x20]   ;;  %v1225_v46 = vld [vmem:[%s2494_s0 + $0x37] sm:$0x2]   ;;  %v516_v50 = vsel %vm67_vm3, %v1211_v37, %v512_v45 }
  0x22   :  { %391 = vrot.lane.b32.xlu0 %v390_v16, %s1371_s17  ;;  %v1146_v35 = vld [vmem:[%s2494_s0 + $0xf6] sm:$0x80]   ;;  %v1213_v41 = vld [vmem:[%s2494_s0 + $0xd3] sm:$0x40]   ;;  %v248_v44 = vsel %vm75_vm5, %v1145_v25, %v244_v38  ;;  %v1226_v47 = vld [vmem:[%s2494_s0 + $0x56] sm:$0x4]   ;;  %v573_v52 = vsel %vm55_vm0, %v1225_v46, %v1224_v42  ;;  %v520_v54 = vsel %vm71_vm4, %v1212_v40, %v516_v50 }
  0x23   :  { %v1227_v48 = vld [vmem:[%s2494_s0 + $0x75] sm:$0x8]   ;;  %426 = vrot.lane.b32.xlu1 %v425_v32, %s1372_s8  ;;  %v252_v49 = vsel %vm79_vm6, %v1146_v35, %v248_v44  ;;  %v1214_v51 = vld [vmem:[%s2494_s0 + $0xf2] sm:$0x80]   ;;  %v577_v55 = vsel %vm59_vm1, %v1226_v47, %v573_v52  ;;  %v1165_v57 = vld [vmem:[%s2494_s0 + $0xb] sm:$0x1]   ;;  %v524_v60 = vsel %vm75_vm5, %v1213_v41, %v520_v54 }
  0x24   :  { %v1228_v53 = vld [vmem:[%s2494_s0 + $0x94] sm:$0x10]   ;;  %253 = vrot.lane.b32.xlu2 %v252_v49, %s1370_s22  ;;  %v1166_v58 = vld [vmem:[%s2494_s0 + $0x2a] sm:$0x2]   ;;  %v581_v61 = vsel %vm63_vm2, %v1227_v48, %v577_v55  ;;  %v1233_v9 = vld [vmem:[%s2494_s0 + $0x7] sm:$0x1]   ;;  %v528_v12 = vsel %vm79_vm6, %v1214_v51, %v524_v60 }
  0x25   :  { %v1229_v56 = vld [vmem:[%s2494_s0 + $0xb3] sm:$0x20]   ;;  %v332_v62 = vsel %vm55_vm0, %v1166_v58, %v1165_v57  ;;  %v1167_v63 = vld [vmem:[%s2494_s0 + $0x49] sm:$0x4]   ;;  %v585_v2 = vsel %vm67_vm3, %v1228_v53, %v581_v61  ;;  %v1234_v10 = vld [vmem:[%s2494_s0 + $0x26] sm:$0x2]  }
  0x26   :  { %v1168_v0 = vld [vmem:[%s2494_s0 + $0x68] sm:$0x8]   ;;  %v1230_v3 = vld [vmem:[%s2494_s0 + $0xd2] sm:$0x40]   ;;  %v336_v4 = vsel %vm59_vm1, %v1167_v63, %v332_v62  ;;  %v589_v7 = vsel %vm71_vm4, %v1229_v56, %v585_v2  ;;  %v1235_v11 = vld [vmem:[%s2494_s0 + $0x45] sm:$0x4]   ;;  %v608_v16 = vsel %vm55_vm0, %v1234_v10, %v1233_v9 }
  0x27   :  { %v1169_v1 = vld [vmem:[%s2494_s0 + $0x87] sm:$0x10]   ;;  %v340_v8 = vsel %vm63_vm2, %v1168_v0, %v336_v4  ;;  %v1231_v13 = vld [vmem:[%s2494_s0 + $0xf1] sm:$0x80]   ;;  %v1236_v17 = vld [vmem:[%s2494_s0 + $0x64] sm:$0x8]   ;;  %v612_v20 = vsel %vm59_vm1, %v1235_v11, %v608_v16  ;;  %v593_v24 = vsel %vm75_vm5, %v1230_v3, %v589_v7 }
  0x28   :  { %v1170_v5 = vld [vmem:[%s2494_s0 + $0xa6] sm:$0x20]   ;;  %v344_v14 = vsel %vm67_vm3, %v1169_v1, %v340_v8  ;;  %v1237_v18 = vld [vmem:[%s2494_s0 + $0x83] sm:$0x10]   ;;  %v1250_v23 = vld [vmem:[%s2494_s0 + $0x6] sm:$0x1]   ;;  %v616_v26 = vsel %vm63_vm2, %v1236_v17, %v612_v20  ;;  %v597_v39 = vsel %vm79_vm6, %v1231_v13, %v593_v24 }
  0x29   :  { %v1171_v6 = vld [vmem:[%s2494_s0 + $0xc5] sm:$0x40]   ;;  %v348_v19 = vsel %vm71_vm4, %v1170_v5, %v344_v14  ;;  %v1238_v21 = vld [vmem:[%s2494_s0 + $0xa2] sm:$0x20]   ;;  %v1251_v27 = vld [vmem:[%s2494_s0 + $0x25] sm:$0x2]   ;;  %v620_v31 = vsel %vm67_vm3, %v1237_v18, %v616_v26 }
  0x2a   :  { %495 = vrot.lane.b32.xlu0 %v494_v59, %s1373_s19  ;;  %v1172_v15 = vld [vmem:[%s2494_s0 + $0xe4] sm:$0x80]   ;;  %v1239_v22 = vld [vmem:[%s2494_s0 + $0xc1] sm:$0x40]   ;;  %v352_v25 = vsel %vm75_vm5, %v1171_v6, %v348_v19  ;;  %v1252_v28 = vld [vmem:[%s2494_s0 + $0x44] sm:$0x4]   ;;  %v677_v32 = vsel %vm55_vm0, %v1251_v27, %v1250_v23  ;;  %v624_v34 = vsel %vm71_vm4, %v1238_v21, %v620_v31 }
  0x2b   :  { %v1253_v29 = vld [vmem:[%s2494_s0 + $0x63] sm:$0x8]   ;;  %529 = vrot.lane.b32.xlu1 %v528_v12, %s1373_s19  ;;  %v356_v30 = vsel %vm79_vm6, %v1172_v15, %v352_v25  ;;  %v1240_v35 = vld [vmem:[%s2494_s0 + $0xe0] sm:$0x80]   ;;  %v681_v36 = vsel %vm59_vm1, %v1252_v28, %v677_v32  ;;  %v1190_v38 = vld [vmem:[%s2494_s0 + $0x1a] sm:$0x1]   ;;  %v628_v40 = vsel %vm75_vm5, %v1239_v22, %v624_v34 }
  0x2c   :  { %v1254_v33 = vld [vmem:[%s2494_s0 + $0x82] sm:$0x10]   ;;  %357 = vrot.lane.b32.xlu2 %v356_v30, %s1371_s17  ;;  %v685_v41 = vsel %vm63_vm2, %v1253_v29, %v681_v36  ;;  %v1191_v42 = vld [vmem:[%s2494_s0 + $0x39] sm:$0x2]   ;;  %v1258_v53 = vld [vmem:[%s2494_s0 + $0x16] sm:$0x1]   ;;  %v632_v55 = vsel %vm79_vm6, %v1240_v35, %v628_v40 }
  0x2d   :  { %v1255_v37 = vld [vmem:[%s2494_s0 + $0xa1] sm:$0x20]   ;;  %v1192_v43 = vld [vmem:[%s2494_s0 + $0x58] sm:$0x4]   ;;  %v689_v45 = vsel %vm67_vm3, %v1254_v33, %v685_v41  ;;  %v435_v47 = vsel %vm55_vm0, %v1191_v42, %v1190_v38  ;;  %v1259_v54 = vld [vmem:[%s2494_s0 + $0x35] sm:$0x2]  }
  0x2e   :  { %v1193_v44 = vld [vmem:[%s2494_s0 + $0x77] sm:$0x8]   ;;  %v1256_v46 = vld [vmem:[%s2494_s0 + $0xc0] sm:$0x40]   ;;  %v693_v50 = vsel %vm71_vm4, %v1255_v37, %v689_v45  ;;  %v439_v51 = vsel %vm59_vm1, %v1192_v43, %v435_v47  ;;  %s1374_s30 = smov 64   ;;  %v711_v58 = vsel %vm55_vm0, %v1259_v54, %v1258_v53  ;;  %s1375_s24 = smov 56  }
  0x2f   :  { %v1194_v48 = vld [vmem:[%s2494_s0 + $0x96] sm:$0x10]   ;;  %v1257_v56 = vld [vmem:[%s2494_s0 + $0xdf] sm:$0x80]   ;;  %v443_v57 = vsel %vm63_vm2, %v1193_v44, %v439_v51  ;;  %v1260_v59 = vld [vmem:[%s2494_s0 + $0x54] sm:$0x4]   ;;  %v697_v3 = vsel %vm75_vm5, %v1256_v46, %v693_v50 }
  0x30   :  { %v1195_v49 = vld [vmem:[%s2494_s0 + $0xb5] sm:$0x20]   ;;  %v1261_v60 = vld [vmem:[%s2494_s0 + $0x73] sm:$0x8]   ;;  %v447_v62 = vsel %vm67_vm3, %v1194_v48, %v443_v57  ;;  %v715_v0 = vsel %vm59_vm1, %v1260_v59, %v711_v58  ;;  %v1275_v6 = vld [vmem:[%s2494_s0 + $0x15] sm:$0x1]   ;;  %v701_v20 = vsel %vm79_vm6, %v1257_v56, %v697_v3 }
  0x31   :  { %v1196_v52 = vld [vmem:[%s2494_s0 + $0xd4] sm:$0x40]   ;;  %v1262_v61 = vld [vmem:[%s2494_s0 + $0x92] sm:$0x10]   ;;  %v451_v4 = vsel %vm71_vm4, %v1195_v49, %v447_v62  ;;  %v719_v5 = vsel %vm63_vm2, %v1261_v60, %v715_v0  ;;  %v1276_v7 = vld [vmem:[%s2494_s0 + $0x34] sm:$0x2]  }
  0x32   :  { %598 = vrot.lane.b32.xlu0 %v597_v39, %s1374_s30  ;;  %v1197_v63 = vld [vmem:[%s2494_s0 + $0xf3] sm:$0x80]   ;;  %v1263_v1 = vld [vmem:[%s2494_s0 + $0xb1] sm:$0x20]   ;;  %v1277_v8 = vld [vmem:[%s2494_s0 + $0x53] sm:$0x4]   ;;  %v455_v9 = vsel %vm75_vm5, %v1196_v52, %v451_v4  ;;  %v723_v10 = vsel %vm67_vm3, %v1262_v61, %v719_v5  ;;  %v780_v11 = vsel %vm55_vm0, %v1276_v7, %v1275_v6 }
  0x33   :  { %v1264_v2 = vld [vmem:[%s2494_s0 + $0xd0] sm:$0x40]   ;;  %633 = vrot.lane.b32.xlu1 %v632_v55, %s1375_s24  ;;  %v1278_v12 = vld [vmem:[%s2494_s0 + $0x72] sm:$0x8]   ;;  %v459_v14 = vsel %vm79_vm6, %v1197_v63, %v455_v9  ;;  %v727_v15 = vsel %vm71_vm4, %v1263_v1, %v723_v10  ;;  %v784_v17 = vsel %vm59_vm1, %v1277_v8, %v780_v11  ;;  %v1216_v19 = vld [vmem:[%s2494_s0 + $0x8] sm:$0x1]  }
  0x34   :  { %v1279_v13 = vld [vmem:[%s2494_s0 + $0x91] sm:$0x10]   ;;  %v1265_v16 = vld [vmem:[%s2494_s0 + $0xef] sm:$0x80]   ;;  %460 = vrot.lane.b32.xlu2 %v459_v14, %s1372_s8  ;;  %v731_v21 = vsel %vm75_vm5, %v1264_v2, %v727_v15  ;;  %v788_v22 = vsel %vm63_vm2, %v1278_v12, %v784_v17  ;;  %v1217_v23 = vld [vmem:[%s2494_s0 + $0x27] sm:$0x2]  }
  0x35   :  { %v1280_v18 = vld [vmem:[%s2494_s0 + $0xb0] sm:$0x20]   ;;  %v1218_v24 = vld [vmem:[%s2494_s0 + $0x46] sm:$0x4]   ;;  %v792_v26 = vsel %vm67_vm3, %v1279_v13, %v788_v22  ;;  %v539_v28 = vsel %vm55_vm0, %v1217_v23, %v1216_v19  ;;  %v1284_v34 = vld [vmem:[%s2494_s0 + $0x4] sm:$0x1]   ;;  %v735_v36 = vsel %vm79_vm6, %v1265_v16, %v731_v21 }
  0x36   :  { %v1219_v25 = vld [vmem:[%s2494_s0 + $0x65] sm:$0x8]   ;;  %v1281_v27 = vld [vmem:[%s2494_s0 + $0xcf] sm:$0x40]   ;;  %v796_v31 = vsel %vm71_vm4, %v1280_v18, %v792_v26  ;;  %v543_v32 = vsel %vm59_vm1, %v1218_v24, %v539_v28  ;;  %v1285_v35 = vld [vmem:[%s2494_s0 + $0x23] sm:$0x2]  }
  0x37   :  { %v1220_v29 = vld [vmem:[%s2494_s0 + $0x84] sm:$0x10]   ;;  %s1376_s26 = smov 48   ;;  %v547_v37 = vsel %vm63_vm2, %v1219_v25, %v543_v32  ;;  %v815_v38 = vsel %vm55_vm0, %v1285_v35, %v1284_v34  ;;  %v1286_v39 = vld [vmem:[%s2494_s0 + $0x42] sm:$0x4]   ;;  %v800_v47 = vsel %vm75_vm5, %v1281_v27, %v796_v31  ;;  %s1377_s14 = smov 40  }
  0x38   :  { %v1221_v30 = vld [vmem:[%s2494_s0 + $0xa3] sm:$0x20]   ;;  %v1287_v40 = vld [vmem:[%s2494_s0 + $0x61] sm:$0x8]   ;;  %v1282_v42 = vld [vmem:[%s2494_s0 + $0xee] sm:$0x80]   ;;  %v551_v43 = vsel %vm67_vm3, %v1220_v29, %v547_v37  ;;  %v819_v45 = vsel %vm59_vm1, %v1286_v39, %v815_v38 }
  0x39   :  { %v1222_v33 = vld [vmem:[%s2494_s0 + $0xc2] sm:$0x40]   ;;  %v1288_v41 = vld [vmem:[%s2494_s0 + $0x80] sm:$0x10]   ;;  %v555_v48 = vsel %vm71_vm4, %v1221_v30, %v551_v43  ;;  %v823_v49 = vsel %vm63_vm2, %v1287_v40, %v819_v45  ;;  %v1301_v51 = vld [vmem:[%s2494_s0 + $0x3] sm:$0x1]   ;;  %v804_v0 = vsel %vm79_vm6, %v1282_v42, %v800_v47 }
  0x3a   :  { %702 = vrot.lane.b32.xlu0 %v701_v20, %s1376_s26  ;;  %v1223_v44 = vld [vmem:[%s2494_s0 + $0xe1] sm:$0x80]   ;;  %v1289_v46 = vld [vmem:[%s2494_s0 + $0x9f] sm:$0x20]   ;;  %v1302_v52 = vld [vmem:[%s2494_s0 + $0x22] sm:$0x2]   ;;  %v559_v53 = vsel %vm75_vm5, %v1222_v33, %v555_v48  ;;  %v827_v54 = vsel %vm67_vm3, %v1288_v41, %v823_v49 }
  0x3b   :  { %v1290_v50 = vld [vmem:[%s2494_s0 + $0xbe] sm:$0x40]   ;;  %736 = vrot.lane.b32.xlu1 %v735_v36, %s1376_s26  ;;  %v884_v55 = vsel %vm55_vm0, %v1302_v52, %v1301_v51  ;;  %v1303_v56 = vld [vmem:[%s2494_s0 + $0x41] sm:$0x4]   ;;  %v563_v59 = vsel %vm79_vm6, %v1223_v44, %v559_v53  ;;  %v831_v60 = vsel %vm71_vm4, %v1289_v46, %v827_v54  ;;  %v1241_v3 = vld [vmem:[%s2494_s0 + $0x17] sm:$0x1]  }
  0x3c   :  { %v1304_v57 = vld [vmem:[%s2494_s0 + $0x60] sm:$0x8]   ;;  %v1291_v61 = vld [vmem:[%s2494_s0 + $0xdd] sm:$0x80]   ;;  %v888_v62 = vsel %vm59_vm1, %v1303_v56, %v884_v55  ;;  %564 = vrot.lane.b32.xlu2 %v563_v59, %s1374_s30  ;;  %v835_v1 = vsel %vm75_vm5, %v1290_v50, %v831_v60  ;;  %v1242_v4 = vld [vmem:[%s2494_s0 + $0x36] sm:$0x2]  }
  0x3d   :  { %v1305_v58 = vld [vmem:[%s2494_s0 + $0x7f] sm:$0x10]   ;;  %v892_v2 = vsel %vm63_vm2, %v1304_v57, %v888_v62  ;;  %v1243_v5 = vld [vmem:[%s2494_s0 + $0x55] sm:$0x4]   ;;  %v642_v8 = vsel %vm55_vm0, %v1242_v4, %v1241_v3  ;;  %v1309_v15 = vld [vmem:[%s2494_s0 + $0x13] sm:$0x1]   ;;  %v839_v16 = vsel %vm79_vm6, %v1291_v61, %v835_v1 }
  0x3e   :  { %v1306_v63 = vld [vmem:[%s2494_s0 + $0x9e] sm:$0x20]   ;;  %v896_v6 = vsel %vm67_vm3, %v1305_v58, %v892_v2  ;;  %v1244_v9 = vld [vmem:[%s2494_s0 + $0x74] sm:$0x8]   ;;  %v646_v12 = vsel %vm59_vm1, %v1243_v5, %v642_v8  ;;  %v1310_v18 = vld [vmem:[%s2494_s0 + $0x32] sm:$0x2]  }
  0x3f   :  { %v1307_v7 = vld [vmem:[%s2494_s0 + $0xbd] sm:$0x40]   ;;  %v1245_v10 = vld [vmem:[%s2494_s0 + $0x93] sm:$0x10]   ;;  %v900_v11 = vsel %vm71_vm4, %v1306_v63, %v896_v6  ;;  %v650_v17 = vsel %vm63_vm2, %v1244_v9, %v646_v12  ;;  %v1311_v19 = vld [vmem:[%s2494_s0 + $0x51] sm:$0x4]   ;;  %v918_v24 = vsel %vm55_vm0, %v1310_v18, %v1309_v15 }
  0x40   :  { %v1246_v13 = vld [vmem:[%s2494_s0 + $0xb2] sm:$0x20]   ;;  %v1312_v20 = vld [vmem:[%s2494_s0 + $0x70] sm:$0x8]   ;;  %v1308_v21 = vld [vmem:[%s2494_s0 + $0xdc] sm:$0x80]   ;;  %v654_v22 = vsel %vm67_vm3, %v1245_v10, %v650_v17  ;;  %v904_v26 = vsel %vm75_vm5, %v1307_v7, %v900_v11  ;;  %v922_v28 = vsel %vm59_vm1, %v1311_v19, %v918_v24 }
  0x41   :  { %v1247_v14 = vld [vmem:[%s2494_s0 + $0xd1] sm:$0x40]   ;;  %v1313_v25 = vld [vmem:[%s2494_s0 + $0x8f] sm:$0x10]   ;;  %v658_v27 = vsel %vm71_vm4, %v1246_v13, %v654_v22  ;;  %v1326_v31 = vld [vmem:[%s2494_s0 + $0x12] sm:$0x1]   ;;  %v926_v33 = vsel %vm63_vm2, %v1312_v20, %v922_v28  ;;  %v908_v42 = vsel %vm79_vm6, %v1308_v21, %v904_v26 }
  0x42   :  { %805 = vrot.lane.b32.xlu0 %v804_v0, %s1377_s14  ;;  %v1248_v23 = vld [vmem:[%s2494_s0 + $0xf0] sm:$0x80]   ;;  %v1314_v29 = vld [vmem:[%s2494_s0 + $0xae] sm:$0x20]   ;;  %s1378_s5 = smov 32   ;;  %v662_v32 = vsel %vm75_vm5, %v1247_v14, %v658_v27  ;;  %v930_v38 = vsel %vm67_vm3, %v1313_v25, %v926_v33  ;;  %s1379_s7 = smov 24  }
  0x43   :  { %v1315_v30 = vld [vmem:[%s2494_s0 + $0xcd] sm:$0x40]   ;;  %840 = vrot.lane.b32.xlu1 %v839_v16, %s1378_s5  ;;  %v1327_v34 = vld [vmem:[%s2494_s0 + $0x31] sm:$0x2]   ;;  %v666_v37 = vsel %vm79_vm6, %v1248_v23, %v662_v32  ;;  %v934_v43 = vsel %vm71_vm4, %v1314_v29, %v930_v38  ;;  %v1267_v46 = vld [vmem:[%s2494_s0 + $0x5] sm:$0x1]  }
  0x44   :  { %v1328_v35 = vld [vmem:[%s2494_s0 + $0x50] sm:$0x4]   ;;  %v1316_v39 = vld [vmem:[%s2494_s0 + $0xec] sm:$0x80]   ;;  %v987_v40 = vsel %vm55_vm0, %v1327_v34, %v1326_v31  ;;  %667 = vrot.lane.b32.xlu2 %v666_v37, %s1375_s24  ;;  %v1268_v47 = vld [vmem:[%s2494_s0 + $0x24] sm:$0x2]   ;;  %v938_v48 = vsel %vm75_vm5, %v1315_v30, %v934_v43 }
  0x45   :  { %v1329_v36 = vld [vmem:[%s2494_s0 + $0x6f] sm:$0x8]   ;;  %v991_v44 = vsel %vm59_vm1, %v1328_v35, %v987_v40  ;;  %v746_v50 = vsel %vm55_vm0, %v1268_v47, %v1267_v46  ;;  %v1269_v51 = vld [vmem:[%s2494_s0 + $0x43] sm:$0x4]   ;;  %v942_v59 = vsel %vm79_vm6, %v1316_v39, %v938_v48  ;;  %v1335_v63 = vld [vmem:[%s2494_s0 + $0x1] sm:$0x1]  }
  0x46   :  { %v1330_v41 = vld [vmem:[%s2494_s0 + $0x8e] sm:$0x10]   ;;  %v995_v49 = vsel %vm63_vm2, %v1329_v36, %v991_v44  ;;  %v1270_v52 = vld [vmem:[%s2494_s0 + $0x62] sm:$0x8]   ;;  %v750_v56 = vsel %vm59_vm1, %v1269_v51, %v746_v50  ;;  %v1336_v0 = vld [vmem:[%s2494_s0 + $0x20] sm:$0x2]  }
  0x47   :  { %v1331_v45 = vld [vmem:[%s2494_s0 + $0xad] sm:$0x20]   ;;  %v1271_v53 = vld [vmem:[%s2494_s0 + $0x81] sm:$0x10]   ;;  %v999_v54 = vsel %vm67_vm3, %v1330_v41, %v995_v49  ;;  %v754_v62 = vsel %vm63_vm2, %v1270_v52, %v750_v56  ;;  %v1337_v1 = vld [vmem:[%s2494_s0 + $0x3f] sm:$0x4]   ;;  %v1022_v4 = vsel %vm55_vm0, %v1336_v0, %v1335_v63 }
  0x48   :  { %v1332_v55 = vld [vmem:[%s2494_s0 + $0xcc] sm:$0x40]   ;;  %v1272_v57 = vld [vmem:[%s2494_s0 + $0xa0] sm:$0x20]   ;;  %v1003_v60 = vsel %vm71_vm4, %v1331_v45, %v999_v54  ;;  %v758_v2 = vsel %vm67_vm3, %v1271_v53, %v754_v62  ;;  %v1338_v5 = vld [vmem:[%s2494_s0 + $0x5e] sm:$0x8]   ;;  %v1026_v9 = vsel %vm59_vm1, %v1337_v1, %v1022_v4 }
  0x49   :  { %v1273_v58 = vld [vmem:[%s2494_s0 + $0xbf] sm:$0x40]   ;;  %v1333_v61 = vld [vmem:[%s2494_s0 + $0xeb] sm:$0x80]   ;;  %v1339_v6 = vld [vmem:[%s2494_s0 + $0x7d] sm:$0x10]   ;;  %v1007_v7 = vsel %vm75_vm5, %v1332_v55, %v1003_v60  ;;  %v762_v8 = vsel %vm71_vm4, %v1272_v57, %v758_v2  ;;  %v1030_v14 = vsel %vm63_vm2, %v1338_v5, %v1026_v9 }
  0x4a   :  { %909 = vrot.lane.b32.xlu0 %v908_v42, %s1379_s7  ;;  %v1274_v3 = vld [vmem:[%s2494_s0 + $0xde] sm:$0x80]   ;;  %v1340_v10 = vld [vmem:[%s2494_s0 + $0x9c] sm:$0x20]   ;;  %v1292_v12 = vld [vmem:[%s2494_s0 + $0x14] sm:$0x1]   ;;  %v766_v13 = vsel %vm75_vm5, %v1273_v58, %v762_v8  ;;  %v1034_v19 = vsel %vm67_vm3, %v1339_v6, %v1030_v14  ;;  %v1011_v24 = vsel %vm79_vm6, %v1333_v61, %v1007_v7 }
  0x4b   :  { %v1341_v11 = vld [vmem:[%s2494_s0 + $0xbb] sm:$0x40]   ;;  %943 = vrot.lane.b32.xlu1 %v942_v59, %s1379_s7  ;;  %v1293_v15 = vld [vmem:[%s2494_s0 + $0x33] sm:$0x2]   ;;  %v770_v18 = vsel %vm79_vm6, %v1274_v3, %v766_v13  ;;  %v1038_v25 = vsel %vm71_vm4, %v1340_v10, %v1034_v19  ;;  %v1318_v28 = vld [vmem:[%s2494_s0 + $0x2] sm:$0x1]  }
  0x4c   :  { %v1294_v16 = vld [vmem:[%s2494_s0 + $0x52] sm:$0x4]   ;;  %v1342_v20 = vld [vmem:[%s2494_s0 + $0xda] sm:$0x80]   ;;  %v849_v21 = vsel %vm55_vm0, %v1293_v15, %v1292_v12  ;;  %771 = vrot.lane.b32.xlu2 %v770_v18, %s1377_s14  ;;  %v1319_v29 = vld [vmem:[%s2494_s0 + $0x21] sm:$0x2]   ;;  %v1042_v30 = vsel %vm75_vm5, %v1341_v11, %v1038_v25 }
  0x4d   :  { %v1295_v17 = vld [vmem:[%s2494_s0 + $0x71] sm:$0x8]   ;;  %v853_v26 = vsel %vm59_vm1, %v1294_v16, %v849_v21  ;;  %v953_v32 = vsel %vm55_vm0, %v1319_v29, %v1318_v28  ;;  %v1320_v33 = vld [vmem:[%s2494_s0 + $0x40] sm:$0x4]   ;;  %s1380_s28 = smov 16   ;;  %v1046_v39 = vsel %vm79_vm6, %v1342_v20, %v1042_v30  ;;  %s1381_s10 = smov 8  }
  0x4e   :  { %v1296_v22 = vld [vmem:[%s2494_s0 + $0x90] sm:$0x10]   ;;  %v857_v31 = vsel %vm63_vm2, %v1295_v17, %v853_v26  ;;  %v1321_v34 = vld [vmem:[%s2494_s0 + $0x5f] sm:$0x8]   ;;  %v957_v38 = vsel %vm59_vm1, %v1320_v33, %v953_v32  ;;  %v1343_v42 = vld [vmem:[%s2494_s0 + $0x11] sm:$0x1]  }
  0x4f   :  { %v1297_v23 = vld [vmem:[%s2494_s0 + $0xaf] sm:$0x20]   ;;  %v1322_v35 = vld [vmem:[%s2494_s0 + $0x7e] sm:$0x10]   ;;  %v861_v36 = vsel %vm67_vm3, %v1296_v22, %v857_v31  ;;  %v961_v41 = vsel %vm63_vm2, %v1321_v34, %v957_v38  ;;  %v1344_v43 = vld [vmem:[%s2494_s0 + $0x30] sm:$0x2]  }
  0x50   :  { %v1298_v27 = vld [vmem:[%s2494_s0 + $0xce] sm:$0x40]   ;;  %v865_v40 = vsel %vm71_vm4, %v1297_v23, %v861_v36  ;;  %v1345_v44 = vld [vmem:[%s2494_s0 + $0x4f] sm:$0x4]   ;;  %v965_v46 = vsel %vm67_vm3, %v1322_v35, %v961_v41  ;;  %v1323_v47 = vld [vmem:[%s2494_s0 + $0x9d] sm:$0x20]   ;;  %v1056_v48 = vsel %vm55_vm0, %v1344_v43, %v1343_v42 }
  0x51   :  { %v1299_v37 = vld [vmem:[%s2494_s0 + $0xed] sm:$0x80]   ;;  %v869_v45 = vsel %vm75_vm5, %v1298_v27, %v865_v40  ;;  %v1060_v50 = vsel %vm59_vm1, %v1345_v44, %v1056_v48  ;;  %v1346_v51 = vld [vmem:[%s2494_s0 + $0x6e] sm:$0x8]   ;;  %v969_v52 = vsel %vm71_vm4, %v1323_v47, %v965_v46  ;;  %v1324_v53 = vld [vmem:[%s2494_s0 + $0xbc] sm:$0x40]  }
  0x52   :  { %1012 = vrot.lane.b32.xlu0 %v1011_v24, %s1380_s28  ;;  %v873_v49 = vsel %vm79_vm6, %v1299_v37, %v869_v45  ;;  %s4_s14 = smov 12  ;;  %v1064_v54 = vsel %vm63_vm2, %v1346_v51, %v1060_v50  ;;  %v1347_v55 = vld [vmem:[%s2494_s0 + $0x8d] sm:$0x10]   ;;  %s8_s16 = smov 48  ;;  %v973_v56 = vsel %vm75_vm5, %v1324_v53, %v969_v52  ;;  %v1325_v57 = vld [vmem:[%s2494_s0 + $0xdb] sm:$0x80]  }
  0x53   :  { %1047 = vrot.lane.b32.xlu1 %v1046_v39, %s1381_s10  ;;  %s25_s24 = smov 3  ;;  %v1348_v58 = vld [vmem:[%s2494_s0 + $0xac] sm:$0x20]   ;;  %s12_s25 = smov 192  ;;  %vm6_vm7 = vcmask 1043458   ;;  %v1068_v61 = vsel %vm67_vm3, %v1347_v55, %v1064_v54  ;;  %vm10_vm8 = vcmask 1045508   ;;  %v977_v1 = vsel %vm79_vm6, %v1325_v57, %v973_v56 }
  0x54   :  { %874 = vrot.lane.b32.xlu2 %v873_v49, %s1378_s5  ;;  %s2_s5 = smov 3  ;;  %s28_s26 = smov 12  ;;  %v5_v60 = vld [vmem:[%s2494_s0] ss:$16 sm:%s4_s14]   ;;  %vm14_vm9 = vcmask 1047558   ;;  %vm16_vm10 = vcmask 64512   ;;  %v1072_v6 = vsel %vm71_vm4, %v1348_v58, %v1068_v61 }
  0x55   :  { %s33_s9 = smov 48  ;;  %v3_v59 = vld [vmem:[%s2494_s0] ss:$16 sm:%s2_s5]   ;;  %s38_s3 = smov 192  ;;  %v1349_v7 = vld [vmem:[%s2494_s0 + $0xcb] sm:$0x40]  }
  0x56   :  { %v7_v62 = vsel %vm6_vm7, %v5_v60, %v3_v59  ;;  %v9_v63 = vld [vmem:[%s2494_s0] ss:$16 sm:%s8_s16]   ;;  %v1076_v13 = vsel %vm75_vm5, %v1349_v7, %v1072_v6  ;;  %v1350_v14 = vld [vmem:[%s2494_s0 + $0xea] sm:$0x80]   ;;  %vm83_vm11 = vcmask 1048512   ;;  %vm152_vm12 = vcmask 982912  }
  0x57   :  { %v1089_v0 = vld [vmem:[%s2494_s0 + $0x80] ss:$16 sm:%s25_s24]   ;;  %v11_v3 = vsel %vm10_vm8, %v9_v63, %v7_v62  ;;  %v1080_v15 = vsel %vm79_vm6, %v1350_v14, %v1076_v13  ;;  %vm221_vm13 = vcmask 917312   ;;  %vm290_vm14 = vcmask 851712  }
  0x58   :  { %v13_v2 = vld [vmem:[%s2494_s0] ss:$16 sm:%s12_s25]   ;;  %vm359_vm15 = vcmask 786112   ;;  %vm428_vm0 = vcmask 720512   ;;  %vm497_vm1 = vcmask 654912   ;;  %vm566_vm2 = vcmask 589312  }
  0x59   :  { %v1090_v4 = vld [vmem:[%s2494_s0 + $0x80] ss:$16 sm:%s28_s26]   ;;  %v15_v8 = vsel %vm14_vm9, %v13_v2, %v11_v3  ;;  %vm635_vm3 = vcmask 523712   ;;  %vm704_vm4 = vcmask 458112   ;;  %vm773_vm5 = vcmask 392512  }
  0x5a   :  { %v1091_v5 = vld [vmem:[%s2494_s0 + $0x80] ss:$16 sm:%s33_s9]   ;;  %v31_v9 = vsel %vm6_vm7, %v1090_v4, %v1089_v0  ;;  %17 = vst.msk [vmem:[%s2495_s1] ss:$8 sm:$0x3] %vm16_vm10, %v15_v8   ;;  %vm842_vm6 = vcmask 326912  }
  0x5b   :  { %v1092_v10 = vld [vmem:[%s2494_s0 + $0x80] ss:$16 sm:%s38_s3]   ;;  %v36_v11 = vsel %vm10_vm8, %v1091_v5, %v31_v9  ;;  %1086 = vst.msk [vmem:[%s2495_s1 - $0xf] ss:$8 sm:$0xc] %vm16_vm10, %v15_v8   ;;  %vm911_vm7 = vcmask 261312  }
  0x5c   :  { %978 = vrot.lane.b32.xlu2 %v977_v1, %s1380_s28  ;;  %v41_v12 = vsel %vm14_vm9, %v1092_v10, %v36_v11  ;;  %1087 = vst.msk [vmem:[%s2495_s1 - $0x1e] ss:$8 sm:$0x30] %vm16_vm10, %v15_v8   ;;  %vm980_vm8 = vcmask 195712   ;;  %vm1049_vm9 = vcmask 130112  }
  0x5d   :  { %1088 = vst.msk [vmem:[%s2495_s1 - $0x2d] ss:$8 sm:$0xc0] %vm16_vm10, %v15_v8  }
  0x5e   :  { %1093 = vst.msk [vmem:[%s2495_s1 + $0x4] ss:$8 sm:$0x3] %vm16_vm10, %v41_v12  }
  0x5f   :  { %1094 = vst.msk [vmem:[%s2495_s1 - $0xb] ss:$8 sm:$0xc] %vm16_vm10, %v41_v12  }
  0x60   :  { %1095 = vst.msk [vmem:[%s2495_s1 - $0x1a] ss:$8 sm:$0x30] %vm16_vm10, %v41_v12  }
  0x61   :  { %1096 = vst.msk [vmem:[%s2495_s1 - $0x29] ss:$8 sm:$0xc0] %vm16_vm10, %v41_v12  }
  0x64   :  { %1081 = vrot.lane.b32.xlu2 %v1080_v15, %s1381_s10 }
  0x75   :  { %v220_v16 = vpop.permute.xlu2 %219  }
  0x7c   :  { %v82_v17 = vpop.permute.xlu0 %81  }
  0x7d   :  { %84 = vst.msk [vmem:[%s2495_s1] sm:$0xff] %vm83_vm11, %v82_v17   ;;  %v151_v18 = vpop.permute.xlu1 %150  }
  0x7e   :  { %153 = vst.msk [vmem:[%s2495_s1] sm:$0xff] %vm152_vm12, %v151_v18   ;;  %v254_v19 = vpop.permute.xlu2 %253  }
  0x7f   :  { %222 = vst.msk [vmem:[%s2495_s1] sm:$0xff] %vm221_vm13, %v220_v16  }
  0x84   :  { %v116_v20 = vpop.permute.xlu0 %115  }
  0x85   :  { %1113 = vst.msk [vmem:[%s2495_s1 + $0x8] sm:$0xff] %vm83_vm11, %v116_v20   ;;  %v185_v21 = vpop.permute.xlu1 %184  }
  0x86   :  { %1130 = vst.msk [vmem:[%s2495_s1 + $0x8] sm:$0xff] %vm152_vm12, %v185_v21   ;;  %v358_v22 = vpop.permute.xlu2 %357  }
  0x87   :  { %1147 = vst.msk [vmem:[%s2495_s1 + $0x8] sm:$0xff] %vm221_vm13, %v254_v19  }
  0x8c   :  { %v289_v23 = vpop.permute.xlu0 %288  }
  0x8d   :  { %291 = vst.msk [vmem:[%s2495_s1] sm:$0xff] %vm290_vm14, %v289_v23   ;;  %v323_v24 = vpop.permute.xlu1 %322  }
  0x8e   :  { %360 = vst.msk [vmem:[%s2495_s1] sm:$0xff] %vm359_vm15, %v358_v22   ;;  %v461_v25 = vpop.permute.xlu2 %460  }
  0x8f   :  { %1164 = vst.msk [vmem:[%s2495_s1 + $0x8] sm:$0xff] %vm290_vm14, %v323_v24  }
  0x94   :  { %v392_v26 = vpop.permute.xlu0 %391  }
  0x95   :  { %1181 = vst.msk [vmem:[%s2495_s1 + $0x8] sm:$0xff] %vm359_vm15, %v392_v26   ;;  %v427_v27 = vpop.permute.xlu1 %426  }
  0x96   :  { %1198 = vst.msk [vmem:[%s2495_s1 + $0x8] sm:$0xff] %vm428_vm0, %v461_v25   ;;  %v565_v28 = vpop.permute.xlu2 %564  }
  0x97   :  { %429 = vst.msk [vmem:[%s2495_s1] sm:$0xff] %vm428_vm0, %v427_v27  }
  0x9c   :  { %v496_v29 = vpop.permute.xlu0 %495  }
  0x9d   :  { %498 = vst.msk [vmem:[%s2495_s1] sm:$0xff] %vm497_vm1, %v496_v29   ;;  %v530_v30 = vpop.permute.xlu1 %529  }
  0x9e   :  { %567 = vst.msk [vmem:[%s2495_s1] sm:$0xff] %vm566_vm2, %v565_v28   ;;  %v668_v31 = vpop.permute.xlu2 %667  }
  0x9f   :  { %1215 = vst.msk [vmem:[%s2495_s1 + $0x8] sm:$0xff] %vm497_vm1, %v530_v30  }
  0xa4   :  { %v599_v32 = vpop.permute.xlu0 %598  }
  0xa5   :  { %1232 = vst.msk [vmem:[%s2495_s1 + $0x8] sm:$0xff] %vm566_vm2, %v599_v32   ;;  %v634_v33 = vpop.permute.xlu1 %633  }
  0xa6   :  { %1249 = vst.msk [vmem:[%s2495_s1 + $0x8] sm:$0xff] %vm635_vm3, %v668_v31   ;;  %v772_v34 = vpop.permute.xlu2 %771  }
  0xa7   :  { %636 = vst.msk [vmem:[%s2495_s1] sm:$0xff] %vm635_vm3, %v634_v33  }
  0xac   :  { %v703_v35 = vpop.permute.xlu0 %702  }
  0xad   :  { %705 = vst.msk [vmem:[%s2495_s1] sm:$0xff] %vm704_vm4, %v703_v35   ;;  %v737_v36 = vpop.permute.xlu1 %736  }
  0xae   :  { %774 = vst.msk [vmem:[%s2495_s1] sm:$0xff] %vm773_vm5, %v772_v34   ;;  %v875_v37 = vpop.permute.xlu2 %874  }
  0xaf   :  { %1266 = vst.msk [vmem:[%s2495_s1 + $0x8] sm:$0xff] %vm704_vm4, %v737_v36  }
  0xb4   :  { %v806_v38 = vpop.permute.xlu0 %805  }
  0xb5   :  { %1283 = vst.msk [vmem:[%s2495_s1 + $0x8] sm:$0xff] %vm773_vm5, %v806_v38   ;;  %v841_v39 = vpop.permute.xlu1 %840  }
  0xb6   :  { %1300 = vst.msk [vmem:[%s2495_s1 + $0x8] sm:$0xff] %vm842_vm6, %v875_v37   ;;  %v979_v40 = vpop.permute.xlu2 %978  }
  0xb7   :  { %843 = vst.msk [vmem:[%s2495_s1] sm:$0xff] %vm842_vm6, %v841_v39  }
  0xbc   :  { %v910_v41 = vpop.permute.xlu0 %909  }
  0xbd   :  { %912 = vst.msk [vmem:[%s2495_s1] sm:$0xff] %vm911_vm7, %v910_v41   ;;  %v944_v42 = vpop.permute.xlu1 %943  }
  0xbe   :  { %981 = vst.msk [vmem:[%s2495_s1] sm:$0xff] %vm980_vm8, %v979_v40   ;;  %v1082_v43 = vpop.permute.xlu2 %1081  }
  0xbf   :  { %1317 = vst.msk [vmem:[%s2495_s1 + $0x8] sm:$0xff] %vm911_vm7, %v944_v42  }
  0xc4   :  { %v1013_v44 = vpop.permute.xlu0 %1012  }
  0xc5   :  { %1334 = vst.msk [vmem:[%s2495_s1 + $0x8] sm:$0xff] %vm980_vm8, %v1013_v44   ;;  %v1048_v45 = vpop.permute.xlu1 %1047  }
  0xc6   :  { %1351 = vst.msk [vmem:[%s2495_s1 + $0x8] sm:$0xff] %vm1049_vm9, %v1082_v43  }
  0xc7   :  { %1050 = vst.msk [vmem:[%s2495_s1] sm:$0xff] %vm1049_vm9, %v1048_v45  }

// kernel: generator_forward.1
= control target key start
LH: loop header
LB: loop body
LE: loop exit
PB: predicated region body
PF: predicated region fallthrough
CT: control target
= control target key end

     0   :  { %vm95_vm0 = vcmask 261120   ;;  %vm195_vm1 = vcmask 1041408   ;;  %vm191_vm2 = vcmask 15360   ;;  %vm495_vm3 = vcmask 64512   ;;  %s13904_s1 = inlined_call_operand.vmem [shape: f32[4,32,256], index: 1, kind: input, shape index: {}]   ;;  %s13905_s0 = inlined_call_operand.vmem [shape: f32[2,32], index: 0, kind: input, shape index: {}]   ;;  %s13906_s2 = inlined_call_operand.vmem [shape: f32[4,8,2], index: 2, kind: input, shape index: {}]   ;;  %s13907_s3 = inlined_call_operand.vmem [shape: f32[256,64], index: 3, kind: input, shape index: {}]   ;;  %s13908_s4 = inlined_call_operand.vmem [shape: f32[64,256], index: 4, kind: input, shape index: {}]   ;;  %s13909_s7 = inlined_call_operand.vmem [shape: f32[4,256,256], index: 7, kind: input, shape index: {}]   ;;  %s13910_s5 = inlined_call_operand.vmem [shape: f32[1,64], index: 5, kind: input, shape index: {}]   ;;  %s13911_s6 = inlined_call_operand.vmem [shape: f32[1,64], index: 6, kind: input, shape index: {}]   ;;  %s13912_s8 = inlined_call_operand.vmem [shape: f32[4,16,8], index: 8, kind: input, shape index: {}]   ;;  %s13913_s9 = inlined_call_operand.vmem [shape: f32[256,32], index: 9, kind: input, shape index: {}]   ;;  %s13914_s10 = inlined_call_operand.vmem [shape: f32[32,256], index: 10, kind: input, shape index: {}]   ;;  %s13915_s13 = inlined_call_operand.vmem [shape: f32[4,256,256], index: 13, kind: input, shape index: {}]   ;;  %s13916_s11 = inlined_call_operand.vmem [shape: f32[1,32], index: 11, kind: input, shape index: {}]   ;;  %s13917_s12 = inlined_call_operand.vmem [shape: f32[1,32], index: 12, kind: input, shape index: {}]   ;;  %s13918_s14 = inlined_call_operand.vmem [shape: f32[4,32,16], index: 14, kind: input, shape index: {}]   ;;  %s13919_s15 = inlined_call_operand.vmem [shape: f32[256,16], index: 15, kind: input, shape index: {}]   ;;  %s13920_s16 = inlined_call_operand.vmem [shape: f32[16,256], index: 16, kind: input, shape index: {}]   ;;  %s13921_s19 = inlined_call_operand.vmem [shape: f32[4,256,256], index: 19, kind: input, shape index: {}]   ;;  %s13922_s17 = inlined_call_operand.vmem [shape: f32[1,16], index: 17, kind: input, shape index: {}]   ;;  %s13923_s18 = inlined_call_operand.vmem [shape: f32[1,16], index: 18, kind: input, shape index: {}]   ;;  %s13924_s20 = inlined_call_operand.vmem [shape: f32[4,64,32], index: 20, kind: input, shape index: {}]   ;;  %s13925_s21 = inlined_call_operand.vmem [shape: f32[256,8], index: 21, kind: input, shape index: {}]   ;;  %s13926_s22 = inlined_call_operand.vmem [shape: f32[8,256], index: 22, kind: input, shape index: {}]   ;;  %s13927_s25 = inlined_call_operand.vmem [shape: f32[4,256,256], index: 25, kind: input, shape index: {}]   ;;  %s13928_s23 = inlined_call_operand.vmem [shape: f32[1,8], index: 23, kind: input, shape index: {}]   ;;  %s13929_s24 = inlined_call_operand.vmem [shape: f32[1,8], index: 24, kind: input, shape index: {}]   ;;  %s13930_s26 = inlined_call_operand.vmem [shape: f32[4,128,64], index: 26, kind: input, shape index: {}]   ;;  %s13931_s27 = inlined_call_operand.vmem [shape: f32[128,256], index: 27, kind: output, shape index: {}]  }
   0x1   :  { %13943 = sst [smem:[#allocation48_spill]] %s13904_s1  ;;  %v13941_v61 = vmov 1.0   ;;  %vm729_vm7 = vcmask 523264   ;;  %vm1632_vm8 = vcmask 130048  }
   0x2   :  { %13944 = sst [smem:[#allocation49_spill]] %s13905_s0 }
   0x3   :  { %13945 = sst [smem:[#allocation50_spill]] %s13906_s2 }
   0x4   :  { %13946 = sst [smem:[#allocation51_spill]] %s13907_s3 }
   0x5   :  { %13947 = sst [smem:[#allocation52_spill]] %s13908_s4 }
   0x6   :  { %13948 = sst [smem:[#allocation53_spill]] %s13909_s7 }
   0x7   :  { %13949 = sst [smem:[#allocation54_spill]] %s13910_s5 }
   0x8   :  { %13950 = sst [smem:[#allocation55_spill]] %s13911_s6 }
   0x9   :  { %13951 = sst [smem:[#allocation56_spill]] %s13912_s8 }
   0xa   :  { %13952 = sst [smem:[#allocation57_spill]] %s13913_s9 }
   0xb   :  { %13953 = sst [smem:[#allocation58_spill]] %s13914_s10 }
   0xc   :  { %13954 = sst [smem:[#allocation59_spill]] %s13915_s13 }
   0xd   :  { %s13955_s8 = sld [smem:[#allocation48_spill]] }
   0xe   :  { %s13956_s0 = sld [smem:[#allocation49_spill]] }
   0xf   :  { %s13957_s1 = sld [smem:[#allocation50_spill]] }
  0x10   :  { %s13958_s29 = sld [smem:[#allocation51_spill]] }
  0x11   :  { %s13959_s7 = sld [smem:[#allocation52_spill]] }
  0x12   :  { %s13961_s5 = sld [smem:[#allocation54_spill]] }
  0x13   :  { %v93_v0 = vld [vmem:[%s13955_s8 + $0x30] sm:$0xff]  ;;  %v94_v1 = vld [vmem:[%s13955_s8 + $0x38] sm:$0xff]  ;;  %v91_v4 = vld [vmem:[%s13955_s8 + $0x20] sm:$0xff]  ;;  %s13962_s13 = sld [smem:[#allocation55_spill]] }
  0x14   :  { %v6661_v2 = vld [vmem:[%s13955_s8 + $0x70] sm:$0xff]  ;;  %111 = vmatpush.msra.mxu0 %v93_v0  ;;  %131 = vmatpush.msra.mxu1 %v94_v1  ;;  %v6662_v3 = vld [vmem:[%s13955_s8 + $0x78] sm:$0xff]  ;;  %v92_v5 = vld [vmem:[%s13955_s8 + $0x28] sm:$0xff]  ;;  %s13964_s4 = sld [smem:[#allocation57_spill]] }
  0x15   :  { %161 = vmatpush.msra.mxu2 %v6661_v2  ;;  %181 = vmatpush.msra.mxu3 %v6662_v3  ;;  %v6659_v6 = vld [vmem:[%s13955_s8 + $0x60] sm:$0xff]  ;;  %v6660_v7 = vld [vmem:[%s13955_s8 + $0x68] sm:$0xff]  ;;  %v89_v8 = vld [vmem:[%s13955_s8 + $0x10] sm:$0xff]  ;;  %s13966_s3 = sld [smem:[#allocation59_spill]] }
  0x16   :  { %112 = vmatpush.msra.mxu0 %v91_v4  ;;  %132 = vmatpush.msra.mxu1 %v92_v5  ;;  %v90_v9 = vld [vmem:[%s13955_s8 + $0x18] sm:$0xff]  ;;  %v6657_v10 = vld [vmem:[%s13955_s8 + $0x50] sm:$0xff]  ;;  %v87_v12 = vld [vmem:[%s13955_s8] sm:$0xff] }
  0x17   :  { %v6658_v11 = vld [vmem:[%s13955_s8 + $0x58] sm:$0xff]  ;;  %162 = vmatpush.msra.mxu2 %v6659_v6  ;;  %182 = vmatpush.msra.mxu3 %v6660_v7  ;;  %v88_v13 = vld [vmem:[%s13955_s8 + $0x8] sm:$0xff]  ;;  %v6655_v14 = vld [vmem:[%s13955_s8 + $0x40] sm:$0xff] }
  0x18   :  { %113 = vmatpush.msra.mxu0 %v89_v8  ;;  %133 = vmatpush.msra.mxu1 %v90_v9  ;;  %v6656_v15 = vld [vmem:[%s13955_s8 + $0x48] sm:$0xff]  ;;  %v86_v16 = vld [vmem:[%s13956_s0] sm:$0x3]  ;;  %v6680_v23 = vld [vmem:[%s13955_s8 + $0xb0] sm:$0xff] }
  0x19   :  { %163 = vmatpush.msra.mxu2 %v6657_v10  ;;  %183 = vmatpush.msra.mxu3 %v6658_v11  ;;  %v139_v17 = vld [vmem:[%s13957_s1] sm:$0xff]  ;;  %v6665_v20 = vld [vmem:[%s13957_s1 + $0x8] sm:$0xff]  ;;  %v6681_v24 = vld [vmem:[%s13955_s8 + $0xb8] sm:$0xff] }
  0x1a   :  { %114 = vmatpush.msra.mxu0 %v87_v12  ;;  %134 = vmatpush.msra.mxu1 %v88_v13  ;;  %v6678_v25 = vld [vmem:[%s13955_s8 + $0xa0] sm:$0xff]  ;;  %v6679_v26 = vld [vmem:[%s13955_s8 + $0xa8] sm:$0xff]  ;;  %v6676_v27 = vld [vmem:[%s13955_s8 + $0x90] sm:$0xff] }
  0x1b   :  { %164 = vmatpush.msra.mxu2 %v6655_v14  ;;  %184 = vmatpush.msra.mxu3 %v6656_v15  ;;  %v6677_v28 = vld [vmem:[%s13955_s8 + $0x98] sm:$0xff]  ;;  %v6674_v29 = vld [vmem:[%s13955_s8 + $0x80] sm:$0xff]  ;;  %v6675_v30 = vld [vmem:[%s13955_s8 + $0x88] sm:$0xff] }
  0x1c   :  { %6653 = vmatmul.msk.f32.vlgmr.msra.gmra.mxu0 %vm95_vm0, %v86_v16  ;;  %6654 = vmatmul.msk.f32.vlgmr.msra.gmra.mxu1 %vm95_vm0, %v86_v16  ;;  %v6695_v31 = vld [vmem:[%s13955_s8 + $0xf0] sm:$0xff]  ;;  %v6696_v32 = vld [vmem:[%s13955_s8 + $0xf8] sm:$0xff]  ;;  %v6693_v33 = vld [vmem:[%s13955_s8 + $0xe0] sm:$0xff] }
  0x1d   :  { %6663 = vmatmul.msk.f32.vlgmr.msra.gmra.mxu2 %vm95_vm0, %v86_v16  ;;  %6664 = vmatmul.msk.f32.vlgmr.msra.gmra.mxu3 %vm95_vm0, %v86_v16  ;;  %v6694_v34 = vld [vmem:[%s13955_s8 + $0xe8] sm:$0xff]  ;;  %v6691_v35 = vld [vmem:[%s13955_s8 + $0xd0] sm:$0xff]  ;;  %v6692_v36 = vld [vmem:[%s13955_s8 + $0xd8] sm:$0xff] }
  0x1e   :  { %v6689_v37 = vld [vmem:[%s13955_s8 + $0xc0] sm:$0xff]  ;;  %v6690_v38 = vld [vmem:[%s13955_s8 + $0xc8] sm:$0xff]  ;;  %v6684_v41 = vld [vmem:[%s13957_s1 + $0x10] sm:$0xff] }
  0x1f   :  { %v6699_v44 = vld [vmem:[%s13957_s1 + $0x18] sm:$0xff]  ;;  %v595_v0 = vld [vmem:[%s13958_s29 + $0x70] sm:$0xff]  ;;  %v594_v2 = vld [vmem:[%s13958_s29 + $0x68] sm:$0xff]  ;;  %s13960_s1 = sld [smem:[#allocation53_spill]] }
  0x20   :  { %v596_v62 = vld [vmem:[%s13958_s29 + $0x78] sm:$0xff]  ;;  %v611_v1 = vld [vmem:[%s13958_s29 + $0xf0] sm:$0xff]  ;;  %v610_v3 = vld [vmem:[%s13958_s29 + $0xe8] sm:$0xff] }
  0x21   :  { %v612_v63 = vld [vmem:[%s13958_s29 + $0xf8] sm:$0xff]  ;;  %v593_v4 = vld [vmem:[%s13958_s29 + $0x60] sm:$0xff]  ;;  %v591_v8 = vld [vmem:[%s13958_s29 + $0x50] sm:$0xff] }
  0x22   :  { %v609_v5 = vld [vmem:[%s13958_s29 + $0xe0] sm:$0xff]  ;;  %v592_v6 = vld [vmem:[%s13958_s29 + $0x58] sm:$0xff]  ;;  %v607_v9 = vld [vmem:[%s13958_s29 + $0xd0] sm:$0xff] }
  0x23   :  { %v608_v7 = vld [vmem:[%s13958_s29 + $0xd8] sm:$0xff]  ;;  %v590_v10 = vld [vmem:[%s13958_s29 + $0x48] sm:$0xff]  ;;  %v589_v12 = vld [vmem:[%s13958_s29 + $0x40] sm:$0xff] }
  0x24   :  { %v606_v11 = vld [vmem:[%s13958_s29 + $0xc8] sm:$0xff]  ;;  %v605_v13 = vld [vmem:[%s13958_s29 + $0xc0] sm:$0xff]  ;;  %v588_v14 = vld [vmem:[%s13958_s29 + $0x38] sm:$0xff] }
  0x25   :  { %v604_v15 = vld [vmem:[%s13958_s29 + $0xb8] sm:$0xff] }
  0x99   :  { %v116_v18 = vpop.f32.mrf.mxu0  ;;  %v136_v19 = vpop.f32.mrf.mxu1 }
  0x9a   :  { %6670 = vmatpush.msk.msrb.mxu2 %vm195_vm1, %v116_v18  ;;  %6672 = vmatpush.msk.msrb.mxu3 %vm195_vm1, %v136_v19  ;;  %v586_v18 = vld [vmem:[%s13958_s29 + $0x28] sm:$0xff] }
  0x9b   :  { %6671 = vmatmul.msk.f32.vlgmr.msrb.gmra.mxu2 %vm191_vm2, %v139_v17  ;;  %6673 = vmatmul.msk.f32.vlgmr.msrb.gmra.mxu3 %vm191_vm2, %v139_v17  ;;  %v603_v17 = vld [vmem:[%s13958_s29 + $0xb0] sm:$0xff]  ;;  %v602_v19 = vld [vmem:[%s13958_s29 + $0xa8] sm:$0xff] }
  0xa0   :  { %v166_v21 = vpop.f32.mrf.mxu2  ;;  %v186_v22 = vpop.f32.mrf.mxu3 }
  0xa1   :  { %6666 = vmatpush.msk.msrb.mxu0 %vm195_vm1, %v166_v21  ;;  %6668 = vmatpush.msk.msrb.mxu1 %vm195_vm1, %v186_v22  ;;  %v601_v21 = vld [vmem:[%s13958_s29 + $0xa0] sm:$0xff]  ;;  %v584_v22 = vld [vmem:[%s13958_s29 + $0x18] sm:$0xff] }
  0xa2   :  { %6667 = vmatmul.msk.f32.vlgmr.msrb.gmra.mxu0 %vm191_vm2, %v6665_v20  ;;  %6669 = vmatmul.msk.f32.vlgmr.msrb.gmra.mxu1 %vm191_vm2, %v6665_v20  ;;  %v585_v20 = vld [vmem:[%s13958_s29 + $0x20] sm:$0xff] }
  0xa3   :  { %312 = vmatpush.msra.mxu0 %v6680_v23  ;;  %332 = vmatpush.msra.mxu1 %v6681_v24  ;;  %v600_v23 = vld [vmem:[%s13958_s29 + $0x98] sm:$0xff]  ;;  %v583_v24 = vld [vmem:[%s13958_s29 + $0x10] sm:$0xff] }
  0xa5   :  { %313 = vmatpush.msra.mxu0 %v6678_v25  ;;  %333 = vmatpush.msra.mxu1 %v6679_v26  ;;  %v599_v25 = vld [vmem:[%s13958_s29 + $0x90] sm:$0xff]  ;;  %v582_v26 = vld [vmem:[%s13958_s29 + $0x8] sm:$0xff] }
  0xa7   :  { %314 = vmatpush.msra.mxu0 %v6676_v27  ;;  %334 = vmatpush.msra.mxu1 %v6677_v28  ;;  %v598_v27 = vld [vmem:[%s13958_s29 + $0x88] sm:$0xff]  ;;  %v581_v28 = vld [vmem:[%s13958_s29] sm:$0xff] }
  0xa9   :  { %315 = vmatpush.msra.mxu0 %v6674_v29  ;;  %335 = vmatpush.msra.mxu1 %v6675_v30  ;;  %v597_v29 = vld [vmem:[%s13958_s29 + $0x80] sm:$0xff] }
  0xaa   :  { %6682 = vmatmul.msk.f32.vlgmr.msra.gmra.mxu0 %vm95_vm0, %v86_v16  ;;  %6683 = vmatmul.msk.f32.vlgmr.msra.gmra.mxu1 %vm95_vm0, %v86_v16 }
  0xab   :  { %414 = vmatpush.msrb.mxu0 %v6695_v31  ;;  %434 = vmatpush.msrb.mxu1 %v6696_v32 }
  0xad   :  { %415 = vmatpush.msrb.mxu0 %v6693_v33  ;;  %435 = vmatpush.msrb.mxu1 %v6694_v34  ;;  %v727_v34 = vld [vmem:[%s13959_s7 + $0x70] sm:$0xff] }
  0xaf   :  { %416 = vmatpush.msrb.mxu0 %v6691_v35  ;;  %436 = vmatpush.msrb.mxu1 %v6692_v36  ;;  %v728_v35 = vld [vmem:[%s13959_s7 + $0x78] sm:$0xff]  ;;  %v725_v36 = vld [vmem:[%s13959_s7 + $0x60] sm:$0xff] }
  0xb1   :  { %417 = vmatpush.msrb.mxu0 %v6689_v37  ;;  %437 = vmatpush.msrb.mxu1 %v6690_v38  ;;  %v726_v37 = vld [vmem:[%s13959_s7 + $0x68] sm:$0xff]  ;;  %v723_v38 = vld [vmem:[%s13959_s7 + $0x50] sm:$0xff] }
  0xb2   :  { %6697 = vmatmul.msk.f32.vlgmr.msrb.gmra.mxu0 %vm95_vm0, %v86_v16  ;;  %6698 = vmatmul.msk.f32.vlgmr.msrb.gmra.mxu1 %vm95_vm0, %v86_v16  ;;  %v587_v16 = vld [vmem:[%s13958_s29 + $0x30] sm:$0xff]  ;;  %s13963_s29 = sld [smem:[#allocation56_spill]] }
 0x11e   :  { %v268_v47 = vpop.f32.mrf.mxu2  ;;  %v288_v48 = vpop.f32.mrf.mxu3 }
 0x11f   :  { %v219_v39 = vpop.f32.mrf.mxu0  ;;  %v239_v40 = vpop.f32.mrf.mxu1 }
 0x120   :  { %v269_v51 = vadd.f32 %v268_v47, %v219_v39  ;;  %v289_v52 = vadd.f32 %v288_v48, %v239_v40  ;;  %v724_v39 = vld [vmem:[%s13959_s7 + $0x58] sm:$0xff]  ;;  %v721_v40 = vld [vmem:[%s13959_s7 + $0x40] sm:$0xff]  ;;  %v718_v47 = vld [vmem:[%s13959_s7 + $0x28] sm:$0xff] }
 0x127   :  { %v317_v42 = vpop.f32.mrf.mxu0  ;;  %v337_v43 = vpop.f32.mrf.mxu1 }
 0x128   :  { %6685 = vmatpush.msk.msra.mxu2 %vm195_vm1, %v317_v42  ;;  %6687 = vmatpush.msk.msra.mxu3 %vm195_vm1, %v337_v43  ;;  %v719_v42 = vld [vmem:[%s13959_s7 + $0x30] sm:$0xff]  ;;  %v720_v43 = vld [vmem:[%s13959_s7 + $0x38] sm:$0xff] }
 0x129   :  { %6686 = vmatmul.msk.f32.vlgmr.msra.gmra.mxu2 %vm191_vm2, %v6684_v41  ;;  %6688 = vmatmul.msk.f32.vlgmr.msra.gmra.mxu3 %vm191_vm2, %v6684_v41  ;;  %v722_v41 = vld [vmem:[%s13959_s7 + $0x48] sm:$0xff] }
 0x12f   :  { %v419_v45 = vpop.f32.mrf.mxu0  ;;  %v439_v46 = vpop.f32.mrf.mxu1 }
 0x130   :  { %6700 = vmatpush.msk.msrb.mxu2 %vm195_vm1, %v419_v45  ;;  %6702 = vmatpush.msk.msrb.mxu3 %vm195_vm1, %v439_v46  ;;  %v717_v46 = vld [vmem:[%s13959_s7 + $0x20] sm:$0xff] }
 0x131   :  { %6701 = vmatmul.msk.f32.vlgmr.msrb.gmra.mxu2 %vm191_vm2, %v6699_v44  ;;  %6703 = vmatmul.msk.f32.vlgmr.msrb.gmra.mxu3 %vm191_vm2, %v6699_v44 }
 0x1ac   :  { %v368_v49 = vpop.f32.mrf.mxu2  ;;  %v388_v50 = vpop.f32.mrf.mxu3 }
 0x1ad   :  { %v391_v53 = vadd.f32 %v368_v49, %v269_v51  ;;  %v392_v54 = vadd.f32 %v388_v50, %v289_v52  ;;  %v715_v49 = vld [vmem:[%s13959_s7 + $0x10] sm:$0xff]  ;;  %v716_v50 = vld [vmem:[%s13959_s7 + $0x18] sm:$0xff]  ;;  %v713_v51 = vld [vmem:[%s13959_s7] sm:$0xff] }
 0x1ae   :  { %v714_v52 = vld [vmem:[%s13959_s7 + $0x8] sm:$0xff] }
 0x1b4   :  { %v470_v55 = vpop.f32.mrf.mxu2  ;;  %v490_v56 = vpop.f32.mrf.mxu3 }
 0x1b5   :  { %v8183_v57 = vadd.f32 %v470_v55, %v391_v53  ;;  %v8185_v58 = vadd.f32 %v490_v56, %v392_v54 }
 0x1b7   :  { %v539_v59 = vmul.f32 %v8183_v57, %v8183_v57  ;;  %v540_v60 = vmul.f32 %v8185_v58, %v8185_v58  ;;  %514 = vmatpush.msra.mxu0 %v8183_v57  ;;  %534 = vmatpush.msra.mxu1 %v8185_v58 }
 0x1b8   :  { %6704 = vmatmul.msk.f32.vlgmr.msra.gmra.mxu0 %vm495_vm3, %v13941_v61  ;;  %6705 = vmatmul.msk.f32.vlgmr.msra.gmra.mxu1 %vm495_vm3, %v13941_v61 }
 0x1b9   :  { %556 = vmatpush.msra.mxu2 %v539_v59  ;;  %576 = vmatpush.msra.mxu3 %v540_v60  ;;  %v856_v60 = vld [vmem:[%s13960_s1 + $0xf0] sm:$0xff] }
 0x1ba   :  { %6706 = vmatmul.msk.f32.vlgmr.msra.gmra.mxu2 %vm495_vm3, %v13941_v61  ;;  %6707 = vmatmul.msk.f32.vlgmr.msra.gmra.mxu3 %vm495_vm3, %v13941_v61 }
 0x1bb   :  { %654 = vmatpush.msrb.mxu2 %v596_v62  ;;  %674 = vmatpush.msrb.mxu3 %v612_v63 }
 0x1bc   :  { %613 = vmatpush.msrb.mxu0 %v596_v62  ;;  %633 = vmatpush.msrb.mxu1 %v612_v63  ;;  %v888_v62 = vld [vmem:[%s13960_s1 + $0x1f0] sm:$0xff]  ;;  %v857_v63 = vld [vmem:[%s13960_s1 + $0xf8] sm:$0xff] }
 0x1bd   :  { %655 = vmatpush.msrb.mxu2 %v595_v0  ;;  %675 = vmatpush.msrb.mxu3 %v611_v1 }
 0x1be   :  { %614 = vmatpush.msrb.mxu0 %v595_v0  ;;  %634 = vmatpush.msrb.mxu1 %v611_v1  ;;  %v889_v0 = vld [vmem:[%s13960_s1 + $0x1f8] sm:$0xff]  ;;  %v854_v1 = vld [vmem:[%s13960_s1 + $0xe0] sm:$0xff] }
 0x1bf   :  { %656 = vmatpush.msrb.mxu2 %v594_v2  ;;  %676 = vmatpush.msrb.mxu3 %v610_v3 }
 0x1c0   :  { %615 = vmatpush.msrb.mxu0 %v594_v2  ;;  %635 = vmatpush.msrb.mxu1 %v610_v3  ;;  %v886_v2 = vld [vmem:[%s13960_s1 + $0x1e0] sm:$0xff] }
 0x1c1   :  { %657 = vmatpush.msrb.mxu2 %v593_v4  ;;  %677 = vmatpush.msrb.mxu3 %v609_v5 }
 0x1c2   :  { %616 = vmatpush.msrb.mxu0 %v593_v4  ;;  %636 = vmatpush.msrb.mxu1 %v609_v5  ;;  %v855_v4 = vld [vmem:[%s13960_s1 + $0xe8] sm:$0xff] }
 0x1c3   :  { %658 = vmatpush.msrb.mxu2 %v592_v6  ;;  %678 = vmatpush.msrb.mxu3 %v608_v7  ;;  %v887_v5 = vld [vmem:[%s13960_s1 + $0x1e8] sm:$0xff] }
 0x1c4   :  { %617 = vmatpush.msrb.mxu0 %v592_v6  ;;  %637 = vmatpush.msrb.mxu1 %v608_v7  ;;  %v852_v6 = vld [vmem:[%s13960_s1 + $0xd0] sm:$0xff] }
 0x1c5   :  { %659 = vmatpush.msrb.mxu2 %v591_v8  ;;  %679 = vmatpush.msrb.mxu3 %v607_v9  ;;  %v884_v7 = vld [vmem:[%s13960_s1 + $0x1d0] sm:$0xff] }
 0x1c6   :  { %618 = vmatpush.msrb.mxu0 %v591_v8  ;;  %638 = vmatpush.msrb.mxu1 %v607_v9  ;;  %v853_v8 = vld [vmem:[%s13960_s1 + $0xd8] sm:$0xff] }
 0x1c7   :  { %660 = vmatpush.msrb.mxu2 %v590_v10  ;;  %680 = vmatpush.msrb.mxu3 %v606_v11  ;;  %v885_v9 = vld [vmem:[%s13960_s1 + $0x1d8] sm:$0xff] }
 0x1c8   :  { %619 = vmatpush.msrb.mxu0 %v590_v10  ;;  %639 = vmatpush.msrb.mxu1 %v606_v11  ;;  %v850_v11 = vld [vmem:[%s13960_s1 + $0xc0] sm:$0xff] }
 0x1c9   :  { %661 = vmatpush.msrb.mxu2 %v589_v12  ;;  %681 = vmatpush.msrb.mxu3 %v605_v13 }
 0x1ca   :  { %620 = vmatpush.msrb.mxu0 %v589_v12  ;;  %640 = vmatpush.msrb.mxu1 %v605_v13  ;;  %v882_v12 = vld [vmem:[%s13960_s1 + $0x1c0] sm:$0xff]  ;;  %v851_v13 = vld [vmem:[%s13960_s1 + $0xc8] sm:$0xff] }
 0x1cb   :  { %662 = vmatpush.msrb.mxu2 %v588_v14  ;;  %682 = vmatpush.msrb.mxu3 %v604_v15 }
 0x1cc   :  { %621 = vmatpush.msrb.mxu0 %v588_v14  ;;  %641 = vmatpush.msrb.mxu1 %v604_v15  ;;  %v883_v14 = vld [vmem:[%s13960_s1 + $0x1c8] sm:$0xff] }
 0x1cd   :  { %663 = vmatpush.msrb.mxu2 %v587_v16  ;;  %683 = vmatpush.msrb.mxu3 %v603_v17 }
 0x1ce   :  { %622 = vmatpush.msrb.mxu0 %v587_v16  ;;  %642 = vmatpush.msrb.mxu1 %v603_v17  ;;  %v848_v16 = vld [vmem:[%s13960_s1 + $0xb0] sm:$0xff] }
 0x1cf   :  { %664 = vmatpush.msrb.mxu2 %v586_v18  ;;  %684 = vmatpush.msrb.mxu3 %v602_v19  ;;  %v880_v17 = vld [vmem:[%s13960_s1 + $0x1b0] sm:$0xff] }
 0x1d0   :  { %623 = vmatpush.msrb.mxu0 %v586_v18  ;;  %643 = vmatpush.msrb.mxu1 %v602_v19  ;;  %v849_v18 = vld [vmem:[%s13960_s1 + $0xb8] sm:$0xff] }
 0x1d1   :  { %665 = vmatpush.msrb.mxu2 %v585_v20  ;;  %685 = vmatpush.msrb.mxu3 %v601_v21  ;;  %v881_v19 = vld [vmem:[%s13960_s1 + $0x1b8] sm:$0xff] }
 0x1d2   :  { %624 = vmatpush.msrb.mxu0 %v585_v20  ;;  %644 = vmatpush.msrb.mxu1 %v601_v21  ;;  %v846_v20 = vld [vmem:[%s13960_s1 + $0xa0] sm:$0xff] }
 0x1d3   :  { %666 = vmatpush.msrb.mxu2 %v584_v22  ;;  %686 = vmatpush.msrb.mxu3 %v600_v23  ;;  %v878_v21 = vld [vmem:[%s13960_s1 + $0x1a0] sm:$0xff] }
 0x1d4   :  { %625 = vmatpush.msrb.mxu0 %v584_v22  ;;  %645 = vmatpush.msrb.mxu1 %v600_v23  ;;  %v847_v22 = vld [vmem:[%s13960_s1 + $0xa8] sm:$0xff] }
 0x1d5   :  { %667 = vmatpush.msrb.mxu2 %v583_v24  ;;  %687 = vmatpush.msrb.mxu3 %v599_v25  ;;  %v879_v23 = vld [vmem:[%s13960_s1 + $0x1a8] sm:$0xff] }
 0x1d6   :  { %626 = vmatpush.msrb.mxu0 %v583_v24  ;;  %646 = vmatpush.msrb.mxu1 %v599_v25  ;;  %v844_v24 = vld [vmem:[%s13960_s1 + $0x90] sm:$0xff] }
 0x1d7   :  { %668 = vmatpush.msrb.mxu2 %v582_v26  ;;  %688 = vmatpush.msrb.mxu3 %v598_v27  ;;  %v876_v25 = vld [vmem:[%s13960_s1 + $0x190] sm:$0xff] }
 0x1d8   :  { %627 = vmatpush.msrb.mxu0 %v582_v26  ;;  %647 = vmatpush.msrb.mxu1 %v598_v27  ;;  %v845_v26 = vld [vmem:[%s13960_s1 + $0x98] sm:$0xff] }
 0x1d9   :  { %669 = vmatpush.msrb.mxu2 %v581_v28  ;;  %689 = vmatpush.msrb.mxu3 %v597_v29  ;;  %v877_v27 = vld [vmem:[%s13960_s1 + $0x198] sm:$0xff] }
 0x1da   :  { %628 = vmatpush.msrb.mxu0 %v581_v28  ;;  %648 = vmatpush.msrb.mxu1 %v597_v29  ;;  %v842_v28 = vld [vmem:[%s13960_s1 + $0x80] sm:$0xff] }
 0x1db   :  { %784 = vmatpush.msra.mxu2 %v727_v34  ;;  %804 = vmatpush.msra.mxu3 %v728_v35  ;;  %v874_v29 = vld [vmem:[%s13960_s1 + $0x180] sm:$0xff] }
 0x1dc   :  { %741 = vmatpush.msra.mxu0 %v727_v34  ;;  %761 = vmatpush.msra.mxu1 %v728_v35  ;;  %v872_v34 = vld [vmem:[%s13960_s1 + $0x170] sm:$0xff] }
 0x1dd   :  { %785 = vmatpush.msra.mxu2 %v725_v36  ;;  %805 = vmatpush.msra.mxu3 %v726_v37 }
 0x1de   :  { %742 = vmatpush.msra.mxu0 %v725_v36  ;;  %762 = vmatpush.msra.mxu1 %v726_v37  ;;  %v841_v36 = vld [vmem:[%s13960_s1 + $0x78] sm:$0xff] }
 0x1df   :  { %786 = vmatpush.msra.mxu2 %v723_v38  ;;  %806 = vmatpush.msra.mxu3 %v724_v39  ;;  %v873_v37 = vld [vmem:[%s13960_s1 + $0x178] sm:$0xff] }
 0x1e0   :  { %743 = vmatpush.msra.mxu0 %v723_v38  ;;  %763 = vmatpush.msra.mxu1 %v724_v39  ;;  %v838_v38 = vld [vmem:[%s13960_s1 + $0x60] sm:$0xff] }
 0x1e1   :  { %787 = vmatpush.msra.mxu2 %v721_v40  ;;  %807 = vmatpush.msra.mxu3 %v722_v41  ;;  %v870_v39 = vld [vmem:[%s13960_s1 + $0x160] sm:$0xff] }
 0x1e2   :  { %744 = vmatpush.msra.mxu0 %v721_v40  ;;  %764 = vmatpush.msra.mxu1 %v722_v41  ;;  %v839_v41 = vld [vmem:[%s13960_s1 + $0x68] sm:$0xff] }
 0x1e3   :  { %788 = vmatpush.msra.mxu2 %v719_v42  ;;  %808 = vmatpush.msra.mxu3 %v720_v43 }
 0x1e4   :  { %745 = vmatpush.msra.mxu0 %v719_v42  ;;  %765 = vmatpush.msra.mxu1 %v720_v43  ;;  %v871_v42 = vld [vmem:[%s13960_s1 + $0x168] sm:$0xff]  ;;  %v836_v43 = vld [vmem:[%s13960_s1 + $0x50] sm:$0xff] }
 0x1e5   :  { %789 = vmatpush.msra.mxu2 %v717_v46  ;;  %809 = vmatpush.msra.mxu3 %v718_v47 }
 0x1e6   :  { %746 = vmatpush.msra.mxu0 %v717_v46  ;;  %766 = vmatpush.msra.mxu1 %v718_v47  ;;  %v837_v46 = vld [vmem:[%s13960_s1 + $0x58] sm:$0xff] }
 0x1e7   :  { %790 = vmatpush.msra.mxu2 %v715_v49  ;;  %810 = vmatpush.msra.mxu3 %v716_v50  ;;  %v869_v47 = vld [vmem:[%s13960_s1 + $0x158] sm:$0xff] }
 0x1e8   :  { %747 = vmatpush.msra.mxu0 %v715_v49  ;;  %767 = vmatpush.msra.mxu1 %v716_v50  ;;  %v866_v49 = vld [vmem:[%s13960_s1 + $0x140] sm:$0xff] }
 0x1e9   :  { %791 = vmatpush.msra.mxu2 %v713_v51  ;;  %811 = vmatpush.msra.mxu3 %v714_v52 }
 0x1ea   :  { %748 = vmatpush.msra.mxu0 %v713_v51  ;;  %768 = vmatpush.msra.mxu1 %v714_v52  ;;  %v835_v51 = vld [vmem:[%s13960_s1 + $0x48] sm:$0xff] }
 0x1eb   :  { %v867_v52 = vld [vmem:[%s13960_s1 + $0x148] sm:$0xff] }
 0x235   :  { %v516_v30 = vpop.f32.mrf.mxu0  ;;  %v536_v31 = vpop.f32.mrf.mxu1 }
 0x236   :  { %629 = vmatmul.f32.vlgmr.msrb.gmra.mxu0 %v516_v30  ;;  %649 = vmatmul.f32.vlgmr.msrb.gmra.mxu1 %v536_v31  ;;  %v843_v30 = vld [vmem:[%s13960_s1 + $0x88] sm:$0xff] }
 0x237   :  { %890 = vmatpush.msrb.mxu0 %v856_v60  ;;  %910 = vmatpush.msrb.mxu1 %v888_v62  ;;  %v875_v31 = vld [vmem:[%s13960_s1 + $0x188] sm:$0xff]  ;;  %v833_v60 = vld [vmem:[%s13960_s1 + $0x38] sm:$0xff] }
 0x238   :  { %v865_v62 = vld [vmem:[%s13960_s1 + $0x138] sm:$0xff] }
 0x239   :  { %891 = vmatpush.msrb.mxu0 %v854_v1  ;;  %911 = vmatpush.msrb.mxu1 %v886_v2 }
 0x23b   :  { %892 = vmatpush.msrb.mxu0 %v852_v6  ;;  %912 = vmatpush.msrb.mxu1 %v884_v7  ;;  %v828_v6 = vld [vmem:[%s13960_s1 + $0x10] sm:$0xff] }
 0x23c   :  { %v860_v7 = vld [vmem:[%s13960_s1 + $0x110] sm:$0xff] }
 0x23d   :  { %v558_v32 = vpop.f32.mrf.mxu2  ;;  %v578_v33 = vpop.f32.mrf.mxu3  ;;  %893 = vmatpush.msrb.mxu0 %v850_v11  ;;  %913 = vmatpush.msrb.mxu1 %v882_v12  ;;  %v826_v12 = vld [vmem:[%s13960_s1] sm:$0xff] }
 0x23e   :  { %670 = vmatmul.f32.vlgmr.msrb.gmra.mxu2 %v558_v32  ;;  %690 = vmatmul.f32.vlgmr.msrb.gmra.mxu3 %v578_v33  ;;  %v840_v33 = vld [vmem:[%s13960_s1 + $0x70] sm:$0xff] }
 0x23f   :  { %930 = vmatpush.msrb.mxu2 %v857_v63  ;;  %950 = vmatpush.msrb.mxu3 %v889_v0  ;;  %v830_v63 = vld [vmem:[%s13960_s1 + $0x20] sm:$0xff] }
 0x240   :  { %894 = vmatpush.msrb.mxu0 %v848_v16  ;;  %914 = vmatpush.msrb.mxu1 %v880_v17  ;;  %v862_v0 = vld [vmem:[%s13960_s1 + $0x120] sm:$0xff]  ;;  %v6774_v16 = vld [vmem:[%s13960_s1 + $0x3f0] sm:$0xff]  ;;  %v6743_v17 = vld [vmem:[%s13960_s1 + $0x2f8] sm:$0xff] }
 0x241   :  { %931 = vmatpush.msrb.mxu2 %v855_v4  ;;  %951 = vmatpush.msrb.mxu3 %v887_v5  ;;  %v863_v4 = vld [vmem:[%s13960_s1 + $0x128] sm:$0xff]  ;;  %v710_v5 = vld [vmem:[%s13962_s13] sm:$0x1]  ;;  %s13965_s13 = sld [smem:[#allocation58_spill]] }
 0x242   :  { %895 = vmatpush.msrb.mxu0 %v846_v20  ;;  %915 = vmatpush.msrb.mxu1 %v878_v21  ;;  %v6772_v20 = vld [vmem:[%s13960_s1 + $0x3e0] sm:$0xff]  ;;  %v6741_v21 = vld [vmem:[%s13960_s1 + $0x2e8] sm:$0xff] }
 0x243   :  { %932 = vmatpush.msrb.mxu2 %v853_v8  ;;  %952 = vmatpush.msrb.mxu3 %v885_v9  ;;  %v829_v9 = vld [vmem:[%s13960_s1 + $0x18] sm:$0xff] }
 0x244   :  { %896 = vmatpush.msrb.mxu0 %v844_v24  ;;  %916 = vmatpush.msrb.mxu1 %v876_v25  ;;  %v6770_v24 = vld [vmem:[%s13960_s1 + $0x3d0] sm:$0xff]  ;;  %v6739_v25 = vld [vmem:[%s13960_s1 + $0x2d8] sm:$0xff] }
 0x245   :  { %933 = vmatpush.msrb.mxu2 %v851_v13  ;;  %953 = vmatpush.msrb.mxu3 %v883_v14  ;;  %v827_v13 = vld [vmem:[%s13960_s1 + $0x8] sm:$0xff] }
 0x246   :  { %897 = vmatpush.msrb.mxu0 %v842_v28  ;;  %917 = vmatpush.msrb.mxu1 %v874_v29  ;;  %v859_v14 = vld [vmem:[%s13960_s1 + $0x108] sm:$0xff]  ;;  %v6768_v28 = vld [vmem:[%s13960_s1 + $0x3c0] sm:$0xff] }
 0x247   :  { %934 = vmatpush.msrb.mxu2 %v849_v18  ;;  %954 = vmatpush.msrb.mxu3 %v881_v19  ;;  %v6775_v18 = vld [vmem:[%s13960_s1 + $0x3f8] sm:$0xff]  ;;  %v6740_v19 = vld [vmem:[%s13960_s1 + $0x2e0] sm:$0xff]  ;;  %v6737_v29 = vld [vmem:[%s13960_s1 + $0x2c8] sm:$0xff] }
 0x248   :  { %898 = vmatpush.msrb.mxu0 %v840_v33  ;;  %918 = vmatpush.msrb.mxu1 %v872_v34  ;;  %v6735_v33 = vld [vmem:[%s13960_s1 + $0x2b8] sm:$0xff] }
 0x249   :  { %935 = vmatpush.msrb.mxu2 %v847_v22  ;;  %955 = vmatpush.msrb.mxu3 %v879_v23  ;;  %v6773_v22 = vld [vmem:[%s13960_s1 + $0x3e8] sm:$0xff]  ;;  %v6738_v23 = vld [vmem:[%s13960_s1 + $0x2d0] sm:$0xff]  ;;  %v6767_v34 = vld [vmem:[%s13960_s1 + $0x3b8] sm:$0xff] }
 0x24a   :  { %899 = vmatpush.msrb.mxu0 %v838_v38  ;;  %919 = vmatpush.msrb.mxu1 %v870_v39  ;;  %v6765_v38 = vld [vmem:[%s13960_s1 + $0x3a8] sm:$0xff]  ;;  %v6730_v39 = vld [vmem:[%s13960_s1 + $0x290] sm:$0xff] }
 0x24b   :  { %936 = vmatpush.msrb.mxu2 %v845_v26  ;;  %956 = vmatpush.msrb.mxu3 %v877_v27  ;;  %v6771_v26 = vld [vmem:[%s13960_s1 + $0x3d8] sm:$0xff]  ;;  %v6736_v27 = vld [vmem:[%s13960_s1 + $0x2c0] sm:$0xff] }
 0x24c   :  { %900 = vmatpush.msrb.mxu0 %v836_v43  ;;  %v6728_v43 = vld [vmem:[%s13960_s1 + $0x280] sm:$0xff] }
 0x24d   :  { %937 = vmatpush.msrb.mxu2 %v843_v30  ;;  %957 = vmatpush.msrb.mxu3 %v875_v31  ;;  %v6769_v30 = vld [vmem:[%s13960_s1 + $0x3c8] sm:$0xff]  ;;  %v6734_v31 = vld [vmem:[%s13960_s1 + $0x2b0] sm:$0xff] }
 0x24f   :  { %938 = vmatpush.msrb.mxu2 %v841_v36  ;;  %958 = vmatpush.msrb.mxu3 %v873_v37  ;;  %v6764_v36 = vld [vmem:[%s13960_s1 + $0x3a0] sm:$0xff]  ;;  %v6733_v37 = vld [vmem:[%s13960_s1 + $0x2a8] sm:$0xff] }
 0x251   :  { %939 = vmatpush.msrb.mxu2 %v839_v41  ;;  %959 = vmatpush.msrb.mxu3 %v871_v42  ;;  %v6731_v41 = vld [vmem:[%s13960_s1 + $0x298] sm:$0xff] }
 0x252   :  { %v6763_v42 = vld [vmem:[%s13960_s1 + $0x398] sm:$0xff] }
 0x253   :  { %940 = vmatpush.msrb.mxu2 %v837_v46  ;;  %960 = vmatpush.msrb.mxu3 %v869_v47  ;;  %v6761_v46 = vld [vmem:[%s13960_s1 + $0x388] sm:$0xff]  ;;  %v6726_v47 = vld [vmem:[%s13960_s1 + $0x270] sm:$0xff] }
 0x255   :  { %941 = vmatpush.msrb.mxu2 %v835_v51  ;;  %961 = vmatpush.msrb.mxu3 %v867_v52  ;;  %v6724_v51 = vld [vmem:[%s13960_s1 + $0x260] sm:$0xff] }
 0x256   :  { %v6756_v52 = vld [vmem:[%s13960_s1 + $0x360] sm:$0xff] }
 0x257   :  { %942 = vmatpush.msrb.mxu2 %v833_v60  ;;  %962 = vmatpush.msrb.mxu3 %v865_v62  ;;  %v6723_v60 = vld [vmem:[%s13960_s1 + $0x258] sm:$0xff] }
 0x258   :  { %v6755_v62 = vld [vmem:[%s13960_s1 + $0x358] sm:$0xff] }
 0x259   :  { %963 = vmatpush.msrb.mxu3 %v863_v4  ;;  %v6750_v4 = vld [vmem:[%s13960_s1 + $0x330] sm:$0xff] }
 0x2b3   :  { %v630_v44 = vpop.f32.mrf.mxu0  ;;  %v650_v45 = vpop.f32.mrf.mxu1 }
 0x2b4   :  { %v651_v48 = vadd.f32 %v650_v45, %v630_v44  ;;  %v868_v44 = vld [vmem:[%s13960_s1 + $0x150] sm:$0xff] }
 0x2b5   :  { %920 = vmatpush.msrb.mxu1 %v868_v44  ;;  %v6760_v44 = vld [vmem:[%s13960_s1 + $0x380] sm:$0xff] }
 0x2b6   :  { %v8345_v53 = vmul.f32 0.03125, %v651_v48  ;;  %v834_v48 = vld [vmem:[%s13960_s1 + $0x40] sm:$0xff] }
 0x2b7   :  { %901 = vmatpush.msrb.mxu0 %v834_v48  ;;  %921 = vmatpush.msrb.mxu1 %v866_v49  ;;  %v6758_v48 = vld [vmem:[%s13960_s1 + $0x370] sm:$0xff]  ;;  %v6727_v49 = vld [vmem:[%s13960_s1 + $0x278] sm:$0xff] }
 0x2b8   :  { %v695_v56 = vmul.f32 %v8345_v53, %v8345_v53 }
 0x2c1   :  { %v671_v54 = vpop.f32.mrf.mxu2  ;;  %v691_v55 = vpop.f32.mrf.mxu3 }
 0x2c2   :  { %v692_v59 = vadd.f32 %v691_v55, %v671_v54  ;;  %v832_v54 = vld [vmem:[%s13960_s1 + $0x30] sm:$0xff] }
 0x2c3   :  { %v864_v55 = vld [vmem:[%s13960_s1 + $0x130] sm:$0xff]  ;;  %902 = vmatpush.msrb.mxu0 %v832_v54  ;;  %v6725_v54 = vld [vmem:[%s13960_s1 + $0x268] sm:$0xff] }
 0x2c4   :  { %v694_v3 = vmul.f32 0.03125, %v692_v59  ;;  %v697_v59 = vld [vmem:[%s13961_s5] sm:$0x1]  ;;  %922 = vmatpush.msrb.mxu1 %v864_v55  ;;  %v6757_v55 = vld [vmem:[%s13960_s1 + $0x368] sm:$0xff] }
 0x2c5   :  { %903 = vmatpush.msrb.mxu0 %v830_v63  ;;  %v6720_v63 = vld [vmem:[%s13960_s1 + $0x240] sm:$0xff] }
 0x2c6   :  { %v696_v10 = vsub.f32 %v694_v3, %v695_v56  ;;  %v831_v3 = vld [vmem:[%s13960_s1 + $0x28] sm:$0xff]  ;;  %923 = vmatpush.msrb.mxu1 %v862_v0  ;;  %v6752_v0 = vld [vmem:[%s13960_s1 + $0x340] sm:$0xff] }
 0x2c7   :  { %943 = vmatpush.msrb.mxu2 %v831_v3  ;;  %904 = vmatpush.msrb.mxu0 %v828_v6  ;;  %v6718_v3 = vld [vmem:[%s13960_s1 + $0x230] sm:$0xff]  ;;  %v6751_v6 = vld [vmem:[%s13960_s1 + $0x338] sm:$0xff] }
 0x2c8   :  { %v8397_v15 = vadd.f32 1e-05, %v696_v10  ;;  %v861_v10 = vld [vmem:[%s13960_s1 + $0x118] sm:$0xff]  ;;  %924 = vmatpush.msrb.mxu1 %v860_v7  ;;  %v6716_v7 = vld [vmem:[%s13960_s1 + $0x220] sm:$0xff] }
 0x2c9   :  { %944 = vmatpush.msrb.mxu2 %v829_v9  ;;  %964 = vmatpush.msrb.mxu3 %v861_v10  ;;  %v6717_v9 = vld [vmem:[%s13960_s1 + $0x228] sm:$0xff] }
 0x2ca   :  { %7835 = vrsqrt.f32 %v8397_v15  ;;  %vm705_vm5 = vweird.f32 %v8397_v15  ;;  %905 = vmatpush.msrb.mxu0 %v826_v12  ;;  %v6749_v10 = vld [vmem:[%s13960_s1 + $0x328] sm:$0xff]  ;;  %v6746_v12 = vld [vmem:[%s13960_s1 + $0x310] sm:$0xff] }
 0x2cb   :  { %945 = vmatpush.msrb.mxu2 %v827_v13  ;;  %965 = vmatpush.msrb.mxu3 %v859_v14  ;;  %v6747_v13 = vld [vmem:[%s13960_s1 + $0x318] sm:$0xff]  ;;  %v6712_v14 = vld [vmem:[%s13960_s1 + $0x200] sm:$0xff] }
 0x2d0   :  { %v7836_v32 = vpop.eup %7835 }
 0x2d1   :  { %v700_v35 = vmul.f32 %v7836_v32, %v8397_v15  ;;  %vm706_vm4 = vweird.f32 %v7836_v32  ;;  %v6742_v15 = vld [vmem:[%s13960_s1 + $0x2f0] sm:$0xff] }
 0x2d2   :  { %vm707_vm6 = vmor %vm705_vm5, %vm706_vm4 }
 0x2d3   :  { %v701_v40 = vmul.f32 %v7836_v32, %v700_v35  ;;  %v6732_v35 = vld [vmem:[%s13960_s1 + $0x2a0] sm:$0xff] }
 0x2d5   :  { %v702_v45 = vmul.f32 0.5, %v701_v40  ;;  %v6762_v40 = vld [vmem:[%s13960_s1 + $0x390] sm:$0xff] }
 0x2d7   :  { %v703_v50 = vsub.f32 1.5, %v702_v45  ;;  %v6729_v45 = vld [vmem:[%s13960_s1 + $0x288] sm:$0xff] }
 0x2d9   :  { %v704_v56 = vmul.f32 %v7836_v32, %v703_v50  ;;  %v6759_v50 = vld [vmem:[%s13960_s1 + $0x378] sm:$0xff] }
 0x2db   :  { %v708_v1 = vsel %vm707_vm6, %v7836_v32, %v704_v56  ;;  %v6766_v32 = vld [vmem:[%s13960_s1 + $0x3b0] sm:$0xff] }
 0x2dc   :  { %v709_v2 = vmul.f32 %v708_v1, %v697_v59  ;;  %v6722_v56 = vld [vmem:[%s13960_s1 + $0x250] sm:$0xff]  ;;  %v6721_v1 = vld [vmem:[%s13960_s1 + $0x248] sm:$0xff] }
 0x2dd   :  { %v6754_v59 = vld [vmem:[%s13960_s1 + $0x350] sm:$0xff] }
 0x2de   :  { %6708 = vmatmul.msk.f32.vlgmr.msra.gmra.mxu0 %vm729_vm7, %v709_v2  ;;  %6709 = vmatmul.msk.f32.vlgmr.msra.gmra.mxu1 %vm729_vm7, %v709_v2  ;;  %v711_v8 = vmul.f32 %v709_v2, %v8345_v53  ;;  %v858_v53 = vld [vmem:[%s13960_s1 + $0x100] sm:$0xff]  ;;  %v6753_v2 = vld [vmem:[%s13960_s1 + $0x348] sm:$0xff] }
 0x2df   :  { %925 = vmatpush.msrb.mxu1 %v858_v53  ;;  %1037 = vmatpush.msra.mxu0 %v6742_v15  ;;  %v6715_v53 = vld [vmem:[%s13960_s1 + $0x218] sm:$0xff]  ;;  %v6744_v15 = vld [vmem:[%s13960_s1 + $0x300] sm:$0xff] }
 0x2e0   :  { %v712_v11 = vsub.f32 %v710_v5, %v711_v8  ;;  %v6719_v5 = vld [vmem:[%s13960_s1 + $0x238] sm:$0xff]  ;;  %v6748_v8 = vld [vmem:[%s13960_s1 + $0x320] sm:$0xff] }
 0x2e1   :  { %1057 = vmatpush.msra.mxu1 %v6774_v16  ;;  %1038 = vmatpush.msra.mxu0 %v6740_v19  ;;  %v6713_v16 = vld [vmem:[%s13960_s1 + $0x208] sm:$0xff] }
 0x2e2   :  { %6710 = vmatmul.msk.f32.vlgmr.msra.gmra.mxu2 %vm729_vm7, %v712_v11  ;;  %6711 = vmatmul.msk.f32.vlgmr.msra.gmra.mxu3 %vm729_vm7, %v712_v11  ;;  %v6714_v11 = vld [vmem:[%s13960_s1 + $0x210] sm:$0xff] }
 0x2e3   :  { %1077 = vmatpush.msra.mxu2 %v6743_v17  ;;  %1097 = vmatpush.msra.mxu3 %v6775_v18  ;;  %v6745_v17 = vld [vmem:[%s13960_s1 + $0x308] sm:$0xff] }
 0x2e4   :  { %1058 = vmatpush.msra.mxu1 %v6772_v20  ;;  %1039 = vmatpush.msra.mxu0 %v6738_v23 }
 0x2e5   :  { %1078 = vmatpush.msra.mxu2 %v6741_v21  ;;  %1098 = vmatpush.msra.mxu3 %v6773_v22 }
 0x2e6   :  { %1059 = vmatpush.msra.mxu1 %v6770_v24  ;;  %1040 = vmatpush.msra.mxu0 %v6736_v27 }
 0x2e7   :  { %1079 = vmatpush.msra.mxu2 %v6739_v25  ;;  %1099 = vmatpush.msra.mxu3 %v6771_v26 }
 0x2e8   :  { %1060 = vmatpush.msra.mxu1 %v6768_v28  ;;  %1041 = vmatpush.msra.mxu0 %v6734_v31 }
 0x2e9   :  { %1080 = vmatpush.msra.mxu2 %v6737_v29  ;;  %1100 = vmatpush.msra.mxu3 %v6769_v30 }
 0x2ea   :  { %1061 = vmatpush.msra.mxu1 %v6766_v32  ;;  %1042 = vmatpush.msra.mxu0 %v6732_v35  ;;  %v6815_v35 = vld [vmem:[%s13960_s1 + $0x4e8] sm:$0xff] }
 0x2eb   :  { %1081 = vmatpush.msra.mxu2 %v6735_v33  ;;  %1101 = vmatpush.msra.mxu3 %v6767_v34  ;;  %v6817_v33 = vld [vmem:[%s13960_s1 + $0x4f8] sm:$0xff]  ;;  %v8770_v34 = vld [vmem:[%s13963_s29] sm:$0xff] }
 0x2ec   :  { %1062 = vmatpush.msra.mxu1 %v6764_v36  ;;  %1043 = vmatpush.msra.mxu0 %v6730_v39  ;;  %v6813_v36 = vld [vmem:[%s13960_s1 + $0x4d8] sm:$0xff]  ;;  %v6811_v39 = vld [vmem:[%s13960_s1 + $0x4c8] sm:$0xff] }
 0x2ed   :  { %1082 = vmatpush.msra.mxu2 %v6733_v37  ;;  %1102 = vmatpush.msra.mxu3 %v6765_v38 }
 0x2ee   :  { %1063 = vmatpush.msra.mxu1 %v6762_v40  ;;  %1044 = vmatpush.msra.mxu0 %v6728_v43  ;;  %v6849_v43 = vld [vmem:[%s13960_s1 + $0x5f8] sm:$0xff] }
 0x2ef   :  { %1083 = vmatpush.msra.mxu2 %v6731_v41  ;;  %1103 = vmatpush.msra.mxu3 %v6763_v42 }
 0x2f0   :  { %1064 = vmatpush.msra.mxu1 %v6760_v44  ;;  %1045 = vmatpush.msra.mxu0 %v6726_v47  ;;  %v6847_v47 = vld [vmem:[%s13960_s1 + $0x5e8] sm:$0xff] }
 0x2f1   :  { %1084 = vmatpush.msra.mxu2 %v6729_v45  ;;  %1104 = vmatpush.msra.mxu3 %v6761_v46  ;;  %v6816_v45 = vld [vmem:[%s13960_s1 + $0x4f0] sm:$0xff]  ;;  %v6809_v46 = vld [vmem:[%s13960_s1 + $0x4b8] sm:$0xff] }
 0x2f2   :  { %1065 = vmatpush.msra.mxu1 %v6758_v48  ;;  %1046 = vmatpush.msra.mxu0 %v6724_v51  ;;  %v8798_v48 = vld [vmem:[%s13963_s29 + $0x10] sm:$0xff]  ;;  %v6845_v51 = vld [vmem:[%s13960_s1 + $0x5d8] sm:$0xff] }
 0x2f3   :  { %1085 = vmatpush.msra.mxu2 %v6727_v49  ;;  %1105 = vmatpush.msra.mxu3 %v6759_v50  ;;  %v6814_v49 = vld [vmem:[%s13960_s1 + $0x4e0] sm:$0xff]  ;;  %v6807_v50 = vld [vmem:[%s13960_s1 + $0x4a8] sm:$0xff] }
 0x2f4   :  { %1066 = vmatpush.msra.mxu1 %v6756_v52  ;;  %1047 = vmatpush.msra.mxu0 %v6722_v56  ;;  %v8812_v52 = vld [vmem:[%s13963_s29 + $0x8] sm:$0xff] }
 0x2f5   :  { %1086 = vmatpush.msra.mxu2 %v6725_v54  ;;  %1106 = vmatpush.msra.mxu3 %v6757_v55  ;;  %v6812_v54 = vld [vmem:[%s13960_s1 + $0x4d0] sm:$0xff]  ;;  %v6805_v55 = vld [vmem:[%s13960_s1 + $0x498] sm:$0xff]  ;;  %v6843_v56 = vld [vmem:[%s13960_s1 + $0x5c8] sm:$0xff] }
 0x2f6   :  { %1067 = vmatpush.msra.mxu1 %v6754_v59  ;;  %1048 = vmatpush.msra.mxu0 %v6720_v63 }
 0x2f7   :  { %1087 = vmatpush.msra.mxu2 %v6723_v60  ;;  %1107 = vmatpush.msra.mxu3 %v6755_v62  ;;  %v6810_v62 = vld [vmem:[%s13960_s1 + $0x4c0] sm:$0xff] }
 0x2f8   :  { %1068 = vmatpush.msra.mxu1 %v6752_v0  ;;  %1049 = vmatpush.msra.mxu0 %v6718_v3  ;;  %v6848_v0 = vld [vmem:[%s13960_s1 + $0x5f0] sm:$0xff] }
 0x2f9   :  { %1088 = vmatpush.msra.mxu2 %v6721_v1  ;;  %1108 = vmatpush.msra.mxu3 %v6753_v2  ;;  %v6803_v1 = vld [vmem:[%s13960_s1 + $0x488] sm:$0xff]  ;;  %v6841_v2 = vld [vmem:[%s13960_s1 + $0x5b8] sm:$0xff]  ;;  %v6808_v3 = vld [vmem:[%s13960_s1 + $0x4b0] sm:$0xff] }
 0x2fa   :  { %1069 = vmatpush.msra.mxu1 %v6750_v4  ;;  %1050 = vmatpush.msra.mxu0 %v6716_v7  ;;  %v6846_v4 = vld [vmem:[%s13960_s1 + $0x5e0] sm:$0xff] }
 0x2fb   :  { %1089 = vmatpush.msra.mxu2 %v6719_v5  ;;  %1109 = vmatpush.msra.mxu3 %v6751_v6  ;;  %v6801_v5 = vld [vmem:[%s13960_s1 + $0x478] sm:$0xff]  ;;  %v6839_v6 = vld [vmem:[%s13960_s1 + $0x5a8] sm:$0xff]  ;;  %v6806_v7 = vld [vmem:[%s13960_s1 + $0x4a0] sm:$0xff] }
 0x2fc   :  { %1070 = vmatpush.msra.mxu1 %v6748_v8  ;;  %1051 = vmatpush.msra.mxu0 %v6714_v11  ;;  %v6844_v8 = vld [vmem:[%s13960_s1 + $0x5d0] sm:$0xff] }
 0x2fd   :  { %1090 = vmatpush.msra.mxu2 %v6717_v9  ;;  %1110 = vmatpush.msra.mxu3 %v6749_v10  ;;  %v6799_v9 = vld [vmem:[%s13960_s1 + $0x468] sm:$0xff]  ;;  %v6837_v10 = vld [vmem:[%s13960_s1 + $0x598] sm:$0xff]  ;;  %v6804_v11 = vld [vmem:[%s13960_s1 + $0x490] sm:$0xff] }
 0x2fe   :  { %1071 = vmatpush.msra.mxu1 %v6746_v12  ;;  %1052 = vmatpush.msra.mxu0 %v6712_v14  ;;  %v6842_v12 = vld [vmem:[%s13960_s1 + $0x5c0] sm:$0xff] }
 0x2ff   :  { %1091 = vmatpush.msra.mxu2 %v6715_v53  ;;  %1111 = vmatpush.msra.mxu3 %v6747_v13  ;;  %v6797_v53 = vld [vmem:[%s13960_s1 + $0x458] sm:$0xff]  ;;  %v6835_v13 = vld [vmem:[%s13960_s1 + $0x588] sm:$0xff]  ;;  %v6802_v14 = vld [vmem:[%s13960_s1 + $0x480] sm:$0xff] }
 0x300   :  { %1072 = vmatpush.msra.mxu1 %v6744_v15  ;;  %v6840_v15 = vld [vmem:[%s13960_s1 + $0x5b0] sm:$0xff] }
 0x301   :  { %1092 = vmatpush.msra.mxu2 %v6713_v16  ;;  %1112 = vmatpush.msra.mxu3 %v6745_v17  ;;  %v6795_v16 = vld [vmem:[%s13960_s1 + $0x448] sm:$0xff]  ;;  %v6833_v17 = vld [vmem:[%s13960_s1 + $0x578] sm:$0xff] }
 0x35b   :  { %v750_v18 = vpop.f32.mrf.mxu0  ;;  %v770_v19 = vpop.f32.mrf.mxu1 }
 0x35c   :  { %v816_v20 = vperm.slane %v750_v18, 0  ;;  %v817_v21 = vperm.slane %v770_v19, 0  ;;  %v6800_v18 = vld [vmem:[%s13960_s1 + $0x470] sm:$0xff]  ;;  %v6838_v19 = vld [vmem:[%s13960_s1 + $0x5a0] sm:$0xff] }
 0x35e   :  { %v818_v24 = vmul.f32 %v816_v20, %v8183_v57  ;;  %v819_v25 = vmul.f32 %v817_v21, %v8185_v58  ;;  %v6793_v20 = vld [vmem:[%s13960_s1 + $0x438] sm:$0xff]  ;;  %v6831_v21 = vld [vmem:[%s13960_s1 + $0x568] sm:$0xff] }
 0x365   :  { %v793_v22 = vpop.f32.mrf.mxu2  ;;  %v813_v23 = vpop.f32.mrf.mxu3 }
 0x366   :  { %v820_v26 = vperm.slane %v793_v22, 0  ;;  %v821_v27 = vperm.slane %v813_v23, 0  ;;  %v6798_v22 = vld [vmem:[%s13960_s1 + $0x460] sm:$0xff]  ;;  %v6836_v23 = vld [vmem:[%s13960_s1 + $0x590] sm:$0xff] }
 0x368   :  { %v822_v28 = vadd.f32 %v820_v26, %v818_v24  ;;  %v823_v29 = vadd.f32 %v821_v27, %v819_v25  ;;  %v6791_v24 = vld [vmem:[%s13960_s1 + $0x428] sm:$0xff]  ;;  %v6829_v25 = vld [vmem:[%s13960_s1 + $0x558] sm:$0xff]  ;;  %v6796_v26 = vld [vmem:[%s13960_s1 + $0x450] sm:$0xff] }
 0x369   :  { %v6834_v27 = vld [vmem:[%s13960_s1 + $0x580] sm:$0xff] }
 0x36a   :  { %v8752_v30 = vmax.f32 %v822_v28, 0.0  ;;  %v8754_v31 = vmax.f32 %v823_v29, 0.0  ;;  %v6789_v28 = vld [vmem:[%s13960_s1 + $0x418] sm:$0xff]  ;;  %v6827_v29 = vld [vmem:[%s13960_s1 + $0x548] sm:$0xff] }
 0x36c   :  { %906 = vmatmul.f32.vlgmr.msrb.gmra.mxu0 %v8752_v30  ;;  %926 = vmatmul.f32.vlgmr.msrb.gmra.mxu1 %v8754_v31 }
 0x36d   :  { %946 = vmatmul.f32.vlgmr.msrb.gmra.mxu2 %v8752_v30  ;;  %966 = vmatmul.f32.vlgmr.msrb.gmra.mxu3 %v8754_v31 }
 0x374   :  { %1053 = vmatmul.f32.vlgmr.msra.gmra.mxu0 %v8752_v30  ;;  %1073 = vmatmul.f32.vlgmr.msra.gmra.mxu1 %v8754_v31 }
 0x375   :  { %1093 = vmatmul.f32.vlgmr.msra.gmra.mxu2 %v8752_v30  ;;  %1113 = vmatmul.f32.vlgmr.msra.gmra.mxu3 %v8754_v31 }
 0x3e9   :  { %v907_v57 = vpop.f32.mrf.mxu0  ;;  %v927_v58 = vpop.f32.mrf.mxu1 }
 0x3ea   :  { %v928_v32 = vadd.f32 %v927_v58, %v907_v57  ;;  %v6794_v57 = vld [vmem:[%s13960_s1 + $0x440] sm:$0xff]  ;;  %v6832_v58 = vld [vmem:[%s13960_s1 + $0x570] sm:$0xff] }
 0x3ec   :  { %1193 = vmatpush.msrb.mxu2 %v928_v32  ;;  %v6787_v32 = vld [vmem:[%s13960_s1 + $0x408] sm:$0xff] }
 0x3ed   :  { %6782 = vmatmul.msk.f32.vlgmr.msrb.gmra.mxu2 %vm495_vm3, %v8770_v34 }
 0x3ee   :  { %1329 = vmatpush.msra.mxu2 %v6817_v33  ;;  %v6825_v33 = vld [vmem:[%s13960_s1 + $0x538] sm:$0xff] }
 0x3f0   :  { %1330 = vmatpush.msra.mxu2 %v6815_v35  ;;  %v947_v37 = vpop.f32.mrf.mxu2  ;;  %v967_v38 = vpop.f32.mrf.mxu3  ;;  %v6886_v35 = vld [vmem:[%s13960_s1 + $0x6f0] sm:$0xff] }
 0x3f1   :  { %v968_v40 = vadd.f32 %v967_v38, %v947_v37  ;;  %v1054_v41 = vpop.f32.mrf.mxu0  ;;  %v1074_v42 = vpop.f32.mrf.mxu1  ;;  %v6830_v37 = vld [vmem:[%s13960_s1 + $0x560] sm:$0xff]  ;;  %v6823_v38 = vld [vmem:[%s13960_s1 + $0x528] sm:$0xff] }
 0x3f2   :  { %1331 = vmatpush.msra.mxu2 %v6813_v36  ;;  %v1075_v44 = vadd.f32 %v1074_v42, %v1054_v41  ;;  %v6792_v36 = vld [vmem:[%s13960_s1 + $0x430] sm:$0xff]  ;;  %v6821_v42 = vld [vmem:[%s13960_s1 + $0x518] sm:$0xff] }
 0x3f3   :  { %1216 = vmatpush.msrb.mxu3 %v968_v40  ;;  %v6790_v40 = vld [vmem:[%s13960_s1 + $0x420] sm:$0xff]  ;;  %v6828_v41 = vld [vmem:[%s13960_s1 + $0x550] sm:$0xff] }
 0x3f4   :  { %1332 = vmatpush.msra.mxu2 %v6811_v39  ;;  %1141 = vmatpush.msrb.mxu0 %v1075_v44  ;;  %v6884_v39 = vld [vmem:[%s13960_s1 + $0x6e0] sm:$0xff]  ;;  %v6788_v44 = vld [vmem:[%s13960_s1 + $0x410] sm:$0xff] }
 0x3f5   :  { %1349 = vmatpush.msra.mxu3 %v6849_v43  ;;  %6778 = vmatmul.msk.f32.vlgmr.msrb.gmra.mxu0 %vm495_vm3, %v8798_v48  ;;  %v6882_v43 = vld [vmem:[%s13960_s1 + $0x6d0] sm:$0xff] }
 0x3f6   :  { %1289 = vmatpush.msra.mxu0 %v6816_v45  ;;  %1333 = vmatpush.msra.mxu2 %v6809_v46  ;;  %v6826_v45 = vld [vmem:[%s13960_s1 + $0x540] sm:$0xff]  ;;  %v6819_v46 = vld [vmem:[%s13960_s1 + $0x508] sm:$0xff] }
 0x3f7   :  { %1350 = vmatpush.msra.mxu3 %v6847_v47  ;;  %6783 = vmatmul.msk.f32.gmra.mxu2 %vm495_vm3, %v8812_v52  ;;  %v6880_v47 = vld [vmem:[%s13960_s1 + $0x6c0] sm:$0xff] }
 0x3f8   :  { %1290 = vmatpush.msra.mxu0 %v6814_v49  ;;  %1334 = vmatpush.msra.mxu2 %v6807_v50  ;;  %v1094_v59 = vpop.f32.mrf.mxu2  ;;  %v1114_v60 = vpop.f32.mrf.mxu3  ;;  %v6786_v49 = vld [vmem:[%s13960_s1 + $0x400] sm:$0xff]  ;;  %v6824_v50 = vld [vmem:[%s13960_s1 + $0x530] sm:$0xff] }
 0x3f9   :  { %1351 = vmatpush.msra.mxu3 %v6845_v51  ;;  %v1115_v63 = vadd.f32 %v1114_v60, %v1094_v59  ;;  %v6878_v51 = vld [vmem:[%s13960_s1 + $0x6b0] sm:$0xff] }
 0x3fa   :  { %1291 = vmatpush.msra.mxu0 %v6812_v54  ;;  %1335 = vmatpush.msra.mxu2 %v6805_v55  ;;  %v6822_v54 = vld [vmem:[%s13960_s1 + $0x520] sm:$0xff]  ;;  %v6820_v59 = vld [vmem:[%s13960_s1 + $0x510] sm:$0xff] }
 0x3fb   :  { %1352 = vmatpush.msra.mxu3 %v6843_v56  ;;  %1164 = vmatpush.msrb.mxu1 %v1115_v63  ;;  %v6876_v55 = vld [vmem:[%s13960_s1 + $0x6a0] sm:$0xff]  ;;  %v6914_v56 = vld [vmem:[%s13960_s1 + $0x7d0] sm:$0xff] }
 0x3fc   :  { %1292 = vmatpush.msra.mxu0 %v6810_v62  ;;  %1336 = vmatpush.msra.mxu2 %v6803_v1  ;;  %v6874_v60 = vld [vmem:[%s13960_s1 + $0x690] sm:$0xff]  ;;  %v6912_v62 = vld [vmem:[%s13960_s1 + $0x7c0] sm:$0xff] }
 0x3fd   :  { %1309 = vmatpush.msra.mxu1 %v6848_v0  ;;  %1353 = vmatpush.msra.mxu3 %v6841_v2  ;;  %v6818_v63 = vld [vmem:[%s13960_s1 + $0x500] sm:$0xff]  ;;  %v6910_v1 = vld [vmem:[%s13960_s1 + $0x7b0] sm:$0xff] }
 0x3fe   :  { %1293 = vmatpush.msra.mxu0 %v6808_v3  ;;  %1337 = vmatpush.msra.mxu2 %v6801_v5  ;;  %v6872_v0 = vld [vmem:[%s13960_s1 + $0x680] sm:$0xff]  ;;  %v6870_v2 = vld [vmem:[%s13960_s1 + $0x670] sm:$0xff] }
 0x3ff   :  { %1310 = vmatpush.msra.mxu1 %v6846_v4  ;;  %1354 = vmatpush.msra.mxu3 %v6839_v6  ;;  %v6908_v3 = vld [vmem:[%s13960_s1 + $0x7a0] sm:$0xff]  ;;  %v6906_v5 = vld [vmem:[%s13960_s1 + $0x790] sm:$0xff] }
 0x400   :  { %1294 = vmatpush.msra.mxu0 %v6806_v7  ;;  %1338 = vmatpush.msra.mxu2 %v6799_v9  ;;  %v6868_v4 = vld [vmem:[%s13960_s1 + $0x660] sm:$0xff]  ;;  %v6866_v6 = vld [vmem:[%s13960_s1 + $0x650] sm:$0xff] }
 0x401   :  { %1311 = vmatpush.msra.mxu1 %v6844_v8  ;;  %1355 = vmatpush.msra.mxu3 %v6837_v10  ;;  %v6904_v7 = vld [vmem:[%s13960_s1 + $0x780] sm:$0xff]  ;;  %v6902_v9 = vld [vmem:[%s13960_s1 + $0x770] sm:$0xff] }
 0x402   :  { %1295 = vmatpush.msra.mxu0 %v6804_v11  ;;  %1339 = vmatpush.msra.mxu2 %v6797_v53  ;;  %v6864_v8 = vld [vmem:[%s13960_s1 + $0x640] sm:$0xff]  ;;  %v6862_v10 = vld [vmem:[%s13960_s1 + $0x630] sm:$0xff] }
 0x403   :  { %1312 = vmatpush.msra.mxu1 %v6842_v12  ;;  %1356 = vmatpush.msra.mxu3 %v6835_v13  ;;  %v6900_v11 = vld [vmem:[%s13960_s1 + $0x760] sm:$0xff]  ;;  %v6898_v53 = vld [vmem:[%s13960_s1 + $0x750] sm:$0xff] }
 0x404   :  { %1296 = vmatpush.msra.mxu0 %v6802_v14  ;;  %6784 = vmatmul.msk.f32.vlgmr.msrb.gmra.mxu3 %vm495_vm3, %v8770_v34  ;;  %v6777_v34 = vld [vmem:[%s13963_s29 + $0x18] sm:$0xff]  ;;  %v6860_v12 = vld [vmem:[%s13960_s1 + $0x620] sm:$0xff]  ;;  %v6858_v13 = vld [vmem:[%s13960_s1 + $0x610] sm:$0xff] }
 0x405   :  { %1313 = vmatpush.msra.mxu1 %v6840_v15  ;;  %1340 = vmatpush.msra.mxu2 %v6795_v16  ;;  %v6896_v14 = vld [vmem:[%s13960_s1 + $0x740] sm:$0xff]  ;;  %v6894_v16 = vld [vmem:[%s13960_s1 + $0x730] sm:$0xff] }
 0x406   :  { %1357 = vmatpush.msra.mxu3 %v6833_v17  ;;  %1297 = vmatpush.msra.mxu0 %v6800_v18  ;;  %v6856_v15 = vld [vmem:[%s13960_s1 + $0x600] sm:$0xff]  ;;  %v6890_v18 = vld [vmem:[%s13960_s1 + $0x710] sm:$0xff] }
 0x407   :  { %1314 = vmatpush.msra.mxu1 %v6838_v19  ;;  %1341 = vmatpush.msra.mxu2 %v6793_v20  ;;  %v6892_v17 = vld [vmem:[%s13960_s1 + $0x720] sm:$0xff] }
 0x408   :  { %1358 = vmatpush.msra.mxu3 %v6831_v21  ;;  %1298 = vmatpush.msra.mxu0 %v6798_v22  ;;  %v6888_v19 = vld [vmem:[%s13960_s1 + $0x700] sm:$0xff] }
 0x409   :  { %1315 = vmatpush.msra.mxu1 %v6836_v23  ;;  %1342 = vmatpush.msra.mxu2 %v6791_v24 }
 0x40a   :  { %1359 = vmatpush.msra.mxu3 %v6829_v25  ;;  %1299 = vmatpush.msra.mxu0 %v6796_v26 }
 0x40b   :  { %1316 = vmatpush.msra.mxu1 %v6834_v27  ;;  %1343 = vmatpush.msra.mxu2 %v6789_v28 }
 0x40c   :  { %1360 = vmatpush.msra.mxu3 %v6827_v29  ;;  %6780 = vmatmul.msk.f32.vlgmr.msrb.gmra.mxu1 %vm495_vm3, %v8798_v48  ;;  %v6918_v48 = vld [vmem:[%s13960_s1 + $0x7f0] sm:$0xff] }
 0x40d   :  { %6785 = vmatmul.msk.f32.gmra.mxu3 %vm495_vm3, %v8812_v52  ;;  %1300 = vmatpush.msra.mxu0 %v6794_v57  ;;  %v6916_v52 = vld [vmem:[%s13960_s1 + $0x7e0] sm:$0xff] }
 0x40e   :  { %1317 = vmatpush.msra.mxu1 %v6832_v58  ;;  %1344 = vmatpush.msra.mxu2 %v6787_v32  ;;  %v6850_v58 = vld [vmem:[%s13963_s29 + $0x20] sm:$0xff]  ;;  %v6919_v32 = vld [vmem:[%s13960_s1 + $0x7f8] sm:$0xff] }
 0x40f   :  { %1361 = vmatpush.msra.mxu3 %v6825_v33  ;;  %6779 = vmatmul.msk.f32.gmra.mxu0 %vm495_vm3, %v6777_v34 }
 0x410   :  { %1345 = vmatmul.f32.vlgmr.msra.gmra.mxu2 %v8752_v30  ;;  %1301 = vmatpush.msra.mxu0 %v6792_v36  ;;  %v6917_v36 = vld [vmem:[%s13960_s1 + $0x7e8] sm:$0xff] }
 0x411   :  { %1493 = vmatpush.msrb.mxu2 %v6886_v35  ;;  %1318 = vmatpush.msra.mxu1 %v6830_v37  ;;  %v6887_v37 = vld [vmem:[%s13960_s1 + $0x6f8] sm:$0xff] }
 0x412   :  { %1362 = vmatpush.msra.mxu3 %v6823_v38  ;;  %1302 = vmatpush.msra.mxu0 %v6790_v40  ;;  %v6915_v38 = vld [vmem:[%s13960_s1 + $0x7d8] sm:$0xff]  ;;  %v6913_v40 = vld [vmem:[%s13960_s1 + $0x7c8] sm:$0xff] }
 0x413   :  { %1494 = vmatpush.msrb.mxu2 %v6884_v39  ;;  %1319 = vmatpush.msra.mxu1 %v6828_v41  ;;  %v6885_v39 = vld [vmem:[%s13960_s1 + $0x6e8] sm:$0xff]  ;;  %v6883_v41 = vld [vmem:[%s13960_s1 + $0x6d8] sm:$0xff] }
 0x414   :  { %1363 = vmatpush.msra.mxu3 %v6821_v42  ;;  %1303 = vmatpush.msra.mxu0 %v6788_v44  ;;  %v6851_v42 = vld [vmem:[%s13963_s29 + $0x28] sm:$0xff] }
 0x415   :  { %1495 = vmatpush.msrb.mxu2 %v6882_v43  ;;  %1320 = vmatpush.msra.mxu1 %v6826_v45  ;;  %v6911_v43 = vld [vmem:[%s13960_s1 + $0x7b8] sm:$0xff]  ;;  %v6881_v44 = vld [vmem:[%s13960_s1 + $0x6c8] sm:$0xff] }
 0x416   :  { %1364 = vmatpush.msra.mxu3 %v6819_v46  ;;  %6781 = vmatmul.msk.f32.gmra.mxu1 %vm495_vm3, %v6777_v34  ;;  %v6909_v45 = vld [vmem:[%s13960_s1 + $0x7a8] sm:$0xff]  ;;  %v6879_v46 = vld [vmem:[%s13960_s1 + $0x6b8] sm:$0xff] }
 0x417   :  { %1365 = vmatmul.f32.vlgmr.msra.gmra.mxu3 %v8754_v31  ;;  %1496 = vmatpush.msrb.mxu2 %v6880_v47  ;;  %v6907_v47 = vld [vmem:[%s13960_s1 + $0x798] sm:$0xff] }
 0x418   :  { %1513 = vmatpush.msrb.mxu3 %v6918_v48  ;;  %1304 = vmatpush.msra.mxu0 %v6786_v49  ;;  %v6877_v48 = vld [vmem:[%s13960_s1 + $0x6a8] sm:$0xff] }
 0x419   :  { %1321 = vmatpush.msra.mxu1 %v6824_v50  ;;  %1305 = vmatmul.f32.vlgmr.msra.gmra.mxu0 %v8752_v30  ;;  %v6905_v49 = vld [vmem:[%s13960_s1 + $0x788] sm:$0xff]  ;;  %v6875_v50 = vld [vmem:[%s13960_s1 + $0x698] sm:$0xff] }
 0x41a   :  { %1497 = vmatpush.msrb.mxu2 %v6878_v51  ;;  %1514 = vmatpush.msrb.mxu3 %v6916_v52  ;;  %v6903_v51 = vld [vmem:[%s13960_s1 + $0x778] sm:$0xff]  ;;  %v6873_v52 = vld [vmem:[%s13960_s1 + $0x688] sm:$0xff] }
 0x41b   :  { %1322 = vmatpush.msra.mxu1 %v6822_v54  ;;  %v6901_v54 = vld [vmem:[%s13960_s1 + $0x768] sm:$0xff] }
 0x41c   :  { %1498 = vmatpush.msrb.mxu2 %v6876_v55  ;;  %1515 = vmatpush.msrb.mxu3 %v6914_v56  ;;  %v6871_v55 = vld [vmem:[%s13960_s1 + $0x678] sm:$0xff] }
 0x41d   :  { %1323 = vmatpush.msra.mxu1 %v6820_v59  ;;  %v6899_v56 = vld [vmem:[%s13960_s1 + $0x758] sm:$0xff]  ;;  %v6869_v59 = vld [vmem:[%s13960_s1 + $0x668] sm:$0xff] }
 0x41e   :  { %1499 = vmatpush.msrb.mxu2 %v6874_v60  ;;  %1516 = vmatpush.msrb.mxu3 %v6912_v62  ;;  %v6897_v60 = vld [vmem:[%s13960_s1 + $0x748] sm:$0xff]  ;;  %v6867_v62 = vld [vmem:[%s13960_s1 + $0x658] sm:$0xff] }
 0x41f   :  { %1324 = vmatpush.msra.mxu1 %v6818_v63  ;;  %v6895_v63 = vld [vmem:[%s13960_s1 + $0x738] sm:$0xff] }
 0x420   :  { %1325 = vmatmul.f32.vlgmr.msra.gmra.mxu1 %v8754_v31  ;;  %1500 = vmatpush.msrb.mxu2 %v6872_v0  ;;  %v6865_v0 = vld [vmem:[%s13960_s1 + $0x648] sm:$0xff] }
 0x421   :  { %1517 = vmatpush.msrb.mxu3 %v6910_v1  ;;  %v6893_v1 = vld [vmem:[%s13960_s1 + $0x728] sm:$0xff] }
 0x422   :  { %1501 = vmatpush.msrb.mxu2 %v6870_v2  ;;  %v6863_v2 = vld [vmem:[%s13960_s1 + $0x638] sm:$0xff] }
 0x423   :  { %1518 = vmatpush.msrb.mxu3 %v6908_v3  ;;  %v6891_v3 = vld [vmem:[%s13960_s1 + $0x718] sm:$0xff] }
 0x424   :  { %1502 = vmatpush.msrb.mxu2 %v6868_v4  ;;  %v6861_v4 = vld [vmem:[%s13960_s1 + $0x628] sm:$0xff] }
 0x425   :  { %1519 = vmatpush.msrb.mxu3 %v6906_v5  ;;  %v6889_v5 = vld [vmem:[%s13960_s1 + $0x708] sm:$0xff] }
 0x426   :  { %1503 = vmatpush.msrb.mxu2 %v6866_v6 }
 0x427   :  { %1520 = vmatpush.msrb.mxu3 %v6904_v7 }
 0x428   :  { %1504 = vmatpush.msrb.mxu2 %v6864_v8  ;;  %v6859_v8 = vld [vmem:[%s13960_s1 + $0x618] sm:$0xff] }
 0x429   :  { %1521 = vmatpush.msrb.mxu3 %v6902_v9 }
 0x42a   :  { %1505 = vmatpush.msrb.mxu2 %v6862_v10  ;;  %v6920_v10 = vld [vmem:[%s13963_s29 + $0x30] sm:$0xff] }
 0x42b   :  { %1522 = vmatpush.msrb.mxu3 %v6900_v11  ;;  %v6857_v11 = vld [vmem:[%s13960_s1 + $0x608] sm:$0xff] }
 0x42c   :  { %1506 = vmatpush.msrb.mxu2 %v6860_v12  ;;  %v6921_v12 = vld [vmem:[%s13963_s29 + $0x38] sm:$0xff] }
 0x42d   :  { %1523 = vmatpush.msrb.mxu3 %v6898_v53 }
 0x42e   :  { %1507 = vmatpush.msrb.mxu2 %v6858_v13 }
 0x42f   :  { %1524 = vmatpush.msrb.mxu3 %v6896_v14 }
 0x430   :  { %1508 = vmatpush.msrb.mxu2 %v6856_v15 }
 0x431   :  { %1525 = vmatpush.msrb.mxu3 %v6894_v16  ;;  %1509 = vmatmul.f32.vlgmr.msrb.gmra.mxu2 %v8752_v30 }
 0x433   :  { %1526 = vmatpush.msrb.mxu3 %v6892_v17 }
 0x435   :  { %1527 = vmatpush.msrb.mxu3 %v6890_v18 }
 0x437   :  { %1528 = vmatpush.msrb.mxu3 %v6888_v19 }
 0x438   :  { %1529 = vmatmul.f32.vlgmr.msrb.gmra.mxu3 %v8754_v31 }
 0x470   :  { %v9090_v20 = vpop.f32.mrf.mxu2 }
 0x472   :  { %v9094_v22 = vpop.f32.mrf.mxu0 }
 0x473   :  { %v1196_v19 = vadd.f32 %v9090_v20, %v9094_v22  ;;  %v1734_v22 = vld [vmem:[%s13964_s4 + $0x78] sm:$0xff] }
 0x47a   :  { %v9098_v24 = vpop.f32.mrf.mxu2 }
 0x487   :  { %v9092_v21 = vpop.f32.mrf.mxu3 }
 0x489   :  { %v9096_v23 = vpop.f32.mrf.mxu1 }
 0x48c   :  { %v9102_v26 = vpop.f32.mrf.mxu0 }
 0x490   :  { %v9100_v25 = vpop.f32.mrf.mxu3 }
 0x493   :  { %v9104_v27 = vpop.f32.mrf.mxu1  ;;  %v1346_v28 = vpop.f32.mrf.mxu2 }
 0x496   :  { %v1306_v33 = vpop.f32.mrf.mxu0 }
 0x49a   :  { %v1366_v29 = vpop.f32.mrf.mxu3 }
 0x49b   :  { %v1367_v57 = vadd.f32 %v1366_v29, %v1346_v28 }
 0x49d   :  { %v1326_v34 = vpop.f32.mrf.mxu1  ;;  %1416 = vmatpush.msrb.mxu1 %v1367_v57 }
 0x49e   :  { %v1327_v35 = vadd.f32 %v1326_v34, %v1306_v33  ;;  %6854 = vmatmul.msk.f32.vlgmr.msrb.gmra.mxu1 %vm495_vm3, %v6850_v58  ;;  %v9261_v34 = vld [vmem:[%s13964_s4 + $0xf0] sm:$0xff] }
 0x49f   :  { %1553 = vmatpush.msra.mxu1 %v6919_v32 }
 0x4a0   :  { %1393 = vmatpush.msrb.mxu0 %v1327_v35  ;;  %v1732_v35 = vld [vmem:[%s13964_s4 + $0x68] sm:$0xff] }
 0x4a1   :  { %6852 = vmatmul.msk.f32.vlgmr.msrb.gmra.mxu0 %vm495_vm3, %v6850_v58  ;;  %1554 = vmatpush.msra.mxu1 %v6917_v36  ;;  %v9269_v36 = vld [vmem:[%s13964_s4 + $0xe8] sm:$0xff] }
 0x4a2   :  { %1533 = vmatpush.msra.mxu0 %v6887_v37  ;;  %v1731_v37 = vld [vmem:[%s13964_s4 + $0x60] sm:$0xff] }
 0x4a3   :  { %1555 = vmatpush.msra.mxu1 %v6915_v38  ;;  %v9278_v38 = vld [vmem:[%s13964_s4 + $0xe0] sm:$0xff] }
 0x4a4   :  { %1534 = vmatpush.msra.mxu0 %v6885_v39  ;;  %v1730_v39 = vld [vmem:[%s13964_s4 + $0x58] sm:$0xff] }
 0x4a5   :  { %1556 = vmatpush.msra.mxu1 %v6913_v40  ;;  %v9287_v40 = vld [vmem:[%s13964_s4 + $0xd8] sm:$0xff] }
 0x4a6   :  { %1535 = vmatpush.msra.mxu0 %v6883_v41  ;;  %6855 = vmatmul.msk.f32.gmra.mxu1 %vm495_vm3, %v6851_v42  ;;  %v1729_v41 = vld [vmem:[%s13964_s4 + $0x50] sm:$0xff] }
 0x4a7   :  { %1557 = vmatpush.msra.mxu1 %v6911_v43 }
 0x4a8   :  { %1536 = vmatpush.msra.mxu0 %v6881_v44  ;;  %v1728_v44 = vld [vmem:[%s13964_s4 + $0x48] sm:$0xff] }
 0x4a9   :  { %6853 = vmatmul.msk.f32.gmra.mxu0 %vm495_vm3, %v6851_v42  ;;  %1558 = vmatpush.msra.mxu1 %v6909_v45  ;;  %v9296_v42 = vld [vmem:[%s13964_s4 + $0xd0] sm:$0xff]  ;;  %v9305_v45 = vld [vmem:[%s13964_s4 + $0xc8] sm:$0xff] }
 0x4aa   :  { %1537 = vmatpush.msra.mxu0 %v6879_v46  ;;  %v1727_v46 = vld [vmem:[%s13964_s4 + $0x40] sm:$0xff] }
 0x4ab   :  { %1559 = vmatpush.msra.mxu1 %v6907_v47  ;;  %v9314_v47 = vld [vmem:[%s13964_s4 + $0xc0] sm:$0xff] }
 0x4ac   :  { %1538 = vmatpush.msra.mxu0 %v6877_v48  ;;  %v1726_v48 = vld [vmem:[%s13964_s4 + $0x38] sm:$0xff] }
 0x4ad   :  { %1560 = vmatpush.msra.mxu1 %v6905_v49  ;;  %v1742_v49 = vld [vmem:[%s13964_s4 + $0xb8] sm:$0xff] }
 0x4ae   :  { %1539 = vmatpush.msra.mxu0 %v6875_v50  ;;  %v1222_v50 = vadd.f32 %v9100_v25, %v9104_v27  ;;  %v1724_v27 = vld [vmem:[%s13964_s4 + $0x28] sm:$0xff] }
 0x4af   :  { %1561 = vmatpush.msra.mxu1 %v6903_v51  ;;  %v1725_v51 = vld [vmem:[%s13964_s4 + $0x30] sm:$0xff] }
 0x4b0   :  { %1540 = vmatpush.msra.mxu0 %v6873_v52  ;;  %v1741_v52 = vld [vmem:[%s13964_s4 + $0xb0] sm:$0xff] }
 0x4b1   :  { %1562 = vmatpush.msra.mxu1 %v6901_v54  ;;  %v1219_v54 = vadd.f32 %v9092_v21, %v9096_v23  ;;  %v1740_v21 = vld [vmem:[%s13964_s4 + $0xa8] sm:$0xff]  ;;  %v1723_v23 = vld [vmem:[%s13964_s4 + $0x20] sm:$0xff] }
 0x4b2   :  { %1541 = vmatpush.msra.mxu0 %v6871_v55 }
 0x4b3   :  { %1563 = vmatpush.msra.mxu1 %v6899_v56 }
 0x4b4   :  { %1542 = vmatpush.msra.mxu0 %v6869_v59  ;;  %v1510_v6 = vpop.f32.mrf.mxu2 }
 0x4b5   :  { %1564 = vmatpush.msra.mxu1 %v6897_v60 }
 0x4b6   :  { %1543 = vmatpush.msra.mxu0 %v6867_v62 }
 0x4b7   :  { %1565 = vmatpush.msra.mxu1 %v6895_v63  ;;  %v1739_v63 = vld [vmem:[%s13964_s4 + $0xa0] sm:$0xff] }
 0x4b8   :  { %1544 = vmatpush.msra.mxu0 %v6865_v0  ;;  %v1722_v0 = vld [vmem:[%s13964_s4 + $0x18] sm:$0xff] }
 0x4b9   :  { %1566 = vmatpush.msra.mxu1 %v6893_v1  ;;  %v1738_v1 = vld [vmem:[%s13964_s4 + $0x98] sm:$0xff] }
 0x4ba   :  { %1545 = vmatpush.msra.mxu0 %v6863_v2  ;;  %v1721_v2 = vld [vmem:[%s13964_s4 + $0x10] sm:$0xff] }
 0x4bb   :  { %v1530_v7 = vpop.f32.mrf.mxu3  ;;  %1567 = vmatpush.msra.mxu1 %v6891_v3 }
 0x4bc   :  { %v1531_v9 = vadd.f32 %v1530_v7, %v1510_v6  ;;  %1546 = vmatpush.msra.mxu0 %v6861_v4  ;;  %v1737_v4 = vld [vmem:[%s13964_s4 + $0x90] sm:$0xff]  ;;  %v1736_v6 = vld [vmem:[%s13964_s4 + $0x88] sm:$0xff] }
 0x4bd   :  { %1568 = vmatpush.msra.mxu1 %v6889_v5  ;;  %v1720_v5 = vld [vmem:[%s13964_s4 + $0x8] sm:$0xff] }
 0x4be   :  { %1547 = vmatpush.msra.mxu0 %v6859_v8  ;;  %1597 = vmatpush.msra.mxu2 %v1531_v9  ;;  %v1719_v8 = vld [vmem:[%s13964_s4] sm:$0xff] }
 0x4bf   :  { %1569 = vmatmul.f32.vlgmr.msra.gmra.mxu1 %v8754_v31  ;;  %6922 = vmatmul.msk.f32.vlgmr.msra.gmra.mxu2 %vm495_vm3, %v6920_v10  ;;  %v1735_v9 = vld [vmem:[%s13964_s4 + $0x80] sm:$0xff] }
 0x4c0   :  { %1548 = vmatpush.msra.mxu0 %v6857_v11  ;;  %1751 = vmatpush.msrb.mxu2 %v1734_v22 }
 0x4c1   :  { %1549 = vmatmul.f32.vlgmr.msra.gmra.mxu0 %v8752_v30  ;;  %v1199_v30 = vadd.f32 %v9098_v24, %v9102_v26  ;;  %v9252_v24 = vld [vmem:[%s13964_s4 + $0xf8] sm:$0xff]  ;;  %v1733_v26 = vld [vmem:[%s13964_s4 + $0x70] sm:$0xff] }
 0x4c2   :  { %1752 = vmatpush.msrb.mxu2 %v1733_v26 }
 0x4c4   :  { %1753 = vmatpush.msrb.mxu2 %v1732_v35 }
 0x4c6   :  { %1754 = vmatpush.msrb.mxu2 %v1731_v37 }
 0x4c7   :  { %6923 = vmatmul.msk.f32.gmra.mxu2 %vm495_vm3, %v6921_v12 }
 0x4c8   :  { %1755 = vmatpush.msrb.mxu2 %v1730_v39 }
 0x4ca   :  { %1756 = vmatpush.msrb.mxu2 %v1729_v41 }
 0x4cc   :  { %1757 = vmatpush.msrb.mxu2 %v1728_v44 }
 0x4ce   :  { %1758 = vmatpush.msrb.mxu2 %v1727_v46 }
 0x4d0   :  { %1759 = vmatpush.msrb.mxu2 %v1726_v48 }
 0x4d2   :  { %1760 = vmatpush.msrb.mxu2 %v1725_v51 }
 0x4d4   :  { %1761 = vmatpush.msrb.mxu2 %v1724_v27 }
 0x4d6   :  { %1762 = vmatpush.msrb.mxu2 %v1723_v23 }
 0x4d8   :  { %1763 = vmatpush.msrb.mxu2 %v1722_v0 }
 0x4da   :  { %1764 = vmatpush.msrb.mxu2 %v1721_v2 }
 0x4dc   :  { %1765 = vmatpush.msrb.mxu2 %v1720_v5 }
 0x4de   :  { %1766 = vmatpush.msrb.mxu2 %v1719_v8 }
 0x51b   :  { %v9222_v53 = vpop.f32.mrf.mxu1 }
 0x51c   :  { %v1425_v56 = vadd.f32 %v9222_v53, %v1219_v54  ;;  %v1857_v53 = vld [vmem:[%s13965_s13 + $0x30] sm:$0xff] }
 0x51d   :  { %1874 = vmatpush.msra.mxu2 %v1857_v53 }
 0x51e   :  { %v1395_v13 = vpop.f32.mrf.mxu0 }
 0x51f   :  { %v1424_v29 = vadd.f32 %v1395_v13, %v1196_v19  ;;  %v1858_v13 = vld [vmem:[%s13965_s13 + $0x38] sm:$0xff] }
 0x523   :  { %v9224_v14 = vpop.f32.mrf.mxu1 }
 0x524   :  { %v1427_v55 = vadd.f32 %v9224_v14, %v1222_v50  ;;  %v1855_v14 = vld [vmem:[%s13965_s13 + $0x20] sm:$0xff] }
 0x525   :  { %1875 = vmatpush.msra.mxu2 %v1855_v14 }
 0x526   :  { %v1398_v15 = vpop.f32.mrf.mxu0 }
 0x527   :  { %v1426_v28 = vadd.f32 %v1398_v15, %v1199_v30  ;;  %v1856_v15 = vld [vmem:[%s13965_s13 + $0x28] sm:$0xff] }
 0x53c   :  { %v1570_v16 = vpop.f32.mrf.mxu1 }
 0x53e   :  { %v1550_v17 = vpop.f32.mrf.mxu0 }
 0x53f   :  { %v1571_v31 = vadd.f32 %v1570_v16, %v1550_v17  ;;  %v1853_v16 = vld [vmem:[%s13965_s13 + $0x10] sm:$0xff]  ;;  %v1854_v17 = vld [vmem:[%s13965_s13 + $0x18] sm:$0xff] }
 0x540   :  { %1876 = vmatpush.msra.mxu2 %v1853_v16 }
 0x541   :  { %1620 = vmatpush.msra.mxu3 %v1571_v31  ;;  %v1851_v31 = vld [vmem:[%s13965_s13] sm:$0xff] }
 0x542   :  { %v1599_v18 = vpop.f32.mrf.mxu2  ;;  %6924 = vmatmul.msk.f32.vlgmr.msra.gmra.mxu3 %vm495_vm3, %v6920_v10  ;;  %1877 = vmatpush.msra.mxu2 %v1851_v31 }
 0x543   :  { %v9234_v32 = vadd.f32 %v1599_v18, %v1424_v29  ;;  %1771 = vmatpush.msrb.mxu3 %v9252_v24  ;;  %v1852_v18 = vld [vmem:[%s13965_s13 + $0x8] sm:$0xff] }
 0x545   :  { %v1675_v20 = vmul.f32 %v9234_v32, %v9234_v32  ;;  %1772 = vmatpush.msrb.mxu3 %v9261_v34 }
 0x547   :  { %1773 = vmatpush.msrb.mxu3 %v9269_v36 }
 0x549   :  { %1774 = vmatpush.msrb.mxu3 %v9278_v38 }
 0x54a   :  { %v1602_v57 = vpop.f32.mrf.mxu2  ;;  %6925 = vmatmul.msk.f32.gmra.mxu3 %vm495_vm3, %v6921_v12 }
 0x54b   :  { %v9232_v58 = vadd.f32 %v1602_v57, %v1426_v28  ;;  %1775 = vmatpush.msrb.mxu3 %v9287_v40 }
 0x54d   :  { %v1677_v33 = vmul.f32 %v9232_v58, %v9232_v58  ;;  %1649 = vmatpush.msrb.mxu0 %v9232_v58  ;;  %1776 = vmatpush.msrb.mxu3 %v9296_v42 }
 0x54f   :  { %1650 = vmatpush.msrb.mxu0 %v9234_v32  ;;  %1777 = vmatpush.msrb.mxu3 %v9305_v45 }
 0x550   :  { %6926 = vmatmul.msk.f32.vlgmr.msrb.gmra.mxu0 %vm1632_vm8, %v13941_v61 }
 0x551   :  { %1693 = vmatpush.msra.mxu0 %v1677_v33  ;;  %1778 = vmatpush.msrb.mxu3 %v9314_v47 }
 0x553   :  { %1694 = vmatpush.msra.mxu0 %v1675_v20  ;;  %1779 = vmatpush.msrb.mxu3 %v1742_v49 }
 0x555   :  { %1792 = vmatpush.msrb.mxu0 %v1734_v22  ;;  %1780 = vmatpush.msrb.mxu3 %v1741_v52 }
 0x557   :  { %1793 = vmatpush.msrb.mxu0 %v1733_v26  ;;  %1781 = vmatpush.msrb.mxu3 %v1740_v21 }
 0x558   :  { %6928 = vmatmul.msk.f32.vlgmr.msra.gmra.mxu0 %vm1632_vm8, %v13941_v61 }
 0x559   :  { %1794 = vmatpush.msrb.mxu0 %v1732_v35  ;;  %1782 = vmatpush.msrb.mxu3 %v1739_v63  ;;  %v2023_v35 = vld [vmem:[%s13966_s3 + $0x1f0] sm:$0xff] }
 0x55b   :  { %1795 = vmatpush.msrb.mxu0 %v1731_v37  ;;  %1783 = vmatpush.msrb.mxu3 %v1738_v1  ;;  %v2021_v37 = vld [vmem:[%s13966_s3 + $0x1e0] sm:$0xff] }
 0x55d   :  { %1796 = vmatpush.msrb.mxu0 %v1730_v39  ;;  %1784 = vmatpush.msrb.mxu3 %v1737_v4  ;;  %v1987_v39 = vld [vmem:[%s13966_s3 + $0xd0] sm:$0xff] }
 0x55f   :  { %1797 = vmatpush.msrb.mxu0 %v1729_v41  ;;  %1785 = vmatpush.msrb.mxu3 %v1736_v6  ;;  %v1985_v41 = vld [vmem:[%s13966_s3 + $0xc0] sm:$0xff] }
 0x561   :  { %1798 = vmatpush.msrb.mxu0 %v1728_v44  ;;  %1786 = vmatpush.msrb.mxu3 %v1735_v9  ;;  %v2015_v44 = vld [vmem:[%s13966_s3 + $0x1b0] sm:$0xff] }
 0x563   :  { %1799 = vmatpush.msrb.mxu0 %v1727_v46  ;;  %1894 = vmatpush.msra.mxu3 %v1858_v13  ;;  %v2013_v46 = vld [vmem:[%s13966_s3 + $0x1a0] sm:$0xff] }
 0x565   :  { %1800 = vmatpush.msrb.mxu0 %v1726_v48  ;;  %1895 = vmatpush.msra.mxu3 %v1856_v15  ;;  %v1979_v48 = vld [vmem:[%s13966_s3 + $0x90] sm:$0xff] }
 0x567   :  { %1801 = vmatpush.msrb.mxu0 %v1725_v51  ;;  %1896 = vmatpush.msra.mxu3 %v1854_v17  ;;  %v1977_v51 = vld [vmem:[%s13966_s3 + $0x80] sm:$0xff] }
 0x569   :  { %1802 = vmatpush.msrb.mxu0 %v1724_v27  ;;  %1897 = vmatpush.msra.mxu3 %v1852_v18 }
 0x56b   :  { %1803 = vmatpush.msrb.mxu0 %v1723_v23 }
 0x56d   :  { %1804 = vmatpush.msrb.mxu0 %v1722_v0 }
 0x56f   :  { %1805 = vmatpush.msrb.mxu0 %v1721_v2  ;;  %v1969_v2 = vld [vmem:[%s13966_s3 + $0x40] sm:$0xff] }
 0x571   :  { %1806 = vmatpush.msrb.mxu0 %v1720_v5 }
 0x573   :  { %1807 = vmatpush.msrb.mxu0 %v1719_v8  ;;  %v1967_v8 = vld [vmem:[%s13966_s3 + $0x30] sm:$0xff] }
 0x5c5   :  { %v1622_v43 = vpop.f32.mrf.mxu3 }
 0x5c6   :  { %v9347_v60 = vadd.f32 %v1622_v43, %v1425_v56  ;;  %v1983_v43 = vld [vmem:[%s13966_s3 + $0xb0] sm:$0xff]  ;;  %v1973_v56 = vld [vmem:[%s13966_s3 + $0x60] sm:$0xff] }
 0x5c8   :  { %v1676_v3 = vmul.f32 %v9347_v60, %v9347_v60 }
 0x5cd   :  { %v1625_v25 = vpop.f32.mrf.mxu3  ;;  %v1652_v7 = vpop.f32.mrf.mxu0 }
 0x5ce   :  { %v9339_v59 = vadd.f32 %v1625_v25, %v1427_v55  ;;  %1767 = vmatmul.f32.vlgmr.msrb.gmra.mxu2 %v1652_v7  ;;  %v1975_v55 = vld [vmem:[%s13966_s3 + $0x70] sm:$0xff]  ;;  %v2024_v7 = vld [vmem:[%s13966_s3 + $0x1f8] sm:$0xff] }
 0x5cf   :  { %1917 = vmatpush.msrb.mxu2 %v1857_v53  ;;  %v2007_v25 = vld [vmem:[%s13966_s3 + $0x170] sm:$0xff]  ;;  %v1997_v53 = vld [vmem:[%s13966_s3 + $0x120] sm:$0xff] }
 0x5d0   :  { %v1678_v62 = vmul.f32 %v9339_v59, %v9339_v59  ;;  %1669 = vmatpush.msrb.mxu1 %v9339_v59 }
 0x5d1   :  { %1918 = vmatpush.msrb.mxu2 %v1855_v14  ;;  %v1988_v14 = vld [vmem:[%s13966_s3 + $0xd8] sm:$0xff] }
 0x5d2   :  { %1670 = vmatpush.msrb.mxu1 %v9347_v60 }
 0x5d3   :  { %6927 = vmatmul.msk.f32.vlgmr.msrb.gmra.mxu1 %vm1632_vm8, %v13941_v61  ;;  %1919 = vmatpush.msrb.mxu2 %v1853_v16  ;;  %v1848_v16 = vld [vmem:[%s13917_s12] sm:$0x1] }
 0x5d4   :  { %1713 = vmatpush.msra.mxu1 %v1678_v62  ;;  %v1971_v62 = vld [vmem:[%s13966_s3 + $0x50] sm:$0xff] }
 0x5d5   :  { %v1696_v10 = vpop.f32.mrf.mxu0  ;;  %1920 = vmatpush.msrb.mxu2 %v1851_v31  ;;  %v1995_v31 = vld [vmem:[%s13966_s3 + $0x110] sm:$0xff] }
 0x5d6   :  { %1714 = vmatpush.msra.mxu1 %v1676_v3  ;;  %1808 = vmatmul.f32.vlgmr.msrb.gmra.mxu0 %v1696_v10  ;;  %v2001_v3 = vld [vmem:[%s13966_s3 + $0x140] sm:$0xff]  ;;  %v1990_v10 = vld [vmem:[%s13966_s3 + $0xe8] sm:$0xff] }
 0x5d8   :  { %1812 = vmatpush.msrb.mxu1 %v9252_v24 }
 0x5da   :  { %1813 = vmatpush.msrb.mxu1 %v9261_v34  ;;  %v1991_v34 = vld [vmem:[%s13966_s3 + $0xf0] sm:$0xff] }
 0x5db   :  { %6929 = vmatmul.msk.f32.vlgmr.msra.gmra.mxu1 %vm1632_vm8, %v13941_v61  ;;  %2025 = vmatpush.msra.mxu0 %v1991_v34  ;;  %v1978_v34 = vld [vmem:[%s13966_s3 + $0x88] sm:$0xff] }
 0x5dc   :  { %1814 = vmatpush.msrb.mxu1 %v9269_v36  ;;  %v1989_v36 = vld [vmem:[%s13966_s3 + $0xe0] sm:$0xff] }
 0x5dd   :  { %2026 = vmatpush.msra.mxu0 %v1989_v36  ;;  %v1976_v36 = vld [vmem:[%s13966_s3 + $0x78] sm:$0xff] }
 0x5de   :  { %1815 = vmatpush.msrb.mxu1 %v9278_v38 }
 0x5df   :  { %2027 = vmatpush.msra.mxu0 %v1987_v39  ;;  %v2006_v39 = vld [vmem:[%s13966_s3 + $0x168] sm:$0xff] }
 0x5e0   :  { %1816 = vmatpush.msrb.mxu1 %v9287_v40  ;;  %v2019_v40 = vld [vmem:[%s13966_s3 + $0x1d0] sm:$0xff] }
 0x5e1   :  { %2028 = vmatpush.msra.mxu0 %v1985_v41  ;;  %v2004_v41 = vld [vmem:[%s13966_s3 + $0x158] sm:$0xff] }
 0x5e2   :  { %1817 = vmatpush.msrb.mxu1 %v9296_v42  ;;  %v2017_v42 = vld [vmem:[%s13966_s3 + $0x1c0] sm:$0xff] }
 0x5e3   :  { %2029 = vmatpush.msra.mxu0 %v1983_v43  ;;  %v2002_v43 = vld [vmem:[%s13966_s3 + $0x148] sm:$0xff] }
 0x5e4   :  { %1818 = vmatpush.msrb.mxu1 %v9305_v45  ;;  %v1981_v45 = vld [vmem:[%s13966_s3 + $0xa0] sm:$0xff] }
 0x5e5   :  { %2030 = vmatpush.msra.mxu0 %v1981_v45  ;;  %v2000_v45 = vld [vmem:[%s13966_s3 + $0x138] sm:$0xff] }
 0x5e6   :  { %1819 = vmatpush.msrb.mxu1 %v9314_v47 }
 0x5e7   :  { %2031 = vmatpush.msra.mxu0 %v1979_v48  ;;  %v1964_v48 = vld [vmem:[%s13966_s3 + $0x18] sm:$0xff] }
 0x5e8   :  { %1820 = vmatpush.msrb.mxu1 %v1742_v49  ;;  %v2011_v49 = vld [vmem:[%s13966_s3 + $0x190] sm:$0xff] }
 0x5e9   :  { %2032 = vmatpush.msra.mxu0 %v1977_v51  ;;  %v1994_v51 = vld [vmem:[%s13966_s3 + $0x108] sm:$0xff] }
 0x5ea   :  { %1821 = vmatpush.msrb.mxu1 %v1741_v52  ;;  %v2009_v52 = vld [vmem:[%s13966_s3 + $0x180] sm:$0xff] }
 0x5eb   :  { %2033 = vmatpush.msra.mxu0 %v1975_v55  ;;  %v6965_v55 = vld [vmem:[%s13966_s3 + $0x2f8] sm:$0xff] }
 0x5ec   :  { %1822 = vmatpush.msrb.mxu1 %v1740_v21  ;;  %v2005_v21 = vld [vmem:[%s13966_s3 + $0x160] sm:$0xff] }
 0x5ed   :  { %2034 = vmatpush.msra.mxu0 %v1973_v56  ;;  %v6994_v56 = vld [vmem:[%s13966_s3 + $0x3e0] sm:$0xff] }
 0x5ee   :  { %1823 = vmatpush.msrb.mxu1 %v1739_v63  ;;  %v2003_v63 = vld [vmem:[%s13966_s3 + $0x150] sm:$0xff] }
 0x5ef   :  { %2035 = vmatpush.msra.mxu0 %v1971_v62  ;;  %v6960_v62 = vld [vmem:[%s13966_s3 + $0x2d0] sm:$0xff] }
 0x5f0   :  { %1824 = vmatpush.msrb.mxu1 %v1738_v1  ;;  %v1835_v1 = vld [vmem:[%s13916_s11] sm:$0x1] }
 0x5f1   :  { %2036 = vmatpush.msra.mxu0 %v1969_v2  ;;  %v6958_v2 = vld [vmem:[%s13966_s3 + $0x2c0] sm:$0xff] }
 0x5f2   :  { %1825 = vmatpush.msrb.mxu1 %v1737_v4 }
 0x5f3   :  { %2037 = vmatpush.msra.mxu0 %v1967_v8  ;;  %v6957_v8 = vld [vmem:[%s13966_s3 + $0x2b8] sm:$0xff] }
 0x5f4   :  { %1826 = vmatpush.msrb.mxu1 %v1736_v6  ;;  %v1992_v6 = vld [vmem:[%s13966_s3 + $0xf8] sm:$0xff] }
 0x5f6   :  { %1827 = vmatpush.msrb.mxu1 %v1735_v9  ;;  %v1999_v9 = vld [vmem:[%s13966_s3 + $0x130] sm:$0xff] }
 0x5f8   :  { %2048 = vmatpush.msra.mxu1 %v2023_v35  ;;  %v2010_v35 = vld [vmem:[%s13966_s3 + $0x188] sm:$0xff] }
 0x5fa   :  { %2049 = vmatpush.msra.mxu1 %v2021_v37  ;;  %v2008_v37 = vld [vmem:[%s13966_s3 + $0x178] sm:$0xff] }
 0x5fc   :  { %2050 = vmatpush.msra.mxu1 %v2019_v40  ;;  %v1972_v40 = vld [vmem:[%s13966_s3 + $0x58] sm:$0xff] }
 0x5fe   :  { %2051 = vmatpush.msra.mxu1 %v2017_v42  ;;  %v1970_v42 = vld [vmem:[%s13966_s3 + $0x48] sm:$0xff] }
 0x600   :  { %2052 = vmatpush.msra.mxu1 %v2015_v44  ;;  %v1968_v44 = vld [vmem:[%s13966_s3 + $0x38] sm:$0xff] }
 0x602   :  { %2053 = vmatpush.msra.mxu1 %v2013_v46  ;;  %v1966_v46 = vld [vmem:[%s13966_s3 + $0x28] sm:$0xff] }
 0x604   :  { %2054 = vmatpush.msra.mxu1 %v2011_v49  ;;  %v1996_v49 = vld [vmem:[%s13966_s3 + $0x118] sm:$0xff] }
 0x606   :  { %2055 = vmatpush.msra.mxu1 %v2009_v52  ;;  %v6964_v52 = vld [vmem:[%s13966_s3 + $0x2f0] sm:$0xff] }
 0x608   :  { %2056 = vmatpush.msra.mxu1 %v2007_v25  ;;  %v6997_v25 = vld [vmem:[%s13966_s3 + $0x3f8] sm:$0xff] }
 0x60a   :  { %2057 = vmatpush.msra.mxu1 %v2005_v21  ;;  %v6963_v21 = vld [vmem:[%s13966_s3 + $0x2e8] sm:$0xff] }
 0x60c   :  { %2058 = vmatpush.msra.mxu1 %v2003_v63  ;;  %v6992_v63 = vld [vmem:[%s13966_s3 + $0x3d0] sm:$0xff] }
 0x60e   :  { %2059 = vmatpush.msra.mxu1 %v2001_v3  ;;  %v6990_v3 = vld [vmem:[%s13966_s3 + $0x3c0] sm:$0xff] }
 0x610   :  { %2060 = vmatpush.msra.mxu1 %v1999_v9  ;;  %v6989_v9 = vld [vmem:[%s13966_s3 + $0x3b8] sm:$0xff] }
 0x612   :  { %2061 = vmatpush.msra.mxu1 %v1997_v53  ;;  %v6987_v53 = vld [vmem:[%s13966_s3 + $0x3a8] sm:$0xff] }
 0x614   :  { %2062 = vmatpush.msra.mxu1 %v1995_v31  ;;  %v6982_v31 = vld [vmem:[%s13966_s3 + $0x380] sm:$0xff] }
 0x650   :  { %v1672_v11 = vpop.f32.mrf.mxu1 }
 0x651   :  { %1787 = vmatmul.f32.vlgmr.msrb.gmra.mxu3 %v1672_v11  ;;  %v1768_v30 = vpop.f32.mrf.mxu2  ;;  %v2022_v11 = vld [vmem:[%s13966_s3 + $0x1e8] sm:$0xff] }
 0x652   :  { %1937 = vmatpush.msrb.mxu3 %v1858_v13 }
 0x653   :  { %v1809_v28 = vpop.f32.mrf.mxu0 }
 0x654   :  { %1938 = vmatpush.msrb.mxu3 %v1856_v15  ;;  %v2020_v15 = vld [vmem:[%s13966_s3 + $0x1d8] sm:$0xff] }
 0x656   :  { %1939 = vmatpush.msrb.mxu3 %v1854_v17  ;;  %v1963_v17 = vld [vmem:[%s13966_s3 + $0x10] sm:$0xff] }
 0x658   :  { %v1716_v12 = vpop.f32.mrf.mxu1  ;;  %1940 = vmatpush.msrb.mxu3 %v1852_v18  ;;  %v1986_v18 = vld [vmem:[%s13966_s3 + $0xc8] sm:$0xff] }
 0x659   :  { %1828 = vmatmul.f32.vlgmr.msrb.gmra.mxu1 %v1716_v12  ;;  %v1965_v12 = vld [vmem:[%s13966_s3 + $0x20] sm:$0xff] }
 0x65a   :  { %2038 = vmatpush.msra.mxu0 %v1965_v12  ;;  %v6955_v12 = vld [vmem:[%s13966_s3 + $0x2a8] sm:$0xff] }
 0x65c   :  { %2039 = vmatpush.msra.mxu0 %v1963_v17  ;;  %v6950_v17 = vld [vmem:[%s13966_s3 + $0x280] sm:$0xff] }
 0x6d4   :  { %v1788_v19 = vpop.f32.mrf.mxu3 }
 0x6d5   :  { %v1789_v29 = vadd.f32 %v1788_v19, %v1768_v30  ;;  %v2018_v30 = vld [vmem:[%s13966_s3 + $0x1c8] sm:$0xff] }
 0x6d6   :  { %v1829_v57 = vpop.f32.mrf.mxu1 }
 0x6d7   :  { %v9418_v33 = vmul.f32 0.0078125, %v1789_v29  ;;  %v1830_v20 = vadd.f32 %v1829_v57, %v1809_v28  ;;  %v1984_v28 = vld [vmem:[%s13966_s3 + $0xb8] sm:$0xff]  ;;  %v1961_v57 = vld [vmem:[%s13966_s3] sm:$0xff] }
 0x6d8   :  { %v2016_v29 = vld [vmem:[%s13966_s3 + $0x1b8] sm:$0xff]  ;;  %2040 = vmatpush.msra.mxu0 %v1961_v57 }
 0x6d9   :  { %v1833_v22 = vmul.f32 %v9418_v33, %v9418_v33  ;;  %v1832_v24 = vmul.f32 0.0078125, %v1830_v20  ;;  %v1982_v20 = vld [vmem:[%s13966_s3 + $0xa8] sm:$0xff]  ;;  %v6981_v57 = vld [vmem:[%s13966_s3 + $0x378] sm:$0xff] }
 0x6da   :  { %2186 = vmatpush.msrb.mxu0 %v6964_v52  ;;  %v6969_v52 = vld [vmem:[%s13966_s3 + $0x318] sm:$0xff] }
 0x6db   :  { %v1834_v26 = vsub.f32 %v1832_v24, %v1833_v22  ;;  %v2014_v22 = vld [vmem:[%s13966_s3 + $0x1a8] sm:$0xff]  ;;  %v1980_v24 = vld [vmem:[%s13966_s3 + $0x98] sm:$0xff] }
 0x6dd   :  { %v1836_v38 = vadd.f32 1e-05, %v1834_v26  ;;  %v2012_v26 = vld [vmem:[%s13966_s3 + $0x198] sm:$0xff] }
 0x6df   :  { %7837 = vrsqrt.f32 %v1836_v38  ;;  %vm1843_vm10 = vweird.f32 %v1836_v38 }
 0x6e5   :  { %v7838_v47 = vpop.eup %7837 }
 0x6e6   :  { %v1838_v50 = vmul.f32 %v7838_v47, %v1836_v38  ;;  %vm1844_vm9 = vweird.f32 %v7838_v47  ;;  %v1974_v38 = vld [vmem:[%s13966_s3 + $0x68] sm:$0xff] }
 0x6e7   :  { %vm1845_vm11 = vmor %vm1843_vm10, %vm1844_vm9 }
 0x6e8   :  { %v1839_v54 = vmul.f32 %v7838_v47, %v1838_v50  ;;  %v1962_v50 = vld [vmem:[%s13966_s3 + $0x8] sm:$0xff] }
 0x6ea   :  { %v1840_v27 = vmul.f32 0.5, %v1839_v54  ;;  %v6996_v54 = vld [vmem:[%s13966_s3 + $0x3f0] sm:$0xff] }
 0x6ec   :  { %v1841_v23 = vsub.f32 1.5, %v1840_v27  ;;  %v6962_v27 = vld [vmem:[%s13966_s3 + $0x2e0] sm:$0xff] }
 0x6ed   :  { %2187 = vmatpush.msrb.mxu0 %v6962_v27  ;;  %v6967_v27 = vld [vmem:[%s13966_s3 + $0x308] sm:$0xff] }
 0x6ee   :  { %v1842_v0 = vmul.f32 %v7838_v47, %v1841_v23  ;;  %v6995_v23 = vld [vmem:[%s13966_s3 + $0x3e8] sm:$0xff] }
 0x6ef   :  { %2188 = vmatpush.msrb.mxu0 %v6960_v62 }
 0x6f0   :  { %v1846_v4 = vsel %vm1845_vm11, %v7838_v47, %v1842_v0  ;;  %v1998_v47 = vld [vmem:[%s13966_s3 + $0x128] sm:$0xff]  ;;  %v6961_v0 = vld [vmem:[%s13966_s3 + $0x2d8] sm:$0xff] }
 0x6f1   :  { %v1847_v5 = vmul.f32 %v1846_v4, %v1835_v1  ;;  %v6993_v1 = vld [vmem:[%s13966_s3 + $0x3d8] sm:$0xff]  ;;  %v6959_v4 = vld [vmem:[%s13966_s3 + $0x2c8] sm:$0xff]  ;;  %2189 = vmatpush.msrb.mxu0 %v6958_v2 }
 0x6f3   :  { %6930 = vmatmul.msk.f32.vlgmr.msra.gmra.mxu2 %vm95_vm0, %v1847_v5  ;;  %6931 = vmatmul.msk.f32.vlgmr.msra.gmra.mxu3 %vm95_vm0, %v1847_v5  ;;  %v1849_v13 = vmul.f32 %v1847_v5, %v9418_v33  ;;  %v1993_v33 = vld [vmem:[%s13966_s3 + $0x100] sm:$0xff]  ;;  %v6991_v5 = vld [vmem:[%s13966_s3 + $0x3c8] sm:$0xff] }
 0x6f4   :  { %2071 = vmatpush.msra.mxu2 %v1992_v6  ;;  %2094 = vmatpush.msra.mxu3 %v2024_v7  ;;  %v6956_v6 = vld [vmem:[%s13966_s3 + $0x2b0] sm:$0xff] }
 0x6f5   :  { %v1850_v19 = vsub.f32 %v1848_v16, %v1849_v13  ;;  %2063 = vmatpush.msra.mxu1 %v1993_v33  ;;  %v6988_v7 = vld [vmem:[%s13966_s3 + $0x3b0] sm:$0xff]  ;;  %2190 = vmatpush.msrb.mxu0 %v6956_v6  ;;  %v6985_v16 = vld [vmem:[%s13966_s3 + $0x398] sm:$0xff]  ;;  %v6946_v33 = vld [vmem:[%s13966_s3 + $0x260] sm:$0xff] }
 0x6f6   :  { %2072 = vmatpush.msra.mxu2 %v1990_v10  ;;  %2095 = vmatpush.msra.mxu3 %v2022_v11  ;;  %v6954_v10 = vld [vmem:[%s13966_s3 + $0x2a0] sm:$0xff]  ;;  %v6952_v13 = vld [vmem:[%s13966_s3 + $0x290] sm:$0xff] }
 0x6f7   :  { %2209 = vmatpush.msrb.mxu1 %v6996_v54  ;;  %v6986_v11 = vld [vmem:[%s13966_s3 + $0x3a0] sm:$0xff]  ;;  %2191 = vmatpush.msrb.mxu0 %v6954_v10 }
 0x6f8   :  { %2073 = vmatpush.msra.mxu2 %v1988_v14  ;;  %2096 = vmatpush.msra.mxu3 %v2020_v15  ;;  %v6984_v14 = vld [vmem:[%s13966_s3 + $0x390] sm:$0xff]  ;;  %v6953_v15 = vld [vmem:[%s13966_s3 + $0x298] sm:$0xff]  ;;  %v6934_v54 = vld [vmem:[%s13966_s3 + $0x200] sm:$0xff] }
 0x6f9   :  { %2210 = vmatpush.msrb.mxu1 %v6994_v56  ;;  %2192 = vmatpush.msrb.mxu0 %v6952_v13 }
 0x6fa   :  { %2074 = vmatpush.msra.mxu2 %v1986_v18  ;;  %2097 = vmatpush.msra.mxu3 %v2018_v30  ;;  %v6951_v18 = vld [vmem:[%s13966_s3 + $0x288] sm:$0xff] }
 0x6fb   :  { %6932 = vmatmul.msk.f32.vlgmr.msrb.gmra.mxu2 %vm95_vm0, %v1850_v19  ;;  %6933 = vmatmul.msk.f32.vlgmr.msrb.gmra.mxu3 %vm95_vm0, %v1850_v19  ;;  %v6983_v30 = vld [vmem:[%s13966_s3 + $0x388] sm:$0xff]  ;;  %v6948_v19 = vld [vmem:[%s13966_s3 + $0x270] sm:$0xff] }
 0x6fc   :  { %2075 = vmatpush.msra.mxu2 %v1984_v28  ;;  %2098 = vmatpush.msra.mxu3 %v2016_v29  ;;  %v6980_v28 = vld [vmem:[%s13966_s3 + $0x370] sm:$0xff]  ;;  %v6949_v29 = vld [vmem:[%s13966_s3 + $0x278] sm:$0xff] }
 0x6fd   :  { %2211 = vmatpush.msrb.mxu1 %v6992_v63  ;;  %2193 = vmatpush.msrb.mxu0 %v6950_v17 }
 0x6fe   :  { %2076 = vmatpush.msra.mxu2 %v1982_v20  ;;  %2099 = vmatpush.msra.mxu3 %v2014_v22  ;;  %v6978_v20 = vld [vmem:[%s13966_s3 + $0x360] sm:$0xff]  ;;  %v6947_v22 = vld [vmem:[%s13966_s3 + $0x268] sm:$0xff] }
 0x6ff   :  { %2212 = vmatpush.msrb.mxu1 %v6990_v3  ;;  %2194 = vmatpush.msrb.mxu0 %v6948_v19 }
 0x700   :  { %2077 = vmatpush.msra.mxu2 %v1980_v24  ;;  %2100 = vmatpush.msra.mxu3 %v2012_v26  ;;  %v6979_v24 = vld [vmem:[%s13966_s3 + $0x368] sm:$0xff]  ;;  %v6944_v26 = vld [vmem:[%s13966_s3 + $0x250] sm:$0xff] }
 0x701   :  { %2213 = vmatpush.msrb.mxu1 %v6988_v7  ;;  %2195 = vmatpush.msrb.mxu0 %v6946_v33 }
 0x702   :  { %2078 = vmatpush.msra.mxu2 %v1978_v34  ;;  %2101 = vmatpush.msra.mxu3 %v2010_v35  ;;  %v6976_v34 = vld [vmem:[%s13966_s3 + $0x350] sm:$0xff]  ;;  %v6945_v35 = vld [vmem:[%s13966_s3 + $0x258] sm:$0xff] }
 0x703   :  { %2214 = vmatpush.msrb.mxu1 %v6986_v11  ;;  %2196 = vmatpush.msrb.mxu0 %v6944_v26  ;;  %v7081_v26 = vld [vmem:[%s13966_s3 + $0x5f8] sm:$0xff] }
 0x704   :  { %2079 = vmatpush.msra.mxu2 %v1976_v36  ;;  %2102 = vmatpush.msra.mxu3 %v2008_v37  ;;  %v6977_v36 = vld [vmem:[%s13966_s3 + $0x358] sm:$0xff]  ;;  %v6942_v37 = vld [vmem:[%s13966_s3 + $0x240] sm:$0xff] }
 0x705   :  { %2215 = vmatpush.msrb.mxu1 %v6984_v14  ;;  %2197 = vmatpush.msrb.mxu0 %v6942_v37  ;;  %v7039_v37 = vld [vmem:[%s13966_s3 + $0x4a8] sm:$0xff] }
 0x706   :  { %2080 = vmatpush.msra.mxu2 %v1974_v38  ;;  %2103 = vmatpush.msra.mxu3 %v2006_v39  ;;  %v6974_v38 = vld [vmem:[%s13966_s3 + $0x340] sm:$0xff]  ;;  %v6943_v39 = vld [vmem:[%s13966_s3 + $0x248] sm:$0xff] }
 0x707   :  { %2216 = vmatpush.msrb.mxu1 %v6982_v31  ;;  %v2117_v31 = vld [vmem:[%s13918_s14] sm:$0xff] }
 0x708   :  { %2081 = vmatpush.msra.mxu2 %v1972_v40  ;;  %2104 = vmatpush.msra.mxu3 %v2004_v41  ;;  %v6975_v40 = vld [vmem:[%s13966_s3 + $0x348] sm:$0xff]  ;;  %v6940_v41 = vld [vmem:[%s13966_s3 + $0x230] sm:$0xff] }
 0x709   :  { %2217 = vmatpush.msrb.mxu1 %v6980_v28  ;;  %2198 = vmatpush.msrb.mxu0 %v6940_v41 }
 0x70a   :  { %2082 = vmatpush.msra.mxu2 %v1970_v42  ;;  %2105 = vmatpush.msra.mxu3 %v2002_v43  ;;  %v6972_v42 = vld [vmem:[%s13966_s3 + $0x330] sm:$0xff]  ;;  %v6941_v43 = vld [vmem:[%s13966_s3 + $0x238] sm:$0xff] }
 0x70b   :  { %2218 = vmatpush.msrb.mxu1 %v6978_v20  ;;  %v7045_v20 = vld [vmem:[%s13966_s3 + $0x4d8] sm:$0xff] }
 0x70c   :  { %2083 = vmatpush.msra.mxu2 %v1968_v44  ;;  %2106 = vmatpush.msra.mxu3 %v2000_v45  ;;  %v6973_v44 = vld [vmem:[%s13966_s3 + $0x338] sm:$0xff]  ;;  %v6938_v45 = vld [vmem:[%s13966_s3 + $0x220] sm:$0xff] }
 0x70d   :  { %2219 = vmatpush.msrb.mxu1 %v6976_v34  ;;  %2199 = vmatpush.msrb.mxu0 %v6938_v45  ;;  %v2118_v34 = vld [vmem:[%s13918_s14 + $0x8] sm:$0xff] }
 0x70e   :  { %2084 = vmatpush.msra.mxu2 %v1966_v46  ;;  %2107 = vmatpush.msra.mxu3 %v1998_v47  ;;  %v6970_v46 = vld [vmem:[%s13966_s3 + $0x320] sm:$0xff]  ;;  %v6939_v47 = vld [vmem:[%s13966_s3 + $0x228] sm:$0xff] }
 0x70f   :  { %2220 = vmatpush.msrb.mxu1 %v6974_v38  ;;  %v7075_v45 = vld [vmem:[%s13966_s3 + $0x5c8] sm:$0xff] }
 0x710   :  { %2085 = vmatpush.msra.mxu2 %v1964_v48  ;;  %2108 = vmatpush.msra.mxu3 %v1996_v49  ;;  %v6971_v48 = vld [vmem:[%s13966_s3 + $0x328] sm:$0xff]  ;;  %v6936_v49 = vld [vmem:[%s13966_s3 + $0x210] sm:$0xff] }
 0x711   :  { %2221 = vmatpush.msrb.mxu1 %v6972_v42  ;;  %2200 = vmatpush.msrb.mxu0 %v6936_v49  ;;  %v6998_v49 = vld [vmem:[%s13918_s14 + $0x20] sm:$0xff] }
 0x712   :  { %2086 = vmatpush.msra.mxu2 %v1962_v50  ;;  %2109 = vmatpush.msra.mxu3 %v1994_v51  ;;  %v6968_v50 = vld [vmem:[%s13966_s3 + $0x310] sm:$0xff]  ;;  %v6937_v51 = vld [vmem:[%s13966_s3 + $0x218] sm:$0xff] }
 0x713   :  { %2222 = vmatpush.msrb.mxu1 %v6970_v46  ;;  %2201 = vmatpush.msrb.mxu0 %v6934_v54  ;;  %v7035_v46 = vld [vmem:[%s13966_s3 + $0x488] sm:$0xff]  ;;  %v7048_v54 = vld [vmem:[%s13966_s3 + $0x4f0] sm:$0xff] }
 0x714   :  { %2232 = vmatpush.msrb.mxu2 %v6965_v55  ;;  %2255 = vmatpush.msrb.mxu3 %v6997_v25  ;;  %v6966_v55 = vld [vmem:[%s13966_s3 + $0x300] sm:$0xff]  ;;  %v6935_v25 = vld [vmem:[%s13966_s3 + $0x208] sm:$0xff] }
 0x715   :  { %2223 = vmatpush.msrb.mxu1 %v6968_v50  ;;  %v2119_v50 = vld [vmem:[%s13918_s14 + $0x10] sm:$0xff] }
 0x716   :  { %2233 = vmatpush.msrb.mxu2 %v6963_v21  ;;  %2256 = vmatpush.msrb.mxu3 %v6995_v23 }
 0x717   :  { %2224 = vmatpush.msrb.mxu1 %v6966_v55 }
 0x718   :  { %2234 = vmatpush.msrb.mxu2 %v6961_v0  ;;  %2257 = vmatpush.msrb.mxu3 %v6993_v1 }
 0x71a   :  { %2235 = vmatpush.msrb.mxu2 %v6959_v4  ;;  %2258 = vmatpush.msrb.mxu3 %v6991_v5 }
 0x71c   :  { %2236 = vmatpush.msrb.mxu2 %v6957_v8  ;;  %2259 = vmatpush.msrb.mxu3 %v6989_v9 }
 0x71e   :  { %2237 = vmatpush.msrb.mxu2 %v6955_v12  ;;  %2260 = vmatpush.msrb.mxu3 %v6987_v53 }
 0x720   :  { %2238 = vmatpush.msrb.mxu2 %v6953_v15  ;;  %2261 = vmatpush.msrb.mxu3 %v6985_v16 }
 0x722   :  { %2239 = vmatpush.msrb.mxu2 %v6951_v18  ;;  %2262 = vmatpush.msrb.mxu3 %v6983_v30  ;;  %v7049_v18 = vld [vmem:[%s13966_s3 + $0x4f8] sm:$0xff]  ;;  %v7047_v30 = vld [vmem:[%s13966_s3 + $0x4e8] sm:$0xff] }
 0x724   :  { %2240 = vmatpush.msrb.mxu2 %v6949_v29  ;;  %2263 = vmatpush.msrb.mxu3 %v6981_v57 }
 0x726   :  { %2241 = vmatpush.msrb.mxu2 %v6947_v22  ;;  %2264 = vmatpush.msrb.mxu3 %v6979_v24  ;;  %v7043_v24 = vld [vmem:[%s13966_s3 + $0x4c8] sm:$0xff] }
 0x728   :  { %2242 = vmatpush.msrb.mxu2 %v6945_v35  ;;  %2265 = vmatpush.msrb.mxu3 %v6977_v36  ;;  %v7041_v35 = vld [vmem:[%s13966_s3 + $0x4b8] sm:$0xff]  ;;  %v7079_v36 = vld [vmem:[%s13966_s3 + $0x5e8] sm:$0xff] }
 0x72a   :  { %2243 = vmatpush.msrb.mxu2 %v6943_v39  ;;  %2266 = vmatpush.msrb.mxu3 %v6975_v40  ;;  %v7077_v40 = vld [vmem:[%s13966_s3 + $0x5d8] sm:$0xff] }
 0x72c   :  { %2244 = vmatpush.msrb.mxu2 %v6941_v43  ;;  %2267 = vmatpush.msrb.mxu3 %v6973_v44  ;;  %v7037_v43 = vld [vmem:[%s13966_s3 + $0x498] sm:$0xff] }
 0x72e   :  { %2245 = vmatpush.msrb.mxu2 %v6939_v47  ;;  %2268 = vmatpush.msrb.mxu3 %v6971_v48  ;;  %v7073_v47 = vld [vmem:[%s13966_s3 + $0x5b8] sm:$0xff] }
 0x730   :  { %2246 = vmatpush.msrb.mxu2 %v6937_v51  ;;  %2269 = vmatpush.msrb.mxu3 %v6969_v52  ;;  %v7033_v51 = vld [vmem:[%s13966_s3 + $0x478] sm:$0xff]  ;;  %v7071_v52 = vld [vmem:[%s13966_s3 + $0x5a8] sm:$0xff] }
 0x732   :  { %2247 = vmatpush.msrb.mxu2 %v6935_v25  ;;  %2270 = vmatpush.msrb.mxu3 %v6967_v27  ;;  %v7031_v27 = vld [vmem:[%s13966_s3 + $0x468] sm:$0xff] }
 0x776   :  { %v1879_v56 = vpop.f32.mrf.mxu2  ;;  %v1899_v21 = vpop.f32.mrf.mxu3 }
 0x777   :  { %v1945_v23 = vperm.slane %v1879_v56, 0  ;;  %v1946_v62 = vperm.slane %v1899_v21, 0  ;;  %v7069_v56 = vld [vmem:[%s13966_s3 + $0x598] sm:$0xff] }
 0x779   :  { %v1947_v1 = vmul.f32 %v1945_v23, %v9234_v32  ;;  %v1948_v2 = vmul.f32 %v1946_v62, %v9347_v60  ;;  %v1949_v9 = vmul.f32 %v1945_v23, %v9232_v58  ;;  %v1950_v10 = vmul.f32 %v1946_v62, %v9339_v59  ;;  %v7046_v23 = vld [vmem:[%s13966_s3 + $0x4e0] sm:$0xff]  ;;  %v7029_v62 = vld [vmem:[%s13966_s3 + $0x458] sm:$0xff] }
 0x77e   :  { %v1922_v63 = vpop.f32.mrf.mxu2  ;;  %v1942_v0 = vpop.f32.mrf.mxu3 }
 0x77f   :  { %v1951_v3 = vperm.slane %v1922_v63, 0  ;;  %v1952_v4 = vperm.slane %v1942_v0, 0  ;;  %v7067_v63 = vld [vmem:[%s13966_s3 + $0x588] sm:$0xff]  ;;  %v7044_v0 = vld [vmem:[%s13966_s3 + $0x4d0] sm:$0xff] }
 0x781   :  { %v1953_v5 = vadd.f32 %v1951_v3, %v1947_v1  ;;  %v1954_v6 = vadd.f32 %v1952_v4, %v1948_v2  ;;  %v1955_v32 = vadd.f32 %v1951_v3, %v1949_v9  ;;  %v1956_v60 = vadd.f32 %v1952_v4, %v1950_v10  ;;  %v7027_v2 = vld [vmem:[%s13966_s3 + $0x448] sm:$0xff]  ;;  %v7065_v3 = vld [vmem:[%s13966_s3 + $0x578] sm:$0xff]  ;;  %v7042_v4 = vld [vmem:[%s13966_s3 + $0x4c0] sm:$0xff] }
 0x782   :  { %v2120_v9 = vld [vmem:[%s13918_s14 + $0x18] sm:$0xff] }
 0x783   :  { %v9819_v7 = vmax.f32 %v1953_v5, 0.0  ;;  %v9821_v8 = vmax.f32 %v1954_v6, 0.0  ;;  %v9829_v11 = vmax.f32 %v1955_v32, 0.0  ;;  %v9831_v12 = vmax.f32 %v1956_v60, 0.0  ;;  %v7080_v5 = vld [vmem:[%s13966_s3 + $0x5f0] sm:$0xff]  ;;  %v6999_v6 = vld [vmem:[%s13918_s14 + $0x28] sm:$0xff] }
 0x784   :  { %v7025_v10 = vld [vmem:[%s13966_s3 + $0x438] sm:$0xff]  ;;  %v7063_v32 = vld [vmem:[%s13966_s3 + $0x568] sm:$0xff]  ;;  %v7040_v60 = vld [vmem:[%s13966_s3 + $0x4b0] sm:$0xff] }
 0x785   :  { %2041 = vmatmul.f32.vlgmr.msra.gmra.mxu0 %v9819_v7  ;;  %2064 = vmatmul.f32.vlgmr.msra.gmra.mxu1 %v9821_v8 }
 0x786   :  { %2087 = vmatmul.f32.vlgmr.msra.gmra.mxu2 %v9819_v7  ;;  %2110 = vmatmul.f32.vlgmr.msra.gmra.mxu3 %v9821_v8 }
 0x78d   :  { %2044 = vmatmul.f32.gmra.mxu0 %v9829_v11  ;;  %2067 = vmatmul.f32.gmra.mxu1 %v9831_v12 }
 0x78e   :  { %2090 = vmatmul.f32.gmra.mxu2 %v9829_v11  ;;  %2113 = vmatmul.f32.gmra.mxu3 %v9831_v12 }
 0x795   :  { %2202 = vmatmul.f32.vlgmr.msrb.gmra.mxu0 %v9819_v7  ;;  %2225 = vmatmul.f32.vlgmr.msrb.gmra.mxu1 %v9821_v8 }
 0x796   :  { %2248 = vmatmul.f32.vlgmr.msrb.gmra.mxu2 %v9819_v7  ;;  %2271 = vmatmul.f32.vlgmr.msrb.gmra.mxu3 %v9821_v8 }
 0x79d   :  { %2205 = vmatmul.f32.gmra.mxu0 %v9829_v11  ;;  %2228 = vmatmul.f32.gmra.mxu1 %v9831_v12 }
 0x79e   :  { %2251 = vmatmul.f32.gmra.mxu2 %v9829_v11  ;;  %2274 = vmatmul.f32.gmra.mxu3 %v9831_v12 }
 0x802   :  { %v2042_v58 = vpop.f32.mrf.mxu0  ;;  %v2065_v59 = vpop.f32.mrf.mxu1 }
 0x803   :  { %v2066_v17 = vadd.f32 %v2065_v59, %v2042_v58  ;;  %v7078_v58 = vld [vmem:[%s13966_s3 + $0x5e0] sm:$0xff]  ;;  %v7023_v59 = vld [vmem:[%s13966_s3 + $0x428] sm:$0xff] }
 0x809   :  { %v2088_v53 = vpop.f32.mrf.mxu2  ;;  %v2111_v13 = vpop.f32.mrf.mxu3 }
 0x80a   :  { %v2045_v14 = vpop.f32.mrf.mxu0  ;;  %v2068_v15 = vpop.f32.mrf.mxu1  ;;  %v2112_v22 = vadd.f32 %v2111_v13, %v2088_v53  ;;  %v7061_v53 = vld [vmem:[%s13966_s3 + $0x558] sm:$0xff]  ;;  %v7038_v13 = vld [vmem:[%s13966_s3 + $0x4a0] sm:$0xff] }
 0x80b   :  { %v2069_v16 = vadd.f32 %v2068_v15, %v2045_v14  ;;  %v7076_v14 = vld [vmem:[%s13966_s3 + $0x5d0] sm:$0xff]  ;;  %v7021_v15 = vld [vmem:[%s13966_s3 + $0x418] sm:$0xff] }
 0x80d   :  { %2379 = vmatpush.msra.mxu2 %v2069_v16  ;;  %v7059_v16 = vld [vmem:[%s13966_s3 + $0x548] sm:$0xff] }
 0x80f   :  { %2380 = vmatpush.msra.mxu2 %v2066_v17  ;;  %v7036_v17 = vld [vmem:[%s13966_s3 + $0x490] sm:$0xff] }
 0x810   :  { %7010 = vmatmul.msk.f32.vlgmr.msra.gmra.mxu2 %vm1632_vm8, %v2117_v31 }
 0x811   :  { %v2091_v19 = vpop.f32.mrf.mxu2  ;;  %v2114_v28 = vpop.f32.mrf.mxu3  ;;  %2534 = vmatpush.msrb.mxu2 %v7049_v18  ;;  %v7019_v18 = vld [vmem:[%s13966_s3 + $0x408] sm:$0xff] }
 0x812   :  { %v2115_v29 = vadd.f32 %v2114_v28, %v2091_v19  ;;  %v2203_v57 = vpop.f32.mrf.mxu0  ;;  %v2226_v33 = vpop.f32.mrf.mxu1  ;;  %v7034_v19 = vld [vmem:[%s13966_s3 + $0x480] sm:$0xff]  ;;  %v7072_v28 = vld [vmem:[%s13966_s3 + $0x5b0] sm:$0xff] }
 0x813   :  { %2535 = vmatpush.msrb.mxu2 %v7047_v30  ;;  %v2227_v48 = vadd.f32 %v2226_v33, %v2203_v57  ;;  %v7057_v30 = vld [vmem:[%s13966_s3 + $0x538] sm:$0xff]  ;;  %v7000_v57 = vld [vmem:[%s13918_s14 + $0x30] sm:$0xff]  ;;  %v7055_v33 = vld [vmem:[%s13966_s3 + $0x528] sm:$0xff] }
 0x814   :  { %2408 = vmatpush.msra.mxu3 %v2115_v29  ;;  %v7124_v29 = vld [vmem:[%s13966_s3 + $0x6f0] sm:$0xff] }
 0x815   :  { %2536 = vmatpush.msrb.mxu2 %v7045_v20  ;;  %v7032_v20 = vld [vmem:[%s13966_s3 + $0x470] sm:$0xff] }
 0x816   :  { %2409 = vmatpush.msra.mxu3 %v2112_v22  ;;  %v7070_v22 = vld [vmem:[%s13966_s3 + $0x5a0] sm:$0xff] }
 0x817   :  { %7014 = vmatmul.msk.f32.vlgmr.msra.gmra.mxu3 %vm1632_vm8, %v2117_v31  ;;  %2537 = vmatpush.msrb.mxu2 %v7043_v24  ;;  %v7074_v31 = vld [vmem:[%s13966_s3 + $0x5c0] sm:$0xff] }
 0x818   :  { %2557 = vmatpush.msrb.mxu3 %v7081_v26  ;;  %7011 = vmatmul.msk.f32.gmra.mxu2 %vm1632_vm8, %v2118_v34  ;;  %v7122_v24 = vld [vmem:[%s13966_s3 + $0x6e0] sm:$0xff]  ;;  %v7053_v26 = vld [vmem:[%s13966_s3 + $0x518] sm:$0xff] }
 0x819   :  { %v2249_v38 = vpop.f32.mrf.mxu2  ;;  %v2272_v39 = vpop.f32.mrf.mxu3  ;;  %2538 = vmatpush.msrb.mxu2 %v7041_v35  ;;  %v7068_v35 = vld [vmem:[%s13966_s3 + $0x590] sm:$0xff] }
 0x81a   :  { %2558 = vmatpush.msrb.mxu3 %v7079_v36  ;;  %v2206_v41 = vpop.f32.mrf.mxu0  ;;  %v2229_v42 = vpop.f32.mrf.mxu1  ;;  %v2273_v1 = vadd.f32 %v2272_v39, %v2249_v38  ;;  %v7120_v36 = vld [vmem:[%s13966_s3 + $0x6d0] sm:$0xff]  ;;  %v7066_v39 = vld [vmem:[%s13966_s3 + $0x580] sm:$0xff] }
 0x81b   :  { %v2230_v44 = vadd.f32 %v2229_v42, %v2206_v41  ;;  %2539 = vmatpush.msrb.mxu2 %v7039_v37  ;;  %v7051_v37 = vld [vmem:[%s13966_s3 + $0x508] sm:$0xff]  ;;  %v7028_v38 = vld [vmem:[%s13966_s3 + $0x450] sm:$0xff]  ;;  %v7026_v42 = vld [vmem:[%s13966_s3 + $0x440] sm:$0xff] }
 0x81c   :  { %2559 = vmatpush.msrb.mxu3 %v7077_v40  ;;  %v7118_v40 = vld [vmem:[%s13966_s3 + $0x6c0] sm:$0xff]  ;;  %v7156_v41 = vld [vmem:[%s13966_s3 + $0x7f0] sm:$0xff] }
 0x81d   :  { %2540 = vmatpush.msrb.mxu2 %v7037_v43  ;;  %2309 = vmatpush.msra.mxu0 %v2230_v44  ;;  %v7064_v43 = vld [vmem:[%s13966_s3 + $0x570] sm:$0xff] }
 0x81e   :  { %2560 = vmatpush.msrb.mxu3 %v7075_v45  ;;  %v7116_v44 = vld [vmem:[%s13966_s3 + $0x6b0] sm:$0xff]  ;;  %v7154_v45 = vld [vmem:[%s13966_s3 + $0x7e0] sm:$0xff] }
 0x81f   :  { %7015 = vmatmul.msk.f32.gmra.mxu3 %vm1632_vm8, %v2118_v34  ;;  %2541 = vmatpush.msrb.mxu2 %v7035_v46  ;;  %v7030_v34 = vld [vmem:[%s13966_s3 + $0x460] sm:$0xff]  ;;  %v7001_v46 = vld [vmem:[%s13918_s14 + $0x38] sm:$0xff] }
 0x820   :  { %2561 = vmatpush.msrb.mxu3 %v7073_v47  ;;  %2310 = vmatpush.msra.mxu0 %v2227_v48  ;;  %v7024_v47 = vld [vmem:[%s13966_s3 + $0x430] sm:$0xff]  ;;  %v7062_v48 = vld [vmem:[%s13966_s3 + $0x560] sm:$0xff] }
 0x821   :  { %v2252_v55 = vpop.f32.mrf.mxu2  ;;  %v2275_v25 = vpop.f32.mrf.mxu3  ;;  %7002 = vmatmul.msk.f32.vlgmr.msra.gmra.mxu0 %vm1632_vm8, %v6998_v49  ;;  %7012 = vmatmul.msk.f32.gmra.mxu2 %vm1632_vm8, %v2119_v50 }
 0x822   :  { %v2276_v21 = vadd.f32 %v2275_v25, %v2252_v55  ;;  %2542 = vmatpush.msrb.mxu2 %v7033_v51  ;;  %2562 = vmatpush.msrb.mxu3 %v7071_v52  ;;  %v7022_v51 = vld [vmem:[%s13966_s3 + $0x420] sm:$0xff]  ;;  %v7060_v52 = vld [vmem:[%s13966_s3 + $0x550] sm:$0xff] }
 0x823   :  { %2488 = vmatpush.msrb.mxu0 %v7048_v54  ;;  %v7112_v54 = vld [vmem:[%s13966_s3 + $0x690] sm:$0xff]  ;;  %v7150_v55 = vld [vmem:[%s13966_s3 + $0x7c0] sm:$0xff] }
 0x824   :  { %2543 = vmatpush.msrb.mxu2 %v7031_v27  ;;  %2563 = vmatpush.msrb.mxu3 %v7069_v56  ;;  %v7020_v25 = vld [vmem:[%s13966_s3 + $0x410] sm:$0xff]  ;;  %v7058_v27 = vld [vmem:[%s13966_s3 + $0x540] sm:$0xff] }
 0x825   :  { %2338 = vmatpush.msra.mxu1 %v2276_v21  ;;  %2489 = vmatpush.msrb.mxu0 %v7046_v23  ;;  %v7110_v56 = vld [vmem:[%s13966_s3 + $0x680] sm:$0xff]  ;;  %v7148_v21 = vld [vmem:[%s13966_s3 + $0x7b0] sm:$0xff] }
 0x826   :  { %2544 = vmatpush.msrb.mxu2 %v7029_v62  ;;  %2564 = vmatpush.msrb.mxu3 %v7067_v63  ;;  %v7018_v23 = vld [vmem:[%s13966_s3 + $0x400] sm:$0xff]  ;;  %v7056_v62 = vld [vmem:[%s13966_s3 + $0x530] sm:$0xff] }
 0x827   :  { %2339 = vmatpush.msra.mxu1 %v2273_v1  ;;  %2490 = vmatpush.msrb.mxu0 %v7044_v0  ;;  %v7108_v63 = vld [vmem:[%s13966_s3 + $0x670] sm:$0xff]  ;;  %v7146_v0 = vld [vmem:[%s13966_s3 + $0x7a0] sm:$0xff] }
 0x828   :  { %7006 = vmatmul.msk.f32.vlgmr.msra.gmra.mxu1 %vm1632_vm8, %v6998_v49  ;;  %7016 = vmatmul.msk.f32.gmra.mxu3 %vm1632_vm8, %v2119_v50  ;;  %v7114_v49 = vld [vmem:[%s13966_s3 + $0x6a0] sm:$0xff]  ;;  %v7152_v50 = vld [vmem:[%s13966_s3 + $0x7d0] sm:$0xff] }
 0x829   :  { %2545 = vmatpush.msrb.mxu2 %v7027_v2  ;;  %2565 = vmatpush.msrb.mxu3 %v7065_v3  ;;  %v7054_v1 = vld [vmem:[%s13966_s3 + $0x520] sm:$0xff]  ;;  %v7144_v3 = vld [vmem:[%s13966_s3 + $0x790] sm:$0xff] }
 0x82a   :  { %2491 = vmatpush.msrb.mxu0 %v7042_v4  ;;  %2511 = vmatpush.msrb.mxu1 %v7080_v5  ;;  %v7106_v2 = vld [vmem:[%s13966_s3 + $0x660] sm:$0xff]  ;;  %v7052_v4 = vld [vmem:[%s13966_s3 + $0x510] sm:$0xff] }
 0x82b   :  { %7003 = vmatmul.msk.f32.gmra.mxu0 %vm1632_vm8, %v6999_v6  ;;  %7013 = vmatmul.msk.f32.gmra.mxu2 %vm1632_vm8, %v2120_v9  ;;  %v7104_v5 = vld [vmem:[%s13966_s3 + $0x650] sm:$0xff] }
 0x82c   :  { %2546 = vmatpush.msrb.mxu2 %v7025_v10  ;;  %2566 = vmatpush.msrb.mxu3 %v7063_v32  ;;  %v7102_v10 = vld [vmem:[%s13966_s3 + $0x640] sm:$0xff]  ;;  %v7140_v32 = vld [vmem:[%s13966_s3 + $0x770] sm:$0xff] }
 0x82d   :  { %2492 = vmatpush.msrb.mxu0 %v7040_v60  ;;  %2512 = vmatpush.msrb.mxu1 %v7078_v58  ;;  %v7100_v60 = vld [vmem:[%s13966_s3 + $0x630] sm:$0xff]  ;;  %v7138_v58 = vld [vmem:[%s13966_s3 + $0x760] sm:$0xff] }
 0x82e   :  { %2547 = vmatpush.msrb.mxu2 %v7023_v59  ;;  %2567 = vmatpush.msrb.mxu3 %v7061_v53  ;;  %v7098_v59 = vld [vmem:[%s13966_s3 + $0x620] sm:$0xff]  ;;  %v7136_v53 = vld [vmem:[%s13966_s3 + $0x750] sm:$0xff] }
 0x82f   :  { %2493 = vmatpush.msrb.mxu0 %v7038_v13  ;;  %2513 = vmatpush.msrb.mxu1 %v7076_v14  ;;  %v7096_v13 = vld [vmem:[%s13966_s3 + $0x610] sm:$0xff]  ;;  %v7134_v14 = vld [vmem:[%s13966_s3 + $0x740] sm:$0xff] }
 0x830   :  { %2548 = vmatpush.msrb.mxu2 %v7021_v15  ;;  %2568 = vmatpush.msrb.mxu3 %v7059_v16  ;;  %v7094_v15 = vld [vmem:[%s13966_s3 + $0x600] sm:$0xff]  ;;  %v7132_v16 = vld [vmem:[%s13966_s3 + $0x730] sm:$0xff] }
 0x831   :  { %2494 = vmatpush.msrb.mxu0 %v7036_v17  ;;  %2514 = vmatpush.msrb.mxu1 %v7074_v31  ;;  %v7130_v17 = vld [vmem:[%s13966_s3 + $0x720] sm:$0xff]  ;;  %v7128_v31 = vld [vmem:[%s13966_s3 + $0x710] sm:$0xff] }
 0x832   :  { %7007 = vmatmul.msk.f32.gmra.mxu1 %vm1632_vm8, %v6999_v6  ;;  %7017 = vmatmul.msk.f32.gmra.mxu3 %vm1632_vm8, %v2120_v9  ;;  %v7142_v6 = vld [vmem:[%s13966_s3 + $0x780] sm:$0xff] }
 0x833   :  { %2549 = vmatpush.msrb.mxu2 %v7019_v18  ;;  %2569 = vmatpush.msrb.mxu3 %v7057_v30  ;;  %v7050_v9 = vld [vmem:[%s13966_s3 + $0x500] sm:$0xff] }
 0x834   :  { %2495 = vmatpush.msrb.mxu0 %v7034_v19  ;;  %2515 = vmatpush.msrb.mxu1 %v7072_v28  ;;  %v7126_v18 = vld [vmem:[%s13966_s3 + $0x700] sm:$0xff] }
 0x835   :  { %2728 = vmatpush.msra.mxu2 %v7124_v29  ;;  %7004 = vmatmul.msk.f32.gmra.mxu0 %vm1632_vm8, %v7000_v57 }
 0x836   :  { %2550 = vmatmul.f32.vlgmr.msrb.gmra.mxu2 %v9819_v7  ;;  %2570 = vmatpush.msrb.mxu3 %v7055_v33 }
 0x837   :  { %2496 = vmatpush.msrb.mxu0 %v7032_v20  ;;  %2516 = vmatpush.msrb.mxu1 %v7070_v22 }
 0x838   :  { %2729 = vmatpush.msra.mxu2 %v7122_v24  ;;  %2571 = vmatpush.msrb.mxu3 %v7053_v26 }
 0x839   :  { %2497 = vmatpush.msrb.mxu0 %v7030_v34  ;;  %2517 = vmatpush.msrb.mxu1 %v7068_v35 }
 0x83a   :  { %2730 = vmatpush.msra.mxu2 %v7120_v36  ;;  %2572 = vmatpush.msrb.mxu3 %v7051_v37 }
 0x83b   :  { %2498 = vmatpush.msrb.mxu0 %v7028_v38  ;;  %2518 = vmatpush.msrb.mxu1 %v7066_v39 }
 0x83c   :  { %2731 = vmatpush.msra.mxu2 %v7118_v40  ;;  %2751 = vmatpush.msra.mxu3 %v7156_v41 }
 0x83d   :  { %7008 = vmatmul.msk.f32.gmra.mxu1 %vm1632_vm8, %v7000_v57  ;;  %2573 = vmatmul.f32.vlgmr.msrb.gmra.mxu3 %v9821_v8 }
 0x83e   :  { %2499 = vmatpush.msrb.mxu0 %v7026_v42  ;;  %2519 = vmatpush.msrb.mxu1 %v7064_v43 }
 0x83f   :  { %2732 = vmatpush.msra.mxu2 %v7116_v44  ;;  %2752 = vmatpush.msra.mxu3 %v7154_v45 }
 0x840   :  { %7005 = vmatmul.msk.f32.gmra.mxu0 %vm1632_vm8, %v7001_v46  ;;  %2553 = vmatmul.f32.gmra.mxu2 %v9829_v11 }
 0x841   :  { %2500 = vmatpush.msrb.mxu0 %v7024_v47  ;;  %2520 = vmatpush.msrb.mxu1 %v7062_v48  ;;  %v7082_v48 = vld [vmem:[%s13918_s14 + $0x40] sm:$0xff] }
 0x842   :  { %2733 = vmatpush.msra.mxu2 %v7114_v49  ;;  %2753 = vmatpush.msra.mxu3 %v7152_v50  ;;  %v7157_v49 = vld [vmem:[%s13966_s3 + $0x7f8] sm:$0xff]  ;;  %v7155_v50 = vld [vmem:[%s13966_s3 + $0x7e8] sm:$0xff] }
 0x843   :  { %2501 = vmatpush.msrb.mxu0 %v7022_v51  ;;  %2521 = vmatpush.msrb.mxu1 %v7060_v52  ;;  %v7153_v51 = vld [vmem:[%s13966_s3 + $0x7d8] sm:$0xff]  ;;  %v7151_v52 = vld [vmem:[%s13966_s3 + $0x7c8] sm:$0xff] }
 0x844   :  { %2734 = vmatpush.msra.mxu2 %v7112_v54  ;;  %2754 = vmatpush.msra.mxu3 %v7150_v55 }
 0x845   :  { %2502 = vmatpush.msrb.mxu0 %v7020_v25  ;;  %2522 = vmatpush.msrb.mxu1 %v7058_v27  ;;  %v7083_v25 = vld [vmem:[%s13918_s14 + $0x48] sm:$0xff] }
 0x846   :  { %2735 = vmatpush.msra.mxu2 %v7110_v56  ;;  %2755 = vmatpush.msra.mxu3 %v7148_v21  ;;  %v7149_v56 = vld [vmem:[%s13966_s3 + $0x7b8] sm:$0xff] }
 0x847   :  { %7009 = vmatmul.msk.f32.gmra.mxu1 %vm1632_vm8, %v7001_v46  ;;  %2576 = vmatmul.f32.gmra.mxu3 %v9831_v12 }
 0x848   :  { %2503 = vmatpush.msrb.mxu0 %v7018_v23  ;;  %2523 = vmatpush.msrb.mxu1 %v7056_v62  ;;  %v7147_v23 = vld [vmem:[%s13966_s3 + $0x7a8] sm:$0xff]  ;;  %v7125_v62 = vld [vmem:[%s13966_s3 + $0x6f8] sm:$0xff] }
 0x849   :  { %2736 = vmatpush.msra.mxu2 %v7108_v63  ;;  %2756 = vmatpush.msra.mxu3 %v7146_v0  ;;  %v7145_v63 = vld [vmem:[%s13966_s3 + $0x798] sm:$0xff]  ;;  %v7123_v0 = vld [vmem:[%s13966_s3 + $0x6e8] sm:$0xff] }
 0x84a   :  { %2504 = vmatmul.f32.vlgmr.msrb.gmra.mxu0 %v9819_v7  ;;  %2524 = vmatpush.msrb.mxu1 %v7054_v1  ;;  %v7143_v1 = vld [vmem:[%s13966_s3 + $0x788] sm:$0xff] }
 0x84b   :  { %2737 = vmatpush.msra.mxu2 %v7106_v2  ;;  %2757 = vmatpush.msra.mxu3 %v7144_v3  ;;  %v7121_v2 = vld [vmem:[%s13966_s3 + $0x6d8] sm:$0xff]  ;;  %v7084_v3 = vld [vmem:[%s13918_s14 + $0x50] sm:$0xff] }
 0x84c   :  { %2525 = vmatpush.msrb.mxu1 %v7052_v4  ;;  %v7141_v4 = vld [vmem:[%s13966_s3 + $0x778] sm:$0xff] }
 0x84d   :  { %2738 = vmatpush.msra.mxu2 %v7104_v5  ;;  %2758 = vmatpush.msra.mxu3 %v7142_v6  ;;  %v7119_v6 = vld [vmem:[%s13966_s3 + $0x6c8] sm:$0xff] }
 0x84e   :  { %2526 = vmatpush.msrb.mxu1 %v7050_v9  ;;  %v7139_v9 = vld [vmem:[%s13966_s3 + $0x768] sm:$0xff] }
 0x84f   :  { %2739 = vmatpush.msra.mxu2 %v7102_v10  ;;  %2759 = vmatpush.msra.mxu3 %v7140_v32  ;;  %v7117_v32 = vld [vmem:[%s13966_s3 + $0x6b8] sm:$0xff] }
 0x850   :  { %2527 = vmatmul.f32.vlgmr.msrb.gmra.mxu1 %v9821_v8 }
 0x851   :  { %2740 = vmatpush.msra.mxu2 %v7100_v60  ;;  %2760 = vmatpush.msra.mxu3 %v7138_v58  ;;  %v7137_v60 = vld [vmem:[%s13966_s3 + $0x758] sm:$0xff]  ;;  %v7115_v58 = vld [vmem:[%s13966_s3 + $0x6a8] sm:$0xff] }
 0x852   :  { %2507 = vmatmul.f32.gmra.mxu0 %v9829_v11 }
 0x853   :  { %2741 = vmatpush.msra.mxu2 %v7098_v59  ;;  %2761 = vmatpush.msra.mxu3 %v7136_v53  ;;  %v7135_v59 = vld [vmem:[%s13966_s3 + $0x748] sm:$0xff]  ;;  %v7113_v53 = vld [vmem:[%s13966_s3 + $0x698] sm:$0xff] }
 0x855   :  { %2742 = vmatpush.msra.mxu2 %v7096_v13  ;;  %2762 = vmatpush.msra.mxu3 %v7134_v14  ;;  %v7085_v13 = vld [vmem:[%s13918_s14 + $0x58] sm:$0xff] }
 0x856   :  { %v7133_v14 = vld [vmem:[%s13966_s3 + $0x738] sm:$0xff] }
 0x857   :  { %2743 = vmatpush.msra.mxu2 %v7094_v15  ;;  %2763 = vmatpush.msra.mxu3 %v7132_v16  ;;  %v7111_v15 = vld [vmem:[%s13966_s3 + $0x688] sm:$0xff] }
 0x858   :  { %2530 = vmatmul.f32.gmra.mxu1 %v9831_v12  ;;  %2744 = vmatmul.f32.vlgmr.msra.gmra.mxu2 %v9819_v7  ;;  %v7131_v16 = vld [vmem:[%s13966_s3 + $0x728] sm:$0xff] }
 0x859   :  { %2764 = vmatpush.msra.mxu3 %v7130_v17 }
 0x85b   :  { %2765 = vmatpush.msra.mxu3 %v7128_v31 }
 0x85d   :  { %2766 = vmatpush.msra.mxu3 %v7126_v18  ;;  %v7109_v18 = vld [vmem:[%s13966_s3 + $0x678] sm:$0xff] }
 0x85e   :  { %2767 = vmatmul.f32.vlgmr.msra.gmra.mxu3 %v9821_v8 }
 0x860   :  { %2747 = vmatmul.f32.gmra.mxu2 %v9829_v11 }
 0x866   :  { %2770 = vmatmul.f32.gmra.mxu3 %v9831_v12 }
 0x893   :  { %v10185_v30 = vpop.f32.mrf.mxu2 }
 0x89a   :  { %v10187_v19 = vpop.f32.mrf.mxu3 }
 0x89b   :  { %v10189_v28 = vpop.f32.mrf.mxu2 }
 0x89e   :  { %v10193_v57 = vpop.f32.mrf.mxu0 }
 0x8a2   :  { %v10191_v29 = vpop.f32.mrf.mxu3 }
 0x8a4   :  { %v10197_v20 = vpop.f32.mrf.mxu2 }
 0x8a5   :  { %v10195_v33 = vpop.f32.mrf.mxu1 }
 0x8a8   :  { %v10201_v24 = vpop.f32.mrf.mxu0 }
 0x8ab   :  { %v10199_v22 = vpop.f32.mrf.mxu3 }
 0x8ae   :  { %v10205_v34 = vpop.f32.mrf.mxu2 }
 0x8af   :  { %v10203_v26 = vpop.f32.mrf.mxu1 }
 0x8b2   :  { %v10209_v36 = vpop.f32.mrf.mxu0 }
 0x8b5   :  { %v10207_v35 = vpop.f32.mrf.mxu3 }
 0x8b9   :  { %v2551_v38 = vpop.f32.mrf.mxu2 }
 0x8ba   :  { %v10211_v37 = vpop.f32.mrf.mxu1 }
 0x8bd   :  { %v10213_v40 = vpop.f32.mrf.mxu0 }
 0x8c0   :  { %v2574_v39 = vpop.f32.mrf.mxu3 }
 0x8c1   :  { %v2575_v46 = vadd.f32 %v2574_v39, %v2551_v38  ;;  %v7129_v39 = vld [vmem:[%s13966_s3 + $0x718] sm:$0xff] }
 0x8c3   :  { %v2554_v42 = vpop.f32.mrf.mxu2 }
 0x8c4   :  { %v10215_v41 = vpop.f32.mrf.mxu1 }
 0x8c7   :  { %v2505_v44 = vpop.f32.mrf.mxu0 }
 0x8ca   :  { %v2577_v43 = vpop.f32.mrf.mxu3 }
 0x8cb   :  { %v2578_v45 = vadd.f32 %v2577_v43, %v2554_v42  ;;  %v7107_v42 = vld [vmem:[%s13966_s3 + $0x668] sm:$0xff] }
 0x8cd   :  { %v2528_v47 = vpop.f32.mrf.mxu1  ;;  %2640 = vmatpush.msra.mxu1 %v2578_v45  ;;  %v7127_v45 = vld [vmem:[%s13966_s3 + $0x708] sm:$0xff] }
 0x8ce   :  { %v2529_v21 = vadd.f32 %v2528_v47, %v2505_v44  ;;  %v7158_v44 = vld [vmem:[%s13918_s14 + $0x60] sm:$0xff]  ;;  %v7103_v47 = vld [vmem:[%s13966_s3 + $0x648] sm:$0xff] }
 0x8cf   :  { %2641 = vmatpush.msra.mxu1 %v2575_v46  ;;  %v2508_v54 = vpop.f32.mrf.mxu0  ;;  %v7105_v46 = vld [vmem:[%s13966_s3 + $0x658] sm:$0xff] }
 0x8d0   :  { %7090 = vmatmul.msk.f32.vlgmr.msra.gmra.mxu1 %vm1632_vm8, %v7082_v48 }
 0x8d1   :  { %2797 = vmatpush.msrb.mxu1 %v7157_v49  ;;  %v7099_v49 = vld [vmem:[%s13966_s3 + $0x628] sm:$0xff] }
 0x8d3   :  { %2798 = vmatpush.msrb.mxu1 %v7155_v50  ;;  %v7159_v50 = vld [vmem:[%s13918_s14 + $0x68] sm:$0xff] }
 0x8d5   :  { %v2531_v55 = vpop.f32.mrf.mxu1  ;;  %2799 = vmatpush.msrb.mxu1 %v7153_v51  ;;  %v7095_v51 = vld [vmem:[%s13966_s3 + $0x608] sm:$0xff] }
 0x8d6   :  { %v2532_v27 = vadd.f32 %v2531_v55, %v2508_v54  ;;  %v7161_v54 = vld [vmem:[%s13918_s14 + $0x78] sm:$0xff] }
 0x8d7   :  { %2800 = vmatpush.msrb.mxu1 %v7151_v52  ;;  %v7160_v52 = vld [vmem:[%s13918_s14 + $0x70] sm:$0xff] }
 0x8d8   :  { %2611 = vmatpush.msra.mxu0 %v2532_v27  ;;  %7091 = vmatmul.msk.f32.gmra.mxu1 %vm1632_vm8, %v7083_v25 }
 0x8d9   :  { %2801 = vmatpush.msrb.mxu1 %v7149_v56 }
 0x8da   :  { %2612 = vmatpush.msra.mxu0 %v2529_v21 }
 0x8db   :  { %7086 = vmatmul.msk.f32.vlgmr.msra.gmra.mxu0 %vm1632_vm8, %v7082_v48  ;;  %2802 = vmatpush.msrb.mxu1 %v7147_v23  ;;  %v2745_v5 = vpop.f32.mrf.mxu2  ;;  %v7101_v48 = vld [vmem:[%s13966_s3 + $0x638] sm:$0xff] }
 0x8dc   :  { %2774 = vmatpush.msrb.mxu0 %v7125_v62 }
 0x8dd   :  { %2803 = vmatpush.msrb.mxu1 %v7145_v63 }
 0x8de   :  { %2775 = vmatpush.msrb.mxu0 %v7123_v0 }
 0x8df   :  { %2804 = vmatpush.msrb.mxu1 %v7143_v1 }
 0x8e0   :  { %2776 = vmatpush.msrb.mxu0 %v7121_v2  ;;  %7092 = vmatmul.msk.f32.gmra.mxu1 %vm1632_vm8, %v7084_v3 }
 0x8e1   :  { %v2768_v10 = vpop.f32.mrf.mxu3  ;;  %2805 = vmatpush.msrb.mxu1 %v7141_v4 }
 0x8e2   :  { %2777 = vmatpush.msrb.mxu0 %v7119_v6  ;;  %v2769_v43 = vadd.f32 %v2768_v10, %v2745_v5  ;;  %v2392_v6 = vadd.f32 %v10205_v34, %v10213_v40 }
 0x8e3   :  { %7087 = vmatmul.msk.f32.gmra.mxu0 %vm1632_vm8, %v7083_v25  ;;  %2806 = vmatpush.msrb.mxu1 %v7139_v9  ;;  %v2748_v17 = vpop.f32.mrf.mxu2  ;;  %v2389_v9 = vadd.f32 %v10197_v20, %v10209_v36 }
 0x8e4   :  { %2778 = vmatpush.msrb.mxu0 %v7117_v32 }
 0x8e5   :  { %2807 = vmatpush.msrb.mxu1 %v7137_v60  ;;  %v2386_v60 = vadd.f32 %v10189_v28, %v10201_v24 }
 0x8e6   :  { %2779 = vmatpush.msrb.mxu0 %v7115_v58 }
 0x8e7   :  { %2808 = vmatpush.msrb.mxu1 %v7135_v59 }
 0x8e8   :  { %2780 = vmatpush.msrb.mxu0 %v7113_v53  ;;  %7093 = vmatmul.msk.f32.gmra.mxu1 %vm1632_vm8, %v7085_v13  ;;  %v2383_v53 = vadd.f32 %v10185_v30, %v10193_v57 }
 0x8e9   :  { %v2771_v31 = vpop.f32.mrf.mxu3  ;;  %2809 = vmatpush.msrb.mxu1 %v7133_v14 }
 0x8ea   :  { %v2772_v38 = vadd.f32 %v2771_v31, %v2748_v17  ;;  %2781 = vmatpush.msrb.mxu0 %v7111_v15  ;;  %v10405_v17 = vld [vmem:[%s13919_s15 + $0xf8] sm:$0xff]  ;;  %v3007_v31 = vld [vmem:[%s13919_s15 + $0x70] sm:$0xff] }
 0x8eb   :  { %7088 = vmatmul.msk.f32.gmra.mxu0 %vm1632_vm8, %v7084_v3  ;;  %2810 = vmatpush.msrb.mxu1 %v7131_v16  ;;  %v3008_v16 = vld [vmem:[%s13919_s15 + $0x78] sm:$0xff] }
 0x8ec   :  { %2782 = vmatpush.msrb.mxu0 %v7109_v18  ;;  %2851 = vmatpush.msrb.mxu2 %v2772_v38  ;;  %v10414_v18 = vld [vmem:[%s13919_s15 + $0xf0] sm:$0xff]  ;;  %v3006_v38 = vld [vmem:[%s13919_s15 + $0x68] sm:$0xff] }
 0x8ed   :  { %2811 = vmatpush.msrb.mxu1 %v7129_v39  ;;  %v10422_v39 = vld [vmem:[%s13919_s15 + $0xe8] sm:$0xff] }
 0x8ee   :  { %2783 = vmatpush.msrb.mxu0 %v7107_v42  ;;  %2852 = vmatpush.msrb.mxu2 %v2769_v43  ;;  %v3005_v42 = vld [vmem:[%s13919_s15 + $0x60] sm:$0xff] }
 0x8ef   :  { %7162 = vmatmul.msk.f32.vlgmr.msrb.gmra.mxu2 %vm1632_vm8, %v7158_v44  ;;  %2812 = vmatpush.msrb.mxu1 %v7127_v45  ;;  %v10431_v43 = vld [vmem:[%s13919_s15 + $0xe0] sm:$0xff]  ;;  %v3004_v45 = vld [vmem:[%s13919_s15 + $0x58] sm:$0xff] }
 0x8f0   :  { %2784 = vmatpush.msrb.mxu0 %v7105_v46  ;;  %2813 = vmatmul.f32.vlgmr.msrb.gmra.mxu1 %v9821_v8  ;;  %v7097_v8 = vld [vmem:[%s13966_s3 + $0x618] sm:$0xff] }
 0x8f1   :  { %3025 = vmatpush.msra.mxu2 %v3008_v16  ;;  %v10440_v46 = vld [vmem:[%s13919_s15 + $0xd8] sm:$0xff] }
 0x8f2   :  { %2785 = vmatpush.msrb.mxu0 %v7103_v47  ;;  %v3003_v47 = vld [vmem:[%s13919_s15 + $0x50] sm:$0xff] }
 0x8f3   :  { %7089 = vmatmul.msk.f32.gmra.mxu0 %vm1632_vm8, %v7085_v13  ;;  %3026 = vmatpush.msra.mxu2 %v3007_v31 }
 0x8f4   :  { %2786 = vmatpush.msrb.mxu0 %v7101_v48  ;;  %v10449_v48 = vld [vmem:[%s13919_s15 + $0xd0] sm:$0xff] }
 0x8f5   :  { %3027 = vmatpush.msra.mxu2 %v3006_v38 }
 0x8f6   :  { %2787 = vmatpush.msrb.mxu0 %v7099_v49  ;;  %v3002_v49 = vld [vmem:[%s13919_s15 + $0x48] sm:$0xff] }
 0x8f7   :  { %7163 = vmatmul.msk.f32.gmra.mxu2 %vm1632_vm8, %v7159_v50 }
 0x8f8   :  { %2788 = vmatpush.msrb.mxu0 %v7097_v8  ;;  %2816 = vmatmul.f32.gmra.mxu1 %v9831_v12  ;;  %v2421_v8 = vadd.f32 %v10207_v35, %v10215_v41  ;;  %v3000_v41 = vld [vmem:[%s13919_s15 + $0x38] sm:$0xff] }
 0x8f9   :  { %3028 = vmatpush.msra.mxu2 %v3005_v42 }
 0x8fa   :  { %2789 = vmatpush.msrb.mxu0 %v7095_v51  ;;  %v3001_v51 = vld [vmem:[%s13919_s15 + $0x40] sm:$0xff] }
 0x8fb   :  { %2790 = vmatmul.f32.vlgmr.msrb.gmra.mxu0 %v9819_v7  ;;  %3029 = vmatpush.msra.mxu2 %v3004_v45 }
 0x8fd   :  { %3030 = vmatpush.msra.mxu2 %v3003_v47 }
 0x8ff   :  { %7164 = vmatmul.msk.f32.gmra.mxu2 %vm1632_vm8, %v7160_v52 }
 0x900   :  { %3031 = vmatpush.msra.mxu2 %v3002_v49 }
 0x902   :  { %3032 = vmatpush.msra.mxu2 %v3001_v51 }
 0x903   :  { %2793 = vmatmul.f32.gmra.mxu0 %v9829_v11 }
 0x904   :  { %3033 = vmatpush.msra.mxu2 %v3000_v41 }
 0x907   :  { %7165 = vmatmul.msk.f32.gmra.mxu2 %vm1632_vm8, %v7161_v54 }
 0x94d   :  { %v10353_v55 = vpop.f32.mrf.mxu1 }
 0x955   :  { %v10355_v12 = vpop.f32.mrf.mxu1 }
 0x958   :  { %v2614_v25 = vpop.f32.mrf.mxu0 }
 0x959   :  { %v2655_v34 = vadd.f32 %v2614_v25, %v2383_v53  ;;  %v3009_v53 = vld [vmem:[%s13919_s15 + $0x80] sm:$0xff] }
 0x95d   :  { %v10357_v27 = vpop.f32.mrf.mxu1 }
 0x960   :  { %v2617_v7 = vpop.f32.mrf.mxu0 }
 0x961   :  { %v2657_v13 = vadd.f32 %v2617_v7, %v2386_v60  ;;  %v2415_v7 = vadd.f32 %v10191_v29, %v10203_v26 }
 0x963   :  { %v2658_v29 = vadd.f32 %v10355_v12, %v2415_v7  ;;  %v2997_v12 = vld [vmem:[%s13919_s15 + $0x20] sm:$0xff] }
 0x965   :  { %v10359_v21 = vpop.f32.mrf.mxu1 }
 0x966   :  { %v2662_v25 = vadd.f32 %v10359_v21, %v2421_v8  ;;  %v2412_v21 = vadd.f32 %v10187_v19, %v10195_v33  ;;  %v3014_v33 = vld [vmem:[%s13919_s15 + $0xa8] sm:$0xff]  ;;  %v3302_v8 = vld [vmem:[%s13921_s19 + $0x1d8] sm:$0xff] }
 0x968   :  { %v2620_v56 = vpop.f32.mrf.mxu0 }
 0x969   :  { %v2659_v58 = vadd.f32 %v2620_v56, %v2389_v9 }
 0x96d   :  { %v2814_v11 = vpop.f32.mrf.mxu1 }
 0x970   :  { %v2623_v23 = vpop.f32.mrf.mxu0 }
 0x971   :  { %v2661_v10 = vadd.f32 %v2623_v23, %v2392_v6  ;;  %v2994_v6 = vld [vmem:[%s13919_s15 + $0x8] sm:$0xff] }
 0x972   :  { %v2854_v62 = vpop.f32.mrf.mxu2 }
 0x973   :  { %v10379_v36 = vadd.f32 %v2854_v62, %v2655_v34  ;;  %v2998_v62 = vld [vmem:[%s13919_s15 + $0x28] sm:$0xff] }
 0x975   :  { %v2817_v1 = vpop.f32.mrf.mxu1  ;;  %v2945_v24 = vmul.f32 %v10379_v36, %v10379_v36 }
 0x978   :  { %v2791_v63 = vpop.f32.mrf.mxu0 }
 0x979   :  { %v2815_v5 = vadd.f32 %v2814_v11, %v2791_v63  ;;  %v2656_v11 = vadd.f32 %v10353_v55, %v2412_v21  ;;  %v3013_v55 = vld [vmem:[%s13919_s15 + $0xa0] sm:$0xff]  ;;  %v3260_v21 = vld [vmem:[%s13921_s19 + $0x88] sm:$0xff] }
 0x97a   :  { %v2857_v0 = vpop.f32.mrf.mxu2 }
 0x97b   :  { %v10376_v20 = vadd.f32 %v2857_v0, %v2657_v13  ;;  %v2996_v0 = vld [vmem:[%s13919_s15 + $0x18] sm:$0xff] }
 0x97d   :  { %v2947_v57 = vmul.f32 %v10376_v20, %v10376_v20 }
 0x980   :  { %v2794_v2 = vpop.f32.mrf.mxu0 }
 0x981   :  { %v2818_v3 = vadd.f32 %v2817_v1, %v2794_v2  ;;  %v3012_v2 = vld [vmem:[%s13919_s15 + $0x98] sm:$0xff] }
 0x982   :  { %v2860_v4 = vpop.f32.mrf.mxu2 }
 0x983   :  { %2880 = vmatpush.msrb.mxu3 %v2818_v3  ;;  %v10372_v14 = vadd.f32 %v2860_v4, %v2659_v58  ;;  %v2995_v3 = vld [vmem:[%s13919_s15 + $0x10] sm:$0xff]  ;;  %v2993_v58 = vld [vmem:[%s13919_s15] sm:$0xff] }
 0x985   :  { %2881 = vmatpush.msrb.mxu3 %v2815_v5  ;;  %v2949_v30 = vmul.f32 %v10372_v14, %v10372_v14  ;;  %v3011_v5 = vld [vmem:[%s13919_s15 + $0x90] sm:$0xff] }
 0x986   :  { %7166 = vmatmul.msk.f32.vlgmr.msrb.gmra.mxu3 %vm1632_vm8, %v7158_v44 }
 0x987   :  { %3045 = vmatpush.msra.mxu3 %v10405_v17 }
 0x989   :  { %3046 = vmatpush.msra.mxu3 %v10414_v18 }
 0x98a   :  { %v2863_v32 = vpop.f32.mrf.mxu2 }
 0x98b   :  { %v10368_v59 = vadd.f32 %v2863_v32, %v2661_v10  ;;  %3047 = vmatpush.msra.mxu3 %v10422_v39  ;;  %v3010_v10 = vld [vmem:[%s13919_s15 + $0x88] sm:$0xff] }
 0x98d   :  { %2917 = vmatpush.msra.mxu0 %v10368_v59  ;;  %v2951_v28 = vmul.f32 %v10368_v59, %v10368_v59  ;;  %3048 = vmatpush.msra.mxu3 %v10431_v43 }
 0x98e   :  { %7167 = vmatmul.msk.f32.gmra.mxu3 %vm1632_vm8, %v7159_v50  ;;  %v10458_v50 = vld [vmem:[%s13919_s15 + $0xc8] sm:$0xff] }
 0x98f   :  { %2918 = vmatpush.msra.mxu0 %v10372_v14  ;;  %3049 = vmatpush.msra.mxu3 %v10440_v46 }
 0x991   :  { %2919 = vmatpush.msra.mxu0 %v10376_v20  ;;  %3050 = vmatpush.msra.mxu3 %v10449_v48 }
 0x993   :  { %2920 = vmatpush.msra.mxu0 %v10379_v36  ;;  %3051 = vmatpush.msra.mxu3 %v10458_v50 }
 0x994   :  { %7170 = vmatmul.msk.f32.vlgmr.msra.gmra.mxu0 %vm95_vm0, %v13941_v61 }
 0x995   :  { %2965 = vmatpush.msrb.mxu0 %v2951_v28 }
 0x996   :  { %7168 = vmatmul.msk.f32.gmra.mxu3 %vm1632_vm8, %v7160_v52  ;;  %v10469_v52 = vld [vmem:[%s13919_s15 + $0xc0] sm:$0xff] }
 0x997   :  { %2966 = vmatpush.msrb.mxu0 %v2949_v30  ;;  %3052 = vmatpush.msra.mxu3 %v10469_v52  ;;  %v3127_v30 = vld [vmem:[%s13920_s16 + $0x10] sm:$0xff] }
 0x999   :  { %2967 = vmatpush.msrb.mxu0 %v2947_v57  ;;  %v3128_v57 = vld [vmem:[%s13920_s16 + $0x18] sm:$0xff] }
 0x99b   :  { %2968 = vmatpush.msrb.mxu0 %v2945_v24 }
 0x99c   :  { %7172 = vmatmul.msk.f32.vlgmr.msrb.gmra.mxu0 %vm95_vm0, %v13941_v61 }
 0x99d   :  { %3066 = vmatpush.msra.mxu0 %v3008_v16 }
 0x99e   :  { %7169 = vmatmul.msk.f32.gmra.mxu3 %vm1632_vm8, %v7161_v54  ;;  %v2418_v54 = vadd.f32 %v10199_v22, %v10211_v37  ;;  %v3016_v22 = vld [vmem:[%s13919_s15 + $0xb8] sm:$0xff]  ;;  %v2999_v37 = vld [vmem:[%s13919_s15 + $0x30] sm:$0xff] }
 0x99f   :  { %3067 = vmatpush.msra.mxu0 %v3007_v31  ;;  %3053 = vmatpush.msra.mxu3 %v3016_v22 }
 0x9a0   :  { %v2660_v56 = vadd.f32 %v10357_v27, %v2418_v54  ;;  %v3015_v27 = vld [vmem:[%s13919_s15 + $0xb0] sm:$0xff]  ;;  %3034 = vmatpush.msra.mxu2 %v2999_v37  ;;  %v3266_v54 = vld [vmem:[%s13921_s19 + $0xb8] sm:$0xff] }
 0x9a1   :  { %3068 = vmatpush.msra.mxu0 %v3006_v38  ;;  %3054 = vmatpush.msra.mxu3 %v3015_v27 }
 0x9a2   :  { %3035 = vmatpush.msra.mxu2 %v2998_v62 }
 0x9a3   :  { %3069 = vmatpush.msra.mxu0 %v3005_v42  ;;  %3055 = vmatpush.msra.mxu3 %v3014_v33 }
 0x9a4   :  { %3036 = vmatpush.msra.mxu2 %v2997_v12 }
 0x9a5   :  { %3070 = vmatpush.msra.mxu0 %v3004_v45  ;;  %3056 = vmatpush.msra.mxu3 %v3013_v55  ;;  %v3274_v45 = vld [vmem:[%s13921_s19 + $0xf8] sm:$0xff] }
 0x9a6   :  { %3037 = vmatpush.msra.mxu2 %v2996_v0 }
 0x9a7   :  { %3071 = vmatpush.msra.mxu0 %v3003_v47  ;;  %3057 = vmatpush.msra.mxu3 %v3012_v2 }
 0x9a8   :  { %3038 = vmatpush.msra.mxu2 %v2995_v3 }
 0x9a9   :  { %3072 = vmatpush.msra.mxu0 %v3002_v49  ;;  %3058 = vmatpush.msra.mxu3 %v3011_v5  ;;  %v3304_v49 = vld [vmem:[%s13921_s19 + $0x1e8] sm:$0xff] }
 0x9aa   :  { %3039 = vmatpush.msra.mxu2 %v2994_v6 }
 0x9ab   :  { %3073 = vmatpush.msra.mxu0 %v3001_v51  ;;  %3059 = vmatpush.msra.mxu3 %v3010_v10  ;;  %v3268_v51 = vld [vmem:[%s13921_s19 + $0xc8] sm:$0xff] }
 0x9ac   :  { %3040 = vmatpush.msra.mxu2 %v2993_v58 }
 0x9ad   :  { %3074 = vmatpush.msra.mxu0 %v3000_v41  ;;  %3060 = vmatpush.msra.mxu3 %v3009_v53  ;;  %v3296_v41 = vld [vmem:[%s13921_s19 + $0x1a8] sm:$0xff] }
 0x9ae   :  { %3146 = vmatpush.msrb.mxu2 %v3127_v30 }
 0x9af   :  { %3075 = vmatpush.msra.mxu0 %v2999_v37  ;;  %3166 = vmatpush.msrb.mxu3 %v3128_v57  ;;  %v3294_v37 = vld [vmem:[%s13921_s19 + $0x198] sm:$0xff] }
 0x9b1   :  { %3076 = vmatpush.msra.mxu0 %v2998_v62 }
 0x9b3   :  { %3077 = vmatpush.msra.mxu0 %v2997_v12 }
 0x9b5   :  { %3078 = vmatpush.msra.mxu0 %v2996_v0 }
 0x9b7   :  { %3079 = vmatpush.msra.mxu0 %v2995_v3  ;;  %v3271_v3 = vld [vmem:[%s13921_s19 + $0xe0] sm:$0xff] }
 0x9b9   :  { %3080 = vmatpush.msra.mxu0 %v2994_v6  ;;  %v3269_v6 = vld [vmem:[%s13921_s19 + $0xd0] sm:$0xff] }
 0x9bb   :  { %3081 = vmatpush.msra.mxu0 %v2993_v58 }
 0x9bd   :  { %3365 = vmatpush.msrb.mxu0 %v3274_v45  ;;  %v3254_v45 = vld [vmem:[%s13921_s19 + $0x58] sm:$0xff] }
 0xa09   :  { %v10397_v40 = vpop.f32.mrf.mxu3 }
 0xa0a   :  { %v10513_v63 = vadd.f32 %v10397_v40, %v2656_v11  ;;  %v3125_v40 = vld [vmem:[%s13920_s16] sm:$0xff] }
 0xa0b   :  { %3147 = vmatpush.msrb.mxu2 %v3125_v40 }
 0xa0c   :  { %v2946_v32 = vmul.f32 %v10513_v63, %v10513_v63 }
 0xa11   :  { %v2886_v15 = vpop.f32.mrf.mxu3  ;;  %v2922_v60 = vpop.f32.mrf.mxu0 }
 0xa12   :  { %v10503_v19 = vadd.f32 %v2886_v15, %v2658_v29  ;;  %3041 = vmatmul.f32.vlgmr.msra.gmra.mxu2 %v2922_v60  ;;  %v3126_v15 = vld [vmem:[%s13920_s16 + $0x8] sm:$0xff]  ;;  %v3299_v60 = vld [vmem:[%s13921_s19 + $0x1c0] sm:$0xff] }
 0xa13   :  { %3167 = vmatpush.msrb.mxu3 %v3126_v15  ;;  %3189 = vmatpush.msra.mxu2 %v3127_v30  ;;  %v3261_v30 = vld [vmem:[%s13921_s19 + $0x90] sm:$0xff] }
 0xa14   :  { %v2948_v9 = vmul.f32 %v10503_v19, %v10503_v19 }
 0xa15   :  { %3190 = vmatpush.msra.mxu2 %v3125_v40  ;;  %v3291_v40 = vld [vmem:[%s13921_s19 + $0x180] sm:$0xff] }
 0xa19   :  { %v2889_v44 = vpop.f32.mrf.mxu3  ;;  %v2970_v13 = vpop.f32.mrf.mxu0 }
 0xa1a   :  { %v10493_v26 = vadd.f32 %v2889_v44, %v2660_v56  ;;  %3082 = vmatmul.f32.vlgmr.msra.gmra.mxu0 %v2970_v13  ;;  %v3262_v56 = vld [vmem:[%s13921_s19 + $0x98] sm:$0xff]  ;;  %v3297_v13 = vld [vmem:[%s13921_s19 + $0x1b0] sm:$0xff] }
 0xa1c   :  { %v2950_v4 = vmul.f32 %v10493_v26, %v10493_v26 }
 0xa21   :  { %v2892_v35 = vpop.f32.mrf.mxu3 }
 0xa22   :  { %v10481_v23 = vadd.f32 %v2892_v35, %v2662_v25  ;;  %v3298_v25 = vld [vmem:[%s13921_s19 + $0x1b8] sm:$0xff]  ;;  %v3264_v35 = vld [vmem:[%s13921_s19 + $0xa8] sm:$0xff] }
 0xa24   :  { %2937 = vmatpush.msra.mxu1 %v10481_v23  ;;  %v2952_v1 = vmul.f32 %v10481_v23, %v10481_v23 }
 0xa26   :  { %2938 = vmatpush.msra.mxu1 %v10493_v26 }
 0xa28   :  { %2939 = vmatpush.msra.mxu1 %v10503_v19 }
 0xa2a   :  { %2940 = vmatpush.msra.mxu1 %v10513_v63 }
 0xa2b   :  { %7171 = vmatmul.msk.f32.vlgmr.msra.gmra.mxu1 %vm95_vm0, %v13941_v61 }
 0xa2c   :  { %2985 = vmatpush.msrb.mxu1 %v2952_v1  ;;  %v3273_v1 = vld [vmem:[%s13921_s19 + $0xf0] sm:$0xff] }
 0xa2e   :  { %2986 = vmatpush.msrb.mxu1 %v2950_v4  ;;  %v3303_v4 = vld [vmem:[%s13921_s19 + $0x1e0] sm:$0xff] }
 0xa30   :  { %2987 = vmatpush.msrb.mxu1 %v2948_v9  ;;  %v3301_v9 = vld [vmem:[%s13921_s19 + $0x1d0] sm:$0xff] }
 0xa32   :  { %2988 = vmatpush.msrb.mxu1 %v2946_v32  ;;  %v3267_v32 = vld [vmem:[%s13921_s19 + $0xc0] sm:$0xff] }
 0xa33   :  { %7173 = vmatmul.msk.f32.vlgmr.msrb.gmra.mxu1 %vm95_vm0, %v13941_v61 }
 0xa34   :  { %3086 = vmatpush.msra.mxu1 %v10405_v17 }
 0xa36   :  { %3087 = vmatpush.msra.mxu1 %v10414_v18 }
 0xa38   :  { %3088 = vmatpush.msra.mxu1 %v10422_v39 }
 0xa3a   :  { %3089 = vmatpush.msra.mxu1 %v10431_v43 }
 0xa3c   :  { %3090 = vmatpush.msra.mxu1 %v10440_v46  ;;  %v3306_v46 = vld [vmem:[%s13921_s19 + $0x1f8] sm:$0xff] }
 0xa3e   :  { %3091 = vmatpush.msra.mxu1 %v10449_v48  ;;  %v3272_v48 = vld [vmem:[%s13921_s19 + $0xe8] sm:$0xff] }
 0xa3f   :  { %3366 = vmatpush.msrb.mxu0 %v3272_v48  ;;  %v3283_v48 = vld [vmem:[%s13921_s19 + $0x140] sm:$0xff] }
 0xa40   :  { %3092 = vmatpush.msra.mxu1 %v10458_v50  ;;  %v3270_v50 = vld [vmem:[%s13921_s19 + $0xd8] sm:$0xff] }
 0xa41   :  { %3367 = vmatpush.msrb.mxu0 %v3270_v50  ;;  %v3284_v50 = vld [vmem:[%s13921_s19 + $0x148] sm:$0xff] }
 0xa42   :  { %3093 = vmatpush.msra.mxu1 %v10469_v52  ;;  %v3300_v52 = vld [vmem:[%s13921_s19 + $0x1c8] sm:$0xff] }
 0xa43   :  { %3368 = vmatpush.msrb.mxu0 %v3268_v51  ;;  %v3281_v51 = vld [vmem:[%s13921_s19 + $0x130] sm:$0xff] }
 0xa44   :  { %3094 = vmatpush.msra.mxu1 %v3016_v22 }
 0xa45   :  { %3369 = vmatpush.msrb.mxu0 %v3266_v54  ;;  %v3282_v54 = vld [vmem:[%s13921_s19 + $0x138] sm:$0xff] }
 0xa46   :  { %3095 = vmatpush.msra.mxu1 %v3015_v27  ;;  %v3292_v27 = vld [vmem:[%s13921_s19 + $0x188] sm:$0xff] }
 0xa47   :  { %3370 = vmatpush.msrb.mxu0 %v3264_v35  ;;  %v3279_v35 = vld [vmem:[%s13921_s19 + $0x120] sm:$0xff] }
 0xa48   :  { %3096 = vmatpush.msra.mxu1 %v3014_v33  ;;  %v3109_v33 = vld [vmem:[%s13922_s17] sm:$0x1] }
 0xa49   :  { %3371 = vmatpush.msrb.mxu0 %v3262_v56  ;;  %v3245_v56 = vld [vmem:[%s13921_s19 + $0x10] sm:$0xff] }
 0xa4a   :  { %3097 = vmatpush.msra.mxu1 %v3013_v55 }
 0xa4b   :  { %3372 = vmatpush.msrb.mxu0 %v3260_v21  ;;  %v3278_v21 = vld [vmem:[%s13921_s19 + $0x118] sm:$0xff] }
 0xa4c   :  { %3098 = vmatpush.msra.mxu1 %v3012_v2  ;;  %v3305_v2 = vld [vmem:[%s13921_s19 + $0x1f0] sm:$0xff] }
 0xa4e   :  { %3099 = vmatpush.msra.mxu1 %v3011_v5 }
 0xa50   :  { %3100 = vmatpush.msra.mxu1 %v3010_v10  ;;  %v3122_v10 = vld [vmem:[%s13923_s18] sm:$0x1] }
 0xa52   :  { %3101 = vmatpush.msra.mxu1 %v3009_v53  ;;  %v3265_v53 = vld [vmem:[%s13921_s19 + $0xb0] sm:$0xff] }
 0xa54   :  { %3394 = vmatpush.msrb.mxu1 %v3306_v46  ;;  %v3286_v46 = vld [vmem:[%s13921_s19 + $0x158] sm:$0xff] }
 0xa56   :  { %3395 = vmatpush.msrb.mxu1 %v3304_v49  ;;  %v3252_v49 = vld [vmem:[%s13921_s19 + $0x48] sm:$0xff] }
 0xa58   :  { %3396 = vmatpush.msrb.mxu1 %v3302_v8  ;;  %v3249_v8 = vld [vmem:[%s13921_s19 + $0x30] sm:$0xff] }
 0xa5a   :  { %3397 = vmatpush.msrb.mxu1 %v3300_v52  ;;  %v3250_v52 = vld [vmem:[%s13921_s19 + $0x38] sm:$0xff] }
 0xa5c   :  { %3398 = vmatpush.msrb.mxu1 %v3298_v25  ;;  %v3247_v25 = vld [vmem:[%s13921_s19 + $0x20] sm:$0xff] }
 0xa5e   :  { %3399 = vmatpush.msrb.mxu1 %v3296_v41  ;;  %v3248_v41 = vld [vmem:[%s13921_s19 + $0x28] sm:$0xff] }
 0xa60   :  { %3400 = vmatpush.msrb.mxu1 %v3294_v37  ;;  %v3246_v37 = vld [vmem:[%s13921_s19 + $0x18] sm:$0xff] }
 0xa62   :  { %3401 = vmatpush.msrb.mxu1 %v3292_v27  ;;  %v3275_v27 = vld [vmem:[%s13921_s19 + $0x100] sm:$0xff] }
 0xa95   :  { %v3042_v24 = vpop.f32.mrf.mxu2 }
 0xa97   :  { %v3083_v17 = vpop.f32.mrf.mxu0 }
 0xaa8   :  { %v2942_v34 = vpop.f32.mrf.mxu1 }
 0xaa9   :  { %3061 = vmatmul.f32.vlgmr.msra.gmra.mxu3 %v2942_v34  ;;  %v3263_v34 = vld [vmem:[%s13921_s19 + $0xa0] sm:$0xff] }
 0xaaa   :  { %3209 = vmatpush.msra.mxu3 %v3128_v57  ;;  %v3293_v57 = vld [vmem:[%s13921_s19 + $0x190] sm:$0xff] }
 0xaac   :  { %3210 = vmatpush.msra.mxu3 %v3126_v15  ;;  %v3257_v15 = vld [vmem:[%s13921_s19 + $0x70] sm:$0xff] }
 0xab0   :  { %v2990_v28 = vpop.f32.mrf.mxu1 }
 0xab1   :  { %3102 = vmatmul.f32.vlgmr.msra.gmra.mxu1 %v2990_v28  ;;  %v3295_v28 = vld [vmem:[%s13921_s19 + $0x1a0] sm:$0xff] }
 0xb2c   :  { %v3062_v16 = vpop.f32.mrf.mxu3 }
 0xb2d   :  { %v3063_v31 = vadd.f32 %v3062_v16, %v3042_v24  ;;  %v3259_v24 = vld [vmem:[%s13921_s19 + $0x80] sm:$0xff]  ;;  %v3289_v16 = vld [vmem:[%s13921_s19 + $0x170] sm:$0xff] }
 0xb2e   :  { %v3103_v18 = vpop.f32.mrf.mxu1 }
 0xb2f   :  { %v3065_v38 = vmul.f32 0.001953125, %v3063_v31  ;;  %v3104_v39 = vadd.f32 %v3103_v18, %v3083_v17  ;;  %v3258_v17 = vld [vmem:[%s13921_s19 + $0x78] sm:$0xff]  ;;  %v3255_v18 = vld [vmem:[%s13921_s19 + $0x60] sm:$0xff] }
 0xb30   :  { %v3290_v31 = vld [vmem:[%s13921_s19 + $0x178] sm:$0xff]  ;;  %3373 = vmatpush.msrb.mxu0 %v3258_v17  ;;  %v7228_v17 = vld [vmem:[%s13921_s19 + $0x390] sm:$0xff] }
 0xb31   :  { %v3107_v42 = vmul.f32 %v3065_v38, %v3065_v38  ;;  %v3106_v43 = vmul.f32 0.001953125, %v3104_v39  ;;  %3402 = vmatpush.msrb.mxu1 %v3290_v31  ;;  %v3256_v39 = vld [vmem:[%s13921_s19 + $0x68] sm:$0xff]  ;;  %v7197_v31 = vld [vmem:[%s13921_s19 + $0x298] sm:$0xff] }
 0xb32   :  { %3374 = vmatpush.msrb.mxu0 %v3256_v39  ;;  %v7226_v39 = vld [vmem:[%s13921_s19 + $0x380] sm:$0xff] }
 0xb33   :  { %v3108_v44 = vsub.f32 %v3106_v43, %v3107_v42  ;;  %v3288_v42 = vld [vmem:[%s13921_s19 + $0x168] sm:$0xff]  ;;  %v3253_v43 = vld [vmem:[%s13921_s19 + $0x50] sm:$0xff] }
 0xb34   :  { %3403 = vmatpush.msrb.mxu1 %v3288_v42  ;;  %3375 = vmatpush.msrb.mxu0 %v3254_v45  ;;  %v7195_v42 = vld [vmem:[%s13921_s19 + $0x288] sm:$0xff] }
 0xb35   :  { %v3110_v47 = vadd.f32 1e-05, %v3108_v44  ;;  %v3285_v44 = vld [vmem:[%s13921_s19 + $0x150] sm:$0xff] }
 0xb36   :  { %3404 = vmatpush.msrb.mxu1 %v3286_v46  ;;  %3376 = vmatpush.msrb.mxu0 %v3252_v49  ;;  %v7192_v46 = vld [vmem:[%s13921_s19 + $0x270] sm:$0xff]  ;;  %v7225_v49 = vld [vmem:[%s13921_s19 + $0x378] sm:$0xff] }
 0xb37   :  { %7839 = vrsqrt.f32 %v3110_v47  ;;  %vm3117_vm13 = vweird.f32 %v3110_v47 }
 0xb38   :  { %3405 = vmatpush.msrb.mxu1 %v3284_v50  ;;  %3377 = vmatpush.msrb.mxu0 %v3250_v52  ;;  %v7190_v50 = vld [vmem:[%s13921_s19 + $0x260] sm:$0xff]  ;;  %v7223_v52 = vld [vmem:[%s13921_s19 + $0x368] sm:$0xff] }
 0xb3a   :  { %3406 = vmatpush.msrb.mxu1 %v3282_v54  ;;  %3378 = vmatpush.msrb.mxu0 %v3248_v41  ;;  %v7188_v54 = vld [vmem:[%s13921_s19 + $0x250] sm:$0xff]  ;;  %v7221_v41 = vld [vmem:[%s13921_s19 + $0x358] sm:$0xff] }
 0xb3c   :  { %3379 = vmatpush.msrb.mxu0 %v3246_v37 }
 0xb3d   :  { %v7840_v7 = vpop.eup %7839 }
 0xb3e   :  { %v3112_v22 = vmul.f32 %v7840_v7, %v3110_v47  ;;  %vm3118_vm12 = vweird.f32 %v7840_v7  ;;  %v3251_v47 = vld [vmem:[%s13921_s19 + $0x40] sm:$0xff] }
 0xb3f   :  { %vm3119_vm14 = vmor %vm3117_vm13, %vm3118_vm12 }
 0xb40   :  { %v3113_v29 = vmul.f32 %v7840_v7, %v3112_v22  ;;  %v3277_v22 = vld [vmem:[%s13921_s19 + $0x110] sm:$0xff] }
 0xb42   :  { %v3114_v62 = vmul.f32 0.5, %v3113_v29  ;;  %v3243_v29 = vld [vmem:[%s13921_s19] sm:$0xff] }
 0xb44   :  { %v3115_v11 = vsub.f32 1.5, %v3114_v62  ;;  %v3244_v62 = vld [vmem:[%s13921_s19 + $0x8] sm:$0xff] }
 0xb45   :  { %3380 = vmatpush.msrb.mxu0 %v3244_v62 }
 0xb46   :  { %v3116_v12 = vmul.f32 %v7840_v7, %v3115_v11  ;;  %v3276_v11 = vld [vmem:[%s13921_s19 + $0x108] sm:$0xff] }
 0xb48   :  { %v3120_v55 = vsel %vm3119_vm14, %v7840_v7, %v3116_v12  ;;  %v3280_v7 = vld [vmem:[%s13921_s19 + $0x128] sm:$0xff]  ;;  %v7240_v12 = vld [vmem:[%s13921_s19 + $0x3f0] sm:$0xff] }
 0xb49   :  { %v3121_v0 = vmul.f32 %v3120_v55, %v3109_v33  ;;  %3407 = vmatpush.msrb.mxu1 %v3280_v7  ;;  %v7208_v33 = vld [vmem:[%s13921_s19 + $0x2f0] sm:$0xff]  ;;  %v7209_v55 = vld [vmem:[%s13921_s19 + $0x2f8] sm:$0xff] }
 0xb4a   :  { %3554 = vmatpush.msra.mxu0 %v7209_v55 }
 0xb4b   :  { %7174 = vmatmul.msk.f32.vlgmr.msrb.gmra.mxu2 %vm1632_vm8, %v3121_v0  ;;  %7175 = vmatmul.msk.f32.vlgmr.msrb.gmra.mxu3 %vm1632_vm8, %v3121_v0  ;;  %v3123_v5 = vmul.f32 %v3121_v0, %v3065_v38  ;;  %v3287_v38 = vld [vmem:[%s13921_s19 + $0x160] sm:$0xff]  ;;  %v7241_v0 = vld [vmem:[%s13921_s19 + $0x3f8] sm:$0xff] }
 0xb4c   :  { %3307 = vmatpush.msrb.mxu2 %v3273_v1  ;;  %3336 = vmatpush.msrb.mxu3 %v3305_v2  ;;  %v7206_v1 = vld [vmem:[%s13921_s19 + $0x2e0] sm:$0xff] }
 0xb4d   :  { %v3124_v58 = vsub.f32 %v3122_v10, %v3123_v5  ;;  %3408 = vmatpush.msrb.mxu1 %v3278_v21  ;;  %v7238_v2 = vld [vmem:[%s13921_s19 + $0x3e0] sm:$0xff]  ;;  %v7204_v5 = vld [vmem:[%s13921_s19 + $0x2d0] sm:$0xff]  ;;  %v7237_v10 = vld [vmem:[%s13921_s19 + $0x3d8] sm:$0xff] }
 0xb4e   :  { %3308 = vmatpush.msrb.mxu2 %v3271_v3  ;;  %3337 = vmatpush.msrb.mxu3 %v3303_v4  ;;  %v7207_v3 = vld [vmem:[%s13921_s19 + $0x2e8] sm:$0xff] }
 0xb4f   :  { %3409 = vmatpush.msrb.mxu1 %v3276_v11  ;;  %v7239_v4 = vld [vmem:[%s13921_s19 + $0x3e8] sm:$0xff]  ;;  %3555 = vmatpush.msra.mxu0 %v7207_v3  ;;  %v7184_v11 = vld [vmem:[%s13921_s19 + $0x230] sm:$0xff] }
 0xb50   :  { %3309 = vmatpush.msrb.mxu2 %v3269_v6  ;;  %3338 = vmatpush.msrb.mxu3 %v3301_v9  ;;  %v7236_v6 = vld [vmem:[%s13921_s19 + $0x3d0] sm:$0xff]  ;;  %v7205_v9 = vld [vmem:[%s13921_s19 + $0x2d8] sm:$0xff]  ;;  %v7187_v21 = vld [vmem:[%s13921_s19 + $0x248] sm:$0xff] }
 0xb51   :  { %3583 = vmatpush.msra.mxu1 %v7241_v0  ;;  %3556 = vmatpush.msra.mxu0 %v7205_v9 }
 0xb52   :  { %3310 = vmatpush.msrb.mxu2 %v3267_v32  ;;  %3339 = vmatpush.msrb.mxu3 %v3299_v60  ;;  %v7202_v32 = vld [vmem:[%s13921_s19 + $0x2c0] sm:$0xff] }
 0xb53   :  { %7176 = vmatmul.msk.f32.vlgmr.msra.gmra.mxu2 %vm1632_vm8, %v3124_v58  ;;  %7177 = vmatmul.msk.f32.vlgmr.msra.gmra.mxu3 %vm1632_vm8, %v3124_v58  ;;  %v7234_v60 = vld [vmem:[%s13921_s19 + $0x3c0] sm:$0xff]  ;;  %v7203_v58 = vld [vmem:[%s13921_s19 + $0x2c8] sm:$0xff] }
 0xb54   :  { %3311 = vmatpush.msrb.mxu2 %v3265_v53  ;;  %3340 = vmatpush.msrb.mxu3 %v3297_v13  ;;  %v7235_v53 = vld [vmem:[%s13921_s19 + $0x3c8] sm:$0xff]  ;;  %v7200_v13 = vld [vmem:[%s13921_s19 + $0x2b0] sm:$0xff] }
 0xb55   :  { %3584 = vmatpush.msra.mxu1 %v7239_v4  ;;  %3557 = vmatpush.msra.mxu0 %v7203_v58  ;;  %v7182_v4 = vld [vmem:[%s13921_s19 + $0x220] sm:$0xff]  ;;  %v7212_v58 = vld [vmem:[%s13921_s19 + $0x310] sm:$0xff] }
 0xb56   :  { %3312 = vmatpush.msrb.mxu2 %v3263_v34  ;;  %3341 = vmatpush.msrb.mxu3 %v3295_v28  ;;  %v7232_v34 = vld [vmem:[%s13921_s19 + $0x3b0] sm:$0xff]  ;;  %v7201_v28 = vld [vmem:[%s13921_s19 + $0x2b8] sm:$0xff] }
 0xb57   :  { %3585 = vmatpush.msra.mxu1 %v7237_v10  ;;  %3558 = vmatpush.msra.mxu0 %v7201_v28 }
 0xb58   :  { %3313 = vmatpush.msrb.mxu2 %v3261_v30  ;;  %3342 = vmatpush.msrb.mxu3 %v3293_v57  ;;  %v7233_v30 = vld [vmem:[%s13921_s19 + $0x3b8] sm:$0xff]  ;;  %v7198_v57 = vld [vmem:[%s13921_s19 + $0x2a0] sm:$0xff] }
 0xb59   :  { %3586 = vmatpush.msra.mxu1 %v7235_v53 }
 0xb5a   :  { %3314 = vmatpush.msrb.mxu2 %v3259_v24  ;;  %3343 = vmatpush.msrb.mxu3 %v3291_v40  ;;  %v7230_v24 = vld [vmem:[%s13921_s19 + $0x3a0] sm:$0xff]  ;;  %v7199_v40 = vld [vmem:[%s13921_s19 + $0x2a8] sm:$0xff] }
 0xb5b   :  { %3587 = vmatpush.msra.mxu1 %v7233_v30  ;;  %3559 = vmatpush.msra.mxu0 %v7199_v40  ;;  %v7210_v30 = vld [vmem:[%s13921_s19 + $0x300] sm:$0xff] }
 0xb5c   :  { %3315 = vmatpush.msrb.mxu2 %v3257_v15  ;;  %3344 = vmatpush.msrb.mxu3 %v3289_v16  ;;  %v7231_v15 = vld [vmem:[%s13921_s19 + $0x3a8] sm:$0xff]  ;;  %v7196_v16 = vld [vmem:[%s13921_s19 + $0x290] sm:$0xff] }
 0xb5d   :  { %3588 = vmatpush.msra.mxu1 %v7231_v15  ;;  %3560 = vmatpush.msra.mxu0 %v7197_v31  ;;  %v7312_v15 = vld [vmem:[%s13921_s19 + $0x4f0] sm:$0xff] }
 0xb5e   :  { %3316 = vmatpush.msrb.mxu2 %v3255_v18  ;;  %3345 = vmatpush.msrb.mxu3 %v3287_v38  ;;  %v7229_v18 = vld [vmem:[%s13921_s19 + $0x398] sm:$0xff]  ;;  %v7194_v38 = vld [vmem:[%s13921_s19 + $0x280] sm:$0xff] }
 0xb5f   :  { %3589 = vmatpush.msra.mxu1 %v7229_v18  ;;  %3561 = vmatpush.msra.mxu0 %v7195_v42  ;;  %v7310_v18 = vld [vmem:[%s13921_s19 + $0x4e0] sm:$0xff] }
 0xb60   :  { %3317 = vmatpush.msrb.mxu2 %v3253_v43  ;;  %3346 = vmatpush.msrb.mxu3 %v3285_v44  ;;  %v7227_v43 = vld [vmem:[%s13921_s19 + $0x388] sm:$0xff] }
 0xb61   :  { %3590 = vmatpush.msra.mxu1 %v7227_v43  ;;  %v7308_v43 = vld [vmem:[%s13921_s19 + $0x4d0] sm:$0xff] }
 0xb62   :  { %3318 = vmatpush.msrb.mxu2 %v3251_v47  ;;  %3347 = vmatpush.msrb.mxu3 %v3283_v48  ;;  %v7224_v47 = vld [vmem:[%s13921_s19 + $0x370] sm:$0xff]  ;;  %v7193_v48 = vld [vmem:[%s13921_s19 + $0x278] sm:$0xff] }
 0xb63   :  { %3562 = vmatpush.msra.mxu0 %v7193_v48  ;;  %3591 = vmatpush.msra.mxu1 %v7225_v49  ;;  %v7304_v49 = vld [vmem:[%s13921_s19 + $0x4b0] sm:$0xff] }
 0xb64   :  { %3319 = vmatpush.msrb.mxu2 %v3249_v8  ;;  %3348 = vmatpush.msrb.mxu3 %v3281_v51  ;;  %v7222_v8 = vld [vmem:[%s13921_s19 + $0x360] sm:$0xff]  ;;  %v7191_v51 = vld [vmem:[%s13921_s19 + $0x268] sm:$0xff] }
 0xb65   :  { %3563 = vmatpush.msra.mxu0 %v7191_v51  ;;  %3592 = vmatpush.msra.mxu1 %v7223_v52  ;;  %v7302_v52 = vld [vmem:[%s13921_s19 + $0x4a0] sm:$0xff] }
 0xb66   :  { %3320 = vmatpush.msrb.mxu2 %v3247_v25  ;;  %3349 = vmatpush.msrb.mxu3 %v3279_v35  ;;  %v7220_v25 = vld [vmem:[%s13921_s19 + $0x350] sm:$0xff]  ;;  %v7189_v35 = vld [vmem:[%s13921_s19 + $0x258] sm:$0xff] }
 0xb67   :  { %3564 = vmatpush.msra.mxu0 %v7189_v35  ;;  %3593 = vmatpush.msra.mxu1 %v7221_v41  ;;  %v7332_v35 = vld [vmem:[%s13921_s19 + $0x590] sm:$0xff] }
 0xb68   :  { %3321 = vmatpush.msrb.mxu2 %v3245_v56  ;;  %3350 = vmatpush.msrb.mxu3 %v3277_v22  ;;  %v7186_v56 = vld [vmem:[%s13921_s19 + $0x240] sm:$0xff] }
 0xb69   :  { %v7218_v22 = vld [vmem:[%s13921_s19 + $0x340] sm:$0xff]  ;;  %3565 = vmatpush.msra.mxu0 %v7187_v21  ;;  %v7328_v21 = vld [vmem:[%s13921_s19 + $0x570] sm:$0xff] }
 0xb6a   :  { %3322 = vmatpush.msrb.mxu2 %v3243_v29  ;;  %3351 = vmatpush.msrb.mxu3 %v3275_v27  ;;  %v7219_v29 = vld [vmem:[%s13921_s19 + $0x348] sm:$0xff] }
 0xb6b   :  { %3594 = vmatpush.msra.mxu1 %v7219_v29  ;;  %v7294_v29 = vld [vmem:[%s13921_s19 + $0x460] sm:$0xff] }
 0xb6c   :  { %3496 = vmatpush.msra.mxu2 %v7208_v33  ;;  %3525 = vmatpush.msra.mxu3 %v7240_v12  ;;  %v7216_v33 = vld [vmem:[%s13921_s19 + $0x330] sm:$0xff]  ;;  %v7185_v12 = vld [vmem:[%s13921_s19 + $0x238] sm:$0xff] }
 0xb6d   :  { %3566 = vmatpush.msra.mxu0 %v7185_v12  ;;  %v7322_v12 = vld [vmem:[%s13921_s19 + $0x540] sm:$0xff] }
 0xb6e   :  { %3497 = vmatpush.msra.mxu2 %v7206_v1  ;;  %3526 = vmatpush.msra.mxu3 %v7238_v2  ;;  %v7217_v2 = vld [vmem:[%s13921_s19 + $0x338] sm:$0xff] }
 0xb6f   :  { %3595 = vmatpush.msra.mxu1 %v7217_v2  ;;  %v7318_v2 = vld [vmem:[%s13921_s19 + $0x520] sm:$0xff] }
 0xb70   :  { %3498 = vmatpush.msra.mxu2 %v7204_v5  ;;  %3527 = vmatpush.msra.mxu3 %v7236_v6  ;;  %v7183_v6 = vld [vmem:[%s13921_s19 + $0x228] sm:$0xff] }
 0xb71   :  { %3567 = vmatpush.msra.mxu0 %v7183_v6 }
 0xb72   :  { %3499 = vmatpush.msra.mxu2 %v7202_v32  ;;  %3528 = vmatpush.msra.mxu3 %v7234_v60  ;;  %v7180_v60 = vld [vmem:[%s13921_s19 + $0x210] sm:$0xff] }
 0xb74   :  { %3500 = vmatpush.msra.mxu2 %v7200_v13  ;;  %3529 = vmatpush.msra.mxu3 %v7232_v34  ;;  %v7181_v13 = vld [vmem:[%s13921_s19 + $0x218] sm:$0xff] }
 0xb75   :  { %v7213_v34 = vld [vmem:[%s13921_s19 + $0x318] sm:$0xff]  ;;  %3568 = vmatpush.msra.mxu0 %v7181_v13 }
 0xb76   :  { %3501 = vmatpush.msra.mxu2 %v7198_v57  ;;  %3530 = vmatpush.msra.mxu3 %v7230_v24  ;;  %v7211_v24 = vld [vmem:[%s13921_s19 + $0x308] sm:$0xff] }
 0xb78   :  { %3502 = vmatpush.msra.mxu2 %v7196_v16  ;;  %3531 = vmatpush.msra.mxu3 %v7228_v17  ;;  %v7344_v16 = vld [vmem:[%s13921_s19 + $0x5f0] sm:$0xff] }
 0xb7a   :  { %3503 = vmatpush.msra.mxu2 %v7194_v38  ;;  %3532 = vmatpush.msra.mxu3 %v7226_v39  ;;  %v7342_v38 = vld [vmem:[%s13921_s19 + $0x5e0] sm:$0xff] }
 0xb7c   :  { %3504 = vmatpush.msra.mxu2 %v7192_v46  ;;  %3533 = vmatpush.msra.mxu3 %v7224_v47  ;;  %v7338_v46 = vld [vmem:[%s13921_s19 + $0x5c0] sm:$0xff] }
 0xb7e   :  { %3505 = vmatpush.msra.mxu2 %v7190_v50  ;;  %3534 = vmatpush.msra.mxu3 %v7222_v8  ;;  %v7336_v50 = vld [vmem:[%s13921_s19 + $0x5b0] sm:$0xff] }
 0xb80   :  { %3506 = vmatpush.msra.mxu2 %v7188_v54  ;;  %3535 = vmatpush.msra.mxu3 %v7220_v25  ;;  %v7334_v54 = vld [vmem:[%s13921_s19 + $0x5a0] sm:$0xff] }
 0xb82   :  { %3507 = vmatpush.msra.mxu2 %v7186_v56  ;;  %3536 = vmatpush.msra.mxu3 %v7218_v22  ;;  %v7298_v56 = vld [vmem:[%s13921_s19 + $0x480] sm:$0xff] }
 0xb83   :  { %v7330_v22 = vld [vmem:[%s13921_s19 + $0x580] sm:$0xff] }
 0xb84   :  { %3508 = vmatpush.msra.mxu2 %v7184_v11  ;;  %3537 = vmatpush.msra.mxu3 %v7216_v33  ;;  %v7324_v11 = vld [vmem:[%s13921_s19 + $0x550] sm:$0xff]  ;;  %v7290_v33 = vld [vmem:[%s13921_s19 + $0x440] sm:$0xff] }
 0xb86   :  { %3509 = vmatpush.msra.mxu2 %v7182_v4  ;;  %v7316_v4 = vld [vmem:[%s13921_s19 + $0x510] sm:$0xff] }
 0xb88   :  { %3510 = vmatpush.msra.mxu2 %v7180_v60 }
 0xbce   :  { %v3149_v44 = vpop.f32.mrf.mxu2  ;;  %v3169_v45 = vpop.f32.mrf.mxu3 }
 0xbcf   :  { %v10910_v7 = vperm.slane %v3149_v44, 0  ;;  %v10918_v37 = vperm.slane %v3169_v45, 0  ;;  %v7340_v44 = vld [vmem:[%s13921_s19 + $0x5d0] sm:$0xff] }
 0xbd1   :  { %v3217_v55 = vmul.f32 %v10910_v7, %v10379_v36  ;;  %v3218_v3 = vmul.f32 %v10918_v37, %v10513_v63  ;;  %v7214_v36 = vld [vmem:[%s13921_s19 + $0x320] sm:$0xff]  ;;  %v7215_v63 = vld [vmem:[%s13921_s19 + $0x328] sm:$0xff]  ;;  %v3219_v53 = vmul.f32 %v10910_v7, %v10376_v20  ;;  %v3220_v28 = vmul.f32 %v10918_v37, %v10503_v19 }
 0xbd2   :  { %3538 = vmatpush.msra.mxu3 %v7214_v36  ;;  %3596 = vmatpush.msra.mxu1 %v7215_v63  ;;  %v7178_v20 = vld [vmem:[%s13921_s19 + $0x200] sm:$0xff]  ;;  %v7179_v19 = vld [vmem:[%s13921_s19 + $0x208] sm:$0xff]  ;;  %v3221_v39 = vmul.f32 %v10910_v7, %v10372_v14  ;;  %v3222_v42 = vmul.f32 %v10918_v37, %v10493_v26  ;;  %v3223_v8 = vmul.f32 %v10910_v7, %v10368_v59 }
 0xbd3   :  { %3511 = vmatpush.msra.mxu2 %v7178_v20  ;;  %3569 = vmatpush.msra.mxu0 %v7179_v19  ;;  %v7306_v26 = vld [vmem:[%s13921_s19 + $0x4c0] sm:$0xff]  ;;  %v3224_v51 = vmul.f32 %v10918_v37, %v10481_v23  ;;  %v7300_v23 = vld [vmem:[%s13921_s19 + $0x490] sm:$0xff] }
 0xbd4   :  { %3539 = vmatpush.msra.mxu3 %v7212_v58  ;;  %3597 = vmatpush.msra.mxu1 %v7213_v34  ;;  %v7296_v37 = vld [vmem:[%s13921_s19 + $0x470] sm:$0xff]  ;;  %v7282_v36 = vld [vmem:[%s13921_s19 + $0x400] sm:$0xff] }
 0xbd6   :  { %v3192_v27 = vpop.f32.mrf.mxu2  ;;  %v3212_v62 = vpop.f32.mrf.mxu3  ;;  %3540 = vmatpush.msra.mxu3 %v7210_v30  ;;  %3598 = vmatpush.msra.mxu1 %v7211_v24 }
 0xbd7   :  { %v10937_v0 = vperm.slane %v3192_v27, 0  ;;  %v10939_v1 = vperm.slane %v3212_v62, 0  ;;  %v7326_v27 = vld [vmem:[%s13921_s19 + $0x560] sm:$0xff]  ;;  %v7292_v62 = vld [vmem:[%s13921_s19 + $0x450] sm:$0xff] }
 0xbd9   :  { %v3227_v5 = vadd.f32 %v10937_v0, %v3217_v55  ;;  %v3228_v9 = vadd.f32 %v10939_v1, %v3218_v3  ;;  %v3229_v57 = vadd.f32 %v10937_v0, %v3219_v53  ;;  %v3230_v40 = vadd.f32 %v10939_v1, %v3220_v28  ;;  %v7288_v55 = vld [vmem:[%s13921_s19 + $0x430] sm:$0xff] }
 0xbda   :  { %v3231_v14 = vadd.f32 %v10937_v0, %v3221_v39  ;;  %v3232_v45 = vadd.f32 %v10939_v1, %v3222_v42  ;;  %v3233_v59 = vadd.f32 %v10937_v0, %v3223_v8  ;;  %v3234_v25 = vadd.f32 %v10939_v1, %v3224_v51  ;;  %v7320_v0 = vld [vmem:[%s13921_s19 + $0x530] sm:$0xff]  ;;  %v7286_v1 = vld [vmem:[%s13921_s19 + $0x420] sm:$0xff] }
 0xbdb   :  { %v10960_v10 = vmax.f32 %v3227_v5, 0.0  ;;  %v10962_v32 = vmax.f32 %v3228_v9, 0.0  ;;  %v11004_v17 = vmax.f32 %v3229_v57, 0.0  ;;  %v11006_v31 = vmax.f32 %v3230_v40, 0.0  ;;  %v7284_v3 = vld [vmem:[%s13921_s19 + $0x410] sm:$0xff]  ;;  %v7314_v5 = vld [vmem:[%s13921_s19 + $0x500] sm:$0xff] }
 0xbdc   :  { %v11036_v47 = vmax.f32 %v3231_v14, 0.0  ;;  %v11038_v48 = vmax.f32 %v3232_v45, 0.0  ;;  %v11068_v41 = vmax.f32 %v3233_v59, 0.0  ;;  %v11070_v7 = vmax.f32 %v3234_v25, 0.0 }
 0xbdd   :  { %3323 = vmatmul.f32.vlgmr.msrb.gmra.mxu2 %v10960_v10  ;;  %3381 = vmatmul.f32.vlgmr.msrb.gmra.mxu0 %v10960_v10 }
 0xbde   :  { %3352 = vmatmul.f32.vlgmr.msrb.gmra.mxu3 %v10962_v32  ;;  %3410 = vmatmul.f32.vlgmr.msrb.gmra.mxu1 %v10962_v32 }
 0xbdf   :  { %3898 = vmatpush.msrb.mxu2 %v7312_v15  ;;  %3927 = vmatpush.msrb.mxu3 %v7344_v16 }
 0xbe1   :  { %3899 = vmatpush.msrb.mxu2 %v7310_v18  ;;  %3928 = vmatpush.msrb.mxu3 %v7342_v38 }
 0xbe3   :  { %3900 = vmatpush.msrb.mxu2 %v7308_v43  ;;  %3929 = vmatpush.msrb.mxu3 %v7340_v44 }
 0xbe5   :  { %3326 = vmatmul.f32.gmra.mxu2 %v11004_v17  ;;  %3384 = vmatmul.f32.gmra.mxu0 %v11004_v17 }
 0xbe6   :  { %3355 = vmatmul.f32.gmra.mxu3 %v11006_v31  ;;  %3413 = vmatmul.f32.gmra.mxu1 %v11006_v31 }
 0xbe7   :  { %3901 = vmatpush.msrb.mxu2 %v7306_v26  ;;  %3930 = vmatpush.msrb.mxu3 %v7338_v46 }
 0xbe9   :  { %3902 = vmatpush.msrb.mxu2 %v7304_v49  ;;  %3931 = vmatpush.msrb.mxu3 %v7336_v50 }
 0xbeb   :  { %3903 = vmatpush.msrb.mxu2 %v7302_v52  ;;  %3932 = vmatpush.msrb.mxu3 %v7334_v54 }
 0xbed   :  { %3329 = vmatmul.f32.gmra.mxu2 %v11036_v47  ;;  %3387 = vmatmul.f32.gmra.mxu0 %v11036_v47 }
 0xbee   :  { %3358 = vmatmul.f32.gmra.mxu3 %v11038_v48  ;;  %3416 = vmatmul.f32.gmra.mxu1 %v11038_v48 }
 0xbef   :  { %3904 = vmatpush.msrb.mxu2 %v7300_v23  ;;  %3933 = vmatpush.msrb.mxu3 %v7332_v35 }
 0xbf1   :  { %3905 = vmatpush.msrb.mxu2 %v7298_v56  ;;  %3934 = vmatpush.msrb.mxu3 %v7330_v22  ;;  %v7242_v56 = vld [vmem:[%s13924_s20 + $0x40] sm:$0xff] }
 0xbf3   :  { %3906 = vmatpush.msrb.mxu2 %v7296_v37  ;;  %3935 = vmatpush.msrb.mxu3 %v7328_v21 }
 0xbf5   :  { %3332 = vmatmul.f32.gmra.mxu2 %v11068_v41  ;;  %3390 = vmatmul.f32.gmra.mxu0 %v11068_v41 }
 0xbf6   :  { %3361 = vmatmul.f32.gmra.mxu3 %v11070_v7  ;;  %3419 = vmatmul.f32.gmra.mxu1 %v11070_v7 }
 0xbf7   :  { %3907 = vmatpush.msrb.mxu2 %v7294_v29  ;;  %3936 = vmatpush.msrb.mxu3 %v7326_v27 }
 0xbf9   :  { %3908 = vmatpush.msrb.mxu2 %v7292_v62  ;;  %3937 = vmatpush.msrb.mxu3 %v7324_v11 }
 0xbfb   :  { %3909 = vmatpush.msrb.mxu2 %v7290_v33  ;;  %3938 = vmatpush.msrb.mxu3 %v7322_v12 }
 0xbfd   :  { %3512 = vmatmul.f32.vlgmr.msra.gmra.mxu2 %v10960_v10  ;;  %3570 = vmatmul.f32.vlgmr.msra.gmra.mxu0 %v10960_v10 }
 0xbfe   :  { %3541 = vmatmul.f32.vlgmr.msra.gmra.mxu3 %v10962_v32  ;;  %3599 = vmatmul.f32.vlgmr.msra.gmra.mxu1 %v10962_v32 }
 0xbff   :  { %3910 = vmatpush.msrb.mxu2 %v7288_v55  ;;  %3939 = vmatpush.msrb.mxu3 %v7320_v0  ;;  %v7243_v0 = vld [vmem:[%s13924_s20 + $0x48] sm:$0xff] }
 0xc01   :  { %3911 = vmatpush.msrb.mxu2 %v7286_v1  ;;  %3940 = vmatpush.msrb.mxu3 %v7318_v2 }
 0xc03   :  { %3912 = vmatpush.msrb.mxu2 %v7284_v3  ;;  %3941 = vmatpush.msrb.mxu3 %v7316_v4 }
 0xc05   :  { %3515 = vmatmul.f32.gmra.mxu2 %v11004_v17  ;;  %3573 = vmatmul.f32.gmra.mxu0 %v11004_v17 }
 0xc06   :  { %3544 = vmatmul.f32.gmra.mxu3 %v11006_v31  ;;  %3602 = vmatmul.f32.gmra.mxu1 %v11006_v31 }
 0xc07   :  { %3913 = vmatpush.msrb.mxu2 %v7282_v36  ;;  %3942 = vmatpush.msrb.mxu3 %v7314_v5  ;;  %v7244_v5 = vld [vmem:[%s13924_s20 + $0x50] sm:$0xff] }
 0xc0d   :  { %3518 = vmatmul.f32.gmra.mxu2 %v11036_v47  ;;  %3576 = vmatmul.f32.gmra.mxu0 %v11036_v47 }
 0xc0e   :  { %3547 = vmatmul.f32.gmra.mxu3 %v11038_v48  ;;  %3605 = vmatmul.f32.gmra.mxu1 %v11038_v48 }
 0xc15   :  { %3521 = vmatmul.f32.gmra.mxu2 %v11068_v41  ;;  %3579 = vmatmul.f32.gmra.mxu0 %v11068_v41 }
 0xc16   :  { %3550 = vmatmul.f32.gmra.mxu3 %v11070_v7  ;;  %3608 = vmatmul.f32.gmra.mxu1 %v11070_v7 }
 0xc1d   :  { %3914 = vmatmul.f32.vlgmr.msrb.gmra.mxu2 %v10960_v10 }
 0xc1e   :  { %3943 = vmatmul.f32.vlgmr.msrb.gmra.mxu3 %v10962_v32 }
 0xc25   :  { %3917 = vmatmul.f32.gmra.mxu2 %v11004_v17 }
 0xc26   :  { %3946 = vmatmul.f32.gmra.mxu3 %v11006_v31 }
 0xc2d   :  { %3920 = vmatmul.f32.gmra.mxu2 %v11036_v47 }
 0xc2e   :  { %3949 = vmatmul.f32.gmra.mxu3 %v11038_v48 }
 0xc35   :  { %3923 = vmatmul.f32.gmra.mxu2 %v11068_v41 }
 0xc36   :  { %3952 = vmatmul.f32.gmra.mxu3 %v11070_v7 }
 0xc5a   :  { %v3382_v6 = vpop.f32.mrf.mxu0 }
 0xc5b   :  { %v3411_v63 = vpop.f32.mrf.mxu1 }
 0xc5c   :  { %v3412_v12 = vadd.f32 %v3411_v63, %v3382_v6 }
 0xc60   :  { %v11154_v9 = vpop.f32.mrf.mxu2 }
 0xc61   :  { %v11156_v60 = vpop.f32.mrf.mxu3 }
 0xc62   :  { %v3385_v58 = vpop.f32.mrf.mxu0  ;;  %v3354_v3 = vadd.f32 %v11156_v60, %v11154_v9 }
 0xc63   :  { %v3414_v53 = vpop.f32.mrf.mxu1 }
 0xc64   :  { %v3415_v27 = vadd.f32 %v3414_v53, %v3385_v58  ;;  %v7245_v58 = vld [vmem:[%s13924_s20 + $0x58] sm:$0xff] }
 0xc68   :  { %v3327_v13 = vpop.f32.mrf.mxu2 }
 0xc69   :  { %v3356_v34 = vpop.f32.mrf.mxu3 }
 0xc6a   :  { %v3388_v28 = vpop.f32.mrf.mxu0  ;;  %v3357_v2 = vadd.f32 %v3356_v34, %v3327_v13  ;;  %v7246_v13 = vld [vmem:[%s13924_s20 + $0x60] sm:$0xff] }
 0xc6b   :  { %v3417_v20 = vpop.f32.mrf.mxu1 }
 0xc6c   :  { %v3418_v21 = vadd.f32 %v3417_v20, %v3388_v28 }
 0xc70   :  { %v3330_v30 = vpop.f32.mrf.mxu2 }
 0xc71   :  { %v3359_v57 = vpop.f32.mrf.mxu3 }
 0xc72   :  { %v3391_v19 = vpop.f32.mrf.mxu0  ;;  %v3360_v1 = vadd.f32 %v3359_v57, %v3330_v30  ;;  %v11187_v30 = vld [vmem:[%s13924_s20 + $0x80] sm:$0xff]  ;;  %v7247_v57 = vld [vmem:[%s13924_s20 + $0x68] sm:$0xff] }
 0xc73   :  { %v3420_v24 = vpop.f32.mrf.mxu1 }
 0xc74   :  { %v3421_v22 = vadd.f32 %v3420_v24, %v3391_v19  ;;  %v11199_v19 = vld [vmem:[%s13924_s20 + $0x88] sm:$0xff]  ;;  %v7248_v24 = vld [vmem:[%s13924_s20 + $0x70] sm:$0xff] }
 0xc78   :  { %v3333_v40 = vpop.f32.mrf.mxu2 }
 0xc79   :  { %v3362_v15 = vpop.f32.mrf.mxu3 }
 0xc7a   :  { %v3571_v16 = vpop.f32.mrf.mxu0  ;;  %v3363_v55 = vadd.f32 %v3362_v15, %v3333_v40  ;;  %v11211_v40 = vld [vmem:[%s13924_s20 + $0x90] sm:$0xff]  ;;  %v7249_v15 = vld [vmem:[%s13924_s20 + $0x78] sm:$0xff] }
 0xc7b   :  { %v3600_v18 = vpop.f32.mrf.mxu1 }
 0xc7c   :  { %v3601_v23 = vadd.f32 %v3600_v18, %v3571_v16  ;;  %v11223_v16 = vld [vmem:[%s13924_s20 + $0x98] sm:$0xff]  ;;  %v3423_v18 = vld [vmem:[%s13924_s20] sm:$0xff] }
 0xc80   :  { %v3513_v38 = vpop.f32.mrf.mxu2 }
 0xc81   :  { %v3542_v39 = vpop.f32.mrf.mxu3 }
 0xc82   :  { %v3574_v42 = vpop.f32.mrf.mxu0  ;;  %v3543_v62 = vadd.f32 %v3542_v39, %v3513_v38  ;;  %v7345_v38 = vld [vmem:[%s13921_s19 + $0x5f8] sm:$0xff]  ;;  %v7343_v39 = vld [vmem:[%s13921_s19 + $0x5e8] sm:$0xff] }
 0xc83   :  { %v3603_v43 = vpop.f32.mrf.mxu1 }
 0xc84   :  { %v3604_v54 = vadd.f32 %v3603_v43, %v3574_v42  ;;  %v7341_v42 = vld [vmem:[%s13921_s19 + $0x5d8] sm:$0xff]  ;;  %v11244_v43 = vld [vmem:[%s13924_s20 + $0xa0] sm:$0xff] }
 0xc88   :  { %v3516_v44 = vpop.f32.mrf.mxu2 }
 0xc89   :  { %v3545_v14 = vpop.f32.mrf.mxu3 }
 0xc8a   :  { %v3577_v45 = vpop.f32.mrf.mxu0  ;;  %v3546_v29 = vadd.f32 %v3545_v14, %v3516_v44  ;;  %v3424_v44 = vld [vmem:[%s13924_s20 + $0x8] sm:$0xff]  ;;  %v7313_v14 = vld [vmem:[%s13921_s19 + $0x4f8] sm:$0xff] }
 0xc8b   :  { %v3606_v26 = vpop.f32.mrf.mxu1 }
 0xc8c   :  { %v3607_v52 = vadd.f32 %v3606_v26, %v3577_v45  ;;  %v7339_v45 = vld [vmem:[%s13921_s19 + $0x5c8] sm:$0xff] }
 0xc8d   :  { %v7311_v26 = vld [vmem:[%s13921_s19 + $0x4e8] sm:$0xff] }
 0xc90   :  { %v3519_v46 = vpop.f32.mrf.mxu2 }
 0xc91   :  { %v3548_v49 = vpop.f32.mrf.mxu3 }
 0xc92   :  { %v3580_v50 = vpop.f32.mrf.mxu0  ;;  %v3549_v37 = vadd.f32 %v3548_v49, %v3519_v46  ;;  %v7337_v46 = vld [vmem:[%s13921_s19 + $0x5b8] sm:$0xff] }
 0xc93   :  { %v3609_v8 = vpop.f32.mrf.mxu1  ;;  %v7309_v49 = vld [vmem:[%s13921_s19 + $0x4d8] sm:$0xff] }
 0xc94   :  { %v3610_v51 = vadd.f32 %v3609_v8, %v3580_v50  ;;  %v7335_v50 = vld [vmem:[%s13921_s19 + $0x5a8] sm:$0xff] }
 0xc95   :  { %v7307_v8 = vld [vmem:[%s13921_s19 + $0x4c8] sm:$0xff] }
 0xc96   :  { %3698 = vmatpush.msrb.mxu1 %v3610_v51  ;;  %v7333_v51 = vld [vmem:[%s13921_s19 + $0x598] sm:$0xff] }
 0xc98   :  { %3699 = vmatpush.msrb.mxu1 %v3607_v52  ;;  %v3522_v59 = vpop.f32.mrf.mxu2  ;;  %v11280_v52 = vld [vmem:[%s13924_s20 + $0xa8] sm:$0xff] }
 0xc99   :  { %v3551_v25 = vpop.f32.mrf.mxu3 }
 0xc9a   :  { %v3552_v35 = vadd.f32 %v3551_v25, %v3522_v59  ;;  %3700 = vmatpush.msrb.mxu1 %v3604_v54  ;;  %v3425_v54 = vld [vmem:[%s13924_s20 + $0x10] sm:$0xff]  ;;  %v7305_v59 = vld [vmem:[%s13921_s19 + $0x4b8] sm:$0xff]  ;;  %v7331_v25 = vld [vmem:[%s13921_s19 + $0x588] sm:$0xff] }
 0xc9c   :  { %3657 = vmatpush.msrb.mxu0 %v3552_v35  ;;  %3701 = vmatpush.msrb.mxu1 %v3601_v23  ;;  %v7303_v23 = vld [vmem:[%s13921_s19 + $0x4a8] sm:$0xff]  ;;  %v7329_v35 = vld [vmem:[%s13921_s19 + $0x578] sm:$0xff] }
 0xc9d   :  { %7258 = vmatmul.msk.f32.vlgmr.msrb.gmra.mxu1 %vm95_vm0, %v7242_v56 }
 0xc9e   :  { %3804 = vmatpush.msra.mxu1 %v3421_v22  ;;  %3658 = vmatpush.msrb.mxu0 %v3549_v37  ;;  %v7327_v22 = vld [vmem:[%s13921_s19 + $0x568] sm:$0xff] }
 0xc9f   :  { %v7299_v37 = vld [vmem:[%s13921_s19 + $0x488] sm:$0xff] }
 0xca0   :  { %3805 = vmatpush.msra.mxu1 %v3418_v21  ;;  %3659 = vmatpush.msrb.mxu0 %v3546_v29  ;;  %v3915_v11 = vpop.f32.mrf.mxu2  ;;  %v7325_v21 = vld [vmem:[%s13921_s19 + $0x558] sm:$0xff]  ;;  %v11316_v29 = vld [vmem:[%s13924_s20 + $0xb0] sm:$0xff] }
 0xca1   :  { %v3944_v33 = vpop.f32.mrf.mxu3 }
 0xca2   :  { %3806 = vmatpush.msra.mxu1 %v3415_v27  ;;  %3660 = vmatpush.msrb.mxu0 %v3543_v62  ;;  %v3945_v20 = vadd.f32 %v3944_v33, %v3915_v11  ;;  %v3426_v27 = vld [vmem:[%s13924_s20 + $0x18] sm:$0xff]  ;;  %v7323_v11 = vld [vmem:[%s13921_s19 + $0x548] sm:$0xff] }
 0xca3   :  { %7250 = vmatmul.msk.f32.vlgmr.msrb.gmra.mxu0 %vm95_vm0, %v7242_v56  ;;  %v7301_v56 = vld [vmem:[%s13921_s19 + $0x498] sm:$0xff]  ;;  %v7295_v33 = vld [vmem:[%s13921_s19 + $0x468] sm:$0xff] }
 0xca4   :  { %3763 = vmatpush.msra.mxu0 %v3363_v55  ;;  %3807 = vmatpush.msra.mxu1 %v3412_v12  ;;  %v7297_v62 = vld [vmem:[%s13921_s19 + $0x478] sm:$0xff] }
 0xca5   :  { %7259 = vmatmul.msk.f32.gmra.mxu1 %vm95_vm0, %v7243_v0  ;;  %v7321_v12 = vld [vmem:[%s13921_s19 + $0x538] sm:$0xff] }
 0xca6   :  { %3764 = vmatpush.msra.mxu0 %v3360_v1  ;;  %3985 = vmatpush.msrb.mxu1 %v7345_v38  ;;  %v7293_v55 = vld [vmem:[%s13921_s19 + $0x458] sm:$0xff]  ;;  %v7394_v38 = vld [vmem:[%s13921_s19 + $0x6c0] sm:$0xff] }
 0xca7   :  { %v11346_v1 = vld [vmem:[%s13924_s20 + $0xb8] sm:$0xff] }
 0xca8   :  { %3765 = vmatpush.msra.mxu0 %v3357_v2  ;;  %v3918_v4 = vpop.f32.mrf.mxu2  ;;  %3986 = vmatpush.msrb.mxu1 %v7343_v39  ;;  %v3427_v2 = vld [vmem:[%s13924_s20 + $0x20] sm:$0xff]  ;;  %v7420_v39 = vld [vmem:[%s13921_s19 + $0x790] sm:$0xff] }
 0xca9   :  { %v3947_v36 = vpop.f32.mrf.mxu3 }
 0xcaa   :  { %3766 = vmatpush.msra.mxu0 %v3354_v3  ;;  %v3948_v28 = vadd.f32 %v3947_v36, %v3918_v4  ;;  %3987 = vmatpush.msrb.mxu1 %v7341_v42  ;;  %v7291_v3 = vld [vmem:[%s13921_s19 + $0x448] sm:$0xff]  ;;  %v7317_v4 = vld [vmem:[%s13921_s19 + $0x518] sm:$0xff]  ;;  %v7392_v42 = vld [vmem:[%s13921_s19 + $0x6b0] sm:$0xff] }
 0xcab   :  { %7251 = vmatmul.msk.f32.gmra.mxu0 %vm95_vm0, %v7243_v0  ;;  %v7319_v0 = vld [vmem:[%s13921_s19 + $0x528] sm:$0xff]  ;;  %v7289_v36 = vld [vmem:[%s13921_s19 + $0x438] sm:$0xff] }
 0xcac   :  { %3956 = vmatpush.msrb.mxu0 %v7313_v14  ;;  %3988 = vmatpush.msrb.mxu1 %v7339_v45  ;;  %v7390_v14 = vld [vmem:[%s13921_s19 + $0x6a0] sm:$0xff]  ;;  %v7416_v45 = vld [vmem:[%s13921_s19 + $0x770] sm:$0xff] }
 0xcad   :  { %7260 = vmatmul.msk.f32.gmra.mxu1 %vm95_vm0, %v7244_v5 }
 0xcae   :  { %3957 = vmatpush.msrb.mxu0 %v7311_v26  ;;  %3989 = vmatpush.msrb.mxu1 %v7337_v46  ;;  %v7388_v26 = vld [vmem:[%s13921_s19 + $0x690] sm:$0xff]  ;;  %v7414_v46 = vld [vmem:[%s13921_s19 + $0x760] sm:$0xff] }
 0xcb0   :  { %v3921_v6 = vpop.f32.mrf.mxu2  ;;  %3958 = vmatpush.msrb.mxu0 %v7309_v49  ;;  %3990 = vmatpush.msrb.mxu1 %v7335_v50  ;;  %v3430_v49 = vld [vmem:[%s13924_s20 + $0x38] sm:$0xff]  ;;  %v7386_v50 = vld [vmem:[%s13921_s19 + $0x680] sm:$0xff] }
 0xcb1   :  { %v3950_v63 = vpop.f32.mrf.mxu3 }
 0xcb2   :  { %v3951_v34 = vadd.f32 %v3950_v63, %v3921_v6  ;;  %3959 = vmatpush.msrb.mxu0 %v7307_v8  ;;  %3991 = vmatpush.msrb.mxu1 %v7333_v51  ;;  %v7287_v6 = vld [vmem:[%s13921_s19 + $0x428] sm:$0xff]  ;;  %v7432_v63 = vld [vmem:[%s13921_s19 + $0x7f0] sm:$0xff] }
 0xcb3   :  { %7252 = vmatmul.msk.f32.gmra.mxu0 %vm95_vm0, %v7244_v5  ;;  %v7315_v5 = vld [vmem:[%s13921_s19 + $0x508] sm:$0xff]  ;;  %v7412_v8 = vld [vmem:[%s13921_s19 + $0x750] sm:$0xff] }
 0xcb4   :  { %3960 = vmatpush.msrb.mxu0 %v7305_v59  ;;  %3992 = vmatpush.msrb.mxu1 %v7331_v25  ;;  %v7384_v51 = vld [vmem:[%s13921_s19 + $0x670] sm:$0xff]  ;;  %v7382_v59 = vld [vmem:[%s13921_s19 + $0x660] sm:$0xff] }
 0xcb5   :  { %7261 = vmatmul.msk.f32.gmra.mxu1 %vm95_vm0, %v7245_v58  ;;  %v7408_v25 = vld [vmem:[%s13921_s19 + $0x730] sm:$0xff] }
 0xcb6   :  { %3961 = vmatpush.msrb.mxu0 %v7303_v23  ;;  %3993 = vmatpush.msrb.mxu1 %v7329_v35  ;;  %v7380_v23 = vld [vmem:[%s13921_s19 + $0x650] sm:$0xff]  ;;  %v7406_v35 = vld [vmem:[%s13921_s19 + $0x720] sm:$0xff] }
 0xcb8   :  { %v3924_v9 = vpop.f32.mrf.mxu2  ;;  %3962 = vmatpush.msrb.mxu0 %v7301_v56  ;;  %3994 = vmatpush.msrb.mxu1 %v7327_v22  ;;  %v7378_v22 = vld [vmem:[%s13921_s19 + $0x640] sm:$0xff] }
 0xcb9   :  { %v3953_v60 = vpop.f32.mrf.mxu3 }
 0xcba   :  { %v3954_v53 = vadd.f32 %v3953_v60, %v3924_v9  ;;  %3963 = vmatpush.msrb.mxu0 %v7299_v37  ;;  %3995 = vmatpush.msrb.mxu1 %v7325_v21  ;;  %v7430_v9 = vld [vmem:[%s13921_s19 + $0x7e0] sm:$0xff]  ;;  %v3428_v60 = vld [vmem:[%s13924_s20 + $0x28] sm:$0xff]  ;;  %v7404_v37 = vld [vmem:[%s13921_s19 + $0x710] sm:$0xff] }
 0xcbb   :  { %7253 = vmatmul.msk.f32.gmra.mxu0 %vm95_vm0, %v7245_v58  ;;  %v7285_v58 = vld [vmem:[%s13921_s19 + $0x418] sm:$0xff]  ;;  %v7376_v21 = vld [vmem:[%s13921_s19 + $0x630] sm:$0xff] }
 0xcbc   :  { %4059 = vmatpush.msra.mxu2 %v3954_v53  ;;  %3964 = vmatpush.msrb.mxu0 %v7297_v62  ;;  %v7283_v53 = vld [vmem:[%s13921_s19 + $0x408] sm:$0xff]  ;;  %v7374_v62 = vld [vmem:[%s13921_s19 + $0x620] sm:$0xff] }
 0xcbd   :  { %7262 = vmatmul.msk.f32.gmra.mxu1 %vm95_vm0, %v7246_v13 }
 0xcbe   :  { %4060 = vmatpush.msra.mxu2 %v3951_v34  ;;  %3996 = vmatpush.msrb.mxu1 %v7323_v11  ;;  %v7400_v34 = vld [vmem:[%s13921_s19 + $0x6f0] sm:$0xff]  ;;  %v7433_v11 = vld [vmem:[%s13921_s19 + $0x7f8] sm:$0xff] }
 0xcbf   :  { %3965 = vmatpush.msrb.mxu0 %v7295_v33 }
 0xcc0   :  { %4061 = vmatpush.msra.mxu2 %v3948_v28  ;;  %3997 = vmatpush.msrb.mxu1 %v7321_v12  ;;  %v7426_v28 = vld [vmem:[%s13921_s19 + $0x7c0] sm:$0xff]  ;;  %v7372_v12 = vld [vmem:[%s13921_s19 + $0x610] sm:$0xff] }
 0xcc1   :  { %3966 = vmatpush.msrb.mxu0 %v7293_v55  ;;  %v7431_v55 = vld [vmem:[%s13921_s19 + $0x7e8] sm:$0xff] }
 0xcc2   :  { %4062 = vmatpush.msra.mxu2 %v3945_v20  ;;  %3998 = vmatpush.msrb.mxu1 %v7319_v0  ;;  %v7398_v20 = vld [vmem:[%s13921_s19 + $0x6e0] sm:$0xff] }
 0xcc3   :  { %7254 = vmatmul.msk.f32.gmra.mxu0 %vm95_vm0, %v7246_v13  ;;  %7354 = vmatmul.msk.f32.vlgmr.msra.gmra.mxu2 %vm95_vm0, %v11187_v30  ;;  %v7428_v13 = vld [vmem:[%s13921_s19 + $0x7d0] sm:$0xff] }
 0xcc4   :  { %3967 = vmatpush.msrb.mxu0 %v7291_v3  ;;  %3999 = vmatpush.msrb.mxu1 %v7317_v4  ;;  %v7429_v3 = vld [vmem:[%s13921_s19 + $0x7d8] sm:$0xff] }
 0xcc5   :  { %7263 = vmatmul.msk.f32.gmra.mxu1 %vm95_vm0, %v7247_v57  ;;  %v7401_v4 = vld [vmem:[%s13921_s19 + $0x6f8] sm:$0xff] }
 0xcc6   :  { %3968 = vmatpush.msrb.mxu0 %v7289_v36  ;;  %4000 = vmatpush.msrb.mxu1 %v7315_v5  ;;  %v7427_v36 = vld [vmem:[%s13921_s19 + $0x7c8] sm:$0xff] }
 0xcc7   :  { %v7399_v5 = vld [vmem:[%s13921_s19 + $0x6e8] sm:$0xff] }
 0xcc8   :  { %3969 = vmatpush.msrb.mxu0 %v7287_v6  ;;  %v7425_v6 = vld [vmem:[%s13921_s19 + $0x7b8] sm:$0xff] }
 0xcca   :  { %3970 = vmatpush.msrb.mxu0 %v7285_v58  ;;  %v7397_v58 = vld [vmem:[%s13921_s19 + $0x6d8] sm:$0xff] }
 0xccb   :  { %7255 = vmatmul.msk.f32.gmra.mxu0 %vm95_vm0, %v7247_v57  ;;  %7355 = vmatmul.msk.f32.gmra.mxu2 %vm95_vm0, %v11199_v19  ;;  %v7424_v57 = vld [vmem:[%s13921_s19 + $0x7b0] sm:$0xff] }
 0xccc   :  { %3971 = vmatpush.msrb.mxu0 %v7283_v53  ;;  %v7395_v53 = vld [vmem:[%s13921_s19 + $0x6c8] sm:$0xff] }
 0xccd   :  { %7264 = vmatmul.msk.f32.gmra.mxu1 %vm95_vm0, %v7248_v24 }
 0xcd3   :  { %7256 = vmatmul.msk.f32.gmra.mxu0 %vm95_vm0, %v7248_v24  ;;  %7356 = vmatmul.msk.f32.gmra.mxu2 %vm95_vm0, %v11211_v40  ;;  %v7396_v24 = vld [vmem:[%s13921_s19 + $0x6d0] sm:$0xff] }
 0xcd5   :  { %7265 = vmatmul.msk.f32.gmra.mxu1 %vm95_vm0, %v7249_v15 }
 0xcdb   :  { %7257 = vmatmul.msk.f32.gmra.mxu0 %vm95_vm0, %v7249_v15  ;;  %7357 = vmatmul.msk.f32.gmra.mxu2 %vm95_vm0, %v11223_v16  ;;  %v7422_v15 = vld [vmem:[%s13921_s19 + $0x7a0] sm:$0xff] }
 0xcdd   :  { %7274 = vmatmul.msk.f32.vlgmr.msra.gmra.mxu1 %vm95_vm0, %v3423_v18 }
 0xcde   :  { %4239 = vmatpush.msra.mxu1 %v7432_v63 }
 0xce0   :  { %4240 = vmatpush.msra.mxu1 %v7430_v9  ;;  %v7423_v9 = vld [vmem:[%s13921_s19 + $0x7a8] sm:$0xff] }
 0xce2   :  { %4241 = vmatpush.msra.mxu1 %v7428_v13  ;;  %v7421_v13 = vld [vmem:[%s13921_s19 + $0x798] sm:$0xff] }
 0xce3   :  { %7266 = vmatmul.msk.f32.vlgmr.msra.gmra.mxu0 %vm95_vm0, %v3423_v18  ;;  %7358 = vmatmul.msk.f32.gmra.mxu2 %vm95_vm0, %v11244_v43  ;;  %v3429_v18 = vld [vmem:[%s13924_s20 + $0x30] sm:$0xff] }
 0xce4   :  { %4210 = vmatpush.msra.mxu0 %v7400_v34  ;;  %4242 = vmatpush.msra.mxu1 %v7426_v28  ;;  %v7393_v34 = vld [vmem:[%s13921_s19 + $0x6b8] sm:$0xff]  ;;  %v7419_v28 = vld [vmem:[%s13921_s19 + $0x788] sm:$0xff] }
 0xce5   :  { %7275 = vmatmul.msk.f32.gmra.mxu1 %vm95_vm0, %v3424_v44 }
 0xce6   :  { %4211 = vmatpush.msra.mxu0 %v7398_v20  ;;  %4243 = vmatpush.msra.mxu1 %v7424_v57  ;;  %v7391_v20 = vld [vmem:[%s13921_s19 + $0x6a8] sm:$0xff]  ;;  %v7417_v57 = vld [vmem:[%s13921_s19 + $0x778] sm:$0xff] }
 0xce8   :  { %4212 = vmatpush.msra.mxu0 %v7396_v24  ;;  %4244 = vmatpush.msra.mxu1 %v7422_v15  ;;  %v7389_v15 = vld [vmem:[%s13921_s19 + $0x698] sm:$0xff] }
 0xcea   :  { %4213 = vmatpush.msra.mxu0 %v7394_v38  ;;  %4245 = vmatpush.msra.mxu1 %v7420_v39  ;;  %v7387_v39 = vld [vmem:[%s13921_s19 + $0x688] sm:$0xff] }
 0xceb   :  { %7267 = vmatmul.msk.f32.gmra.mxu0 %vm95_vm0, %v3424_v44  ;;  %7359 = vmatmul.msk.f32.gmra.mxu2 %vm95_vm0, %v11280_v52  ;;  %v7418_v44 = vld [vmem:[%s13921_s19 + $0x780] sm:$0xff] }
 0xcec   :  { %4214 = vmatpush.msra.mxu0 %v7392_v42  ;;  %4246 = vmatpush.msra.mxu1 %v7418_v44  ;;  %v7413_v42 = vld [vmem:[%s13921_s19 + $0x758] sm:$0xff] }
 0xced   :  { %7276 = vmatmul.msk.f32.gmra.mxu1 %vm95_vm0, %v3425_v54  ;;  %v7385_v44 = vld [vmem:[%s13921_s19 + $0x678] sm:$0xff] }
 0xcee   :  { %4215 = vmatpush.msra.mxu0 %v7390_v14  ;;  %4247 = vmatpush.msra.mxu1 %v7416_v45  ;;  %v7411_v14 = vld [vmem:[%s13921_s19 + $0x748] sm:$0xff] }
 0xcef   :  { %v7383_v45 = vld [vmem:[%s13921_s19 + $0x668] sm:$0xff] }
 0xcf0   :  { %4216 = vmatpush.msra.mxu0 %v7388_v26  ;;  %4248 = vmatpush.msra.mxu1 %v7414_v46  ;;  %v7409_v26 = vld [vmem:[%s13921_s19 + $0x738] sm:$0xff] }
 0xcf2   :  { %4217 = vmatpush.msra.mxu0 %v7386_v50  ;;  %4249 = vmatpush.msra.mxu1 %v7412_v8  ;;  %v7407_v50 = vld [vmem:[%s13921_s19 + $0x728] sm:$0xff] }
 0xcf3   :  { %7268 = vmatmul.msk.f32.gmra.mxu0 %vm95_vm0, %v3425_v54  ;;  %7360 = vmatmul.msk.f32.gmra.mxu2 %vm95_vm0, %v11316_v29  ;;  %v7410_v54 = vld [vmem:[%s13921_s19 + $0x740] sm:$0xff] }
 0xcf4   :  { %4218 = vmatpush.msra.mxu0 %v7384_v51  ;;  %4250 = vmatpush.msra.mxu1 %v7410_v54  ;;  %v7379_v51 = vld [vmem:[%s13921_s19 + $0x648] sm:$0xff]  ;;  %v7405_v54 = vld [vmem:[%s13921_s19 + $0x718] sm:$0xff] }
 0xcf5   :  { %7277 = vmatmul.msk.f32.gmra.mxu1 %vm95_vm0, %v3426_v27 }
 0xcf6   :  { %4219 = vmatpush.msra.mxu0 %v7382_v59  ;;  %4251 = vmatpush.msra.mxu1 %v7408_v25  ;;  %v7377_v59 = vld [vmem:[%s13921_s19 + $0x638] sm:$0xff]  ;;  %v7403_v25 = vld [vmem:[%s13921_s19 + $0x708] sm:$0xff] }
 0xcf8   :  { %4220 = vmatpush.msra.mxu0 %v7380_v23  ;;  %4252 = vmatpush.msra.mxu1 %v7406_v35  ;;  %v7375_v23 = vld [vmem:[%s13921_s19 + $0x628] sm:$0xff] }
 0xcfa   :  { %4221 = vmatpush.msra.mxu0 %v7378_v22  ;;  %4253 = vmatpush.msra.mxu1 %v7404_v37  ;;  %v7373_v22 = vld [vmem:[%s13921_s19 + $0x618] sm:$0xff] }
 0xcfb   :  { %7269 = vmatmul.msk.f32.gmra.mxu0 %vm95_vm0, %v3426_v27  ;;  %7361 = vmatmul.msk.f32.gmra.mxu2 %vm95_vm0, %v11346_v1  ;;  %v7402_v27 = vld [vmem:[%s13921_s19 + $0x700] sm:$0xff] }
 0xcfc   :  { %4222 = vmatpush.msra.mxu0 %v7376_v21  ;;  %4254 = vmatpush.msra.mxu1 %v7402_v27  ;;  %v7371_v21 = vld [vmem:[%s13921_s19 + $0x608] sm:$0xff] }
 0xcfd   :  { %7278 = vmatmul.msk.f32.gmra.mxu1 %vm95_vm0, %v3427_v2 }
 0xcfe   :  { %4223 = vmatpush.msra.mxu0 %v7374_v62 }
 0xd00   :  { %4224 = vmatpush.msra.mxu0 %v7372_v12 }
 0xd03   :  { %7270 = vmatmul.msk.f32.gmra.mxu0 %vm95_vm0, %v3427_v2  ;;  %v7370_v2 = vld [vmem:[%s13921_s19 + $0x600] sm:$0xff] }
 0xd04   :  { %4225 = vmatpush.msra.mxu0 %v7370_v2 }
 0xd05   :  { %7279 = vmatmul.msk.f32.gmra.mxu1 %vm95_vm0, %v3428_v60 }
 0xd0b   :  { %7271 = vmatmul.msk.f32.gmra.mxu0 %vm95_vm0, %v3428_v60 }
 0xd0d   :  { %7280 = vmatmul.msk.f32.gmra.mxu1 %vm95_vm0, %v3429_v18 }
 0xd13   :  { %7272 = vmatmul.msk.f32.gmra.mxu0 %vm95_vm0, %v3429_v18  ;;  %v7415_v18 = vld [vmem:[%s13921_s19 + $0x768] sm:$0xff] }
 0xd15   :  { %7281 = vmatmul.msk.f32.gmra.mxu1 %vm95_vm0, %v3430_v49 }
 0xd1a   :  { %v11466_v56 = vpop.f32.mrf.mxu1 }
 0xd1b   :  { %7273 = vmatmul.msk.f32.gmra.mxu0 %vm95_vm0, %v3430_v49  ;;  %v7381_v49 = vld [vmem:[%s13921_s19 + $0x658] sm:$0xff] }
 0xd1d   :  { %4001 = vmatmul.f32.vlgmr.msrb.gmra.mxu1 %v10962_v32 }
 0xd1e   :  { %4297 = vmatpush.msrb.mxu1 %v7433_v11 }
 0xd20   :  { %v11488_v33 = vpop.f32.mrf.mxu0  ;;  %4298 = vmatpush.msrb.mxu1 %v7431_v55 }
 0xd22   :  { %v11496_v0 = vpop.f32.mrf.mxu1  ;;  %4299 = vmatpush.msrb.mxu1 %v7429_v3 }
 0xd23   :  { %3972 = vmatmul.f32.vlgmr.msrb.gmra.mxu0 %v10960_v10 }
 0xd24   :  { %4268 = vmatpush.msrb.mxu0 %v7401_v4  ;;  %4300 = vmatpush.msrb.mxu1 %v7427_v36 }
 0xd25   :  { %4004 = vmatmul.f32.gmra.mxu1 %v11006_v31 }
 0xd26   :  { %4269 = vmatpush.msrb.mxu0 %v7399_v5  ;;  %4301 = vmatpush.msrb.mxu1 %v7425_v6 }
 0xd28   :  { %v11518_v63 = vpop.f32.mrf.mxu0  ;;  %4270 = vmatpush.msrb.mxu0 %v7397_v58  ;;  %4302 = vmatpush.msrb.mxu1 %v7423_v9 }
 0xd2a   :  { %v11526_v60 = vpop.f32.mrf.mxu1  ;;  %4271 = vmatpush.msrb.mxu0 %v7395_v53  ;;  %4303 = vmatpush.msrb.mxu1 %v7421_v13 }
 0xd2b   :  { %3975 = vmatmul.f32.gmra.mxu0 %v11004_v17 }
 0xd2c   :  { %4272 = vmatpush.msrb.mxu0 %v7393_v34  ;;  %4304 = vmatpush.msrb.mxu1 %v7419_v28 }
 0xd2d   :  { %4007 = vmatmul.f32.gmra.mxu1 %v11038_v48 }
 0xd2e   :  { %4273 = vmatpush.msrb.mxu0 %v7391_v20  ;;  %4305 = vmatpush.msrb.mxu1 %v7417_v57 }
 0xd30   :  { %v11548_v24 = vpop.f32.mrf.mxu0  ;;  %4274 = vmatpush.msrb.mxu0 %v7389_v15  ;;  %4306 = vmatpush.msrb.mxu1 %v7415_v18 }
 0xd32   :  { %v11556_v38 = vpop.f32.mrf.mxu1  ;;  %4275 = vmatpush.msrb.mxu0 %v7387_v39  ;;  %4307 = vmatpush.msrb.mxu1 %v7413_v42 }
 0xd33   :  { %3978 = vmatmul.f32.gmra.mxu0 %v11036_v47 }
 0xd34   :  { %4276 = vmatpush.msrb.mxu0 %v7385_v44  ;;  %4308 = vmatpush.msrb.mxu1 %v7411_v14 }
 0xd35   :  { %4010 = vmatmul.f32.gmra.mxu1 %v11070_v7 }
 0xd36   :  { %4277 = vmatpush.msrb.mxu0 %v7383_v45  ;;  %4309 = vmatpush.msrb.mxu1 %v7409_v26 }
 0xd38   :  { %v11578_v46 = vpop.f32.mrf.mxu0  ;;  %4278 = vmatpush.msrb.mxu0 %v7381_v49  ;;  %4310 = vmatpush.msrb.mxu1 %v7407_v50 }
 0xd3a   :  { %v11586_v8 = vpop.f32.mrf.mxu1  ;;  %4279 = vmatpush.msrb.mxu0 %v7379_v51  ;;  %4311 = vmatpush.msrb.mxu1 %v7405_v54 }
 0xd3b   :  { %3981 = vmatmul.f32.gmra.mxu0 %v11068_v41 }
 0xd3c   :  { %4280 = vmatpush.msrb.mxu0 %v7377_v59  ;;  %4312 = vmatpush.msrb.mxu1 %v7403_v25 }
 0xd3d   :  { %4255 = vmatmul.f32.vlgmr.msra.gmra.mxu1 %v10962_v32 }
 0xd3e   :  { %4281 = vmatpush.msrb.mxu0 %v7375_v23 }
 0xd40   :  { %v11605_v35 = vpop.f32.mrf.mxu0  ;;  %4282 = vmatpush.msrb.mxu0 %v7373_v22 }
 0xd42   :  { %v11610_v37 = vpop.f32.mrf.mxu1  ;;  %4283 = vmatpush.msrb.mxu0 %v7371_v21 }
 0xd43   :  { %4226 = vmatmul.f32.vlgmr.msra.gmra.mxu0 %v10960_v10 }
 0xd45   :  { %4258 = vmatmul.f32.gmra.mxu1 %v11006_v31 }
 0xd48   :  { %v11617_v27 = vpop.f32.mrf.mxu0 }
 0xd4a   :  { %v11619_v62 = vpop.f32.mrf.mxu1 }
 0xd4b   :  { %4229 = vmatmul.f32.gmra.mxu0 %v11004_v17 }
 0xd4d   :  { %4261 = vmatmul.f32.gmra.mxu1 %v11038_v48 }
 0xd50   :  { %v11623_v11 = vpop.f32.mrf.mxu0 }
 0xd52   :  { %v11625_v12 = vpop.f32.mrf.mxu1 }
 0xd53   :  { %4232 = vmatmul.f32.gmra.mxu0 %v11036_v47 }
 0xd55   :  { %4264 = vmatmul.f32.gmra.mxu1 %v11070_v7 }
 0xd58   :  { %v11629_v55 = vpop.f32.mrf.mxu0 }
 0xd5a   :  { %v11631_v2 = vpop.f32.mrf.mxu1 }
 0xd5b   :  { %4235 = vmatmul.f32.gmra.mxu0 %v11068_v41 }
 0xd5d   :  { %4313 = vmatmul.f32.vlgmr.msrb.gmra.mxu1 %v10962_v32 }
 0xd60   :  { %v11635_v3 = vpop.f32.mrf.mxu0 }
 0xd62   :  { %v11637_v4 = vpop.f32.mrf.mxu1 }
 0xd63   :  { %4284 = vmatmul.f32.vlgmr.msrb.gmra.mxu0 %v10960_v10 }
 0xd65   :  { %4316 = vmatmul.f32.gmra.mxu1 %v11006_v31 }
 0xd68   :  { %v11641_v36 = vpop.f32.mrf.mxu0 }
 0xd6a   :  { %v11643_v5 = vpop.f32.mrf.mxu1 }
 0xd6b   :  { %4287 = vmatmul.f32.gmra.mxu0 %v11004_v17 }
 0xd6d   :  { %4319 = vmatmul.f32.gmra.mxu1 %v11038_v48 }
 0xd70   :  { %v11647_v6 = vpop.f32.mrf.mxu0 }
 0xd72   :  { %v11649_v58 = vpop.f32.mrf.mxu1 }
 0xd73   :  { %4290 = vmatmul.f32.gmra.mxu0 %v11036_v47 }
 0xd75   :  { %4322 = vmatmul.f32.gmra.mxu1 %v11070_v7 }
 0xd78   :  { %v11653_v32 = vpop.f32.mrf.mxu0 }
 0xd7a   :  { %v11655_v10 = vpop.f32.mrf.mxu1 }
 0xd7b   :  { %4293 = vmatmul.f32.gmra.mxu0 %v11068_v41 }
 0xd80   :  { %v11658_v31 = vpop.f32.mrf.mxu0 }
 0xd82   :  { %v11660_v9 = vpop.f32.mrf.mxu1 }
 0xd88   :  { %v11662_v17 = vpop.f32.mrf.mxu0 }
 0xd8a   :  { %v11664_v48 = vpop.f32.mrf.mxu1 }
 0xd90   :  { %v11666_v53 = vpop.f32.mrf.mxu0 }
 0xd92   :  { %v11668_v13 = vpop.f32.mrf.mxu1 }
 0xd98   :  { %v11670_v47 = vpop.f32.mrf.mxu0 }
 0xd9a   :  { %v4002_v7 = vpop.f32.mrf.mxu1 }
 0xda0   :  { %v3973_v34 = vpop.f32.mrf.mxu0 }
 0xda1   :  { %v4003_v45 = vadd.f32 %v4002_v7, %v3973_v34 }
 0xda2   :  { %v4005_v28 = vpop.f32.mrf.mxu1 }
 0xda8   :  { %v3976_v20 = vpop.f32.mrf.mxu0 }
 0xda9   :  { %v4006_v14 = vadd.f32 %v4005_v28, %v3976_v20 }
 0xdaa   :  { %v4008_v57 = vpop.f32.mrf.mxu1 }
 0xdb0   :  { %v3979_v41 = vpop.f32.mrf.mxu0 }
 0xdb1   :  { %v4009_v44 = vadd.f32 %v4008_v57, %v3979_v41  ;;  %v7436_v57 = vld [vmem:[%s13924_s20 + $0xd0] sm:$0xff] }
 0xdb2   :  { %v4011_v15 = vpop.f32.mrf.mxu1 }
 0xdb8   :  { %v3982_v18 = vpop.f32.mrf.mxu0 }
 0xdb9   :  { %v4012_v39 = vadd.f32 %v4011_v15, %v3982_v18 }
 0xdba   :  { %v4256_v42 = vpop.f32.mrf.mxu1 }
 0xdbb   :  { %4100 = vmatpush.msra.mxu3 %v4012_v39 }
 0xdbd   :  { %4101 = vmatpush.msra.mxu3 %v4009_v44 }
 0xdbf   :  { %4102 = vmatpush.msra.mxu3 %v4006_v14  ;;  %v7440_v14 = vld [vmem:[%s13924_s20 + $0xf0] sm:$0xff] }
 0xdc0   :  { %v4227_v26 = vpop.f32.mrf.mxu0 }
 0xdc1   :  { %4103 = vmatpush.msra.mxu3 %v4003_v45  ;;  %v4257_v7 = vadd.f32 %v4256_v42, %v4227_v26  ;;  %v4064_v45 = vpop.f32.mrf.mxu2  ;;  %v7441_v26 = vld [vmem:[%s13924_s20 + $0xf8] sm:$0xff] }
 0xdc2   :  { %7362 = vmatmul.msk.f32.vlgmr.msra.gmra.mxu3 %vm95_vm0, %v11187_v30  ;;  %v4259_v49 = vpop.f32.mrf.mxu1 }
 0xdc8   :  { %v4230_v50 = vpop.f32.mrf.mxu0 }
 0xdc9   :  { %v4260_v30 = vadd.f32 %v4259_v49, %v4230_v50  ;;  %v4067_v49 = vpop.f32.mrf.mxu2 }
 0xdca   :  { %7363 = vmatmul.msk.f32.gmra.mxu3 %vm95_vm0, %v11199_v19  ;;  %v4262_v51 = vpop.f32.mrf.mxu1  ;;  %v7434_v19 = vld [vmem:[%s13924_s20 + $0xc0] sm:$0xff] }
 0xdd0   :  { %v4233_v54 = vpop.f32.mrf.mxu0 }
 0xdd1   :  { %v4263_v21 = vadd.f32 %v4262_v51, %v4233_v54  ;;  %v4070_v50 = vpop.f32.mrf.mxu2 }
 0xdd2   :  { %7364 = vmatmul.msk.f32.gmra.mxu3 %vm95_vm0, %v11211_v40  ;;  %v4265_v59 = vpop.f32.mrf.mxu1 }
 0xdd8   :  { %v4236_v25 = vpop.f32.mrf.mxu0 }
 0xdd9   :  { %v4266_v23 = vadd.f32 %v4265_v59, %v4236_v25  ;;  %v4073_v51 = vpop.f32.mrf.mxu2 }
 0xdda   :  { %7365 = vmatmul.msk.f32.gmra.mxu3 %vm95_vm0, %v11223_v16  ;;  %v4314_v22 = vpop.f32.mrf.mxu1  ;;  %v7435_v16 = vld [vmem:[%s13924_s20 + $0xc8] sm:$0xff] }
 0xddb   :  { %4371 = vmatpush.msrb.mxu2 %v4266_v23 }
 0xddd   :  { %4372 = vmatpush.msrb.mxu2 %v4263_v21 }
 0xddf   :  { %4373 = vmatpush.msrb.mxu2 %v4260_v30 }
 0xde0   :  { %v4285_v34 = vpop.f32.mrf.mxu0 }
 0xde1   :  { %4374 = vmatpush.msrb.mxu2 %v4257_v7  ;;  %v4315_v44 = vadd.f32 %v4314_v22, %v4285_v34  ;;  %v4076_v54 = vpop.f32.mrf.mxu2 }
 0xde2   :  { %7366 = vmatmul.msk.f32.gmra.mxu3 %vm95_vm0, %v11244_v43  ;;  %7442 = vmatmul.msk.f32.vlgmr.msrb.gmra.mxu2 %vm95_vm0, %v7434_v19  ;;  %v4317_v40 = vpop.f32.mrf.mxu1  ;;  %v7437_v43 = vld [vmem:[%s13924_s20 + $0xd8] sm:$0xff] }
 0xde8   :  { %v4288_v28 = vpop.f32.mrf.mxu0 }
 0xde9   :  { %v4318_v42 = vadd.f32 %v4317_v40, %v4288_v28  ;;  %v4079_v25 = vpop.f32.mrf.mxu2 }
 0xdea   :  { %7367 = vmatmul.msk.f32.gmra.mxu3 %vm95_vm0, %v11280_v52  ;;  %7443 = vmatmul.msk.f32.gmra.mxu2 %vm95_vm0, %v7435_v16  ;;  %v4320_v20 = vpop.f32.mrf.mxu1 }
 0xdf0   :  { %v4291_v41 = vpop.f32.mrf.mxu0 }
 0xdf1   :  { %v4321_v39 = vadd.f32 %v4320_v20, %v4291_v41  ;;  %v4082_v22 = vpop.f32.mrf.mxu2 }
 0xdf2   :  { %7368 = vmatmul.msk.f32.gmra.mxu3 %vm95_vm0, %v11316_v29  ;;  %7444 = vmatmul.msk.f32.gmra.mxu2 %vm95_vm0, %v7436_v57  ;;  %v4323_v15 = vpop.f32.mrf.mxu1  ;;  %v7438_v29 = vld [vmem:[%s13924_s20 + $0xe0] sm:$0xff] }
 0xdf8   :  { %v4294_v18 = vpop.f32.mrf.mxu0 }
 0xdf9   :  { %v4324_v52 = vadd.f32 %v4323_v15, %v4294_v18  ;;  %v4085_v30 = vpop.f32.mrf.mxu2 }
 0xdfa   :  { %7369 = vmatmul.msk.f32.gmra.mxu3 %vm95_vm0, %v11346_v1  ;;  %7445 = vmatmul.msk.f32.gmra.mxu2 %vm95_vm0, %v7437_v43  ;;  %v7439_v1 = vld [vmem:[%s13924_s20 + $0xe8] sm:$0xff] }
 0xdfb   :  { %4412 = vmatpush.msrb.mxu3 %v4324_v52 }
 0xdfd   :  { %4413 = vmatpush.msrb.mxu3 %v4321_v39 }
 0xdff   :  { %4414 = vmatpush.msrb.mxu3 %v4318_v42 }
 0xe01   :  { %4415 = vmatpush.msrb.mxu3 %v4315_v44  ;;  %v3790_v44 = vadd.f32 %v11670_v47, %v11629_v55 }
 0xe02   :  { %7446 = vmatmul.msk.f32.gmra.mxu2 %vm95_vm0, %v7438_v29  ;;  %7450 = vmatmul.msk.f32.vlgmr.msrb.gmra.mxu3 %vm95_vm0, %v7434_v19 }
 0xe0a   :  { %7447 = vmatmul.msk.f32.gmra.mxu2 %vm95_vm0, %v7439_v1  ;;  %7451 = vmatmul.msk.f32.gmra.mxu3 %vm95_vm0, %v7435_v16 }
 0xe12   :  { %7448 = vmatmul.msk.f32.gmra.mxu2 %vm95_vm0, %v7440_v14  ;;  %7452 = vmatmul.msk.f32.gmra.mxu3 %vm95_vm0, %v7436_v57 }
 0xe1a   :  { %7449 = vmatmul.msk.f32.gmra.mxu2 %vm95_vm0, %v7441_v26  ;;  %7453 = vmatmul.msk.f32.gmra.mxu3 %vm95_vm0, %v7437_v43 }
 0xe22   :  { %7454 = vmatmul.msk.f32.gmra.mxu3 %vm95_vm0, %v7438_v29  ;;  %v3787_v29 = vadd.f32 %v11666_v53, %v11623_v11 }
 0xe2a   :  { %7455 = vmatmul.msk.f32.gmra.mxu3 %vm95_vm0, %v7439_v1  ;;  %v3784_v1 = vadd.f32 %v11662_v17, %v11617_v27  ;;  %v3775_v27 = vadd.f32 %v11647_v6, %v11548_v24 }
 0xe2c   :  { %v4139_v55 = vadd.f32 %v4079_v25, %v3784_v1  ;;  %v4133_v25 = vadd.f32 %v4070_v50, %v3775_v27  ;;  %v13971_v50 = vmov 1.0   ;;  %v4567_v1 = vld [vmem:[%s13925_s21 + $0x60] sm:$0xff]  ;;  %v4565_v27 = vld [vmem:[%s13925_s21 + $0x50] sm:$0xff] }
 0xe32   :  { %7456 = vmatmul.msk.f32.gmra.mxu3 %vm95_vm0, %v7440_v14  ;;  %v4143_v14 = vadd.f32 %v4085_v30, %v3790_v44 }
 0xe3a   :  { %7457 = vmatmul.msk.f32.gmra.mxu3 %vm95_vm0, %v7441_v26 }
 0xe45   :  { %v11728_v59 = vpop.f32.mrf.mxu3 }
 0xe46   :  { %13967 = vst [vmem:[#allocation2_spill] sm:$0xff] %v11728_v59 }
 0xe4d   :  { %v11730_v23 = vpop.f32.mrf.mxu3 }
 0xe55   :  { %v11732_v21 = vpop.f32.mrf.mxu3 }
 0xe5d   :  { %v11734_v7 = vpop.f32.mrf.mxu3 }
 0xe65   :  { %v11736_v19 = vpop.f32.mrf.mxu3  ;;  %v4376_v34 = vpop.f32.mrf.mxu2 }
 0xe6d   :  { %v11738_v40 = vpop.f32.mrf.mxu3  ;;  %v4379_v16 = vpop.f32.mrf.mxu2 }
 0xe75   :  { %v11740_v28 = vpop.f32.mrf.mxu3  ;;  %v4382_v20 = vpop.f32.mrf.mxu2 }
 0xe7d   :  { %v11742_v57 = vpop.f32.mrf.mxu3  ;;  %v4385_v41 = vpop.f32.mrf.mxu2 }
 0xe85   :  { %v4388_v43 = vpop.f32.mrf.mxu2  ;;  %v11744_v15 = vpop.f32.mrf.mxu3 }
 0xe86   :  { %13968 = vst [vmem:[#allocation3_spill] sm:$0xff] %v11744_v15  ;;  %v3781_v15 = vadd.f32 %v11658_v31, %v11605_v35  ;;  %v3772_v35 = vadd.f32 %v11641_v36, %v11518_v63 }
 0xe88   :  { %v4137_v11 = vadd.f32 %v4076_v54, %v3781_v15  ;;  %v4131_v6 = vadd.f32 %v4067_v49, %v3772_v35  ;;  %v11784_v54 = vadd.f32 %v4382_v20, %v4133_v25  ;;  %v3828_v15 = vadd.f32 %v11664_v48, %v11619_v62  ;;  %v11830_v62 = vld [vmem:[%s13925_s21 + $0xf8] sm:$0xff]  ;;  %v4564_v35 = vld [vmem:[%s13925_s21 + $0x48] sm:$0xff] }
 0xe89   :  { %4648 = vmatpush.msra.mxu3 %v11830_v62 }
 0xe8a   :  { %v11774_v53 = vadd.f32 %v4388_v43, %v4137_v11  ;;  %v11787_v36 = vadd.f32 %v4379_v16, %v4131_v6  ;;  %v4503_v16 = vmul.f32 %v11784_v54, %v11784_v54  ;;  %v11908_v11 = vld [vmem:[%s13925_s21 + $0xd0] sm:$0xff] }
 0xe8c   :  { %v4501_v20 = vmul.f32 %v11787_v36, %v11787_v36 }
 0xe8d   :  { %v4391_v18 = vpop.f32.mrf.mxu2  ;;  %v11746_v52 = vpop.f32.mrf.mxu3  ;;  %v13975_v25 = vld [vmem:[#allocation3_spill] sm:$0xff] }
 0xe8e   :  { %13969 = vst [vmem:[#allocation4_spill] sm:$0xff] %v11746_v52  ;;  %v4141_v52 = vadd.f32 %v4082_v22, %v3787_v29  ;;  %v11769_v17 = vadd.f32 %v4391_v18, %v4139_v55  ;;  %v4507_v22 = vmul.f32 %v11774_v53, %v11774_v53  ;;  %v11860_v29 = vld [vmem:[%s13925_s21 + $0xe8] sm:$0xff]  ;;  %v11892_v55 = vld [vmem:[%s13925_s21 + $0xd8] sm:$0xff] }
 0xe95   :  { %v4394_v39 = vpop.f32.mrf.mxu2  ;;  %v11748_v42 = vpop.f32.mrf.mxu3 }
 0xe96   :  { %13970 = vst [vmem:[#allocation5_spill] sm:$0xff] %v11748_v42  ;;  %v3778_v42 = vadd.f32 %v11653_v32, %v11578_v46  ;;  %v11764_v47 = vadd.f32 %v4394_v39, %v4141_v52  ;;  %v3769_v32 = vadd.f32 %v11635_v3, %v11488_v33  ;;  %v3825_v39 = vadd.f32 %v11660_v9, %v11610_v37  ;;  %v4569_v37 = vld [vmem:[%s13925_s21 + $0x70] sm:$0xff] }
 0xe97   :  { %v3822_v9 = vadd.f32 %v11655_v10, %v11586_v8  ;;  %v3819_v8 = vadd.f32 %v11649_v58, %v11556_v38  ;;  %v3816_v38 = vadd.f32 %v11643_v5, %v11526_v60  ;;  %v3813_v60 = vadd.f32 %v11637_v4, %v11496_v0 }
 0xe98   :  { %v4135_v31 = vadd.f32 %v4073_v51, %v3778_v42  ;;  %v4129_v63 = vadd.f32 %v4064_v45, %v3769_v32  ;;  %v4511_v49 = vmul.f32 %v11764_v47, %v11764_v47  ;;  %v4509_v45 = vmul.f32 %v11769_v17, %v11769_v17  ;;  %v4563_v32 = vld [vmem:[%s13925_s21 + $0x40] sm:$0xff] }
 0xe99   :  { %v4142_v42 = vadd.f32 %v11740_v28, %v3828_v15  ;;  %v4140_v48 = vadd.f32 %v11738_v40, %v3825_v39  ;;  %v11845_v28 = vld [vmem:[%s13925_s21 + $0xf0] sm:$0xff]  ;;  %v4138_v10 = vadd.f32 %v11736_v19, %v3822_v9  ;;  %v4136_v58 = vadd.f32 %v11734_v7, %v3819_v8  ;;  %v4576_v15 = vld [vmem:[%s13925_s21 + $0xa8] sm:$0xff]  ;;  %v4575_v39 = vld [vmem:[%s13925_s21 + $0xa0] sm:$0xff] }
 0xe9a   :  { %v11781_v24 = vadd.f32 %v4385_v41, %v4135_v31  ;;  %v11790_v51 = vadd.f32 %v4376_v34, %v4129_v63  ;;  %v3831_v41 = vadd.f32 %v11668_v13, %v11625_v12  ;;  %v4570_v12 = vld [vmem:[%s13925_s21 + $0x78] sm:$0xff]  ;;  %4649 = vmatpush.msra.mxu3 %v11845_v28  ;;  %v4134_v5 = vadd.f32 %v11732_v21, %v3816_v38  ;;  %v4556_v9 = vld [vmem:[%s13925_s21 + $0x8] sm:$0xff] }
 0xe9b   :  { %4628 = vmatpush.msra.mxu2 %v4570_v12  ;;  %v3810_v0 = vadd.f32 %v11631_v2, %v11466_v56  ;;  %v13973_v56 = vld [vmem:[#allocation2_spill] sm:$0xff]  ;;  %v4572_v8 = vld [vmem:[%s13925_s21 + $0x88] sm:$0xff] }
 0xe9c   :  { %v4505_v34 = vmul.f32 %v11781_v24, %v11781_v24  ;;  %v4499_v43 = vmul.f32 %v11790_v51, %v11790_v51  ;;  %v4144_v18 = vadd.f32 %v11742_v57, %v3831_v41  ;;  %v4568_v57 = vld [vmem:[%s13925_s21 + $0x68] sm:$0xff]  ;;  %4650 = vmatpush.msra.mxu3 %v11860_v29  ;;  %v4559_v41 = vld [vmem:[%s13925_s21 + $0x20] sm:$0xff] }
 0xe9d   :  { %v4397_v26 = vpop.f32.mrf.mxu2  ;;  %v11756_v61 = vpop.f32.mrf.mxu3  ;;  %4629 = vmatpush.msra.mxu2 %v4569_v37  ;;  %v13972_v4 = vld [vmem:[#allocation5_spill] sm:$0xff]  ;;  %v4130_v2 = vadd.f32 %v13973_v56, %v3810_v0  ;;  %v4889_v56 = vld [vmem:[%s13927_s25 + $0x1f0] sm:$0xff] }
 0xe9e   :  { %v11760_v59 = vadd.f32 %v4397_v26, %v4143_v14  ;;  %v11876_v14 = vld [vmem:[%s13925_s21 + $0xe0] sm:$0xff]  ;;  %v4566_v26 = vld [vmem:[%s13925_s21 + $0x58] sm:$0xff]  ;;  %v11885_v7 = vadd.f32 %v11756_v61, %v4136_v58  ;;  %v4132_v61 = vadd.f32 %v11730_v23, %v3813_v60  ;;  %v11901_v21 = vadd.f32 %v13972_v4, %v4134_v5  ;;  %v13974_v23 = vld [vmem:[#allocation4_spill] sm:$0xff] }
 0xe9f   :  { %4630 = vmatpush.msra.mxu2 %v4568_v57  ;;  %4651 = vmatpush.msra.mxu3 %v11876_v14  ;;  %v11928_v6 = vadd.f32 %v13975_v25, %v4130_v2  ;;  %v4688_v60 = vld [vmem:[%s13926_s22 + $0x8] sm:$0xff]  ;;  %v4855_v2 = vld [vmem:[%s13927_s25 + $0xe0] sm:$0xff]  ;;  %v4885_v25 = vld [vmem:[%s13927_s25 + $0x1d0] sm:$0xff] }
 0xea0   :  { %4467 = vmatpush.msra.mxu0 %v11760_v59  ;;  %v4513_v33 = vmul.f32 %v11760_v59, %v11760_v59  ;;  %v11915_v31 = vadd.f32 %v13974_v23, %v4132_v61  ;;  %v4887_v23 = vld [vmem:[%s13927_s25 + $0x1e0] sm:$0xff] }
 0xea1   :  { %4631 = vmatpush.msra.mxu2 %v4567_v1  ;;  %4652 = vmatpush.msra.mxu3 %v11892_v55 }
 0xea2   :  { %4468 = vmatpush.msra.mxu0 %v11764_v47 }
 0xea3   :  { %4632 = vmatpush.msra.mxu2 %v4566_v26  ;;  %4653 = vmatpush.msra.mxu3 %v11908_v11 }
 0xea4   :  { %4469 = vmatpush.msra.mxu0 %v11769_v17 }
 0xea5   :  { %v11777_v46 = vpop.f32.mrf.mxu3  ;;  %4633 = vmatpush.msra.mxu2 %v4565_v27 }
 0xea6   :  { %4470 = vmatpush.msra.mxu0 %v11774_v53  ;;  %v11869_v19 = vadd.f32 %v11777_v46, %v4138_v10  ;;  %v11922_v46 = vld [vmem:[%s13925_s21 + $0xc8] sm:$0xff] }
 0xea7   :  { %4634 = vmatpush.msra.mxu2 %v4564_v35  ;;  %4654 = vmatpush.msra.mxu3 %v11922_v46 }
 0xea8   :  { %4471 = vmatpush.msra.mxu0 %v11781_v24 }
 0xea9   :  { %4635 = vmatpush.msra.mxu2 %v4563_v32 }
 0xeaa   :  { %4472 = vmatpush.msra.mxu0 %v11784_v54 }
 0xeac   :  { %4473 = vmatpush.msra.mxu0 %v11787_v36 }
 0xead   :  { %v4432_v3 = vpop.f32.mrf.mxu3 }
 0xeae   :  { %4474 = vmatpush.msra.mxu0 %v11790_v51  ;;  %v11853_v40 = vadd.f32 %v4432_v3, %v4140_v48  ;;  %v4562_v3 = vld [vmem:[%s13925_s21 + $0x38] sm:$0xff]  ;;  %v4500_v48 = vmul.f32 %v11928_v6, %v11928_v6 }
 0xeaf   :  { %7458 = vmatmul.msk.f32.vlgmr.msra.gmra.mxu0 %vm729_vm7, %v13971_v50  ;;  %4636 = vmatpush.msra.mxu2 %v4562_v3 }
 0xeb0   :  { %4523 = vmatpush.msrb.mxu0 %v4513_v33  ;;  %v4579_v33 = vld [vmem:[%s13925_s21 + $0xc0] sm:$0xff] }
 0xeb1   :  { %4655 = vmatpush.msra.mxu3 %v4579_v33 }
 0xeb2   :  { %4524 = vmatpush.msrb.mxu0 %v4511_v49 }
 0xeb4   :  { %4525 = vmatpush.msrb.mxu0 %v4509_v45  ;;  %v4561_v45 = vld [vmem:[%s13925_s21 + $0x30] sm:$0xff] }
 0xeb5   :  { %v4435_v30 = vpop.f32.mrf.mxu3  ;;  %4637 = vmatpush.msra.mxu2 %v4561_v45 }
 0xeb6   :  { %4526 = vmatpush.msrb.mxu0 %v4507_v22  ;;  %v11838_v13 = vadd.f32 %v4435_v30, %v4142_v42  ;;  %v4510_v22 = vmul.f32 %v11853_v40, %v11853_v40  ;;  %v4578_v30 = vld [vmem:[%s13925_s21 + $0xb8] sm:$0xff]  ;;  %v4557_v42 = vld [vmem:[%s13925_s21 + $0x10] sm:$0xff] }
 0xeb7   :  { %4656 = vmatpush.msra.mxu3 %v4578_v30 }
 0xeb8   :  { %4527 = vmatpush.msrb.mxu0 %v4505_v34  ;;  %v4512_v49 = vmul.f32 %v11838_v13, %v11838_v13  ;;  %v4560_v34 = vld [vmem:[%s13925_s21 + $0x28] sm:$0xff] }
 0xeb9   :  { %4638 = vmatpush.msra.mxu2 %v4560_v34 }
 0xeba   :  { %4528 = vmatpush.msrb.mxu0 %v4503_v16  ;;  %v4508_v16 = vmul.f32 %v11869_v19, %v11869_v19 }
 0xebb   :  { %4639 = vmatpush.msra.mxu2 %v4559_v41 }
 0xebc   :  { %4529 = vmatpush.msrb.mxu0 %v4501_v20  ;;  %v4577_v20 = vld [vmem:[%s13925_s21 + $0xb0] sm:$0xff] }
 0xebd   :  { %v4438_v52 = vpop.f32.mrf.mxu3  ;;  %4657 = vmatpush.msra.mxu3 %v4577_v20 }
 0xebe   :  { %4530 = vmatpush.msrb.mxu0 %v4499_v43  ;;  %v11820_v44 = vadd.f32 %v4438_v52, %v4144_v18  ;;  %v4506_v43 = vmul.f32 %v11885_v7, %v11885_v7  ;;  %v4558_v18 = vld [vmem:[%s13925_s21 + $0x18] sm:$0xff]  ;;  %v4504_v52 = vmul.f32 %v11901_v21, %v11901_v21 }
 0xebf   :  { %7460 = vmatmul.msk.f32.vlgmr.msrb.gmra.mxu0 %vm729_vm7, %v13971_v50  ;;  %4658 = vmatpush.msra.mxu3 %v4576_v15 }
 0xec0   :  { %4587 = vmatpush.msra.mxu0 %v4570_v12  ;;  %4487 = vmatpush.msra.mxu1 %v11820_v44  ;;  %v4514_v63 = vmul.f32 %v11820_v44, %v11820_v44  ;;  %v4502_v12 = vmul.f32 %v11915_v31, %v11915_v31 }
 0xec1   :  { %4659 = vmatpush.msra.mxu3 %v4575_v39  ;;  %4640 = vmatpush.msra.mxu2 %v4558_v18 }
 0xec2   :  { %4588 = vmatpush.msra.mxu0 %v4569_v37  ;;  %4488 = vmatpush.msra.mxu1 %v11838_v13  ;;  %v4574_v37 = vld [vmem:[%s13925_s21 + $0x98] sm:$0xff] }
 0xec3   :  { %4660 = vmatpush.msra.mxu3 %v4574_v37  ;;  %4641 = vmatpush.msra.mxu2 %v4557_v42 }
 0xec4   :  { %4589 = vmatpush.msra.mxu0 %v4568_v57  ;;  %4489 = vmatpush.msra.mxu1 %v11853_v40  ;;  %v4573_v57 = vld [vmem:[%s13925_s21 + $0x90] sm:$0xff] }
 0xec5   :  { %4661 = vmatpush.msra.mxu3 %v4573_v57  ;;  %4642 = vmatpush.msra.mxu2 %v4556_v9 }
 0xec6   :  { %4590 = vmatpush.msra.mxu0 %v4567_v1  ;;  %4490 = vmatpush.msra.mxu1 %v11869_v19 }
 0xec7   :  { %4662 = vmatpush.msra.mxu3 %v4572_v8 }
 0xec8   :  { %4591 = vmatpush.msra.mxu0 %v4566_v26  ;;  %4491 = vmatpush.msra.mxu1 %v11885_v7  ;;  %v4687_v26 = vld [vmem:[%s13926_s22] sm:$0xff] }
 0xeca   :  { %4592 = vmatpush.msra.mxu0 %v4565_v27  ;;  %4492 = vmatpush.msra.mxu1 %v11901_v21 }
 0xecc   :  { %4593 = vmatpush.msra.mxu0 %v4564_v35  ;;  %4493 = vmatpush.msra.mxu1 %v11915_v31  ;;  %v4857_v35 = vld [vmem:[%s13927_s25 + $0xf0] sm:$0xff] }
 0xece   :  { %4594 = vmatpush.msra.mxu0 %v4563_v32  ;;  %4494 = vmatpush.msra.mxu1 %v11928_v6  ;;  %v4853_v32 = vld [vmem:[%s13927_s25 + $0xd0] sm:$0xff] }
 0xecf   :  { %7459 = vmatmul.msk.f32.vlgmr.msra.gmra.mxu1 %vm729_vm7, %v13971_v50 }
 0xed0   :  { %4543 = vmatpush.msrb.mxu1 %v4514_v63  ;;  %4595 = vmatpush.msra.mxu0 %v4562_v3  ;;  %v4851_v63 = vld [vmem:[%s13927_s25 + $0xc0] sm:$0xff]  ;;  %v4849_v3 = vld [vmem:[%s13927_s25 + $0xb0] sm:$0xff] }
 0xed2   :  { %4544 = vmatpush.msrb.mxu1 %v4512_v49  ;;  %4596 = vmatpush.msra.mxu0 %v4561_v45  ;;  %v4881_v49 = vld [vmem:[%s13927_s25 + $0x1b0] sm:$0xff]  ;;  %v4847_v45 = vld [vmem:[%s13927_s25 + $0xa0] sm:$0xff] }
 0xed4   :  { %4545 = vmatpush.msrb.mxu1 %v4510_v22  ;;  %4597 = vmatpush.msra.mxu0 %v4560_v34  ;;  %v4879_v22 = vld [vmem:[%s13927_s25 + $0x1a0] sm:$0xff]  ;;  %v4845_v34 = vld [vmem:[%s13927_s25 + $0x90] sm:$0xff] }
 0xed6   :  { %4546 = vmatpush.msrb.mxu1 %v4508_v16  ;;  %4598 = vmatpush.msra.mxu0 %v4559_v41  ;;  %v4877_v16 = vld [vmem:[%s13927_s25 + $0x190] sm:$0xff]  ;;  %v4843_v41 = vld [vmem:[%s13927_s25 + $0x80] sm:$0xff] }
 0xed8   :  { %4547 = vmatpush.msrb.mxu1 %v4506_v43  ;;  %4599 = vmatpush.msra.mxu0 %v4558_v18  ;;  %v4875_v43 = vld [vmem:[%s13927_s25 + $0x180] sm:$0xff] }
 0xeda   :  { %4548 = vmatpush.msrb.mxu1 %v4504_v52  ;;  %4600 = vmatpush.msra.mxu0 %v4557_v42 }
 0xedc   :  { %4549 = vmatpush.msrb.mxu1 %v4502_v12  ;;  %4601 = vmatpush.msra.mxu0 %v4556_v9  ;;  %v4858_v9 = vld [vmem:[%s13927_s25 + $0xf8] sm:$0xff] }
 0xede   :  { %4550 = vmatpush.msrb.mxu1 %v4500_v48  ;;  %v4890_v48 = vld [vmem:[%s13927_s25 + $0x1f8] sm:$0xff] }
 0xedf   :  { %7461 = vmatmul.msk.f32.vlgmr.msrb.gmra.mxu1 %vm729_vm7, %v13971_v50 }
 0xee0   :  { %4607 = vmatpush.msra.mxu1 %v11830_v62  ;;  %v4555_v62 = vld [vmem:[%s13925_s21] sm:$0xff] }
 0xee1   :  { %4602 = vmatpush.msra.mxu0 %v4555_v62  ;;  %4643 = vmatpush.msra.mxu2 %v4555_v62  ;;  %v4854_v62 = vld [vmem:[%s13927_s25 + $0xd8] sm:$0xff] }
 0xee2   :  { %4608 = vmatpush.msra.mxu1 %v11845_v28  ;;  %v4571_v28 = vld [vmem:[%s13925_s21 + $0x80] sm:$0xff] }
 0xee3   :  { %4663 = vmatpush.msra.mxu3 %v4571_v28  ;;  %4707 = vmatpush.msrb.mxu0 %v4687_v26 }
 0xee4   :  { %4609 = vmatpush.msra.mxu1 %v11860_v29  ;;  %4891 = vmatpush.msrb.mxu2 %v4857_v35  ;;  %v4874_v35 = vld [vmem:[%s13927_s25 + $0x178] sm:$0xff] }
 0xee5   :  { %4932 = vmatpush.msrb.mxu3 %v4889_v56  ;;  %v4839_v56 = vld [vmem:[%s13927_s25 + $0x60] sm:$0xff] }
 0xee6   :  { %4610 = vmatpush.msra.mxu1 %v11876_v14  ;;  %4892 = vmatpush.msrb.mxu2 %v4855_v2  ;;  %v4871_v2 = vld [vmem:[%s13927_s25 + $0x160] sm:$0xff] }
 0xee7   :  { %4933 = vmatpush.msrb.mxu3 %v4887_v23  ;;  %v4840_v23 = vld [vmem:[%s13927_s25 + $0x68] sm:$0xff] }
 0xee8   :  { %4611 = vmatpush.msra.mxu1 %v11892_v55  ;;  %4893 = vmatpush.msrb.mxu2 %v4853_v32  ;;  %v4837_v32 = vld [vmem:[%s13927_s25 + $0x50] sm:$0xff] }
 0xee9   :  { %4934 = vmatpush.msrb.mxu3 %v4885_v25  ;;  %v4869_v25 = vld [vmem:[%s13927_s25 + $0x150] sm:$0xff] }
 0xeea   :  { %4612 = vmatpush.msra.mxu1 %v11908_v11  ;;  %4894 = vmatpush.msrb.mxu2 %v4851_v63  ;;  %v4838_v63 = vld [vmem:[%s13927_s25 + $0x58] sm:$0xff] }
 0xeec   :  { %4613 = vmatpush.msra.mxu1 %v11922_v46  ;;  %4895 = vmatpush.msrb.mxu2 %v4849_v3  ;;  %v4835_v3 = vld [vmem:[%s13927_s25 + $0x40] sm:$0xff] }
 0xeee   :  { %4614 = vmatpush.msra.mxu1 %v4579_v33  ;;  %v4883_v33 = vld [vmem:[%s13927_s25 + $0x1c0] sm:$0xff]  ;;  %4896 = vmatpush.msrb.mxu2 %v4847_v45  ;;  %v4836_v45 = vld [vmem:[%s13927_s25 + $0x48] sm:$0xff] }
 0xeef   :  { %4935 = vmatpush.msrb.mxu3 %v4883_v33  ;;  %v4870_v33 = vld [vmem:[%s13927_s25 + $0x158] sm:$0xff] }
 0xef0   :  { %4615 = vmatpush.msra.mxu1 %v4578_v30  ;;  %4897 = vmatpush.msrb.mxu2 %v4845_v34  ;;  %v4865_v34 = vld [vmem:[%s13927_s25 + $0x130] sm:$0xff] }
 0xef1   :  { %4936 = vmatpush.msrb.mxu3 %v4881_v49  ;;  %v4867_v49 = vld [vmem:[%s13927_s25 + $0x140] sm:$0xff] }
 0xef2   :  { %4616 = vmatpush.msra.mxu1 %v4577_v20  ;;  %4898 = vmatpush.msrb.mxu2 %v4843_v41  ;;  %v4831_v41 = vld [vmem:[%s13927_s25 + $0x20] sm:$0xff] }
 0xef3   :  { %4937 = vmatpush.msrb.mxu3 %v4879_v22  ;;  %v4868_v22 = vld [vmem:[%s13927_s25 + $0x148] sm:$0xff] }
 0xef4   :  { %4617 = vmatpush.msra.mxu1 %v4576_v15 }
 0xef5   :  { %4938 = vmatpush.msrb.mxu3 %v4877_v16  ;;  %v4834_v16 = vld [vmem:[%s13927_s25 + $0x38] sm:$0xff] }
 0xef6   :  { %4618 = vmatpush.msra.mxu1 %v4575_v39  ;;  %v4671_v39 = vld [vmem:[%s13928_s23] sm:$0x1] }
 0xef7   :  { %4939 = vmatpush.msrb.mxu3 %v4875_v43  ;;  %v4863_v43 = vld [vmem:[%s13927_s25 + $0x120] sm:$0xff] }
 0xef8   :  { %4619 = vmatpush.msra.mxu1 %v4574_v37 }
 0xefa   :  { %4620 = vmatpush.msra.mxu1 %v4573_v57  ;;  %v4856_v57 = vld [vmem:[%s13927_s25 + $0xe8] sm:$0xff] }
 0xefc   :  { %4621 = vmatpush.msra.mxu1 %v4572_v8  ;;  %v4888_v8 = vld [vmem:[%s13927_s25 + $0x1e8] sm:$0xff] }
 0xefe   :  { %4622 = vmatpush.msra.mxu1 %v4571_v28  ;;  %v4886_v28 = vld [vmem:[%s13927_s25 + $0x1d8] sm:$0xff] }
 0xf00   :  { %4727 = vmatpush.msrb.mxu1 %v4688_v60 }
 0xf2c   :  { %v4476_v50 = vpop.f32.mrf.mxu0 }
 0xf2d   :  { %4603 = vmatmul.f32.vlgmr.msra.gmra.mxu0 %v4476_v50 }
 0xf2e   :  { %4750 = vmatpush.msra.mxu0 %v4687_v26  ;;  %v4848_v26 = vld [vmem:[%s13927_s25 + $0xa8] sm:$0xff] }
 0xf3c   :  { %v4532_v10 = vpop.f32.mrf.mxu0 }
 0xf3d   :  { %4644 = vmatmul.f32.vlgmr.msra.gmra.mxu2 %v4532_v10  ;;  %v4684_v10 = vld [vmem:[%s13929_s24] sm:$0x1] }
 0xf4c   :  { %v4496_v29 = vpop.f32.mrf.mxu1 }
 0xf4d   :  { %4623 = vmatmul.f32.vlgmr.msra.gmra.mxu1 %v4496_v29  ;;  %v4852_v29 = vld [vmem:[%s13927_s25 + $0xc8] sm:$0xff] }
 0xf4e   :  { %4770 = vmatpush.msra.mxu1 %v4688_v60  ;;  %v4880_v60 = vld [vmem:[%s13927_s25 + $0x1a8] sm:$0xff] }
 0xf5c   :  { %v4552_v1 = vpop.f32.mrf.mxu1 }
 0xf5d   :  { %4664 = vmatmul.f32.vlgmr.msra.gmra.mxu3 %v4552_v1  ;;  %v4884_v1 = vld [vmem:[%s13927_s25 + $0x1c8] sm:$0xff] }
 0xfaa   :  { %v4604_v38 = vpop.f32.mrf.mxu0 }
 0xfc0   :  { %v4645_v5 = vpop.f32.mrf.mxu2 }
 0xfca   :  { %v4624_v58 = vpop.f32.mrf.mxu1 }
 0xfcb   :  { %v4625_v14 = vadd.f32 %v4624_v58, %v4604_v38  ;;  %v4850_v58 = vld [vmem:[%s13927_s25 + $0xb8] sm:$0xff] }
 0xfcd   :  { %v12017_v55 = vmul.f32 0.00048828125, %v4625_v14  ;;  %v4882_v14 = vld [vmem:[%s13927_s25 + $0x1b8] sm:$0xff] }
 0xfcf   :  { %v4669_v61 = vmul.f32 %v12017_v55, %v12017_v55 }
 0xfe0   :  { %v4665_v27 = vpop.f32.mrf.mxu3 }
 0xfe1   :  { %v4666_v0 = vadd.f32 %v4665_v27, %v4645_v5  ;;  %v4846_v5 = vld [vmem:[%s13927_s25 + $0x98] sm:$0xff]  ;;  %v4844_v27 = vld [vmem:[%s13927_s25 + $0x88] sm:$0xff] }
 0xfe3   :  { %v4668_v4 = vmul.f32 0.00048828125, %v4666_v0  ;;  %v4876_v0 = vld [vmem:[%s13927_s25 + $0x188] sm:$0xff] }
 0xfe5   :  { %v4670_v11 = vsub.f32 %v4668_v4, %v4669_v61  ;;  %v4841_v61 = vld [vmem:[%s13927_s25 + $0x70] sm:$0xff] }
 0xfe6   :  { %v4873_v4 = vld [vmem:[%s13927_s25 + $0x170] sm:$0xff]  ;;  %4899 = vmatpush.msrb.mxu2 %v4841_v61 }
 0xfe7   :  { %v4672_v46 = vadd.f32 1e-05, %v4670_v11  ;;  %v4842_v11 = vld [vmem:[%s13927_s25 + $0x78] sm:$0xff]  ;;  %4940 = vmatpush.msrb.mxu3 %v4873_v4 }
 0xfe8   :  { %4900 = vmatpush.msrb.mxu2 %v4839_v56  ;;  %v7529_v4 = vld [vmem:[%s13927_s25 + $0x3f8] sm:$0xff]  ;;  %v7495_v56 = vld [vmem:[%s13927_s25 + $0x2e8] sm:$0xff] }
 0xfe9   :  { %7841 = vrsqrt.f32 %v4672_v46  ;;  %vm4679_vm0 = vweird.f32 %v4672_v46  ;;  %4941 = vmatpush.msrb.mxu3 %v4871_v2  ;;  %v7527_v2 = vld [vmem:[%s13927_s25 + $0x3e8] sm:$0xff] }
 0xfea   :  { %4901 = vmatpush.msrb.mxu2 %v4837_v32  ;;  %v7493_v32 = vld [vmem:[%s13927_s25 + $0x2d8] sm:$0xff] }
 0xfeb   :  { %4942 = vmatpush.msrb.mxu3 %v4869_v25  ;;  %v7525_v25 = vld [vmem:[%s13927_s25 + $0x3d8] sm:$0xff] }
 0xfec   :  { %4902 = vmatpush.msrb.mxu2 %v4835_v3  ;;  %v7490_v3 = vld [vmem:[%s13927_s25 + $0x2c0] sm:$0xff] }
 0xfed   :  { %4943 = vmatpush.msrb.mxu3 %v4867_v49  ;;  %v7522_v49 = vld [vmem:[%s13927_s25 + $0x3c0] sm:$0xff] }
 0xfef   :  { %v7842_v30 = vpop.eup %7841  ;;  %4944 = vmatpush.msrb.mxu3 %v4865_v34  ;;  %v7523_v34 = vld [vmem:[%s13927_s25 + $0x3c8] sm:$0xff] }
 0xff0   :  { %v4674_v20 = vmul.f32 %v7842_v30, %v4672_v46  ;;  %vm4680_vm15 = vweird.f32 %v7842_v30  ;;  %v4872_v46 = vld [vmem:[%s13927_s25 + $0x168] sm:$0xff] }
 0xff1   :  { %vm4681_vm1 = vmor %vm4679_vm0, %vm4680_vm15  ;;  %4945 = vmatpush.msrb.mxu3 %v4863_v43  ;;  %v7521_v43 = vld [vmem:[%s13927_s25 + $0x3b8] sm:$0xff] }
 0xff2   :  { %v4675_v15 = vmul.f32 %v7842_v30, %v4674_v20  ;;  %v4866_v20 = vld [vmem:[%s13927_s25 + $0x138] sm:$0xff] }
 0xff4   :  { %v4676_v18 = vmul.f32 0.5, %v4675_v15  ;;  %v4832_v15 = vld [vmem:[%s13927_s25 + $0x28] sm:$0xff] }
 0xff6   :  { %v4677_v52 = vsub.f32 1.5, %v4676_v18  ;;  %v4864_v18 = vld [vmem:[%s13927_s25 + $0x128] sm:$0xff] }
 0xff8   :  { %v4678_v42 = vmul.f32 %v7842_v30, %v4677_v52  ;;  %v4829_v52 = vld [vmem:[%s13927_s25 + $0x10] sm:$0xff] }
 0xffa   :  { %v4682_v12 = vsel %vm4681_vm1, %v7842_v30, %v4678_v42  ;;  %v4833_v30 = vld [vmem:[%s13927_s25 + $0x30] sm:$0xff]  ;;  %v4830_v42 = vld [vmem:[%s13927_s25 + $0x18] sm:$0xff] }
 0xffb   :  { %v4683_v37 = vmul.f32 %v4682_v12, %v4671_v39  ;;  %4903 = vmatpush.msrb.mxu2 %v4833_v30  ;;  %v4861_v39 = vld [vmem:[%s13927_s25 + $0x110] sm:$0xff]  ;;  %v4862_v12 = vld [vmem:[%s13927_s25 + $0x118] sm:$0xff]  ;;  %v7491_v30 = vld [vmem:[%s13927_s25 + $0x2c8] sm:$0xff] }
 0xffc   :  { %4946 = vmatpush.msrb.mxu3 %v4861_v39  ;;  %v7519_v39 = vld [vmem:[%s13927_s25 + $0x3a8] sm:$0xff] }
 0xffd   :  { %7462 = vmatmul.msk.f32.vlgmr.msrb.gmra.mxu0 %vm495_vm3, %v4683_v37  ;;  %7463 = vmatmul.msk.f32.vlgmr.msrb.gmra.mxu1 %vm495_vm3, %v4683_v37  ;;  %v4685_v50 = vmul.f32 %v4683_v37, %v12017_v55  ;;  %v4878_v55 = vld [vmem:[%s13927_s25 + $0x198] sm:$0xff]  ;;  %v4827_v37 = vld [vmem:[%s13927_s25] sm:$0xff] }
 0xffe   :  { %4973 = vmatpush.msrb.mxu0 %v4858_v9  ;;  %5014 = vmatpush.msrb.mxu1 %v4890_v48  ;;  %v4859_v9 = vld [vmem:[%s13927_s25 + $0x100] sm:$0xff]  ;;  %v4828_v48 = vld [vmem:[%s13927_s25 + $0x8] sm:$0xff] }
 0xfff   :  { %v4686_v38 = vsub.f32 %v4684_v10, %v4685_v50  ;;  %4904 = vmatpush.msrb.mxu2 %v4831_v41  ;;  %4947 = vmatpush.msrb.mxu3 %v4859_v9  ;;  %v7489_v41 = vld [vmem:[%s13927_s25 + $0x2b8] sm:$0xff]  ;;  %v7516_v9 = vld [vmem:[%s13927_s25 + $0x390] sm:$0xff] }
0x1000   :  { %4974 = vmatpush.msrb.mxu0 %v4856_v57  ;;  %5015 = vmatpush.msrb.mxu1 %v4888_v8  ;;  %v4860_v57 = vld [vmem:[%s13927_s25 + $0x108] sm:$0xff] }
0x1001   :  { %4905 = vmatpush.msrb.mxu2 %v4829_v52  ;;  %v7487_v52 = vld [vmem:[%s13927_s25 + $0x2a8] sm:$0xff] }
0x1002   :  { %4975 = vmatpush.msrb.mxu0 %v4854_v62  ;;  %5016 = vmatpush.msrb.mxu1 %v4886_v28 }
0x1003   :  { %4906 = vmatpush.msrb.mxu2 %v4827_v37  ;;  %v7484_v37 = vld [vmem:[%s13927_s25 + $0x290] sm:$0xff] }
0x1004   :  { %4976 = vmatpush.msrb.mxu0 %v4852_v29  ;;  %5017 = vmatpush.msrb.mxu1 %v4884_v1 }
0x1005   :  { %7464 = vmatmul.msk.f32.vlgmr.msra.gmra.mxu0 %vm495_vm3, %v4686_v38  ;;  %7465 = vmatmul.msk.f32.vlgmr.msra.gmra.mxu1 %vm495_vm3, %v4686_v38 }
0x1006   :  { %4977 = vmatpush.msrb.mxu0 %v4850_v58  ;;  %5018 = vmatpush.msrb.mxu1 %v4882_v14 }
0x1008   :  { %4978 = vmatpush.msrb.mxu0 %v4848_v26  ;;  %5019 = vmatpush.msrb.mxu1 %v4880_v60 }
0x100a   :  { %4979 = vmatpush.msrb.mxu0 %v4846_v5  ;;  %5020 = vmatpush.msrb.mxu1 %v4878_v55 }
0x100c   :  { %4980 = vmatpush.msrb.mxu0 %v4844_v27  ;;  %5021 = vmatpush.msrb.mxu1 %v4876_v0  ;;  %v7528_v0 = vld [vmem:[%s13927_s25 + $0x3f0] sm:$0xff] }
0x100d   :  { %5177 = vmatpush.msra.mxu3 %v7528_v0 }
0x100e   :  { %4981 = vmatpush.msrb.mxu0 %v4842_v11  ;;  %5022 = vmatpush.msrb.mxu1 %v4874_v35  ;;  %v7494_v11 = vld [vmem:[%s13927_s25 + $0x2e0] sm:$0xff] }
0x100f   :  { %v7526_v35 = vld [vmem:[%s13927_s25 + $0x3e0] sm:$0xff] }
0x1010   :  { %4982 = vmatpush.msrb.mxu0 %v4840_v23  ;;  %5023 = vmatpush.msrb.mxu1 %v4872_v46  ;;  %v7492_v23 = vld [vmem:[%s13927_s25 + $0x2d0] sm:$0xff] }
0x1011   :  { %5178 = vmatpush.msra.mxu3 %v7526_v35  ;;  %v7524_v46 = vld [vmem:[%s13927_s25 + $0x3d0] sm:$0xff]  ;;  %v7511_v35 = vld [vmem:[%s13927_s25 + $0x368] sm:$0xff] }
0x1012   :  { %4983 = vmatpush.msrb.mxu0 %v4838_v63  ;;  %5024 = vmatpush.msrb.mxu1 %v4870_v33 }
0x1013   :  { %5179 = vmatpush.msra.mxu3 %v7524_v46  ;;  %v7509_v46 = vld [vmem:[%s13927_s25 + $0x358] sm:$0xff] }
0x1014   :  { %4984 = vmatpush.msrb.mxu0 %v4836_v45  ;;  %5025 = vmatpush.msrb.mxu1 %v4868_v22 }
0x1015   :  { %5180 = vmatpush.msra.mxu3 %v7522_v49  ;;  %v7507_v49 = vld [vmem:[%s13927_s25 + $0x348] sm:$0xff] }
0x1016   :  { %4985 = vmatpush.msrb.mxu0 %v4834_v16  ;;  %5026 = vmatpush.msrb.mxu1 %v4866_v20 }
0x1018   :  { %4986 = vmatpush.msrb.mxu0 %v4832_v15  ;;  %5027 = vmatpush.msrb.mxu1 %v4864_v18  ;;  %v7486_v15 = vld [vmem:[%s13927_s25 + $0x2a0] sm:$0xff] }
0x1019   :  { %v7518_v18 = vld [vmem:[%s13927_s25 + $0x3a0] sm:$0xff] }
0x101a   :  { %4987 = vmatpush.msrb.mxu0 %v4830_v42  ;;  %5028 = vmatpush.msrb.mxu1 %v4862_v12 }
0x101c   :  { %4988 = vmatpush.msrb.mxu0 %v4828_v48  ;;  %5029 = vmatpush.msrb.mxu1 %v4860_v57 }
0x101e   :  { %5259 = vmatpush.msra.mxu1 %v7529_v4 }
0x1020   :  { %5260 = vmatpush.msra.mxu1 %v7527_v2 }
0x1022   :  { %5261 = vmatpush.msra.mxu1 %v7525_v25  ;;  %v7506_v25 = vld [vmem:[%s13927_s25 + $0x340] sm:$0xff] }
0x1024   :  { %5262 = vmatpush.msra.mxu1 %v7523_v34  ;;  %v7504_v34 = vld [vmem:[%s13927_s25 + $0x330] sm:$0xff] }
0x1026   :  { %5263 = vmatpush.msra.mxu1 %v7521_v43 }
0x1028   :  { %5264 = vmatpush.msra.mxu1 %v7519_v39  ;;  %v7500_v39 = vld [vmem:[%s13927_s25 + $0x310] sm:$0xff] }
0x107a   :  { %v4709_v8 = vpop.f32.mrf.mxu0  ;;  %v4729_v50 = vpop.f32.mrf.mxu1 }
0x107b   :  { %v12224_v62 = vperm.slane %v4709_v8, 0  ;;  %v12226_v28 = vperm.slane %v4729_v50, 0  ;;  %v7485_v8 = vld [vmem:[%s13927_s25 + $0x298] sm:$0xff] }
0x107c   :  { %v7517_v50 = vld [vmem:[%s13927_s25 + $0x398] sm:$0xff] }
0x107d   :  { %v4777_v1 = vmul.f32 %v12224_v62, %v11790_v51  ;;  %v4778_v38 = vmul.f32 %v12226_v28, %v11928_v6  ;;  %v4779_v27 = vmul.f32 %v12224_v62, %v11787_v36  ;;  %v4780_v51 = vmul.f32 %v12226_v28, %v11915_v31  ;;  %v7496_v6 = vld [vmem:[%s13927_s25 + $0x2f0] sm:$0xff]  ;;  %v7497_v36 = vld [vmem:[%s13927_s25 + $0x2f8] sm:$0xff]  ;;  %5265 = vmatpush.msra.mxu1 %v7517_v50  ;;  %v7498_v50 = vld [vmem:[%s13927_s25 + $0x300] sm:$0xff] }
0x107e   :  { %5136 = vmatpush.msra.mxu2 %v7496_v6  ;;  %5218 = vmatpush.msra.mxu0 %v7497_v36  ;;  %v4781_v45 = vmul.f32 %v12224_v62, %v11784_v54  ;;  %v4782_v22 = vmul.f32 %v12226_v28, %v11901_v21  ;;  %v7488_v54 = vld [vmem:[%s13927_s25 + $0x2b0] sm:$0xff]  ;;  %v4783_v48 = vmul.f32 %v12224_v62, %v11781_v24  ;;  %v7482_v24 = vld [vmem:[%s13927_s25 + $0x280] sm:$0xff] }
0x107f   :  { %v7520_v21 = vld [vmem:[%s13927_s25 + $0x3b0] sm:$0xff]  ;;  %v4784_v57 = vmul.f32 %v12226_v28, %v11885_v7  ;;  %v7514_v7 = vld [vmem:[%s13927_s25 + $0x380] sm:$0xff]  ;;  %v4786_v4 = vmul.f32 %v12226_v28, %v11869_v19 }
0x1080   :  { %5137 = vmatpush.msra.mxu2 %v7494_v11  ;;  %5219 = vmatpush.msra.mxu0 %v7495_v56  ;;  %v7478_v36 = vld [vmem:[%s13927_s25 + $0x260] sm:$0xff]  ;;  %v7479_v11 = vld [vmem:[%s13927_s25 + $0x268] sm:$0xff]  ;;  %v7508_v19 = vld [vmem:[%s13927_s25 + $0x350] sm:$0xff] }
0x1081   :  { %5181 = vmatpush.msra.mxu3 %v7520_v21  ;;  %v4788_v21 = vmul.f32 %v12226_v28, %v11853_v40  ;;  %v7502_v40 = vld [vmem:[%s13927_s25 + $0x320] sm:$0xff] }
0x1082   :  { %v4752_v10 = vpop.f32.mrf.mxu0  ;;  %v4772_v29 = vpop.f32.mrf.mxu1  ;;  %5138 = vmatpush.msra.mxu2 %v7492_v23  ;;  %5220 = vmatpush.msra.mxu0 %v7493_v32  ;;  %v7477_v23 = vld [vmem:[%s13927_s25 + $0x258] sm:$0xff]  ;;  %v7474_v32 = vld [vmem:[%s13927_s25 + $0x240] sm:$0xff] }
0x1083   :  { %v12232_v58 = vperm.slane %v4752_v10, 0  ;;  %v12234_v14 = vperm.slane %v4772_v29, 0  ;;  %5182 = vmatpush.msra.mxu3 %v7518_v18  ;;  %v7503_v18 = vld [vmem:[%s13927_s25 + $0x328] sm:$0xff] }
0x1084   :  { %5139 = vmatpush.msra.mxu2 %v7490_v3  ;;  %5221 = vmatpush.msra.mxu0 %v7491_v30  ;;  %v7475_v3 = vld [vmem:[%s13927_s25 + $0x248] sm:$0xff]  ;;  %v7472_v30 = vld [vmem:[%s13927_s25 + $0x230] sm:$0xff] }
0x1085   :  { %v4795_v26 = vadd.f32 %v12232_v58, %v4777_v1  ;;  %v4796_v60 = vadd.f32 %v12234_v14, %v4778_v38  ;;  %v4797_v31 = vadd.f32 %v12232_v58, %v4779_v27  ;;  %v4798_v61 = vadd.f32 %v12234_v14, %v4780_v51  ;;  %5183 = vmatpush.msra.mxu3 %v7516_v9  ;;  %v7483_v1 = vld [vmem:[%s13927_s25 + $0x288] sm:$0xff]  ;;  %v7481_v27 = vld [vmem:[%s13927_s25 + $0x278] sm:$0xff] }
0x1086   :  { %v4799_v16 = vadd.f32 %v12232_v58, %v4781_v45  ;;  %v4800_v20 = vadd.f32 %v12234_v14, %v4782_v22  ;;  %5140 = vmatpush.msra.mxu2 %v7488_v54  ;;  %5222 = vmatpush.msra.mxu0 %v7489_v41  ;;  %v4801_v10 = vadd.f32 %v12232_v58, %v4783_v48  ;;  %v7515_v38 = vld [vmem:[%s13927_s25 + $0x388] sm:$0xff]  ;;  %v7513_v51 = vld [vmem:[%s13927_s25 + $0x378] sm:$0xff] }
0x1087   :  { %v12238_v5 = vmax.f32 %v4795_v26, 0.0  ;;  %v12240_v55 = vmax.f32 %v4796_v60, 0.0  ;;  %v12288_v63 = vmax.f32 %v4797_v31, 0.0  ;;  %v12290_v33 = vmax.f32 %v4798_v61, 0.0  ;;  %v7480_v26 = vld [vmem:[%s13927_s25 + $0x270] sm:$0xff]  ;;  %5184 = vmatpush.msra.mxu3 %v7514_v7  ;;  %5266 = vmatpush.msra.mxu1 %v7515_v38  ;;  %v7510_v31 = vld [vmem:[%s13927_s25 + $0x360] sm:$0xff] }
0x1088   :  { %v12338_v42 = vmax.f32 %v4799_v16, 0.0  ;;  %v12340_v12 = vmax.f32 %v4800_v20, 0.0  ;;  %5141 = vmatpush.msra.mxu2 %v7486_v15  ;;  %5223 = vmatpush.msra.mxu0 %v7487_v52  ;;  %v4802_v29 = vadd.f32 %v12234_v14, %v4784_v57  ;;  %v7512_v60 = vld [vmem:[%s13927_s25 + $0x370] sm:$0xff]  ;;  %v12388_v6 = vmax.f32 %v4801_v10, 0.0  ;;  %v7473_v16 = vld [vmem:[%s13927_s25 + $0x238] sm:$0xff]  ;;  %v7471_v15 = vld [vmem:[%s13927_s25 + $0x228] sm:$0xff] }
0x1089   :  { %4907 = vmatmul.f32.vlgmr.msrb.gmra.mxu2 %v12238_v5  ;;  %4948 = vmatmul.f32.vlgmr.msrb.gmra.mxu3 %v12240_v55  ;;  %v4785_v61 = vmul.f32 %v12224_v62, %v11774_v53  ;;  %v7476_v53 = vld [vmem:[%s13927_s25 + $0x250] sm:$0xff]  ;;  %v4804_v2 = vadd.f32 %v12234_v14, %v4786_v4  ;;  %v4787_v54 = vmul.f32 %v12224_v62, %v11769_v17  ;;  %v7505_v20 = vld [vmem:[%s13927_s25 + $0x338] sm:$0xff]  ;;  %v7470_v17 = vld [vmem:[%s13927_s25 + $0x220] sm:$0xff] }
0x108a   :  { %4989 = vmatmul.f32.vlgmr.msrb.gmra.mxu0 %v12238_v5  ;;  %5030 = vmatmul.f32.vlgmr.msrb.gmra.mxu1 %v12240_v55  ;;  %v12390_v0 = vmax.f32 %v4802_v29, 0.0  ;;  %v4806_v43 = vadd.f32 %v12234_v14, %v4788_v21  ;;  %v7468_v52 = vld [vmem:[%s13927_s25 + $0x210] sm:$0xff]  ;;  %v7501_v9 = vld [vmem:[%s13927_s25 + $0x318] sm:$0xff]  ;;  %v4790_v7 = vmul.f32 %v12226_v28, %v11838_v13  ;;  %v7467_v10 = vld [vmem:[%s13927_s25 + $0x208] sm:$0xff] }
0x108b   :  { %5142 = vmatpush.msra.mxu2 %v7484_v37  ;;  %5224 = vmatpush.msra.mxu0 %v7485_v8  ;;  %v4803_v56 = vadd.f32 %v12232_v58, %v4785_v61  ;;  %v12440_v22 = vmax.f32 %v4804_v2, 0.0  ;;  %v4805_v41 = vadd.f32 %v12232_v58, %v4787_v54  ;;  %v7469_v37 = vld [vmem:[%s13927_s25 + $0x218] sm:$0xff]  ;;  %v7466_v8 = vld [vmem:[%s13927_s25 + $0x200] sm:$0xff]  ;;  %v7499_v29 = vld [vmem:[%s13927_s25 + $0x308] sm:$0xff] }
0x108c   :  { %5185 = vmatpush.msra.mxu3 %v7512_v60  ;;  %5267 = vmatpush.msra.mxu1 %v7513_v51  ;;  %v12490_v57 = vmax.f32 %v4806_v43, 0.0  ;;  %v4808_v13 = vadd.f32 %v12234_v14, %v4790_v7  ;;  %v4792_v60 = vmul.f32 %v12226_v28, %v11820_v44 }
0x108d   :  { %5143 = vmatpush.msra.mxu2 %v7482_v24  ;;  %5225 = vmatpush.msra.mxu0 %v7483_v1  ;;  %v12438_v45 = vmax.f32 %v4803_v56, 0.0  ;;  %v12488_v48 = vmax.f32 %v4805_v41, 0.0  ;;  %v4789_v24 = vmul.f32 %v12224_v62, %v11764_v47 }
0x108e   :  { %5186 = vmatpush.msra.mxu3 %v7510_v31  ;;  %5268 = vmatpush.msra.mxu1 %v7511_v35  ;;  %v12516_v38 = vmax.f32 %v4808_v13, 0.0  ;;  %v4810_v51 = vadd.f32 %v12234_v14, %v4792_v60 }
0x108f   :  { %5144 = vmatpush.msra.mxu2 %v7480_v26  ;;  %5226 = vmatpush.msra.mxu0 %v7481_v27  ;;  %v4807_v47 = vadd.f32 %v12232_v58, %v4789_v24  ;;  %v4791_v26 = vmul.f32 %v12224_v62, %v11760_v59 }
0x1090   :  { %5187 = vmatpush.msra.mxu3 %v7508_v19  ;;  %5269 = vmatpush.msra.mxu1 %v7509_v46  ;;  %v12530_v31 = vmax.f32 %v4810_v51, 0.0 }
0x1091   :  { %4910 = vmatmul.f32.gmra.mxu2 %v12288_v63  ;;  %4951 = vmatmul.f32.gmra.mxu3 %v12290_v33  ;;  %v12514_v1 = vmax.f32 %v4807_v47, 0.0  ;;  %v4809_v27 = vadd.f32 %v12232_v58, %v4791_v26 }
0x1092   :  { %4992 = vmatmul.f32.gmra.mxu0 %v12288_v63  ;;  %5033 = vmatmul.f32.gmra.mxu1 %v12290_v33 }
0x1093   :  { %5145 = vmatpush.msra.mxu2 %v7478_v36  ;;  %5227 = vmatpush.msra.mxu0 %v7479_v11  ;;  %v12528_v36 = vmax.f32 %v4809_v27, 0.0 }
0x1094   :  { %5188 = vmatpush.msra.mxu3 %v7506_v25  ;;  %5270 = vmatpush.msra.mxu1 %v7507_v49 }
0x1095   :  { %5146 = vmatpush.msra.mxu2 %v7476_v53  ;;  %5228 = vmatpush.msra.mxu0 %v7477_v23 }
0x1096   :  { %5189 = vmatpush.msra.mxu3 %v7504_v34  ;;  %5271 = vmatpush.msra.mxu1 %v7505_v20 }
0x1097   :  { %5147 = vmatpush.msra.mxu2 %v7474_v32  ;;  %5229 = vmatpush.msra.mxu0 %v7475_v3 }
0x1098   :  { %5190 = vmatpush.msra.mxu3 %v7502_v40  ;;  %5272 = vmatpush.msra.mxu1 %v7503_v18 }
0x1099   :  { %4913 = vmatmul.f32.gmra.mxu2 %v12338_v42  ;;  %4954 = vmatmul.f32.gmra.mxu3 %v12340_v12 }
0x109a   :  { %4995 = vmatmul.f32.gmra.mxu0 %v12338_v42  ;;  %5036 = vmatmul.f32.gmra.mxu1 %v12340_v12 }
0x109b   :  { %5148 = vmatpush.msra.mxu2 %v7472_v30  ;;  %5230 = vmatpush.msra.mxu0 %v7473_v16 }
0x109c   :  { %5191 = vmatpush.msra.mxu3 %v7500_v39  ;;  %5273 = vmatpush.msra.mxu1 %v7501_v9 }
0x109d   :  { %5149 = vmatpush.msra.mxu2 %v7470_v17  ;;  %5231 = vmatpush.msra.mxu0 %v7471_v15 }
0x109e   :  { %5192 = vmatpush.msra.mxu3 %v7498_v50  ;;  %5274 = vmatpush.msra.mxu1 %v7499_v29 }
0x109f   :  { %5150 = vmatpush.msra.mxu2 %v7468_v52  ;;  %5232 = vmatpush.msra.mxu0 %v7469_v37 }
0x10a1   :  { %4916 = vmatmul.f32.gmra.mxu2 %v12388_v6  ;;  %4957 = vmatmul.f32.gmra.mxu3 %v12390_v0 }
0x10a2   :  { %4998 = vmatmul.f32.gmra.mxu0 %v12388_v6  ;;  %5039 = vmatmul.f32.gmra.mxu1 %v12390_v0 }
0x10a3   :  { %5151 = vmatpush.msra.mxu2 %v7466_v8  ;;  %5233 = vmatpush.msra.mxu0 %v7467_v10 }
0x10a9   :  { %4919 = vmatmul.f32.gmra.mxu2 %v12438_v45  ;;  %4960 = vmatmul.f32.gmra.mxu3 %v12440_v22 }
0x10aa   :  { %5001 = vmatmul.f32.gmra.mxu0 %v12438_v45  ;;  %5042 = vmatmul.f32.gmra.mxu1 %v12440_v22 }
0x10b1   :  { %4922 = vmatmul.f32.gmra.mxu2 %v12488_v48  ;;  %4963 = vmatmul.f32.gmra.mxu3 %v12490_v57 }
0x10b2   :  { %5004 = vmatmul.f32.gmra.mxu0 %v12488_v48  ;;  %5045 = vmatmul.f32.gmra.mxu1 %v12490_v57 }
0x10b9   :  { %4925 = vmatmul.f32.gmra.mxu2 %v12514_v1  ;;  %4966 = vmatmul.f32.gmra.mxu3 %v12516_v38 }
0x10ba   :  { %5007 = vmatmul.f32.gmra.mxu0 %v12514_v1  ;;  %5048 = vmatmul.f32.gmra.mxu1 %v12516_v38 }
0x10c1   :  { %4928 = vmatmul.f32.gmra.mxu2 %v12528_v36  ;;  %4969 = vmatmul.f32.gmra.mxu3 %v12530_v31 }
0x10c2   :  { %5010 = vmatmul.f32.gmra.mxu0 %v12528_v36  ;;  %5051 = vmatmul.f32.gmra.mxu1 %v12530_v31 }
0x10c9   :  { %5152 = vmatmul.f32.vlgmr.msra.gmra.mxu2 %v12238_v5  ;;  %5193 = vmatmul.f32.vlgmr.msra.gmra.mxu3 %v12240_v55 }
0x10ca   :  { %5234 = vmatmul.f32.vlgmr.msra.gmra.mxu0 %v12238_v5  ;;  %5275 = vmatmul.f32.vlgmr.msra.gmra.mxu1 %v12240_v55 }
0x10d1   :  { %5155 = vmatmul.f32.gmra.mxu2 %v12288_v63  ;;  %5196 = vmatmul.f32.gmra.mxu3 %v12290_v33 }
0x10d2   :  { %5237 = vmatmul.f32.gmra.mxu0 %v12288_v63  ;;  %5278 = vmatmul.f32.gmra.mxu1 %v12290_v33 }
0x10d9   :  { %5158 = vmatmul.f32.gmra.mxu2 %v12338_v42  ;;  %5199 = vmatmul.f32.gmra.mxu3 %v12340_v12 }
0x10da   :  { %5240 = vmatmul.f32.gmra.mxu0 %v12338_v42  ;;  %5281 = vmatmul.f32.gmra.mxu1 %v12340_v12 }
0x10e1   :  { %5161 = vmatmul.f32.gmra.mxu2 %v12388_v6  ;;  %5202 = vmatmul.f32.gmra.mxu3 %v12390_v0 }
0x10e2   :  { %5243 = vmatmul.f32.gmra.mxu0 %v12388_v6  ;;  %5284 = vmatmul.f32.gmra.mxu1 %v12390_v0 }
0x10e9   :  { %5164 = vmatmul.f32.gmra.mxu2 %v12438_v45  ;;  %5205 = vmatmul.f32.gmra.mxu3 %v12440_v22 }
0x10ea   :  { %5246 = vmatmul.f32.gmra.mxu0 %v12438_v45  ;;  %5287 = vmatmul.f32.gmra.mxu1 %v12440_v22 }
0x10f1   :  { %5167 = vmatmul.f32.gmra.mxu2 %v12488_v48  ;;  %5208 = vmatmul.f32.gmra.mxu3 %v12490_v57 }
0x10f2   :  { %5249 = vmatmul.f32.gmra.mxu0 %v12488_v48  ;;  %5290 = vmatmul.f32.gmra.mxu1 %v12490_v57 }
0x10f9   :  { %5170 = vmatmul.f32.gmra.mxu2 %v12514_v1  ;;  %5211 = vmatmul.f32.gmra.mxu3 %v12516_v38 }
0x10fa   :  { %5252 = vmatmul.f32.gmra.mxu0 %v12514_v1  ;;  %5293 = vmatmul.f32.gmra.mxu1 %v12516_v38 }
0x1101   :  { %5173 = vmatmul.f32.gmra.mxu2 %v12528_v36  ;;  %5214 = vmatmul.f32.gmra.mxu3 %v12530_v31 }
0x1102   :  { %5255 = vmatmul.f32.gmra.mxu0 %v12528_v36  ;;  %5296 = vmatmul.f32.gmra.mxu1 %v12530_v31 }
0x1107   :  { %v4990_v59 = vpop.f32.mrf.mxu0  ;;  %v5031_v44 = vpop.f32.mrf.mxu1 }
0x110c   :  { %v12568_v62 = vpop.f32.mrf.mxu2  ;;  %v12570_v28 = vpop.f32.mrf.mxu3 }
0x110f   :  { %v4993_v58 = vpop.f32.mrf.mxu0  ;;  %v5034_v14 = vpop.f32.mrf.mxu1 }
0x1110   :  { %v5035_v26 = vadd.f32 %v5034_v14, %v4993_v58  ;;  %v4950_v14 = vadd.f32 %v12570_v28, %v12568_v62  ;;  %v5057_v62 = vld [vmem:[%s13930_s26 + $0x10] sm:$0xff] }
0x1114   :  { %v4911_v61 = vpop.f32.mrf.mxu2  ;;  %v4952_v4 = vpop.f32.mrf.mxu3 }
0x1115   :  { %v4953_v58 = vadd.f32 %v4952_v4, %v4911_v61 }
0x1117   :  { %v4996_v11 = vpop.f32.mrf.mxu0  ;;  %v5037_v35 = vpop.f32.mrf.mxu1 }
0x1118   :  { %v5038_v47 = vadd.f32 %v5037_v35, %v4996_v11  ;;  %v5056_v35 = vld [vmem:[%s13930_s26 + $0x8] sm:$0xff] }
0x111c   :  { %v4914_v53 = vpop.f32.mrf.mxu2  ;;  %v4955_v19 = vpop.f32.mrf.mxu3 }
0x111f   :  { %v4999_v56 = vpop.f32.mrf.mxu0  ;;  %v5040_v2 = vpop.f32.mrf.mxu1 }
0x1120   :  { %v5041_v10 = vadd.f32 %v5040_v2, %v4999_v56  ;;  %v5055_v56 = vld [vmem:[%s13930_s26] sm:$0xff]  ;;  %v4956_v2 = vadd.f32 %v4955_v19, %v4914_v53 }
0x1124   :  { %v4917_v23 = vpop.f32.mrf.mxu2  ;;  %v4958_v46 = vpop.f32.mrf.mxu3 }
0x1125   :  { %v4959_v51 = vadd.f32 %v4958_v46, %v4917_v23 }
0x1127   :  { %v5002_v32 = vpop.f32.mrf.mxu0  ;;  %v5043_v25 = vpop.f32.mrf.mxu1 }
0x1128   :  { %v5044_v8 = vadd.f32 %v5043_v25, %v5002_v32  ;;  %v5032_v32 = vadd.f32 %v5031_v44, %v4990_v59 }
0x112c   :  { %v4920_v3 = vpop.f32.mrf.mxu2  ;;  %v4961_v49 = vpop.f32.mrf.mxu3 }
0x112d   :  { %v4962_v13 = vadd.f32 %v4961_v49, %v4920_v3  ;;  %v5058_v49 = vld [vmem:[%s13930_s26 + $0x18] sm:$0xff] }
0x112f   :  { %v5005_v30 = vpop.f32.mrf.mxu0  ;;  %v5046_v34 = vpop.f32.mrf.mxu1 }
0x1130   :  { %v5047_v52 = vadd.f32 %v5046_v34, %v5005_v30 }
0x1134   :  { %v4923_v54 = vpop.f32.mrf.mxu2  ;;  %v4964_v21 = vpop.f32.mrf.mxu3 }
0x1135   :  { %v4965_v29 = vadd.f32 %v4964_v21, %v4923_v54 }
0x1137   :  { %v5008_v16 = vpop.f32.mrf.mxu0  ;;  %v5049_v20 = vpop.f32.mrf.mxu1 }
0x1138   :  { %v5050_v18 = vadd.f32 %v5049_v20, %v5008_v16  ;;  %v5059_v16 = vld [vmem:[%s13930_s26 + $0x20] sm:$0xff] }
0x113c   :  { %v4926_v17 = vpop.f32.mrf.mxu2  ;;  %v4967_v40 = vpop.f32.mrf.mxu3 }
0x113d   :  { %v4968_v50 = vadd.f32 %v4967_v40, %v4926_v17 }
0x113f   :  { %v5011_v41 = vpop.f32.mrf.mxu0  ;;  %v5052_v43 = vpop.f32.mrf.mxu1 }
0x1140   :  { %v5053_v15 = vadd.f32 %v5052_v43, %v5011_v41  ;;  %v5060_v43 = vld [vmem:[%s13930_s26 + $0x28] sm:$0xff] }
0x1142   :  { %5616 = vmatpush.msrb.mxu1 %v5053_v15 }
0x1144   :  { %5617 = vmatpush.msrb.mxu1 %v5050_v18  ;;  %v4929_v39 = vpop.f32.mrf.mxu2  ;;  %v4970_v37 = vpop.f32.mrf.mxu3 }
0x1145   :  { %v4971_v9 = vadd.f32 %v4970_v37, %v4929_v39  ;;  %v5061_v37 = vld [vmem:[%s13930_s26 + $0x30] sm:$0xff] }
0x1146   :  { %5618 = vmatpush.msrb.mxu1 %v5047_v52 }
0x1147   :  { %v12572_v24 = vpop.f32.mrf.mxu0  ;;  %v12574_v7 = vpop.f32.mrf.mxu1  ;;  %5551 = vmatpush.msrb.mxu0 %v4971_v9 }
0x1148   :  { %5619 = vmatpush.msrb.mxu1 %v5044_v8 }
0x1149   :  { %5552 = vmatpush.msrb.mxu0 %v4968_v50 }
0x114a   :  { %5620 = vmatpush.msrb.mxu1 %v5041_v10 }
0x114b   :  { %5553 = vmatpush.msrb.mxu0 %v4965_v29 }
0x114c   :  { %5621 = vmatpush.msrb.mxu1 %v5038_v47  ;;  %v12576_v60 = vpop.f32.mrf.mxu2  ;;  %v12578_v27 = vpop.f32.mrf.mxu3 }
0x114d   :  { %5554 = vmatpush.msrb.mxu0 %v4962_v13 }
0x114e   :  { %5622 = vmatpush.msrb.mxu1 %v5035_v26 }
0x114f   :  { %v12583_v25 = vpop.f32.mrf.mxu0  ;;  %v12585_v11 = vpop.f32.mrf.mxu1  ;;  %5555 = vmatpush.msrb.mxu0 %v4959_v51 }
0x1150   :  { %5623 = vmatpush.msrb.mxu1 %v5032_v32  ;;  %v5062_v32 = vld [vmem:[%s13930_s26 + $0x38] sm:$0xff] }
0x1151   :  { %7594 = vmatmul.msk.f32.vlgmr.msrb.gmra.mxu1 %vm729_vm7, %v5055_v56  ;;  %5556 = vmatpush.msrb.mxu0 %v4956_v2 }
0x1153   :  { %5557 = vmatpush.msrb.mxu0 %v4953_v58 }
0x1154   :  { %v12590_v59 = vpop.f32.mrf.mxu2  ;;  %v12592_v44 = vpop.f32.mrf.mxu3 }
0x1155   :  { %5558 = vmatpush.msrb.mxu0 %v4950_v14 }
0x1156   :  { %7578 = vmatmul.msk.f32.vlgmr.msrb.gmra.mxu0 %vm729_vm7, %v5055_v56 }
0x1157   :  { %v5241_v53 = vpop.f32.mrf.mxu0  ;;  %v5282_v61 = vpop.f32.mrf.mxu1 }
0x1158   :  { %v5283_v14 = vadd.f32 %v5282_v61, %v5241_v53  ;;  %v5063_v53 = vld [vmem:[%s13930_s26 + $0x40] sm:$0xff]  ;;  %v5195_v61 = vadd.f32 %v12578_v27, %v12576_v60  ;;  %v7641_v60 = vld [vmem:[%s13927_s25 + $0x4f8] sm:$0xff]  ;;  %v7667_v27 = vld [vmem:[%s13927_s25 + $0x5c8] sm:$0xff] }
0x1159   :  { %7595 = vmatmul.msk.f32.gmra.mxu1 %vm729_vm7, %v5056_v35  ;;  %5820 = vmatpush.msra.mxu0 %v7641_v60  ;;  %v5070_v60 = vld [vmem:[%s13930_s26 + $0x78] sm:$0xff] }
0x115c   :  { %v12599_v4 = vpop.f32.mrf.mxu2  ;;  %v12601_v19 = vpop.f32.mrf.mxu3 }
0x115e   :  { %7579 = vmatmul.msk.f32.gmra.mxu0 %vm729_vm7, %v5056_v35 }
0x115f   :  { %v5244_v28 = vpop.f32.mrf.mxu0  ;;  %v5285_v23 = vpop.f32.mrf.mxu1 }
0x1160   :  { %v5286_v2 = vadd.f32 %v5285_v23, %v5244_v28  ;;  %v7530_v28 = vld [vmem:[%s13930_s26 + $0x80] sm:$0xff]  ;;  %v7665_v23 = vld [vmem:[%s13927_s25 + $0x5b8] sm:$0xff] }
0x1161   :  { %7596 = vmatmul.msk.f32.gmra.mxu1 %vm729_vm7, %v5057_v62 }
0x1164   :  { %v5162_v46 = vpop.f32.mrf.mxu2  ;;  %v5203_v3 = vpop.f32.mrf.mxu3 }
0x1166   :  { %7580 = vmatmul.msk.f32.gmra.mxu0 %vm729_vm7, %v5057_v62  ;;  %v5280_v62 = vadd.f32 %v12585_v11, %v12583_v25  ;;  %v5201_v25 = vadd.f32 %v12601_v19, %v12599_v4  ;;  %v5198_v11 = vadd.f32 %v12592_v44, %v12590_v59  ;;  %v7669_v4 = vld [vmem:[%s13927_s25 + $0x5d8] sm:$0xff]  ;;  %v7531_v19 = vld [vmem:[%s13930_s26 + $0x88] sm:$0xff] }
0x1167   :  { %v5247_v30 = vpop.f32.mrf.mxu0  ;;  %v5288_v34 = vpop.f32.mrf.mxu1  ;;  %v5064_v59 = vld [vmem:[%s13930_s26 + $0x48] sm:$0xff] }
0x1168   :  { %v5289_v51 = vadd.f32 %v5288_v34, %v5247_v30  ;;  %v5277_v30 = vadd.f32 %v12574_v7, %v12572_v24  ;;  %v7673_v24 = vld [vmem:[%s13927_s25 + $0x5f8] sm:$0xff]  ;;  %v7671_v7 = vld [vmem:[%s13927_s25 + $0x5e8] sm:$0xff] }
0x1169   :  { %7597 = vmatmul.msk.f32.gmra.mxu1 %vm729_vm7, %v5058_v49  ;;  %v7639_v44 = vld [vmem:[%s13927_s25 + $0x4e8] sm:$0xff] }
0x116a   :  { %5861 = vmatpush.msra.mxu1 %v7673_v24  ;;  %5821 = vmatpush.msra.mxu0 %v7639_v44  ;;  %v7635_v34 = vld [vmem:[%s13927_s25 + $0x4c8] sm:$0xff]  ;;  %v7668_v24 = vld [vmem:[%s13927_s25 + $0x5d0] sm:$0xff] }
0x116b   :  { %v7664_v44 = vld [vmem:[%s13927_s25 + $0x5b0] sm:$0xff] }
0x116c   :  { %v5165_v54 = vpop.f32.mrf.mxu2  ;;  %v5206_v21 = vpop.f32.mrf.mxu3  ;;  %5862 = vmatpush.msra.mxu1 %v7671_v7  ;;  %v7611_v7 = vld [vmem:[%s13927_s25 + $0x408] sm:$0xff] }
0x116d   :  { %v5207_v35 = vadd.f32 %v5206_v21, %v5165_v54  ;;  %v7661_v54 = vld [vmem:[%s13927_s25 + $0x598] sm:$0xff]  ;;  %v7532_v21 = vld [vmem:[%s13930_s26 + $0x90] sm:$0xff] }
0x116e   :  { %7581 = vmatmul.msk.f32.gmra.mxu0 %vm729_vm7, %v5058_v49  ;;  %v5204_v49 = vadd.f32 %v5203_v3, %v5162_v46  ;;  %5863 = vmatpush.msra.mxu1 %v7669_v4  ;;  %v7637_v46 = vld [vmem:[%s13927_s25 + $0x4d8] sm:$0xff]  ;;  %v7663_v3 = vld [vmem:[%s13927_s25 + $0x5a8] sm:$0xff]  ;;  %v7634_v4 = vld [vmem:[%s13927_s25 + $0x4c0] sm:$0xff] }
0x116f   :  { %v5250_v20 = vpop.f32.mrf.mxu0  ;;  %v5291_v17 = vpop.f32.mrf.mxu1  ;;  %5822 = vmatpush.msra.mxu0 %v7637_v46  ;;  %v7538_v46 = vld [vmem:[%s13930_s26 + $0xc0] sm:$0xff] }
0x1170   :  { %v5292_v29 = vadd.f32 %v5291_v17, %v5250_v20  ;;  %5864 = vmatpush.msra.mxu1 %v7667_v27  ;;  %v7633_v20 = vld [vmem:[%s13927_s25 + $0x4b8] sm:$0xff]  ;;  %v7659_v17 = vld [vmem:[%s13927_s25 + $0x588] sm:$0xff]  ;;  %v7632_v27 = vld [vmem:[%s13927_s25 + $0x4b0] sm:$0xff] }
0x1171   :  { %7598 = vmatmul.msk.f32.gmra.mxu1 %vm729_vm7, %v5059_v16  ;;  %5823 = vmatpush.msra.mxu0 %v7635_v34  ;;  %v7662_v34 = vld [vmem:[%s13927_s25 + $0x5a0] sm:$0xff] }
0x1172   :  { %5865 = vmatpush.msra.mxu1 %v7665_v23 }
0x1173   :  { %5824 = vmatpush.msra.mxu0 %v7633_v20 }
0x1174   :  { %v5168_v40 = vpop.f32.mrf.mxu2  ;;  %v5209_v41 = vpop.f32.mrf.mxu3  ;;  %5866 = vmatpush.msra.mxu1 %v7663_v3  ;;  %v7630_v3 = vld [vmem:[%s13927_s25 + $0x4a0] sm:$0xff] }
0x1175   :  { %v5210_v58 = vadd.f32 %v5209_v41, %v5168_v40  ;;  %v7631_v40 = vld [vmem:[%s13927_s25 + $0x4a8] sm:$0xff]  ;;  %v7657_v41 = vld [vmem:[%s13927_s25 + $0x578] sm:$0xff] }
0x1176   :  { %7582 = vmatmul.msk.f32.gmra.mxu0 %vm729_vm7, %v5059_v16  ;;  %v5065_v16 = vld [vmem:[%s13930_s26 + $0x50] sm:$0xff]  ;;  %5867 = vmatpush.msra.mxu1 %v7661_v54 }
0x1177   :  { %v5253_v15 = vpop.f32.mrf.mxu0  ;;  %v5294_v18 = vpop.f32.mrf.mxu1  ;;  %5825 = vmatpush.msra.mxu0 %v7631_v40  ;;  %v7784_v54 = vld [vmem:[%s13927_s25 + $0x7f0] sm:$0xff] }
0x1178   :  { %v5295_v10 = vadd.f32 %v5294_v18, %v5253_v15  ;;  %5868 = vmatpush.msra.mxu1 %v7659_v17  ;;  %v7629_v15 = vld [vmem:[%s13927_s25 + $0x498] sm:$0xff]  ;;  %v7539_v17 = vld [vmem:[%s13930_s26 + $0xc8] sm:$0xff]  ;;  %v7780_v40 = vld [vmem:[%s13927_s25 + $0x7d0] sm:$0xff] }
0x1179   :  { %7599 = vmatmul.msk.f32.gmra.mxu1 %vm729_vm7, %v5060_v43  ;;  %v7653_v18 = vld [vmem:[%s13927_s25 + $0x558] sm:$0xff]  ;;  %5826 = vmatpush.msra.mxu0 %v7629_v15  ;;  %v7628_v15 = vld [vmem:[%s13927_s25 + $0x490] sm:$0xff] }
0x117a   :  { %5869 = vmatpush.msra.mxu1 %v7657_v41  ;;  %v7752_v41 = vld [vmem:[%s13927_s25 + $0x6f0] sm:$0xff] }
0x117c   :  { %v5171_v52 = vpop.f32.mrf.mxu2  ;;  %v5212_v39 = vpop.f32.mrf.mxu3 }
0x117d   :  { %v5213_v56 = vadd.f32 %v5212_v39, %v5171_v52  ;;  %v7533_v52 = vld [vmem:[%s13930_s26 + $0x98] sm:$0xff] }
0x117e   :  { %7583 = vmatmul.msk.f32.gmra.mxu0 %vm729_vm7, %v5060_v43  ;;  %v7655_v43 = vld [vmem:[%s13927_s25 + $0x568] sm:$0xff]  ;;  %v5066_v39 = vld [vmem:[%s13930_s26 + $0x58] sm:$0xff] }
0x117f   :  { %v5256_v9 = vpop.f32.mrf.mxu0  ;;  %v5297_v8 = vpop.f32.mrf.mxu1  ;;  %5870 = vmatpush.msra.mxu1 %v7655_v43  ;;  %v7778_v43 = vld [vmem:[%s13927_s25 + $0x7c0] sm:$0xff] }
0x1180   :  { %v5298_v50 = vadd.f32 %v5297_v8, %v5256_v9  ;;  %v7651_v9 = vld [vmem:[%s13927_s25 + $0x548] sm:$0xff]  ;;  %v7625_v8 = vld [vmem:[%s13927_s25 + $0x478] sm:$0xff] }
0x1181   :  { %7600 = vmatmul.msk.f32.gmra.mxu1 %vm729_vm7, %v5061_v37 }
0x1182   :  { %5438 = vmatpush.msrb.mxu3 %v5298_v50  ;;  %5871 = vmatpush.msra.mxu1 %v7653_v18  ;;  %v7640_v50 = vld [vmem:[%s13927_s25 + $0x4f0] sm:$0xff] }
0x1183   :  { %v7660_v18 = vld [vmem:[%s13927_s25 + $0x590] sm:$0xff] }
0x1184   :  { %5439 = vmatpush.msrb.mxu3 %v5295_v10  ;;  %v5174_v47 = vpop.f32.mrf.mxu2  ;;  %v5215_v13 = vpop.f32.mrf.mxu3  ;;  %v7672_v10 = vld [vmem:[%s13927_s25 + $0x5f0] sm:$0xff]  ;;  %5872 = vmatpush.msra.mxu1 %v7651_v9 }
0x1185   :  { %v5216_v26 = vadd.f32 %v5215_v13, %v5174_v47  ;;  %v7647_v47 = vld [vmem:[%s13927_s25 + $0x528] sm:$0xff]  ;;  %v7748_v9 = vld [vmem:[%s13927_s25 + $0x6d0] sm:$0xff] }
0x1186   :  { %5440 = vmatpush.msrb.mxu3 %v5292_v29  ;;  %7584 = vmatmul.msk.f32.gmra.mxu0 %vm729_vm7, %v5061_v37  ;;  %v7627_v37 = vld [vmem:[%s13927_s25 + $0x488] sm:$0xff]  ;;  %v7649_v29 = vld [vmem:[%s13927_s25 + $0x538] sm:$0xff] }
0x1187   :  { %5373 = vmatpush.msrb.mxu2 %v5216_v26  ;;  %5827 = vmatpush.msra.mxu0 %v7627_v37  ;;  %v7623_v13 = vld [vmem:[%s13927_s25 + $0x468] sm:$0xff]  ;;  %v7534_v26 = vld [vmem:[%s13930_s26 + $0xa0] sm:$0xff] }
0x1188   :  { %5441 = vmatpush.msrb.mxu3 %v5289_v51  ;;  %5873 = vmatpush.msra.mxu1 %v7649_v29  ;;  %v5067_v51 = vld [vmem:[%s13930_s26 + $0x60] sm:$0xff] }
0x1189   :  { %7601 = vmatmul.msk.f32.gmra.mxu1 %vm729_vm7, %v5062_v32  ;;  %5374 = vmatpush.msrb.mxu2 %v5213_v56  ;;  %v7621_v56 = vld [vmem:[%s13927_s25 + $0x458] sm:$0xff]  ;;  %v7746_v29 = vld [vmem:[%s13927_s25 + $0x6c0] sm:$0xff] }
0x118a   :  { %5442 = vmatpush.msrb.mxu3 %v5286_v2  ;;  %5828 = vmatpush.msra.mxu0 %v7625_v8  ;;  %v7643_v2 = vld [vmem:[%s13927_s25 + $0x508] sm:$0xff]  ;;  %v7774_v8 = vld [vmem:[%s13927_s25 + $0x7a0] sm:$0xff] }
0x118b   :  { %5375 = vmatpush.msrb.mxu2 %v5210_v58  ;;  %5874 = vmatpush.msra.mxu1 %v7647_v47  ;;  %v7619_v58 = vld [vmem:[%s13927_s25 + $0x448] sm:$0xff]  ;;  %v7772_v47 = vld [vmem:[%s13927_s25 + $0x790] sm:$0xff] }
0x118c   :  { %5443 = vmatpush.msrb.mxu3 %v5283_v14  ;;  %5829 = vmatpush.msra.mxu0 %v7623_v13  ;;  %v7638_v14 = vld [vmem:[%s13927_s25 + $0x4e0] sm:$0xff] }
0x118d   :  { %5376 = vmatpush.msrb.mxu2 %v5207_v35  ;;  %v7670_v35 = vld [vmem:[%s13927_s25 + $0x5e0] sm:$0xff] }
0x118e   :  { %5444 = vmatpush.msrb.mxu3 %v5280_v62  ;;  %7585 = vmatmul.msk.f32.gmra.mxu0 %vm729_vm7, %v5062_v32  ;;  %v7645_v32 = vld [vmem:[%s13927_s25 + $0x518] sm:$0xff]  ;;  %v7658_v13 = vld [vmem:[%s13927_s25 + $0x580] sm:$0xff] }
0x118f   :  { %5377 = vmatpush.msrb.mxu2 %v5204_v49  ;;  %5875 = vmatpush.msra.mxu1 %v7645_v32  ;;  %v7617_v62 = vld [vmem:[%s13927_s25 + $0x438] sm:$0xff]  ;;  %v7535_v49 = vld [vmem:[%s13930_s26 + $0xa8] sm:$0xff]  ;;  %v7626_v32 = vld [vmem:[%s13927_s25 + $0x480] sm:$0xff] }
0x1190   :  { %5445 = vmatpush.msrb.mxu3 %v5277_v30  ;;  %5830 = vmatpush.msra.mxu0 %v7621_v56  ;;  %v5068_v30 = vld [vmem:[%s13930_s26 + $0x68] sm:$0xff]  ;;  %v7656_v56 = vld [vmem:[%s13927_s25 + $0x570] sm:$0xff] }
0x1191   :  { %7562 = vmatmul.msk.f32.vlgmr.msrb.gmra.mxu3 %vm729_vm7, %v7530_v28  ;;  %7602 = vmatmul.msk.f32.gmra.mxu1 %vm729_vm7, %v5063_v53 }
0x1192   :  { %5378 = vmatpush.msrb.mxu2 %v5201_v25  ;;  %5779 = vmatpush.msra.mxu3 %v7672_v10  ;;  %v7636_v25 = vld [vmem:[%s13927_s25 + $0x4d0] sm:$0xff] }
0x1193   :  { %5876 = vmatpush.msra.mxu1 %v7643_v2  ;;  %5831 = vmatpush.msra.mxu0 %v7619_v58  ;;  %v7540_v10 = vld [vmem:[%s13930_s26 + $0xd0] sm:$0xff]  ;;  %v7742_v2 = vld [vmem:[%s13927_s25 + $0x6a0] sm:$0xff] }
0x1194   :  { %5379 = vmatpush.msrb.mxu2 %v5198_v11  ;;  %5780 = vmatpush.msra.mxu3 %v7670_v35  ;;  %v7536_v11 = vld [vmem:[%s13930_s26 + $0xb0] sm:$0xff]  ;;  %v7654_v35 = vld [vmem:[%s13927_s25 + $0x560] sm:$0xff] }
0x1195   :  { %5832 = vmatpush.msra.mxu0 %v7617_v62  ;;  %6235 = vmatpush.msrb.mxu1 %v7784_v54  ;;  %v7768_v58 = vld [vmem:[%s13927_s25 + $0x770] sm:$0xff]  ;;  %v7766_v62 = vld [vmem:[%s13927_s25 + $0x760] sm:$0xff] }
0x1196   :  { %5380 = vmatpush.msrb.mxu2 %v5195_v61  ;;  %7586 = vmatmul.msk.f32.gmra.mxu0 %vm729_vm7, %v5063_v53  ;;  %v7613_v53 = vld [vmem:[%s13927_s25 + $0x418] sm:$0xff]  ;;  %v5069_v61 = vld [vmem:[%s13930_s26 + $0x70] sm:$0xff] }
0x1197   :  { %7546 = vmatmul.msk.f32.vlgmr.msrb.gmra.mxu2 %vm729_vm7, %v7530_v28  ;;  %v7615_v28 = vld [vmem:[%s13927_s25 + $0x428] sm:$0xff]  ;;  %5781 = vmatpush.msra.mxu3 %v7668_v24  ;;  %v7738_v24 = vld [vmem:[%s13927_s25 + $0x680] sm:$0xff] }
0x1198   :  { %5738 = vmatpush.msra.mxu2 %v7640_v50  ;;  %5833 = vmatpush.msra.mxu0 %v7615_v28  ;;  %v7541_v28 = vld [vmem:[%s13930_s26 + $0xd8] sm:$0xff] }
0x1199   :  { %7563 = vmatmul.msk.f32.gmra.mxu3 %vm729_vm7, %v7531_v19  ;;  %7603 = vmatmul.msk.f32.gmra.mxu1 %vm729_vm7, %v5064_v59 }
0x119a   :  { %5739 = vmatpush.msra.mxu2 %v7638_v14  ;;  %5834 = vmatpush.msra.mxu0 %v7613_v53  ;;  %v7652_v53 = vld [vmem:[%s13927_s25 + $0x550] sm:$0xff] }
0x119c   :  { %5740 = vmatpush.msra.mxu2 %v7636_v25  ;;  %5835 = vmatpush.msra.mxu0 %v7611_v7  ;;  %v7764_v25 = vld [vmem:[%s13927_s25 + $0x750] sm:$0xff] }
0x119d   :  { %v7624_v7 = vld [vmem:[%s13927_s25 + $0x470] sm:$0xff] }
0x119e   :  { %7587 = vmatmul.msk.f32.gmra.mxu0 %vm729_vm7, %v5064_v59  ;;  %5741 = vmatpush.msra.mxu2 %v7634_v4  ;;  %v7537_v59 = vld [vmem:[%s13930_s26 + $0xb8] sm:$0xff]  ;;  %v7736_v4 = vld [vmem:[%s13927_s25 + $0x670] sm:$0xff] }
0x119f   :  { %7547 = vmatmul.msk.f32.gmra.mxu2 %vm729_vm7, %v7531_v19  ;;  %v7666_v19 = vld [vmem:[%s13927_s25 + $0x5c0] sm:$0xff]  ;;  %6194 = vmatpush.msrb.mxu0 %v7752_v41  ;;  %v7644_v41 = vld [vmem:[%s13927_s25 + $0x510] sm:$0xff] }
0x11a0   :  { %5782 = vmatpush.msra.mxu3 %v7666_v19  ;;  %5742 = vmatpush.msra.mxu2 %v7632_v27  ;;  %v7622_v19 = vld [vmem:[%s13927_s25 + $0x460] sm:$0xff] }
0x11a1   :  { %7564 = vmatmul.msk.f32.gmra.mxu3 %vm729_vm7, %v7532_v21  ;;  %7604 = vmatmul.msk.f32.gmra.mxu1 %vm729_vm7, %v5065_v16 }
0x11a2   :  { %5783 = vmatpush.msra.mxu3 %v7664_v44  ;;  %5743 = vmatpush.msra.mxu2 %v7630_v3  ;;  %v7620_v44 = vld [vmem:[%s13927_s25 + $0x450] sm:$0xff]  ;;  %v7646_v3 = vld [vmem:[%s13927_s25 + $0x520] sm:$0xff] }
0x11a4   :  { %5784 = vmatpush.msra.mxu3 %v7662_v34  ;;  %5744 = vmatpush.msra.mxu2 %v7628_v15  ;;  %v7758_v34 = vld [vmem:[%s13927_s25 + $0x720] sm:$0xff] }
0x11a5   :  { %v7730_v15 = vld [vmem:[%s13927_s25 + $0x640] sm:$0xff] }
0x11a6   :  { %7588 = vmatmul.msk.f32.gmra.mxu0 %vm729_vm7, %v5065_v16  ;;  %v7782_v16 = vld [vmem:[%s13927_s25 + $0x7e0] sm:$0xff]  ;;  %5785 = vmatpush.msra.mxu3 %v7660_v18  ;;  %v7616_v18 = vld [vmem:[%s13927_s25 + $0x430] sm:$0xff] }
0x11a7   :  { %7548 = vmatmul.msk.f32.gmra.mxu2 %vm729_vm7, %v7532_v21  ;;  %6236 = vmatpush.msrb.mxu1 %v7782_v16  ;;  %v7542_v16 = vld [vmem:[%s13930_s26 + $0xe0] sm:$0xff] }
0x11a8   :  { %5786 = vmatpush.msra.mxu3 %v7658_v13  ;;  %5745 = vmatpush.msra.mxu2 %v7626_v32  ;;  %v7543_v13 = vld [vmem:[%s13930_s26 + $0xe8] sm:$0xff]  ;;  %v7724_v32 = vld [vmem:[%s13927_s25 + $0x610] sm:$0xff] }
0x11a9   :  { %7565 = vmatmul.msk.f32.gmra.mxu3 %vm729_vm7, %v7533_v52  ;;  %7605 = vmatmul.msk.f32.gmra.mxu1 %vm729_vm7, %v5066_v39 }
0x11aa   :  { %6237 = vmatpush.msrb.mxu1 %v7780_v40  ;;  %5787 = vmatpush.msra.mxu3 %v7656_v56  ;;  %v7618_v40 = vld [vmem:[%s13927_s25 + $0x440] sm:$0xff] }
0x11ab   :  { %5746 = vmatpush.msra.mxu2 %v7624_v7  ;;  %v7785_v7 = vld [vmem:[%s13927_s25 + $0x7f8] sm:$0xff] }
0x11ac   :  { %6238 = vmatpush.msrb.mxu1 %v7778_v43  ;;  %5788 = vmatpush.msra.mxu3 %v7654_v35  ;;  %v7756_v43 = vld [vmem:[%s13927_s25 + $0x710] sm:$0xff] }
0x11ad   :  { %5747 = vmatpush.msra.mxu2 %v7622_v19  ;;  %v7544_v35 = vld [vmem:[%s13930_s26 + $0xf0] sm:$0xff]  ;;  %v7781_v19 = vld [vmem:[%s13927_s25 + $0x7d8] sm:$0xff] }
0x11ae   :  { %7589 = vmatmul.msk.f32.gmra.mxu0 %vm729_vm7, %v5066_v39  ;;  %v7776_v39 = vld [vmem:[%s13927_s25 + $0x7b0] sm:$0xff]  ;;  %5789 = vmatpush.msra.mxu3 %v7652_v53 }
0x11af   :  { %7549 = vmatmul.msk.f32.gmra.mxu2 %vm729_vm7, %v7533_v52  ;;  %v7750_v52 = vld [vmem:[%s13927_s25 + $0x6e0] sm:$0xff]  ;;  %6239 = vmatpush.msrb.mxu1 %v7776_v39 }
0x11b0   :  { %6195 = vmatpush.msrb.mxu0 %v7750_v52  ;;  %5748 = vmatpush.msra.mxu2 %v7620_v44  ;;  %v7642_v52 = vld [vmem:[%s13927_s25 + $0x500] sm:$0xff] }
0x11b1   :  { %7566 = vmatmul.msk.f32.gmra.mxu3 %vm729_vm7, %v7534_v26  ;;  %7606 = vmatmul.msk.f32.gmra.mxu1 %vm729_vm7, %v5067_v51  ;;  %v7754_v39 = vld [vmem:[%s13927_s25 + $0x700] sm:$0xff] }
0x11b2   :  { %6196 = vmatpush.msrb.mxu0 %v7748_v9  ;;  %6240 = vmatpush.msrb.mxu1 %v7774_v8  ;;  %v7614_v8 = vld [vmem:[%s13927_s25 + $0x420] sm:$0xff] }
0x11b3   :  { %5749 = vmatpush.msra.mxu2 %v7618_v40  ;;  %v7775_v40 = vld [vmem:[%s13927_s25 + $0x7a8] sm:$0xff] }
0x11b4   :  { %6197 = vmatpush.msrb.mxu0 %v7746_v29  ;;  %6241 = vmatpush.msrb.mxu1 %v7772_v47  ;;  %v7612_v29 = vld [vmem:[%s13927_s25 + $0x410] sm:$0xff] }
0x11b5   :  { %5750 = vmatpush.msra.mxu2 %v7616_v18  ;;  %v7771_v18 = vld [vmem:[%s13927_s25 + $0x788] sm:$0xff] }
0x11b6   :  { %7590 = vmatmul.msk.f32.gmra.mxu0 %vm729_vm7, %v5067_v51  ;;  %v7770_v51 = vld [vmem:[%s13927_s25 + $0x780] sm:$0xff] }
0x11b7   :  { %7550 = vmatmul.msk.f32.gmra.mxu2 %vm729_vm7, %v7534_v26  ;;  %v7744_v26 = vld [vmem:[%s13927_s25 + $0x6b0] sm:$0xff]  ;;  %6242 = vmatpush.msrb.mxu1 %v7770_v51  ;;  %v7610_v51 = vld [vmem:[%s13927_s25 + $0x400] sm:$0xff] }
0x11b8   :  { %6198 = vmatpush.msrb.mxu0 %v7744_v26  ;;  %5751 = vmatpush.msra.mxu2 %v7614_v8  ;;  %v7726_v26 = vld [vmem:[%s13927_s25 + $0x620] sm:$0xff] }
0x11b9   :  { %7567 = vmatmul.msk.f32.gmra.mxu3 %vm729_vm7, %v7535_v49  ;;  %7607 = vmatmul.msk.f32.gmra.mxu1 %vm729_vm7, %v5068_v30 }
0x11ba   :  { %6199 = vmatpush.msrb.mxu0 %v7742_v2  ;;  %6243 = vmatpush.msrb.mxu1 %v7768_v58  ;;  %v7722_v2 = vld [vmem:[%s13927_s25 + $0x600] sm:$0xff] }
0x11bb   :  { %5752 = vmatpush.msra.mxu2 %v7612_v29 }
0x11bc   :  { %6244 = vmatpush.msrb.mxu1 %v7766_v62 }
0x11bd   :  { %5753 = vmatpush.msra.mxu2 %v7610_v51 }
0x11be   :  { %7591 = vmatmul.msk.f32.gmra.mxu0 %vm729_vm7, %v5068_v30  ;;  %6245 = vmatpush.msrb.mxu1 %v7764_v25 }
0x11bf   :  { %7551 = vmatmul.msk.f32.gmra.mxu2 %vm729_vm7, %v7535_v49  ;;  %v7740_v49 = vld [vmem:[%s13927_s25 + $0x690] sm:$0xff] }
0x11c0   :  { %6200 = vmatpush.msrb.mxu0 %v7740_v49 }
0x11c1   :  { %7568 = vmatmul.msk.f32.gmra.mxu3 %vm729_vm7, %v7536_v11  ;;  %7608 = vmatmul.msk.f32.gmra.mxu1 %vm729_vm7, %v5069_v61 }
0x11c2   :  { %6201 = vmatpush.msrb.mxu0 %v7738_v24 }
0x11c4   :  { %6202 = vmatpush.msrb.mxu0 %v7736_v4 }
0x11c6   :  { %7592 = vmatmul.msk.f32.gmra.mxu0 %vm729_vm7, %v5069_v61  ;;  %v7762_v61 = vld [vmem:[%s13927_s25 + $0x740] sm:$0xff] }
0x11c7   :  { %7552 = vmatmul.msk.f32.gmra.mxu2 %vm729_vm7, %v7536_v11  ;;  %v7650_v11 = vld [vmem:[%s13927_s25 + $0x540] sm:$0xff]  ;;  %6246 = vmatpush.msrb.mxu1 %v7762_v61  ;;  %v7783_v61 = vld [vmem:[%s13927_s25 + $0x7e8] sm:$0xff] }
0x11c8   :  { %5790 = vmatpush.msra.mxu3 %v7650_v11 }
0x11c9   :  { %7569 = vmatmul.msk.f32.gmra.mxu3 %vm729_vm7, %v7537_v59  ;;  %7609 = vmatmul.msk.f32.gmra.mxu1 %vm729_vm7, %v5070_v60 }
0x11ce   :  { %v12848_v23 = vpop.f32.mrf.mxu1  ;;  %7593 = vmatmul.msk.f32.gmra.mxu0 %vm729_vm7, %v5070_v60  ;;  %v7760_v60 = vld [vmem:[%s13927_s25 + $0x730] sm:$0xff] }
0x11cf   :  { %7553 = vmatmul.msk.f32.gmra.mxu2 %vm729_vm7, %v7537_v59  ;;  %v7648_v59 = vld [vmem:[%s13927_s25 + $0x530] sm:$0xff]  ;;  %6247 = vmatpush.msrb.mxu1 %v7760_v60  ;;  %v7779_v60 = vld [vmem:[%s13927_s25 + $0x7c8] sm:$0xff] }
0x11d0   :  { %5791 = vmatpush.msra.mxu3 %v7648_v59  ;;  %v7753_v59 = vld [vmem:[%s13927_s25 + $0x6f8] sm:$0xff] }
0x11d1   :  { %7570 = vmatmul.msk.f32.gmra.mxu3 %vm729_vm7, %v7538_v46  ;;  %5877 = vmatmul.f32.vlgmr.msra.gmra.mxu1 %v12240_v55 }
0x11d2   :  { %5792 = vmatpush.msra.mxu3 %v7646_v3  ;;  %6248 = vmatpush.msrb.mxu1 %v7758_v34  ;;  %v7751_v3 = vld [vmem:[%s13927_s25 + $0x6e8] sm:$0xff]  ;;  %v7777_v34 = vld [vmem:[%s13927_s25 + $0x7b8] sm:$0xff] }
0x11d3   :  { %v12866_v21 = vpop.f32.mrf.mxu0 }
0x11d4   :  { %13976 = vst [vmem:[#allocation5_spill] sm:$0xff] %v12866_v21  ;;  %5793 = vmatpush.msra.mxu3 %v7644_v41  ;;  %6249 = vmatpush.msrb.mxu1 %v7756_v43  ;;  %v7773_v43 = vld [vmem:[%s13927_s25 + $0x798] sm:$0xff] }
0x11d6   :  { %v12871_v20 = vpop.f32.mrf.mxu1  ;;  %5836 = vmatmul.f32.vlgmr.msra.gmra.mxu0 %v12238_v5  ;;  %5794 = vmatpush.msra.mxu3 %v7642_v52  ;;  %v7745_v52 = vld [vmem:[%s13927_s25 + $0x6b8] sm:$0xff] }
0x11d7   :  { %7554 = vmatmul.msk.f32.gmra.mxu2 %vm729_vm7, %v7538_v46  ;;  %v7734_v46 = vld [vmem:[%s13927_s25 + $0x660] sm:$0xff]  ;;  %6250 = vmatpush.msrb.mxu1 %v7754_v39 }
0x11d8   :  { %6203 = vmatpush.msrb.mxu0 %v7734_v46 }
0x11d9   :  { %7571 = vmatmul.msk.f32.gmra.mxu3 %vm729_vm7, %v7539_v17  ;;  %5880 = vmatmul.f32.gmra.mxu1 %v12290_v33 }
0x11da   :  { %6317 = vmatpush.msra.mxu1 %v7785_v7 }
0x11db   :  { %v12901_v37 = vpop.f32.mrf.mxu0 }
0x11dc   :  { %13977 = vst [vmem:[#allocation2_spill] sm:$0xff] %v12901_v37  ;;  %6318 = vmatpush.msra.mxu1 %v7783_v61 }
0x11de   :  { %v12909_v50 = vpop.f32.mrf.mxu1  ;;  %5839 = vmatmul.f32.gmra.mxu0 %v12288_v63  ;;  %6319 = vmatpush.msra.mxu1 %v7781_v19  ;;  %v7761_v19 = vld [vmem:[%s13927_s25 + $0x738] sm:$0xff] }
0x11df   :  { %7555 = vmatmul.msk.f32.gmra.mxu2 %vm729_vm7, %v7539_v17  ;;  %v7732_v17 = vld [vmem:[%s13927_s25 + $0x650] sm:$0xff] }
0x11e0   :  { %6204 = vmatpush.msrb.mxu0 %v7732_v17  ;;  %6320 = vmatpush.msra.mxu1 %v7779_v60  ;;  %v7749_v17 = vld [vmem:[%s13927_s25 + $0x6d8] sm:$0xff] }
0x11e1   :  { %7572 = vmatmul.msk.f32.gmra.mxu3 %vm729_vm7, %v7540_v10  ;;  %5883 = vmatmul.f32.gmra.mxu1 %v12340_v12  ;;  %v7737_v60 = vld [vmem:[%s13927_s25 + $0x678] sm:$0xff] }
0x11e2   :  { %6205 = vmatpush.msrb.mxu0 %v7730_v15  ;;  %6321 = vmatpush.msra.mxu1 %v7777_v34  ;;  %v7747_v15 = vld [vmem:[%s13927_s25 + $0x6c8] sm:$0xff] }
0x11e3   :  { %v12945_v14 = vpop.f32.mrf.mxu0 }
0x11e4   :  { %13978 = vst [vmem:[#allocation4_spill] sm:$0xff] %v12945_v14  ;;  %6322 = vmatpush.msra.mxu1 %v7775_v40  ;;  %v7735_v40 = vld [vmem:[%s13927_s25 + $0x668] sm:$0xff] }
0x11e6   :  { %v12956_v30 = vpop.f32.mrf.mxu1  ;;  %5842 = vmatmul.f32.gmra.mxu0 %v12338_v42  ;;  %6323 = vmatpush.msra.mxu1 %v7773_v43  ;;  %v7755_v43 = vld [vmem:[%s13927_s25 + $0x708] sm:$0xff] }
0x11e7   :  { %7556 = vmatmul.msk.f32.gmra.mxu2 %vm729_vm7, %v7540_v10  ;;  %v7728_v10 = vld [vmem:[%s13927_s25 + $0x630] sm:$0xff] }
0x11e8   :  { %6206 = vmatpush.msrb.mxu0 %v7728_v10  ;;  %6324 = vmatpush.msra.mxu1 %v7771_v18  ;;  %v7769_v10 = vld [vmem:[%s13927_s25 + $0x778] sm:$0xff] }
0x11e9   :  { %7573 = vmatmul.msk.f32.gmra.mxu3 %vm729_vm7, %v7541_v28  ;;  %5886 = vmatmul.f32.gmra.mxu1 %v12390_v0 }
0x11ea   :  { %6207 = vmatpush.msrb.mxu0 %v7726_v26  ;;  %6325 = vmatpush.msra.mxu1 %v7769_v10  ;;  %v7767_v26 = vld [vmem:[%s13927_s25 + $0x768] sm:$0xff] }
0x11eb   :  { %v12995_v27 = vpop.f32.mrf.mxu0 }
0x11ec   :  { %13979 = vst [vmem:[#allocation3_spill] sm:$0xff] %v12995_v27  ;;  %6208 = vmatpush.msrb.mxu0 %v7724_v32  ;;  %6326 = vmatpush.msra.mxu1 %v7767_v26  ;;  %v7765_v32 = vld [vmem:[%s13927_s25 + $0x758] sm:$0xff]  ;;  %v13404_v27 = vld [vmem:[%s13930_s26 + $0x130] sm:$0xff] }
0x11ee   :  { %v13009_v54 = vpop.f32.mrf.mxu1  ;;  %5845 = vmatmul.f32.gmra.mxu0 %v12388_v6  ;;  %6327 = vmatpush.msra.mxu1 %v7765_v32  ;;  %v7729_v32 = vld [vmem:[%s13927_s25 + $0x638] sm:$0xff] }
0x11ef   :  { %7557 = vmatmul.msk.f32.gmra.mxu2 %vm729_vm7, %v7541_v28  ;;  %6209 = vmatpush.msrb.mxu0 %v7722_v2  ;;  %v7545_v28 = vld [vmem:[%s13930_s26 + $0xf8] sm:$0xff] }
0x11f0   :  { %v7741_v2 = vld [vmem:[%s13927_s25 + $0x698] sm:$0xff] }
0x11f1   :  { %7574 = vmatmul.msk.f32.gmra.mxu3 %vm729_vm7, %v7542_v16  ;;  %5889 = vmatmul.f32.gmra.mxu1 %v12440_v22 }
0x11f2   :  { %6276 = vmatpush.msra.mxu0 %v7753_v59 }
0x11f3   :  { %v13042_v9 = vpop.f32.mrf.mxu0 }
0x11f4   :  { %13980 = vst [vmem:[#allocation6_spill] sm:$0xff] %v13042_v9  ;;  %6277 = vmatpush.msra.mxu0 %v7751_v3  ;;  %v7759_v3 = vld [vmem:[%s13927_s25 + $0x728] sm:$0xff] }
0x11f6   :  { %v13053_v47 = vpop.f32.mrf.mxu1  ;;  %5848 = vmatmul.f32.gmra.mxu0 %v12438_v45 }
0x11f7   :  { %7558 = vmatmul.msk.f32.gmra.mxu2 %vm729_vm7, %v7542_v16  ;;  %6278 = vmatpush.msra.mxu0 %v7749_v17  ;;  %v7757_v17 = vld [vmem:[%s13927_s25 + $0x718] sm:$0xff] }
0x11f9   :  { %7575 = vmatmul.msk.f32.gmra.mxu3 %vm729_vm7, %v7543_v13  ;;  %5892 = vmatmul.f32.gmra.mxu1 %v12490_v57 }
0x11fa   :  { %6279 = vmatpush.msra.mxu0 %v7747_v15  ;;  %v7733_v15 = vld [vmem:[%s13927_s25 + $0x658] sm:$0xff] }
0x11fb   :  { %v13071_v56 = vpop.f32.mrf.mxu0 }
0x11fc   :  { %13981 = vst [vmem:[#allocation7_spill] sm:$0xff] %v13071_v56  ;;  %6280 = vmatpush.msra.mxu0 %v7745_v52 }
0x11fe   :  { %v13076_v58 = vpop.f32.mrf.mxu1  ;;  %5851 = vmatmul.f32.gmra.mxu0 %v12488_v48 }
0x11ff   :  { %7559 = vmatmul.msk.f32.gmra.mxu2 %vm729_vm7, %v7543_v13  ;;  %v7743_v13 = vld [vmem:[%s13927_s25 + $0x6a8] sm:$0xff] }
0x1200   :  { %6281 = vmatpush.msra.mxu0 %v7743_v13  ;;  %v7731_v13 = vld [vmem:[%s13927_s25 + $0x648] sm:$0xff] }
0x1201   :  { %7576 = vmatmul.msk.f32.gmra.mxu3 %vm729_vm7, %v7544_v35  ;;  %5895 = vmatmul.f32.gmra.mxu1 %v12516_v38 }
0x1202   :  { %6282 = vmatpush.msra.mxu0 %v7741_v2  ;;  %v7727_v2 = vld [vmem:[%s13927_s25 + $0x628] sm:$0xff] }
0x1203   :  { %v13085_v62 = vpop.f32.mrf.mxu0 }
0x1204   :  { %13982 = vst [vmem:[#allocation8_spill] sm:$0xff] %v13085_v62 }
0x1206   :  { %v13087_v49 = vpop.f32.mrf.mxu1  ;;  %5854 = vmatmul.f32.gmra.mxu0 %v12514_v1 }
0x1207   :  { %7560 = vmatmul.msk.f32.gmra.mxu2 %vm729_vm7, %v7544_v35  ;;  %v7763_v35 = vld [vmem:[%s13927_s25 + $0x748] sm:$0xff] }
0x1208   :  { %6328 = vmatpush.msra.mxu1 %v7763_v35 }
0x1209   :  { %7577 = vmatmul.msk.f32.gmra.mxu3 %vm729_vm7, %v7545_v28  ;;  %5898 = vmatmul.f32.gmra.mxu1 %v12530_v31 }
0x120a   :  { %6329 = vmatpush.msra.mxu1 %v7761_v19 }
0x120b   :  { %v13096_v53 = vpop.f32.mrf.mxu0 }
0x120c   :  { %13983 = vst [vmem:[#allocation9_spill] sm:$0xff] %v13096_v53  ;;  %6330 = vmatpush.msra.mxu1 %v7759_v3 }
0x120e   :  { %v13098_v25 = vpop.f32.mrf.mxu1  ;;  %5857 = vmatmul.f32.gmra.mxu0 %v12528_v36  ;;  %6331 = vmatpush.msra.mxu1 %v7757_v17  ;;  %v7723_v17 = vld [vmem:[%s13927_s25 + $0x608] sm:$0xff] }
0x120f   :  { %7561 = vmatmul.msk.f32.gmra.mxu2 %vm729_vm7, %v7545_v28  ;;  %v7739_v28 = vld [vmem:[%s13927_s25 + $0x688] sm:$0xff] }
0x1210   :  { %6283 = vmatpush.msra.mxu0 %v7739_v28  ;;  %6332 = vmatpush.msra.mxu1 %v7755_v43 }
0x1211   :  { %5795 = vmatmul.f32.vlgmr.msra.gmra.mxu3 %v12240_v55  ;;  %6251 = vmatmul.f32.vlgmr.msrb.gmra.mxu1 %v12240_v55 }
0x1212   :  { %6284 = vmatpush.msra.mxu0 %v7737_v60  ;;  %v7725_v60 = vld [vmem:[%s13927_s25 + $0x618] sm:$0xff] }
0x1213   :  { %v13104_v24 = vpop.f32.mrf.mxu0 }
0x1214   :  { %13984 = vst [vmem:[#allocation10_spill] sm:$0xff] %v13104_v24  ;;  %v13109_v11 = vpop.f32.mrf.mxu3  ;;  %6285 = vmatpush.msra.mxu0 %v7735_v40 }
0x1216   :  { %v13114_v4 = vpop.f32.mrf.mxu1  ;;  %6210 = vmatmul.f32.vlgmr.msrb.gmra.mxu0 %v12238_v5 }
0x1217   :  { %13985 = vst [vmem:[#allocation11_spill] sm:$0xff] %v13114_v4  ;;  %5754 = vmatmul.f32.vlgmr.msra.gmra.mxu2 %v12238_v5  ;;  %6286 = vmatpush.msra.mxu0 %v7733_v15 }
0x1219   :  { %5798 = vmatmul.f32.gmra.mxu3 %v12290_v33  ;;  %6254 = vmatmul.f32.gmra.mxu1 %v12290_v33 }
0x121a   :  { %v13129_v44 = vpop.f32.mrf.mxu2  ;;  %6287 = vmatpush.msra.mxu0 %v7731_v13 }
0x121b   :  { %13986 = vst [vmem:[#allocation12_spill] sm:$0xff] %v13129_v44  ;;  %v13131_v46 = vpop.f32.mrf.mxu0  ;;  %v13422_v44 = vld [vmem:[%s13930_s26 + $0x140] sm:$0xff] }
0x121c   :  { %13987 = vst [vmem:[#allocation13_spill] sm:$0xff] %v13131_v46  ;;  %v13139_v16 = vpop.f32.mrf.mxu3  ;;  %6288 = vmatpush.msra.mxu0 %v7729_v32 }
0x121e   :  { %v13147_v41 = vpop.f32.mrf.mxu1  ;;  %6213 = vmatmul.f32.gmra.mxu0 %v12288_v63 }
0x121f   :  { %13988 = vst [vmem:[#allocation14_spill] sm:$0xff] %v13147_v41  ;;  %5757 = vmatmul.f32.gmra.mxu2 %v12288_v63  ;;  %6289 = vmatpush.msra.mxu0 %v7727_v2 }
0x1221   :  { %5801 = vmatmul.f32.gmra.mxu3 %v12340_v12  ;;  %6257 = vmatmul.f32.gmra.mxu1 %v12340_v12 }
0x1222   :  { %v13165_v39 = vpop.f32.mrf.mxu2  ;;  %6290 = vmatpush.msra.mxu0 %v7725_v60 }
0x1223   :  { %13989 = vst [vmem:[#allocation15_spill] sm:$0xff] %v13165_v39  ;;  %v13167_v8 = vpop.f32.mrf.mxu0 }
0x1224   :  { %13990 = vst [vmem:[#allocation16_spill] sm:$0xff] %v13167_v8  ;;  %v13172_v29 = vpop.f32.mrf.mxu3  ;;  %6291 = vmatpush.msra.mxu0 %v7723_v17 }
0x1226   :  { %v13180_v51 = vpop.f32.mrf.mxu1  ;;  %6216 = vmatmul.f32.gmra.mxu0 %v12338_v42 }
0x1227   :  { %13991 = vst [vmem:[#allocation17_spill] sm:$0xff] %v13180_v51  ;;  %5760 = vmatmul.f32.gmra.mxu2 %v12338_v42 }
0x1229   :  { %5804 = vmatmul.f32.gmra.mxu3 %v12390_v0  ;;  %6260 = vmatmul.f32.gmra.mxu1 %v12390_v0 }
0x122a   :  { %v13198_v7 = vpop.f32.mrf.mxu2 }
0x122b   :  { %13992 = vst [vmem:[#allocation18_spill] sm:$0xff] %v13198_v7  ;;  %v13200_v61 = vpop.f32.mrf.mxu0  ;;  %v13411_v7 = vld [vmem:[%s13930_s26 + $0x138] sm:$0xff] }
0x122c   :  { %13993 = vst [vmem:[#allocation19_spill] sm:$0xff] %v13200_v61  ;;  %v13205_v59 = vpop.f32.mrf.mxu3 }
0x122e   :  { %v13213_v34 = vpop.f32.mrf.mxu1  ;;  %6219 = vmatmul.f32.gmra.mxu0 %v12388_v6 }
0x122f   :  { %13994 = vst [vmem:[#allocation20_spill] sm:$0xff] %v13213_v34  ;;  %5763 = vmatmul.f32.gmra.mxu2 %v12388_v6 }
0x1231   :  { %5807 = vmatmul.f32.gmra.mxu3 %v12440_v22  ;;  %6263 = vmatmul.f32.gmra.mxu1 %v12440_v22 }
0x1232   :  { %v13231_v18 = vpop.f32.mrf.mxu2 }
0x1233   :  { %13995 = vst [vmem:[#allocation21_spill] sm:$0xff] %v13231_v18  ;;  %v13233_v52 = vpop.f32.mrf.mxu0 }
0x1234   :  { %13996 = vst [vmem:[#allocation22_spill] sm:$0xff] %v13233_v52  ;;  %v13235_v10 = vpop.f32.mrf.mxu3 }
0x1236   :  { %v13240_v26 = vpop.f32.mrf.mxu1  ;;  %6222 = vmatmul.f32.gmra.mxu0 %v12438_v45 }
0x1237   :  { %13997 = vst [vmem:[#allocation23_spill] sm:$0xff] %v13240_v26  ;;  %5766 = vmatmul.f32.gmra.mxu2 %v12438_v45 }
0x1239   :  { %5810 = vmatmul.f32.gmra.mxu3 %v12490_v57  ;;  %6266 = vmatmul.f32.gmra.mxu1 %v12490_v57 }
0x123a   :  { %v13252_v35 = vpop.f32.mrf.mxu2 }
0x123b   :  { %13998 = vst [vmem:[#allocation24_spill] sm:$0xff] %v13252_v35  ;;  %v13254_v28 = vpop.f32.mrf.mxu0 }
0x123c   :  { %13999 = vst [vmem:[#allocation25_spill] sm:$0xff] %v13254_v28  ;;  %v13256_v19 = vpop.f32.mrf.mxu3 }
0x123e   :  { %v13261_v3 = vpop.f32.mrf.mxu1  ;;  %6225 = vmatmul.f32.gmra.mxu0 %v12488_v48 }
0x123f   :  { %14000 = vst [vmem:[#allocation26_spill] sm:$0xff] %v13261_v3  ;;  %5769 = vmatmul.f32.gmra.mxu2 %v12488_v48 }
0x1241   :  { %5813 = vmatmul.f32.gmra.mxu3 %v12516_v38  ;;  %6269 = vmatmul.f32.gmra.mxu1 %v12516_v38 }
0x1242   :  { %v13270_v40 = vpop.f32.mrf.mxu2 }
0x1243   :  { %14001 = vst [vmem:[#allocation27_spill] sm:$0xff] %v13270_v40  ;;  %v13272_v43 = vpop.f32.mrf.mxu0 }
0x1244   :  { %14002 = vst [vmem:[#allocation28_spill] sm:$0xff] %v13272_v43  ;;  %v13274_v15 = vpop.f32.mrf.mxu3 }
0x1246   :  { %v13276_v13 = vpop.f32.mrf.mxu1  ;;  %6228 = vmatmul.f32.gmra.mxu0 %v12514_v1 }
0x1247   :  { %14003 = vst [vmem:[#allocation29_spill] sm:$0xff] %v13276_v13  ;;  %5772 = vmatmul.f32.gmra.mxu2 %v12514_v1 }
0x1249   :  { %5816 = vmatmul.f32.gmra.mxu3 %v12530_v31  ;;  %6272 = vmatmul.f32.gmra.mxu1 %v12530_v31 }
0x124a   :  { %v13282_v32 = vpop.f32.mrf.mxu2 }
0x124b   :  { %14004 = vst [vmem:[#allocation30_spill] sm:$0xff] %v13282_v32  ;;  %v13284_v2 = vpop.f32.mrf.mxu0 }
0x124c   :  { %14005 = vst [vmem:[#allocation31_spill] sm:$0xff] %v13284_v2  ;;  %v13286_v60 = vpop.f32.mrf.mxu3 }
0x124e   :  { %v5878_v17 = vpop.f32.mrf.mxu1  ;;  %6231 = vmatmul.f32.gmra.mxu0 %v12528_v36 }
0x124f   :  { %5775 = vmatmul.f32.gmra.mxu2 %v12528_v36 }
0x1251   :  { %6333 = vmatmul.f32.vlgmr.msra.gmra.mxu1 %v12240_v55 }
0x1252   :  { %v13291_v43 = vpop.f32.mrf.mxu2 }
0x1253   :  { %14006 = vst [vmem:[#allocation32_spill] sm:$0xff] %v13291_v43  ;;  %v5837_v28 = vpop.f32.mrf.mxu0 }
0x1254   :  { %v13293_v52 = vpop.f32.mrf.mxu3  ;;  %v13295_v61 = vadd.f32 %v5878_v17, %v5837_v28 }
0x1256   :  { %v5881_v8 = vpop.f32.mrf.mxu1  ;;  %6292 = vmatmul.f32.vlgmr.msra.gmra.mxu0 %v12238_v5 }
0x1259   :  { %6336 = vmatmul.f32.gmra.mxu1 %v12290_v33 }
0x125a   :  { %v13299_v2 = vpop.f32.mrf.mxu2 }
0x125b   :  { %14007 = vst [vmem:[#allocation33_spill] sm:$0xff] %v13299_v2  ;;  %v5840_v46 = vpop.f32.mrf.mxu0 }
0x125c   :  { %v13301_v24 = vpop.f32.mrf.mxu3 }
0x125d   :  { %14008 = vst [vmem:[#allocation34_spill] sm:$0xff] %v13301_v24 }
0x125e   :  { %v5884_v53 = vpop.f32.mrf.mxu1  ;;  %6295 = vmatmul.f32.gmra.mxu0 %v12288_v63 }
0x1261   :  { %6339 = vmatmul.f32.gmra.mxu1 %v12340_v12 }
0x1262   :  { %v13305_v55 = vpop.f32.mrf.mxu2 }
0x1263   :  { %14009 = vst [vmem:[#allocation35_spill] sm:$0xff] %v13305_v55  ;;  %v5843_v43 = vpop.f32.mrf.mxu0 }
0x1264   :  { %v13307_v28 = vpop.f32.mrf.mxu3 }
0x1265   :  { %14010 = vst [vmem:[#allocation36_spill] sm:$0xff] %v13307_v28 }
0x1266   :  { %v5887_v17 = vpop.f32.mrf.mxu1  ;;  %6298 = vmatmul.f32.gmra.mxu0 %v12338_v42 }
0x1269   :  { %6342 = vmatmul.f32.gmra.mxu1 %v12390_v0 }
0x126a   :  { %v13311_v5 = vpop.f32.mrf.mxu2 }
0x126b   :  { %14011 = vst [vmem:[#allocation37_spill] sm:$0xff] %v13311_v5  ;;  %v5846_v33 = vpop.f32.mrf.mxu0 }
0x126c   :  { %v13313_v2 = vpop.f32.mrf.mxu3  ;;  %v5888_v26 = vadd.f32 %v5887_v17, %v5846_v33 }
0x126d   :  { %14012 = vst [vmem:[#allocation38_spill] sm:$0xff] %v13313_v2 }
0x126e   :  { %v5890_v13 = vpop.f32.mrf.mxu1  ;;  %6301 = vmatmul.f32.gmra.mxu0 %v12388_v6 }
0x1271   :  { %6345 = vmatmul.f32.gmra.mxu1 %v12440_v22 }
0x1272   :  { %v13317_v63 = vpop.f32.mrf.mxu2 }
0x1273   :  { %14013 = vst [vmem:[#allocation39_spill] sm:$0xff] %v13317_v63  ;;  %v5849_v12 = vpop.f32.mrf.mxu0 }
0x1274   :  { %v13319_v55 = vpop.f32.mrf.mxu3 }
0x1275   :  { %14014 = vst [vmem:[#allocation40_spill] sm:$0xff] %v13319_v55 }
0x1276   :  { %v5893_v62 = vpop.f32.mrf.mxu1  ;;  %6304 = vmatmul.f32.gmra.mxu0 %v12438_v45 }
0x1279   :  { %6348 = vmatmul.f32.gmra.mxu1 %v12490_v57 }
0x127a   :  { %v13323_v42 = vpop.f32.mrf.mxu2 }
0x127b   :  { %14015 = vst [vmem:[#allocation41_spill] sm:$0xff] %v13323_v42  ;;  %v5852_v0 = vpop.f32.mrf.mxu0 }
0x127c   :  { %v13325_v5 = vpop.f32.mrf.mxu3 }
0x127d   :  { %14016 = vst [vmem:[#allocation42_spill] sm:$0xff] %v13325_v5  ;;  %v13397_v5 = vld [vmem:[%s13930_s26 + $0x128] sm:$0xff] }
0x127e   :  { %v5896_v32 = vpop.f32.mrf.mxu1  ;;  %6307 = vmatmul.f32.gmra.mxu0 %v12488_v48 }
0x1281   :  { %6351 = vmatmul.f32.gmra.mxu1 %v12516_v38  ;;  %v5894_v38 = vadd.f32 %v5893_v62, %v5852_v0 }
0x1282   :  { %v13329_v6 = vpop.f32.mrf.mxu2 }
0x1283   :  { %14017 = vst [vmem:[#allocation43_spill] sm:$0xff] %v13329_v6  ;;  %v5855_v22 = vpop.f32.mrf.mxu0  ;;  %v5891_v6 = vadd.f32 %v5890_v13, %v5849_v12  ;;  %v13374_v12 = vld [vmem:[%s13930_s26 + $0x110] sm:$0xff] }
0x1284   :  { %v13331_v63 = vpop.f32.mrf.mxu3  ;;  %v5897_v40 = vadd.f32 %v5896_v32, %v5855_v22  ;;  %v5882_v32 = vadd.f32 %v5881_v8, %v5840_v46  ;;  %v13363_v8 = vld [vmem:[%s13930_s26 + $0x108] sm:$0xff] }
0x1285   :  { %14018 = vst [vmem:[#allocation44_spill] sm:$0xff] %v13331_v63 }
0x1286   :  { %v5899_v3 = vpop.f32.mrf.mxu1  ;;  %6310 = vmatmul.f32.gmra.mxu0 %v12514_v1 }
0x1289   :  { %6354 = vmatmul.f32.gmra.mxu1 %v12530_v31 }
0x128a   :  { %v13335_v45 = vpop.f32.mrf.mxu2 }
0x128b   :  { %14019 = vst [vmem:[#allocation45_spill] sm:$0xff] %v13335_v45  ;;  %v5858_v57 = vpop.f32.mrf.mxu0 }
0x128c   :  { %v13337_v42 = vpop.f32.mrf.mxu3  ;;  %v5900_v56 = vadd.f32 %v5899_v3, %v5858_v57  ;;  %v13383_v57 = vld [vmem:[%s13930_s26 + $0x118] sm:$0xff] }
0x128d   :  { %14020 = vst [vmem:[#allocation46_spill] sm:$0xff] %v13337_v42  ;;  %v5885_v42 = vadd.f32 %v5884_v53, %v5843_v43 }
0x128e   :  { %v6252_v48 = vpop.f32.mrf.mxu1  ;;  %6040 = vmatpush.msrb.mxu3 %v5900_v56  ;;  %6313 = vmatmul.f32.gmra.mxu0 %v12528_v36  ;;  %v13351_v36 = vld [vmem:[%s13930_s26 + $0x100] sm:$0xff] }
0x1290   :  { %6041 = vmatpush.msrb.mxu3 %v5897_v40 }
0x1292   :  { %v13340_v63 = vpop.f32.mrf.mxu2  ;;  %6042 = vmatpush.msrb.mxu3 %v5894_v38 }
0x1293   :  { %14021 = vst [vmem:[#allocation47_spill] sm:$0xff] %v13340_v63  ;;  %v6211_v1 = vpop.f32.mrf.mxu0 }
0x1294   :  { %v13342_v31 = vpop.f32.mrf.mxu3  ;;  %v13344_v45 = vadd.f32 %v6252_v48, %v6211_v1  ;;  %6043 = vmatpush.msrb.mxu3 %v5891_v6 }
0x1296   :  { %v6255_v3 = vpop.f32.mrf.mxu1  ;;  %6044 = vmatpush.msrb.mxu3 %v5888_v26 }
0x1298   :  { %6045 = vmatpush.msrb.mxu3 %v5885_v42 }
0x129a   :  { %v13346_v56 = vpop.f32.mrf.mxu2  ;;  %6046 = vmatpush.msrb.mxu3 %v5882_v32  ;;  %v13390_v32 = vld [vmem:[%s13930_s26 + $0x120] sm:$0xff] }
0x129b   :  { %v6214_v62 = vpop.f32.mrf.mxu0 }
0x129c   :  { %v13353_v40 = vpop.f32.mrf.mxu3  ;;  %v13355_v13 = vadd.f32 %v6255_v3, %v6214_v62  ;;  %6047 = vmatpush.msrb.mxu3 %v13295_v61 }
0x129d   :  { %7706 = vmatmul.msk.f32.vlgmr.msrb.gmra.mxu3 %vm729_vm7, %v13351_v36 }
0x129e   :  { %v6258_v53 = vpop.f32.mrf.mxu1 }
0x12a2   :  { %v5758_v46 = vpop.f32.mrf.mxu2 }
0x12a3   :  { %v6217_v26 = vpop.f32.mrf.mxu0 }
0x12a4   :  { %v5802_v43 = vpop.f32.mrf.mxu3  ;;  %v13365_v17 = vadd.f32 %v6258_v53, %v6217_v26 }
0x12a5   :  { %7707 = vmatmul.msk.f32.gmra.mxu3 %vm729_vm7, %v13363_v8 }
0x12a6   :  { %v13369_v33 = vpop.f32.mrf.mxu1 }
0x12aa   :  { %v5761_v61 = vpop.f32.mrf.mxu2 }
0x12ab   :  { %v13376_v42 = vpop.f32.mrf.mxu0 }
0x12ac   :  { %v5805_v0 = vpop.f32.mrf.mxu3 }
0x12ad   :  { %7708 = vmatmul.msk.f32.gmra.mxu3 %vm729_vm7, %v13374_v12 }
0x12ae   :  { %v6264_v6 = vpop.f32.mrf.mxu1 }
0x12b2   :  { %v5764_v22 = vpop.f32.mrf.mxu2 }
0x12b3   :  { %v6223_v48 = vpop.f32.mrf.mxu0 }
0x12b4   :  { %v5808_v38 = vpop.f32.mrf.mxu3 }
0x12b5   :  { %7709 = vmatmul.msk.f32.gmra.mxu3 %vm729_vm7, %v13383_v57 }
0x12b6   :  { %v6267_v1 = vpop.f32.mrf.mxu1 }
0x12ba   :  { %v5767_v3 = vpop.f32.mrf.mxu2 }
0x12bb   :  { %v6226_v62 = vpop.f32.mrf.mxu0  ;;  %v5809_v21 = vadd.f32 %v5808_v38, %v5767_v3  ;;  %v7786_v3 = vld [vmem:[%s13930_s26 + $0x180] sm:$0xff] }
0x12bc   :  { %v5811_v53 = vpop.f32.mrf.mxu3 }
0x12bd   :  { %7710 = vmatmul.msk.f32.gmra.mxu3 %vm729_vm7, %v13390_v32 }
0x12be   :  { %v6270_v26 = vpop.f32.mrf.mxu1 }
0x12c2   :  { %v5770_v63 = vpop.f32.mrf.mxu2 }
0x12c3   :  { %v6229_v9 = vpop.f32.mrf.mxu0  ;;  %v5812_v24 = vadd.f32 %v5811_v53, %v5770_v63 }
0x12c4   :  { %v5814_v34 = vpop.f32.mrf.mxu3 }
0x12c5   :  { %7711 = vmatmul.msk.f32.gmra.mxu3 %vm729_vm7, %v13397_v5 }
0x12c6   :  { %v6273_v35 = vpop.f32.mrf.mxu1 }
0x12ca   :  { %v5773_v55 = vpop.f32.mrf.mxu2 }
0x12cb   :  { %v6232_v18 = vpop.f32.mrf.mxu0  ;;  %v5815_v39 = vadd.f32 %v5814_v34, %v5773_v55  ;;  %v5803_v34 = vadd.f32 %v5802_v43, %v5761_v61  ;;  %v13466_v43 = vld [vmem:[%s13930_s26 + $0x160] sm:$0xff]  ;;  %v13484_v61 = vld [vmem:[%s13930_s26 + $0x170] sm:$0xff] }
0x12cc   :  { %v5817_v2 = vpop.f32.mrf.mxu3 }
0x12cd   :  { %7712 = vmatmul.msk.f32.gmra.mxu3 %vm729_vm7, %v13404_v27 }
0x12ce   :  { %v6334_v51 = vpop.f32.mrf.mxu1 }
0x12d2   :  { %v5776_v14 = vpop.f32.mrf.mxu2 }
0x12d3   :  { %v5818_v41 = vadd.f32 %v5817_v2, %v5776_v14  ;;  %v6293_v28 = vpop.f32.mrf.mxu0  ;;  %v5806_v14 = vadd.f32 %v5805_v0, %v5764_v22  ;;  %v5800_v2 = vadd.f32 %v13353_v40, %v5758_v46  ;;  %v6268_v40 = vadd.f32 %v6267_v1, %v6226_v62 }
0x12d4   :  { %v13413_v37 = vadd.f32 %v6334_v51, %v6293_v28  ;;  %v6271_v28 = vadd.f32 %v6270_v26, %v6229_v9 }
0x12d5   :  { %5975 = vmatpush.msrb.mxu2 %v5818_v41  ;;  %7713 = vmatmul.msk.f32.gmra.mxu3 %vm729_vm7, %v13411_v7 }
0x12d6   :  { %v13417_v4 = vpop.f32.mrf.mxu1 }
0x12d7   :  { %5976 = vmatpush.msrb.mxu2 %v5815_v39  ;;  %v13434_v39 = vld [vmem:[%s13930_s26 + $0x148] sm:$0xff] }
0x12d9   :  { %5977 = vmatpush.msrb.mxu2 %v5812_v24  ;;  %v5797_v24 = vadd.f32 %v13342_v31, %v13346_v56  ;;  %v6265_v31 = vadd.f32 %v6264_v6, %v6223_v48  ;;  %v13443_v56 = vld [vmem:[%s13930_s26 + $0x150] sm:$0xff]  ;;  %v7689_v48 = vld [vmem:[%s13930_s26 + $0x178] sm:$0xff] }
0x12db   :  { %5978 = vmatpush.msrb.mxu2 %v5809_v21  ;;  %v13424_v51 = vpop.f32.mrf.mxu0  ;;  %v6274_v21 = vadd.f32 %v6273_v35, %v6232_v18  ;;  %v6262_v18 = vadd.f32 %v13369_v33, %v13376_v42 }
0x12dc   :  { %v6338_v1 = vadd.f32 %v13417_v4, %v13424_v51  ;;  %v7787_v4 = vld [vmem:[%s13930_s26 + $0x188] sm:$0xff] }
0x12dd   :  { %5979 = vmatpush.msrb.mxu2 %v5806_v14  ;;  %7714 = vmatmul.msk.f32.gmra.mxu3 %vm729_vm7, %v13422_v44 }
0x12de   :  { %v6340_v41 = vpop.f32.mrf.mxu1 }
0x12df   :  { %5980 = vmatpush.msrb.mxu2 %v5803_v34 }
0x12e1   :  { %5981 = vmatpush.msrb.mxu2 %v5800_v2 }
0x12e3   :  { %5982 = vmatpush.msrb.mxu2 %v5797_v24  ;;  %v6299_v55 = vpop.f32.mrf.mxu0 }
0x12e4   :  { %7690 = vmatmul.msk.f32.vlgmr.msrb.gmra.mxu2 %vm729_vm7, %v13351_v36  ;;  %v13456_v36 = vld [vmem:[%s13930_s26 + $0x158] sm:$0xff] }
0x12e5   :  { %6431 = vmatpush.msra.mxu2 %v6274_v21  ;;  %7715 = vmatmul.msk.f32.gmra.mxu3 %vm729_vm7, %v13434_v39 }
0x12e6   :  { %v6343_v63 = vpop.f32.mrf.mxu1 }
0x12e7   :  { %6432 = vmatpush.msra.mxu2 %v6271_v28 }
0x12e9   :  { %6433 = vmatpush.msra.mxu2 %v6268_v40 }
0x12eb   :  { %6434 = vmatpush.msra.mxu2 %v6265_v31  ;;  %v6302_v35 = vpop.f32.mrf.mxu0  ;;  %v14023_v31 = vld [vmem:[#allocation5_spill] sm:$0xff] }
0x12ec   :  { %7691 = vmatmul.msk.f32.gmra.mxu2 %vm729_vm7, %v13363_v8  ;;  %v6344_v38 = vadd.f32 %v6343_v63, %v6302_v35  ;;  %v14025_v35 = vld [vmem:[#allocation11_spill] sm:$0xff] }
0x12ed   :  { %6435 = vmatpush.msra.mxu2 %v6262_v18  ;;  %7716 = vmatmul.msk.f32.gmra.mxu3 %vm729_vm7, %v13443_v56  ;;  %v14024_v18 = vld [vmem:[#allocation34_spill] sm:$0xff] }
0x12ee   :  { %v6346_v9 = vpop.f32.mrf.mxu1 }
0x12ef   :  { %6436 = vmatpush.msra.mxu2 %v13365_v17  ;;  %v13475_v17 = vld [vmem:[%s13930_s26 + $0x168] sm:$0xff] }
0x12f1   :  { %6437 = vmatpush.msra.mxu2 %v13355_v13 }
0x12f3   :  { %6438 = vmatpush.msra.mxu2 %v13344_v45  ;;  %v6305_v46 = vpop.f32.mrf.mxu0 }
0x12f4   :  { %7692 = vmatmul.msk.f32.gmra.mxu2 %vm729_vm7, %v13374_v12 }
0x12f5   :  { %7717 = vmatmul.msk.f32.gmra.mxu3 %vm729_vm7, %v13456_v36 }
0x12f6   :  { %v6349_v8 = vpop.f32.mrf.mxu1 }
0x12fb   :  { %v6308_v13 = vpop.f32.mrf.mxu0 }
0x12fc   :  { %7693 = vmatmul.msk.f32.gmra.mxu2 %vm729_vm7, %v13383_v57  ;;  %v6350_v22 = vadd.f32 %v6349_v8, %v6308_v13  ;;  %v6347_v57 = vadd.f32 %v6346_v9, %v6305_v46  ;;  %v5653_v9 = vadd.f32 %v14025_v35, %v14024_v18  ;;  %v13625_v8 = vld [vmem:[%s13930_s26 + $0x1d0] sm:$0xff]  ;;  %v14027_v13 = vld [vmem:[#allocation2_spill] sm:$0xff] }
0x12fd   :  { %7718 = vmatmul.msk.f32.gmra.mxu3 %vm729_vm7, %v13466_v43 }
0x12fe   :  { %v6352_v45 = vpop.f32.mrf.mxu1 }
0x1303   :  { %v6311_v33 = vpop.f32.mrf.mxu0 }
0x1304   :  { %7694 = vmatmul.msk.f32.gmra.mxu2 %vm729_vm7, %v13390_v32  ;;  %v6353_v6 = vadd.f32 %v6352_v45, %v6311_v33  ;;  %v14029_v33 = vld [vmem:[#allocation14_spill] sm:$0xff] }
0x1305   :  { %7719 = vmatmul.msk.f32.gmra.mxu3 %vm729_vm7, %v13475_v17 }
0x1306   :  { %v6355_v12 = vpop.f32.mrf.mxu1 }
0x130b   :  { %v6314_v42 = vpop.f32.mrf.mxu0 }
0x130c   :  { %7695 = vmatmul.msk.f32.gmra.mxu2 %vm729_vm7, %v13397_v5  ;;  %v6356_v0 = vadd.f32 %v6355_v12, %v6314_v42  ;;  %v6341_v5 = vadd.f32 %v6340_v41, %v6299_v55 }
0x130d   :  { %7720 = vmatmul.msk.f32.gmra.mxu3 %vm729_vm7, %v13484_v61 }
0x130e   :  { %6496 = vmatpush.msra.mxu3 %v6356_v0 }
0x1310   :  { %6497 = vmatpush.msra.mxu3 %v6353_v6 }
0x1312   :  { %6498 = vmatpush.msra.mxu3 %v6350_v22  ;;  %v13641_v22 = vld [vmem:[%s13930_s26 + $0x1d8] sm:$0xff] }
0x1314   :  { %7696 = vmatmul.msk.f32.gmra.mxu2 %vm729_vm7, %v13404_v27  ;;  %6499 = vmatpush.msra.mxu3 %v6347_v57  ;;  %v5626_v27 = vadd.f32 %v12848_v23, %v13109_v11  ;;  %v7788_v23 = vld [vmem:[%s13930_s26 + $0x190] sm:$0xff]  ;;  %v5632_v11 = vadd.f32 %v12909_v50, %v13172_v29  ;;  %v13545_v50 = vld [vmem:[%s13930_s26 + $0x1a0] sm:$0xff]  ;;  %v5638_v29 = vadd.f32 %v13009_v54, %v13235_v10 }
0x1315   :  { %7721 = vmatmul.msk.f32.gmra.mxu3 %vm729_vm7, %v7689_v48  ;;  %v13571_v54 = vld [vmem:[%s13930_s26 + $0x1b0] sm:$0xff]  ;;  %v5644_v10 = vadd.f32 %v13076_v58, %v13274_v15  ;;  %v13597_v58 = vld [vmem:[%s13930_s26 + $0x1c0] sm:$0xff]  ;;  %v5650_v15 = vadd.f32 %v13098_v25, %v13293_v52 }
0x1316   :  { %6500 = vmatpush.msra.mxu3 %v6344_v38  ;;  %v14030_v57 = vld [vmem:[#allocation18_spill] sm:$0xff] }
0x1318   :  { %6501 = vmatpush.msra.mxu3 %v6341_v5  ;;  %v14032_v5 = vld [vmem:[#allocation38_spill] sm:$0xff] }
0x131a   :  { %6502 = vmatpush.msra.mxu3 %v6338_v1  ;;  %v14033_v1 = vld [vmem:[#allocation17_spill] sm:$0xff] }
0x131c   :  { %7697 = vmatmul.msk.f32.gmra.mxu2 %vm729_vm7, %v13411_v7  ;;  %6503 = vmatpush.msra.mxu3 %v13413_v37  ;;  %v5629_v37 = vadd.f32 %v12871_v20, %v13139_v16  ;;  %v13532_v20 = vld [vmem:[%s13930_s26 + $0x198] sm:$0xff]  ;;  %v5635_v16 = vadd.f32 %v12956_v30, %v13205_v59  ;;  %v13558_v30 = vld [vmem:[%s13930_s26 + $0x1a8] sm:$0xff]  ;;  %v5641_v59 = vadd.f32 %v13053_v47, %v13256_v19 }
0x131d   :  { %7818 = vmatmul.msk.f32.vlgmr.msra.gmra.mxu3 %vm729_vm7, %v7786_v3  ;;  %v13584_v47 = vld [vmem:[%s13930_s26 + $0x1b8] sm:$0xff]  ;;  %v5647_v19 = vadd.f32 %v13087_v49, %v13286_v60  ;;  %v13609_v49 = vld [vmem:[%s13930_s26 + $0x1c8] sm:$0xff]  ;;  %v14022_v60 = vld [vmem:[#allocation12_spill] sm:$0xff] }
0x1320   :  { %v6049_v32 = vpop.f32.mrf.mxu3 }
0x1321   :  { %v13507_v62 = vadd.f32 %v6049_v32, %v5626_v27 }
0x1324   :  { %7698 = vmatmul.msk.f32.gmra.mxu2 %vm729_vm7, %v13422_v44 }
0x1325   :  { %7819 = vmatmul.msk.f32.gmra.mxu3 %vm729_vm7, %v7787_v4 }
0x1328   :  { %v6052_v7 = vpop.f32.mrf.mxu3 }
0x1329   :  { %v13517_v53 = vadd.f32 %v6052_v7, %v5629_v37  ;;  %v13657_v7 = vld [vmem:[%s13930_s26 + $0x1e0] sm:$0xff] }
0x132c   :  { %7699 = vmatmul.msk.f32.gmra.mxu2 %vm729_vm7, %v13434_v39 }
0x132d   :  { %7820 = vmatmul.msk.f32.gmra.mxu3 %vm729_vm7, %v7788_v23 }
0x1330   :  { %v6055_v44 = vpop.f32.mrf.mxu3 }
0x1331   :  { %v13527_v26 = vadd.f32 %v6055_v44, %v5632_v11  ;;  %v14035_v11 = vld [vmem:[#allocation3_spill] sm:$0xff] }
0x1334   :  { %7700 = vmatmul.msk.f32.gmra.mxu2 %vm729_vm7, %v13443_v56  ;;  %v5561_v56 = vadd.f32 %v14023_v31, %v14022_v60 }
0x1335   :  { %7821 = vmatmul.msk.f32.gmra.mxu3 %vm729_vm7, %v13532_v20 }
0x1338   :  { %v6058_v14 = vpop.f32.mrf.mxu3 }
0x1339   :  { %v13540_v51 = vadd.f32 %v6058_v14, %v5635_v16  ;;  %v14036_v16 = vld [vmem:[#allocation40_spill] sm:$0xff] }
0x133a   :  { %v14037_v14 = vld [vmem:[#allocation20_spill] sm:$0xff] }
0x133c   :  { %7701 = vmatmul.msk.f32.gmra.mxu2 %vm729_vm7, %v13456_v36 }
0x133d   :  { %7822 = vmatmul.msk.f32.gmra.mxu3 %vm729_vm7, %v13545_v50 }
0x1340   :  { %v6061_v34 = vpop.f32.mrf.mxu3 }
0x1341   :  { %v13553_v41 = vadd.f32 %v6061_v34, %v5638_v29  ;;  %v5662_v29 = vadd.f32 %v14037_v14, %v14036_v16 }
0x1344   :  { %7702 = vmatmul.msk.f32.gmra.mxu2 %vm729_vm7, %v13466_v43  ;;  %v14026_v43 = vld [vmem:[#allocation15_spill] sm:$0xff] }
0x1345   :  { %7823 = vmatmul.msk.f32.gmra.mxu3 %vm729_vm7, %v13558_v30  ;;  %v5564_v45 = vadd.f32 %v14027_v13, %v14026_v43  ;;  %v14044_v43 = vld [vmem:[#allocation44_spill] sm:$0xff]  ;;  %v14045_v13 = vld [vmem:[#allocation26_spill] sm:$0xff] }
0x1348   :  { %v6064_v2 = vpop.f32.mrf.mxu3 }
0x1349   :  { %v13566_v24 = vadd.f32 %v6064_v2, %v5641_v59 }
0x134c   :  { %7703 = vmatmul.msk.f32.gmra.mxu2 %vm729_vm7, %v13475_v17  ;;  %v14028_v17 = vld [vmem:[#allocation36_spill] sm:$0xff] }
0x134d   :  { %7824 = vmatmul.msk.f32.gmra.mxu3 %vm729_vm7, %v13571_v54 }
0x1350   :  { %v6067_v39 = vpop.f32.mrf.mxu3 }
0x1351   :  { %v13579_v21 = vadd.f32 %v6067_v39, %v5644_v10  ;;  %v13674_v39 = vld [vmem:[%s13930_s26 + $0x1e8] sm:$0xff] }
0x1354   :  { %7704 = vmatmul.msk.f32.gmra.mxu2 %vm729_vm7, %v13484_v61  ;;  %v5656_v61 = vadd.f32 %v14029_v33, %v14028_v17 }
0x1355   :  { %7825 = vmatmul.msk.f32.gmra.mxu3 %vm729_vm7, %v13584_v47 }
0x1358   :  { %v6070_v55 = vpop.f32.mrf.mxu3 }
0x1359   :  { %v13592_v28 = vadd.f32 %v6070_v55, %v5647_v19  ;;  %v14039_v19 = vld [vmem:[#allocation6_spill] sm:$0xff] }
0x135c   :  { %7705 = vmatmul.msk.f32.gmra.mxu2 %vm729_vm7, %v7689_v48  ;;  %v14031_v48 = vld [vmem:[#allocation4_spill] sm:$0xff] }
0x135d   :  { %7826 = vmatmul.msk.f32.gmra.mxu3 %vm729_vm7, %v13597_v58  ;;  %v5567_v38 = vadd.f32 %v14031_v48, %v14030_v57  ;;  %v14047_v57 = vld [vmem:[#allocation8_spill] sm:$0xff] }
0x1360   :  { %v6073_v63 = vpop.f32.mrf.mxu3 }
0x1361   :  { %v13604_v40 = vadd.f32 %v6073_v63, %v5650_v15  ;;  %v14040_v15 = vld [vmem:[#allocation42_spill] sm:$0xff]  ;;  %v14041_v63 = vld [vmem:[#allocation23_spill] sm:$0xff] }
0x1362   :  { %v5665_v60 = vadd.f32 %v14041_v63, %v14040_v15 }
0x1364   :  { %7802 = vmatmul.msk.f32.vlgmr.msra.gmra.mxu2 %vm729_vm7, %v7786_v3  ;;  %v5659_v3 = vadd.f32 %v14033_v1, %v14032_v5  ;;  %v14049_v5 = vld [vmem:[#allocation29_spill] sm:$0xff] }
0x1365   :  { %7827 = vmatmul.msk.f32.gmra.mxu3 %vm729_vm7, %v13609_v49 }
0x1367   :  { %v5984_v25 = vpop.f32.mrf.mxu2 }
0x1368   :  { %v13618_v52 = vadd.f32 %v5984_v25, %v5561_v56  ;;  %v6076_v36 = vpop.f32.mrf.mxu3  ;;  %v14043_v25 = vld [vmem:[#allocation7_spill] sm:$0xff] }
0x1369   :  { %v13620_v46 = vadd.f32 %v6076_v36, %v5653_v9  ;;  %v13691_v9 = vld [vmem:[%s13930_s26 + $0x1f0] sm:$0xff] }
0x136c   :  { %7803 = vmatmul.msk.f32.gmra.mxu2 %vm729_vm7, %v7787_v4 }
0x136d   :  { %7828 = vmatmul.msk.f32.gmra.mxu3 %vm729_vm7, %v13625_v8 }
0x136f   :  { %v5987_v12 = vpop.f32.mrf.mxu2 }
0x1370   :  { %v13634_v42 = vadd.f32 %v5987_v12, %v5564_v45  ;;  %v6079_v0 = vpop.f32.mrf.mxu3  ;;  %v5668_v45 = vadd.f32 %v14045_v13, %v14044_v43 }
0x1371   :  { %v13636_v6 = vadd.f32 %v6079_v0, %v5656_v61  ;;  %v13708_v0 = vld [vmem:[%s13930_s26 + $0x1f8] sm:$0xff] }
0x1374   :  { %7804 = vmatmul.msk.f32.gmra.mxu2 %vm729_vm7, %v7788_v23  ;;  %v14034_v23 = vld [vmem:[#allocation21_spill] sm:$0xff] }
0x1375   :  { %7829 = vmatmul.msk.f32.gmra.mxu3 %vm729_vm7, %v13641_v22  ;;  %v5570_v44 = vadd.f32 %v14035_v11, %v14034_v23  ;;  %v14050_v11 = vld [vmem:[#allocation32_spill] sm:$0xff] }
0x1377   :  { %v5990_v27 = vpop.f32.mrf.mxu2 }
0x1378   :  { %v13650_v32 = vadd.f32 %v5990_v27, %v5567_v38  ;;  %v6082_v4 = vpop.f32.mrf.mxu3  ;;  %v14048_v38 = vld [vmem:[#allocation46_spill] sm:$0xff] }
0x1379   :  { %v13652_v37 = vadd.f32 %v6082_v4, %v5659_v3  ;;  %v5671_v1 = vadd.f32 %v14049_v5, %v14048_v38 }
0x137c   :  { %7805 = vmatmul.msk.f32.gmra.mxu2 %vm729_vm7, %v13532_v20  ;;  %v14038_v20 = vld [vmem:[#allocation24_spill] sm:$0xff] }
0x137d   :  { %7830 = vmatmul.msk.f32.gmra.mxu3 %vm729_vm7, %v13657_v7  ;;  %v5573_v55 = vadd.f32 %v14039_v19, %v14038_v20  ;;  %v14053_v20 = vld [vmem:[#allocation10_spill] sm:$0xff] }
0x137f   :  { %v5993_v34 = vpop.f32.mrf.mxu2 }
0x1380   :  { %v13667_v59 = vadd.f32 %v5993_v34, %v5570_v44  ;;  %v6085_v2 = vpop.f32.mrf.mxu3 }
0x1381   :  { %v13669_v10 = vadd.f32 %v6085_v2, %v5662_v29  ;;  %v14052_v2 = vld [vmem:[#allocation33_spill] sm:$0xff] }
0x1382   :  { %v5585_v19 = vadd.f32 %v14053_v20, %v14052_v2 }
0x1384   :  { %7806 = vmatmul.msk.f32.gmra.mxu2 %vm729_vm7, %v13545_v50  ;;  %v14042_v50 = vld [vmem:[#allocation27_spill] sm:$0xff] }
0x1385   :  { %7831 = vmatmul.msk.f32.gmra.mxu3 %vm729_vm7, %v13674_v39  ;;  %v5576_v36 = vadd.f32 %v14043_v25, %v14042_v50 }
0x1387   :  { %v5996_v31 = vpop.f32.mrf.mxu2 }
0x1388   :  { %v13684_v56 = vadd.f32 %v5996_v31, %v5573_v55  ;;  %v6088_v18 = vpop.f32.mrf.mxu3 }
0x1389   :  { %v13686_v35 = vadd.f32 %v6088_v18, %v5665_v60 }
0x138c   :  { %7807 = vmatmul.msk.f32.gmra.mxu2 %vm729_vm7, %v13558_v30  ;;  %v14046_v30 = vld [vmem:[#allocation30_spill] sm:$0xff] }
0x138d   :  { %7832 = vmatmul.msk.f32.gmra.mxu3 %vm729_vm7, %v13691_v9  ;;  %v5579_v48 = vadd.f32 %v14047_v57, %v14046_v30 }
0x138f   :  { %v5999_v17 = vpop.f32.mrf.mxu2 }
0x1390   :  { %v13701_v33 = vadd.f32 %v5999_v17, %v5576_v36  ;;  %v6091_v61 = vpop.f32.mrf.mxu3 }
0x1391   :  { %v13703_v12 = vadd.f32 %v6091_v61, %v5668_v45 }
0x1394   :  { %7808 = vmatmul.msk.f32.gmra.mxu2 %vm729_vm7, %v13571_v54  ;;  %v14051_v54 = vld [vmem:[#allocation9_spill] sm:$0xff] }
0x1395   :  { %7833 = vmatmul.msk.f32.gmra.mxu3 %vm729_vm7, %v13708_v0  ;;  %v5582_v44 = vadd.f32 %v14051_v54, %v14050_v11 }
0x1397   :  { %v6002_v3 = vpop.f32.mrf.mxu2 }
0x1398   :  { %v13718_v27 = vadd.f32 %v6002_v3, %v5579_v48  ;;  %v6094_v4 = vpop.f32.mrf.mxu3 }
0x1399   :  { %v13720_v23 = vadd.f32 %v6094_v4, %v5671_v1 }
0x139c   :  { %7809 = vmatmul.msk.f32.gmra.mxu2 %vm729_vm7, %v13584_v47 }
0x139f   :  { %v6005_v16 = vpop.f32.mrf.mxu2 }
0x13a0   :  { %v13726_v14 = vadd.f32 %v6005_v16, %v5582_v44  ;;  %v6505_v29 = vpop.f32.mrf.mxu3 }
0x13a1   :  { %v6554_v34 = vadd.f32 %v6505_v29, %v13507_v62  ;;  %v14054_v62 = vld [vmem:[#allocation35_spill] sm:$0xff] }
0x13a3   :  { %7843 = vtanh.f32 %v6554_v34 }
0x13a4   :  { %7810 = vmatmul.msk.f32.gmra.mxu2 %vm729_vm7, %v13597_v58  ;;  %v14055_v58 = vld [vmem:[#allocation13_spill] sm:$0xff] }
0x13a5   :  { %v5588_v31 = vadd.f32 %v14055_v58, %v14054_v62 }
0x13a7   :  { %v6008_v55 = vpop.f32.mrf.mxu2 }
0x13a8   :  { %v13733_v15 = vadd.f32 %v6008_v55, %v5585_v19  ;;  %v6508_v47 = vpop.f32.mrf.mxu3 }
0x13a9   :  { %v7844_v63 = vpop.eup %7843  ;;  %v6556_v60 = vadd.f32 %v6508_v47, %v13517_v53  ;;  %v14056_v53 = vld [vmem:[#allocation37_spill] sm:$0xff] }
0x13aa   :  { %6618 = vst [vmem:[%s13931_s27 + $0x8] sm:$0xff] %v7844_v63 }
0x13ab   :  { %7845 = vtanh.f32 %v6556_v60 }
0x13ac   :  { %7811 = vmatmul.msk.f32.gmra.mxu2 %vm729_vm7, %v13609_v49  ;;  %v14057_v49 = vld [vmem:[#allocation16_spill] sm:$0xff] }
0x13ad   :  { %v5591_v13 = vadd.f32 %v14057_v49, %v14056_v53 }
0x13af   :  { %v6011_v18 = vpop.f32.mrf.mxu2 }
0x13b0   :  { %v13743_v50 = vadd.f32 %v6011_v18, %v5588_v31  ;;  %v6511_v25 = vpop.f32.mrf.mxu3 }
0x13b1   :  { %v7846_v36 = vpop.eup %7845  ;;  %v6558_v43 = vadd.f32 %v6511_v25, %v13527_v26  ;;  %v14058_v26 = vld [vmem:[#allocation39_spill] sm:$0xff] }
0x13b2   :  { %6620 = vst [vmem:[%s13931_s27 + $0x18] sm:$0xff] %v7846_v36 }
0x13b3   :  { %7847 = vtanh.f32 %v6558_v43 }
0x13b4   :  { %7812 = vmatmul.msk.f32.gmra.mxu2 %vm729_vm7, %v13625_v8  ;;  %v14059_v8 = vld [vmem:[#allocation19_spill] sm:$0xff] }
0x13b5   :  { %v5594_v48 = vadd.f32 %v14059_v8, %v14058_v26 }
0x13b7   :  { %v6014_v45 = vpop.f32.mrf.mxu2 }
0x13b8   :  { %v13753_v17 = vadd.f32 %v6014_v45, %v5591_v13  ;;  %v6514_v61 = vpop.f32.mrf.mxu3 }
0x13b9   :  { %v7848_v30 = vpop.eup %7847  ;;  %v6560_v57 = vadd.f32 %v6514_v61, %v13540_v51  ;;  %v14060_v51 = vld [vmem:[#allocation41_spill] sm:$0xff] }
0x13ba   :  { %6622 = vst [vmem:[%s13931_s27 + $0x28] sm:$0xff] %v7848_v30 }
0x13bb   :  { %7849 = vtanh.f32 %v6560_v57 }
0x13bc   :  { %7813 = vmatmul.msk.f32.gmra.mxu2 %vm729_vm7, %v13641_v22  ;;  %v14061_v22 = vld [vmem:[#allocation22_spill] sm:$0xff] }
0x13bd   :  { %v5597_v11 = vadd.f32 %v14061_v22, %v14060_v51 }
0x13bf   :  { %v6017_v38 = vpop.f32.mrf.mxu2 }
0x13c0   :  { %v13763_v5 = vadd.f32 %v6017_v38, %v5594_v48  ;;  %v6517_v1 = vpop.f32.mrf.mxu3 }
0x13c1   :  { %v7850_v3 = vpop.eup %7849  ;;  %v6562_v4 = vadd.f32 %v6517_v1, %v13553_v41  ;;  %v14062_v41 = vld [vmem:[#allocation43_spill] sm:$0xff] }
0x13c2   :  { %6624 = vst [vmem:[%s13931_s27 + $0x38] sm:$0xff] %v7850_v3 }
0x13c3   :  { %7851 = vtanh.f32 %v6562_v4 }
0x13c4   :  { %7814 = vmatmul.msk.f32.gmra.mxu2 %vm729_vm7, %v13657_v7  ;;  %v14063_v7 = vld [vmem:[#allocation25_spill] sm:$0xff] }
0x13c5   :  { %v5600_v2 = vadd.f32 %v14063_v7, %v14062_v41 }
0x13c7   :  { %v6020_v54 = vpop.f32.mrf.mxu2 }
0x13c8   :  { %v13773_v44 = vadd.f32 %v6020_v54, %v5597_v11  ;;  %v6520_v16 = vpop.f32.mrf.mxu3 }
0x13c9   :  { %v7852_v29 = vpop.eup %7851  ;;  %v6564_v34 = vadd.f32 %v6520_v16, %v13566_v24  ;;  %v14064_v24 = vld [vmem:[#allocation45_spill] sm:$0xff] }
0x13ca   :  { %6626 = vst [vmem:[%s13931_s27 + $0x48] sm:$0xff] %v7852_v29 }
0x13cb   :  { %7853 = vtanh.f32 %v6564_v34 }
0x13cc   :  { %7815 = vmatmul.msk.f32.gmra.mxu2 %vm729_vm7, %v13674_v39  ;;  %v14065_v39 = vld [vmem:[#allocation28_spill] sm:$0xff] }
0x13cd   :  { %v5603_v60 = vadd.f32 %v14065_v39, %v14064_v24 }
0x13cf   :  { %v6023_v20 = vpop.f32.mrf.mxu2 }
0x13d0   :  { %v13783_v19 = vadd.f32 %v6023_v20, %v5600_v2  ;;  %v6523_v55 = vpop.f32.mrf.mxu3 }
0x13d1   :  { %v7854_v47 = vpop.eup %7853  ;;  %v6566_v63 = vadd.f32 %v6523_v55, %v13579_v21  ;;  %v14066_v21 = vld [vmem:[#allocation47_spill] sm:$0xff] }
0x13d2   :  { %6628 = vst [vmem:[%s13931_s27 + $0x58] sm:$0xff] %v7854_v47 }
0x13d3   :  { %7855 = vtanh.f32 %v6566_v63 }
0x13d4   :  { %7816 = vmatmul.msk.f32.gmra.mxu2 %vm729_vm7, %v13691_v9  ;;  %v14067_v9 = vld [vmem:[#allocation31_spill] sm:$0xff] }
0x13d5   :  { %v5606_v36 = vadd.f32 %v14067_v9, %v14066_v21 }
0x13d7   :  { %v6026_v62 = vpop.f32.mrf.mxu2 }
0x13d8   :  { %v13793_v58 = vadd.f32 %v6026_v62, %v5603_v60  ;;  %v6526_v31 = vpop.f32.mrf.mxu3 }
0x13d9   :  { %v7856_v18 = vpop.eup %7855  ;;  %v6568_v25 = vadd.f32 %v6526_v31, %v13592_v28 }
0x13da   :  { %6630 = vst [vmem:[%s13931_s27 + $0x68] sm:$0xff] %v7856_v18 }
0x13db   :  { %7857 = vtanh.f32 %v6568_v25 }
0x13dc   :  { %7817 = vmatmul.msk.f32.gmra.mxu2 %vm729_vm7, %v13708_v0 }
0x13df   :  { %v6029_v43 = vpop.f32.mrf.mxu2 }
0x13e0   :  { %v13803_v53 = vadd.f32 %v6029_v43, %v5606_v36  ;;  %v6529_v49 = vpop.f32.mrf.mxu3 }
0x13e1   :  { %v7858_v13 = vpop.eup %7857  ;;  %v6570_v45 = vadd.f32 %v6529_v49, %v13604_v40 }
0x13e2   :  { %6632 = vst [vmem:[%s13931_s27 + $0x78] sm:$0xff] %v7858_v13 }
0x13e3   :  { %7859 = vtanh.f32 %v6570_v45 }
0x13e7   :  { %v6440_v28 = vpop.f32.mrf.mxu2 }
0x13e8   :  { %v6553_v61 = vadd.f32 %v6440_v28, %v13618_v52  ;;  %v6532_v30 = vpop.f32.mrf.mxu3 }
0x13e9   :  { %v7860_v0 = vpop.eup %7859  ;;  %v6572_v57 = vadd.f32 %v6532_v30, %v13620_v46 }
0x13ea   :  { %6634 = vst [vmem:[%s13931_s27 + $0x88] sm:$0xff] %v7860_v0  ;;  %7861 = vtanh.f32 %v6553_v61 }
0x13eb   :  { %7863 = vtanh.f32 %v6572_v57 }
0x13ef   :  { %v6443_v26 = vpop.f32.mrf.mxu2 }
0x13f0   :  { %v7862_v40 = vpop.eup %7861  ;;  %v6555_v8 = vadd.f32 %v6443_v26, %v13634_v42  ;;  %v6535_v48 = vpop.f32.mrf.mxu3 }
0x13f1   :  { %v7864_v38 = vpop.eup %7863  ;;  %6617 = vst [vmem:[%s13931_s27] sm:$0xff] %v7862_v40  ;;  %v6574_v52 = vadd.f32 %v6535_v48, %v13636_v6 }
0x13f2   :  { %6636 = vst [vmem:[%s13931_s27 + $0x98] sm:$0xff] %v7864_v38  ;;  %7865 = vtanh.f32 %v6555_v8 }
0x13f3   :  { %7867 = vtanh.f32 %v6574_v52 }
0x13f7   :  { %v6446_v46 = vpop.f32.mrf.mxu2 }
0x13f8   :  { %v7866_v1 = vpop.eup %7865  ;;  %v6557_v3 = vadd.f32 %v6446_v46, %v13650_v32  ;;  %v6538_v4 = vpop.f32.mrf.mxu3 }
0x13f9   :  { %v7868_v42 = vpop.eup %7867  ;;  %6619 = vst [vmem:[%s13931_s27 + $0x10] sm:$0xff] %v7866_v1  ;;  %v6576_v51 = vadd.f32 %v6538_v4, %v13652_v37 }
0x13fa   :  { %6638 = vst [vmem:[%s13931_s27 + $0xa8] sm:$0xff] %v7868_v42  ;;  %7869 = vtanh.f32 %v6557_v3 }
0x13fb   :  { %7871 = vtanh.f32 %v6576_v51 }
0x13ff   :  { %v6449_v6 = vpop.f32.mrf.mxu2 }
0x1400   :  { %v7870_v22 = vpop.eup %7869  ;;  %v6559_v11 = vadd.f32 %v6449_v6, %v13667_v59  ;;  %v6541_v54 = vpop.f32.mrf.mxu3 }
0x1401   :  { %v7872_v32 = vpop.eup %7871  ;;  %6621 = vst [vmem:[%s13931_s27 + $0x20] sm:$0xff] %v7870_v22  ;;  %v6578_v16 = vadd.f32 %v6541_v54, %v13669_v10 }
0x1402   :  { %6640 = vst [vmem:[%s13931_s27 + $0xb8] sm:$0xff] %v7872_v32  ;;  %7873 = vtanh.f32 %v6559_v11 }
0x1403   :  { %7875 = vtanh.f32 %v6578_v16 }
0x1407   :  { %v6452_v37 = vpop.f32.mrf.mxu2 }
0x1408   :  { %v7874_v29 = vpop.eup %7873  ;;  %v6561_v34 = vadd.f32 %v6452_v37, %v13684_v56  ;;  %v6544_v41 = vpop.f32.mrf.mxu3 }
0x1409   :  { %v7876_v59 = vpop.eup %7875  ;;  %6623 = vst [vmem:[%s13931_s27 + $0x30] sm:$0xff] %v7874_v29  ;;  %v6580_v7 = vadd.f32 %v6544_v41, %v13686_v35 }
0x140a   :  { %6642 = vst [vmem:[%s13931_s27 + $0xc8] sm:$0xff] %v7876_v59  ;;  %7877 = vtanh.f32 %v6561_v34 }
0x140b   :  { %7879 = vtanh.f32 %v6580_v7 }
0x140f   :  { %v6455_v10 = vpop.f32.mrf.mxu2 }
0x1410   :  { %v7878_v2 = vpop.eup %7877  ;;  %v6563_v20 = vadd.f32 %v6455_v10, %v13701_v33  ;;  %v6547_v55 = vpop.f32.mrf.mxu3 }
0x1411   :  { %v7880_v56 = vpop.eup %7879  ;;  %6625 = vst [vmem:[%s13931_s27 + $0x40] sm:$0xff] %v7878_v2  ;;  %v6582_v47 = vadd.f32 %v6547_v55, %v13703_v12 }
0x1412   :  { %6644 = vst [vmem:[%s13931_s27 + $0xd8] sm:$0xff] %v7880_v56  ;;  %7881 = vtanh.f32 %v6563_v20 }
0x1413   :  { %7883 = vtanh.f32 %v6582_v47 }
0x1417   :  { %v6458_v35 = vpop.f32.mrf.mxu2 }
0x1418   :  { %v7882_v63 = vpop.eup %7881  ;;  %v6565_v24 = vadd.f32 %v6458_v35, %v13718_v27  ;;  %v6550_v39 = vpop.f32.mrf.mxu3 }
0x1419   :  { %v7884_v33 = vpop.eup %7883  ;;  %6627 = vst [vmem:[%s13931_s27 + $0x50] sm:$0xff] %v7882_v63  ;;  %v6584_v60 = vadd.f32 %v6550_v39, %v13720_v23 }
0x141a   :  { %6646 = vst [vmem:[%s13931_s27 + $0xe8] sm:$0xff] %v7884_v33  ;;  %7885 = vtanh.f32 %v6565_v24 }
0x141b   :  { %7887 = vtanh.f32 %v6584_v60 }
0x141f   :  { %v6461_v12 = vpop.f32.mrf.mxu2 }
0x1420   :  { %v7886_v62 = vpop.eup %7885  ;;  %v6567_v31 = vadd.f32 %v6461_v12, %v13726_v14 }
0x1421   :  { %v7888_v18 = vpop.eup %7887  ;;  %6629 = vst [vmem:[%s13931_s27 + $0x60] sm:$0xff] %v7886_v62 }
0x1422   :  { %6648 = vst [vmem:[%s13931_s27 + $0xf8] sm:$0xff] %v7888_v18  ;;  %7889 = vtanh.f32 %v6567_v31 }
0x1427   :  { %v6464_v27 = vpop.f32.mrf.mxu2 }
0x1428   :  { %v7890_v23 = vpop.eup %7889  ;;  %v6569_v25 = vadd.f32 %v6464_v27, %v13733_v15 }
0x1429   :  { %6631 = vst [vmem:[%s13931_s27 + $0x70] sm:$0xff] %v7890_v23 }
0x142a   :  { %7891 = vtanh.f32 %v6569_v25 }
0x142f   :  { %v6467_v14 = vpop.f32.mrf.mxu2 }
0x1430   :  { %v7892_v21 = vpop.eup %7891  ;;  %v6571_v9 = vadd.f32 %v6467_v14, %v13743_v50 }
0x1431   :  { %6633 = vst [vmem:[%s13931_s27 + $0x80] sm:$0xff] %v7892_v21 }
0x1432   :  { %7893 = vtanh.f32 %v6571_v9 }
0x1437   :  { %v6470_v36 = vpop.f32.mrf.mxu2 }
0x1438   :  { %v7894_v43 = vpop.eup %7893  ;;  %v6573_v49 = vadd.f32 %v6470_v36, %v13753_v17 }
0x1439   :  { %6635 = vst [vmem:[%s13931_s27 + $0x90] sm:$0xff] %v7894_v43 }
0x143a   :  { %7895 = vtanh.f32 %v6573_v49 }
0x143f   :  { %v6473_v15 = vpop.f32.mrf.mxu2 }
0x1440   :  { %v7896_v13 = vpop.eup %7895  ;;  %v6575_v45 = vadd.f32 %v6473_v15, %v13763_v5 }
0x1441   :  { %6637 = vst [vmem:[%s13931_s27 + $0xa0] sm:$0xff] %v7896_v13 }
0x1442   :  { %7897 = vtanh.f32 %v6575_v45 }
0x1447   :  { %v6476_v50 = vpop.f32.mrf.mxu2 }
0x1448   :  { %v7898_v28 = vpop.eup %7897  ;;  %v6577_v61 = vadd.f32 %v6476_v50, %v13773_v44 }
0x1449   :  { %6639 = vst [vmem:[%s13931_s27 + $0xb0] sm:$0xff] %v7898_v28 }
0x144a   :  { %7899 = vtanh.f32 %v6577_v61 }
0x144f   :  { %v6479_v17 = vpop.f32.mrf.mxu2 }
0x1450   :  { %v7900_v30 = vpop.eup %7899  ;;  %v6579_v0 = vadd.f32 %v6479_v17, %v13783_v19 }
0x1451   :  { %6641 = vst [vmem:[%s13931_s27 + $0xc0] sm:$0xff] %v7900_v30 }
0x1452   :  { %7901 = vtanh.f32 %v6579_v0 }
0x1457   :  { %v6482_v5 = vpop.f32.mrf.mxu2 }
0x1458   :  { %v7902_v57 = vpop.eup %7901  ;;  %v6581_v26 = vadd.f32 %v6482_v5, %v13793_v58 }
0x1459   :  { %6643 = vst [vmem:[%s13931_s27 + $0xd0] sm:$0xff] %v7902_v57 }
0x145a   :  { %7903 = vtanh.f32 %v6581_v26 }
0x145f   :  { %v6485_v44 = vpop.f32.mrf.mxu2 }
0x1460   :  { %v7904_v40 = vpop.eup %7903  ;;  %v6583_v8 = vadd.f32 %v6485_v44, %v13803_v53 }
0x1461   :  { %6645 = vst [vmem:[%s13931_s27 + $0xe0] sm:$0xff] %v7904_v40 }
0x1462   :  { %7905 = vtanh.f32 %v6583_v8 }
0x1468   :  { %v7906_v19 = vpop.eup %7905 }
0x1469   :  { %6647 = vst [vmem:[%s13931_s27 + $0xf0] sm:$0xff] %v7906_v19 }

</bundles_post_ra>
